<compile_context>
chip_gen: v7x
topology: tpu7x:2x2x1
jax: 0.10.0
libtpu: 0.0.40
codegen_flags: <defaults>
</compile_context>

<pallas_src>
import math
import functools
import numpy as np

import jax
import jax.numpy as jnp
from jax.experimental import pallas as pl
from jax.experimental.pallas import tpu as pltpu

LANE = 128


# ----------------------------------------------------------------------------
# sin-cos positional embedding (numpy, identical to the PyTorch module's code)
# ----------------------------------------------------------------------------
def get_1d_sincos_pos_embed_from_grid(embed_dim, pos):
    assert embed_dim % 2 == 0
    omega = np.arange(embed_dim // 2, dtype=np.float64)
    omega /= embed_dim / 2.0
    omega = 1.0 / 10000 ** omega
    pos = pos.reshape(-1)
    out = np.einsum('m,d->md', pos, omega)
    emb_sin = np.sin(out)
    emb_cos = np.cos(out)
    return np.concatenate([emb_sin, emb_cos], axis=1)


def get_2d_sincos_pos_embed_from_grid(embed_dim, grid):
    assert embed_dim % 2 == 0
    emb_h = get_1d_sincos_pos_embed_from_grid(embed_dim // 2, grid[0])
    emb_w = get_1d_sincos_pos_embed_from_grid(embed_dim // 2, grid[1])
    return np.concatenate([emb_h, emb_w], axis=1)


def get_2d_sincos_pos_embed(embed_dim, grid_size):
    grid_h = np.arange(grid_size, dtype=np.float32)
    grid_w = np.arange(grid_size, dtype=np.float32)
    grid = np.meshgrid(grid_w, grid_h)
    grid = np.stack(grid, axis=0)
    grid = grid.reshape([2, 1, grid_size, grid_size])
    return get_2d_sincos_pos_embed_from_grid(embed_dim, grid)


# ----------------------------------------------------------------------------
# in-kernel helpers (traced, not separate kernels)
# ----------------------------------------------------------------------------
def _silu(x):
    return x * jax.nn.sigmoid(x)


def _gelu_tanh(y):
    c = math.sqrt(2.0 / math.pi)
    return 0.5 * y * (1.0 + jnp.tanh(c * (y + 0.044715 * y * y * y)))


def _ln_modulate(x, shift, scale):
    """LayerNorm(eps=1e-6, no affine) over last axis + adaLN modulate.
    x: (..., D) f32, shift/scale broadcastable to x."""
    mean = jnp.mean(x, axis=-1, keepdims=True)
    var = jnp.mean((x - mean) ** 2, axis=-1, keepdims=True)
    xn = (x - mean) * jax.lax.rsqrt(var + 1e-6)
    return xn * (1.0 + scale) + shift


# ----------------------------------------------------------------------------
# Kernel 1: patch embed (flattened-patch matmul, K padded to 128) + pos embed
# ----------------------------------------------------------------------------
def _embed_kernel(xp_ref, w_ref, b_ref, pos_ref, o_ref):
    # xp: (N*T, Kp) f32, w: (Kp, D) bf16, b: (1, D) f32, pos: (T, D) f32
    T, D = pos_ref.shape
    NT = xp_ref.shape[0]
    N = NT // T
    tok = jnp.dot(xp_ref[...].astype(jnp.bfloat16), w_ref[...],
                  preferred_element_type=jnp.float32)          # (N*T, D) f32
    tok = tok.reshape(N, T, D) + b_ref[...] + pos_ref[...][None]
    o_ref[...] = tok


def patch_embed_pallas(xp_pad, w_pad, b, pos):
    NT = xp_pad.shape[0]
    T, D = pos.shape
    N = NT // T
    return pl.pallas_call(
        _embed_kernel,
        out_shape=jax.ShapeDtypeStruct((N, T, D), jnp.float32),
    )(xp_pad, w_pad, b, pos)


# ----------------------------------------------------------------------------
# Kernel 2: conditioning — timestep MLP + ALL adaLN modulations in one matmul
# ----------------------------------------------------------------------------
def _cond_kernel(tf_ref, w1_ref, b1_ref, w2_ref, b2_ref,
                 adaw_ref, adab_ref, mod_ref):
    h = _silu(jnp.dot(tf_ref[...].astype(jnp.bfloat16), w1_ref[...],
                      preferred_element_type=jnp.float32) + b1_ref[...])
    c = jnp.dot(h.astype(jnp.bfloat16), w2_ref[...],
                preferred_element_type=jnp.float32) + b2_ref[...]
    sc = _silu(c)
    mod_ref[...] = jnp.dot(sc.astype(jnp.bfloat16), adaw_ref[...],
                           preferred_element_type=jnp.float32) + adab_ref[...]


def conditioning_pallas(t_freq, p):
    N = t_freq.shape[0]
    M = p["ada_w_all"].shape[1]        # depth*6D + 2D modulation columns
    return pl.pallas_call(
        _cond_kernel,
        out_shape=jax.ShapeDtypeStruct((N, M), jnp.float32),
    )(t_freq, p["t_w1"], p["t_b1"], p["t_w2"], p["t_b2"],
      p["ada_w_all"], p["ada_b_all"])


# ----------------------------------------------------------------------------
# Kernel 3: fused transformer stack, grid = (N/Nb, depth)
# ----------------------------------------------------------------------------
def _stack_kernel(x_ref, mod_ref,
                  qkv_w_ref, qkv_b_ref, proj_w_ref, proj_b_ref,
                  fc1_w_ref, fc1_b_ref, fc2_w_ref, fc2_b_ref,
                  o_ref, attn_scr, *, num_heads):
    d_idx = pl.program_id(1)

    # Bring this batch block's activations into the resident output block
    # at the first layer; afterwards o_ref carries the activations in VMEM.
    @pl.when(d_idx == 0)
    def _():
        o_ref[...] = x_ref[...]

    Nb, T, D = o_ref.shape
    H = num_heads
    Dh = D // H
    att_scale = Dh ** -0.5

    x = o_ref[...]                                   # (Nb, T, D) f32
    mod = mod_ref[0]                                 # (Nb, 6D)   f32
    shift_msa = mod[:, None, 0 * D:1 * D]
    scale_msa = mod[:, None, 1 * D:2 * D]
    gate_msa = mod[:, None, 2 * D:3 * D]
    shift_mlp = mod[:, None, 3 * D:4 * D]
    scale_mlp = mod[:, None, 4 * D:5 * D]
    gate_mlp = mod[:, None, 5 * D:6 * D]

    # --- attention branch ---------------------------------------------------
    xm = _ln_modulate(x, shift_msa, scale_msa)                   # f32
    xm_bf = xm.reshape(Nb * T, D).astype(jnp.bfloat16)           # cast once
    qkv = jnp.dot(xm_bf, qkv_w_ref[0],
                  preferred_element_type=jnp.float32) + qkv_b_ref[0]
    qkv_bf = qkv.reshape(Nb, T, 3 * D).astype(jnp.bfloat16)      # (Nb,T,3D)

    for h in range(H):                               # heads unrolled (small H)
        q_h = qkv_bf[:, :, h * Dh:(h + 1) * Dh]
        k_h = qkv_bf[:, :, D + h * Dh:D + (h + 1) * Dh]
        v_h = qkv_bf[:, :, 2 * D + h * Dh:2 * D + (h + 1) * Dh]
        s = jnp.einsum('bqd,bkd->bqk', q_h, k_h,
                       preferred_element_type=jnp.float32) * att_scale
        s = s - jnp.max(s, axis=-1, keepdims=True)
        pexp = jnp.exp(s)
        pexp = pexp * pl.reciprocal(jnp.sum(pexp, axis=-1, keepdims=True),
                                    approx=True)
        out_h = jnp.einsum('bqk,bkd->bqd', pexp.astype(jnp.bfloat16), v_h,
                           preferred_element_type=jnp.float32)   # (Nb,T,Dh)
        # write head output at its lane offset (no concat copy)
        attn_scr[:, h * Dh:(h + 1) * Dh] = (
            out_h.reshape(Nb * T, Dh).astype(jnp.bfloat16))

    attn_bf = attn_scr[...]                                      # (Nb*T, D)
    y = jnp.dot(attn_bf, proj_w_ref[0],
                preferred_element_type=jnp.float32) + proj_b_ref[0]
    x = x + gate_msa * y.reshape(Nb, T, D)

    # --- MLP branch ----------------------------------------------------------
    xm2 = _ln_modulate(x, shift_mlp, scale_mlp)
    xm2_bf = xm2.reshape(Nb * T, D).astype(jnp.bfloat16)
    h1 = jnp.dot(xm2_bf, fc1_w_ref[0],
                 preferred_element_type=jnp.float32) + fc1_b_ref[0]
    h1 = _gelu_tanh(h1)                                          # f32 (v5e)
    y2 = jnp.dot(h1.astype(jnp.bfloat16), fc2_w_ref[0],
                 preferred_element_type=jnp.float32) + fc2_b_ref[0]
    x = x + gate_mlp * y2.reshape(Nb, T, D)

    o_ref[...] = x


def _pick_batch_block(N, T, target_rows=256):
    """Largest Nb dividing N with Nb*T <= max(target_rows, T)."""
    nb = 1
    for cand in range(1, N + 1):
        if N % cand == 0 and cand * T <= max(target_rows, T):
            nb = cand
    return nb


def transformer_stack_pallas(x_tok, mod_stack, p, cfg):
    N, T, D = x_tok.shape
    L = cfg.depth
    Dm = cfg.mlp_hidden
    Nb = _pick_batch_block(N, T)
    kernel = functools.partial(_stack_kernel, num_heads=cfg.num_heads)
    return pl.pallas_call(
        kernel,
        out_shape=jax.ShapeDtypeStruct((N, T, D), jnp.float32),
        grid_spec=pltpu.PrefetchScalarGridSpec(
            num_scalar_prefetch=0,
            grid=(N // Nb, L),
            in_specs=[
                pl.BlockSpec((Nb, T, D), lambda b, d: (b, 0, 0)),     # x (d=0)
                pl.BlockSpec((1, Nb, 6 * D), lambda b, d: (d, b, 0)), # mod
                pl.BlockSpec((1, D, 3 * D), lambda b, d: (d, 0, 0)),  # qkv_w
                pl.BlockSpec((1, 1, 3 * D), lambda b, d: (d, 0, 0)),  # qkv_b
                pl.BlockSpec((1, D, D), lambda b, d: (d, 0, 0)),      # proj_w
                pl.BlockSpec((1, 1, D), lambda b, d: (d, 0, 0)),      # proj_b
                pl.BlockSpec((1, D, Dm), lambda b, d: (d, 0, 0)),     # fc1_w
                pl.BlockSpec((1, 1, Dm), lambda b, d: (d, 0, 0)),     # fc1_b
                pl.BlockSpec((1, Dm, D), lambda b, d: (d, 0, 0)),     # fc2_w
                pl.BlockSpec((1, 1, D), lambda b, d: (d, 0, 0)),      # fc2_b
            ],
            # constant across the depth axis -> activations stay resident
            out_specs=pl.BlockSpec((Nb, T, D), lambda b, d: (b, 0, 0)),
            scratch_shapes=[pltpu.VMEM((Nb * T, D), jnp.bfloat16)],
        ),
        compiler_params=pltpu.CompilerParams(
            dimension_semantics=("parallel", "arbitrary"),
            vmem_limit_bytes=32 * 1024 * 1024),
    )(x_tok, mod_stack,
      p["qkv_w"], p["qkv_b"], p["proj_w"], p["proj_b"],
      p["fc1_w"], p["fc1_b"], p["fc2_w"], p["fc2_b"])


# ----------------------------------------------------------------------------
# Kernel 4: final layer (modulation already hoisted; output padded to 128 lanes)
# ----------------------------------------------------------------------------
def _final_kernel(x_ref, mod_ref, w_ref, b_ref, o_ref):
    N, T, D = x_ref.shape
    x = x_ref[...]
    mod = mod_ref[...]                        # (N, 2D)
    shift = mod[:, None, :D]
    scale = mod[:, None, D:]
    xm = _ln_modulate(x, shift, scale)
    y = jnp.dot(xm.reshape(N * T, D).astype(jnp.bfloat16), w_ref[...],
                preferred_element_type=jnp.float32) + b_ref[...]
    o_ref[...] = y.reshape(N, T, -1)


def final_layer_pallas(x_tok, mod_final, p):
    N, T, D = x_tok.shape
    Dop = p["f_lin_w"].shape[1]               # padded (lane-dense) output dim
    return pl.pallas_call(
        _final_kernel,
        out_shape=jax.ShapeDtypeStruct((N, T, Dop), jnp.float32),
    )(x_tok, mod_final, p["f_lin_w"], p["f_lin_b"])


# ----------------------------------------------------------------------------
# Model config / params / forward
# ----------------------------------------------------------------------------
class ViTConfig:
    def __init__(self, input_size=16, patch_size=2, in_channels=4,
                 hidden_size=128, depth=2, num_heads=4, mlp_ratio=4.0,
                 learn_sigma=True, freq_embedding_size=256):
        self.input_size = input_size
        self.patch_size = patch_size
        self.in_channels = in_channels
        self.hidden_size = hidden_size
        self.depth = depth
        self.num_heads = num_heads
        self.mlp_ratio = mlp_ratio
        self.learn_sigma = learn_sigma
        self.out_channels = in_channels * 2 if learn_sigma else in_channels
        self.freq_embedding_size = freq_embedding_size
        self.grid_size = input_size // patch_size
        self.num_patches = self.grid_size ** 2
        self.mlp_hidden = int(hidden_size * mlp_ratio)


def _round_up(v, m):
    return ((v + m - 1) // m) * m


def init_params(key, cfg):
    state = {"key": key}

    def nk():
        state["key"], sub = jax.random.split(state["key"])
        return sub

    def wf32(shape, scale=0.02):
        return scale * jax.random.normal(nk(), shape, dtype=jnp.float32)

    def w(shape, scale=0.02):
        # weights stored bf16 (MXU-native, halves weight DMA traffic)
        return wf32(shape, scale).astype(jnp.bfloat16)

    def b(shape, scale=0.02):
        # biases stay f32 (added post-accumulation)
        return wf32(shape, scale)

    D = cfg.hidden_size
    P = cfg.patch_size
    Dm = cfg.mlp_hidden
    L = cfg.depth
    K = cfg.in_channels * P * P
    Kp = _round_up(K, LANE)                      # lane-dense patch contraction
    Do = P * P * cfg.out_channels
    Dop = _round_up(Do, LANE)                    # lane-dense final output

    # patch embed weight, zero-padded along the contraction dim
    pe_w = jnp.zeros((Kp, D), jnp.float32).at[:K].set(wf32((K, D)))
    # final linear, zero-padded along the output dim (sliced off in XLA)
    f_lin_w = jnp.zeros((D, Dop), jnp.float32).at[:, :Do].set(wf32((D, Do)))
    f_lin_b = jnp.zeros((1, Dop), jnp.float32).at[:, :Do].set(wf32((1, Do)))

    # all adaLN projections (depth blocks + final layer) fused into one matmul
    ada_w_all = wf32((D, L * 6 * D + 2 * D))
    ada_b_all = wf32((1, L * 6 * D + 2 * D))

    params = {
        "pe_w": pe_w.astype(jnp.bfloat16),
        "pe_b": b((1, D)),
        "pos_embed": jnp.asarray(
            get_2d_sincos_pos_embed(D, cfg.grid_size), dtype=jnp.float32),
        # Timestep embedder MLP
        "t_w1": w((cfg.freq_embedding_size, D)),
        "t_b1": b((1, D)),
        "t_w2": w((D, D)),
        "t_b2": b((1, D)),
        # hoisted adaLN modulation (blocks + final layer)
        "ada_w_all": ada_w_all.astype(jnp.bfloat16),
        "ada_b_all": ada_b_all,
        # block weights stacked along a leading layer axis
        "qkv_w": w((L, D, 3 * D)),
        "qkv_b": b((L, 1, 3 * D)),
        "proj_w": w((L, D, D)),
        "proj_b": b((L, 1, D)),
        "fc1_w": w((L, D, Dm)),
        "fc1_b": b((L, 1, Dm)),
        "fc2_w": w((L, Dm, D)),
        "fc2_b": b((L, 1, D)),
        # final layer
        "f_lin_w": f_lin_w.astype(jnp.bfloat16),
        "f_lin_b": f_lin_b,
    }
    return params


def vit_forward(params, x, t, y, cfg):
    """x: (N, C, H, W); t: (N,); y: (N,) (unused — this ViT has no label
    embedder, conditioning is the timestep embedding only)."""
    del y
    N, C, H, W = x.shape
    P = cfg.patch_size
    gh, gw = H // P, W // P
    T = gh * gw
    D = cfg.hidden_size
    L = cfg.depth
    K = C * P * P
    Kp = params["pe_w"].shape[0]

    # Patchify: NCHW -> (N*T, C*P*P), zero-pad contraction to 128 lanes.
    xp = x.reshape(N, C, gh, P, gw, P).transpose(0, 2, 4, 1, 3, 5)
    xp = xp.reshape(N * T, K)
    xp = jnp.pad(xp, ((0, 0), (0, Kp - K)))
    x_tok = patch_embed_pallas(xp, params["pe_w"], params["pe_b"],
                               params["pos_embed"])              # (N, T, D)

    # Timestep sinusoidal table (tiny scalar glue), then the fused
    # conditioning kernel: MLP + all adaLN modulations in one matmul.
    half = cfg.freq_embedding_size // 2
    freqs = jnp.exp(-math.log(10000.0)
                    * jnp.arange(half, dtype=jnp.float32) / half)
    args = t[:, None].astype(jnp.float32) * freqs[None]
    t_freq = jnp.concatenate([jnp.cos(args), jnp.sin(args)], axis=-1)
    mod_all = conditioning_pallas(t_freq, params)        # (N, L*6D + 2D)

    # split / restack the (tiny) modulation tensor in XLA
    mod_blocks = mod_all[:, :L * 6 * D].reshape(N, L, 6 * D)
    mod_stack = jnp.transpose(mod_blocks, (1, 0, 2))     # (L, N, 6D)
    mod_final = mod_all[:, L * 6 * D:]                   # (N, 2D)

    # fused transformer stack (activations stay resident across depth)
    x_tok = transformer_stack_pallas(x_tok, mod_stack, params, cfg)

    out_pad = final_layer_pallas(x_tok, mod_final, params)   # (N, T, Dop)
    co = cfg.out_channels
    Do = P * P * co
    out = out_pad[:, :, :Do]

    # unpatchify: (N, T, P*P*Cout) -> (N, Cout, H, W)
    out = out.reshape(N, gh, gw, P, P, co)
    out = jnp.einsum('nhwpqc->nchpwq', out)
    imgs = out.reshape(N, co, gh * P, gw * P)
    return imgs


# ----------------------------------------------------------------------------
if __name__ == "__main__":
    cfg = ViTConfig(input_size=16, patch_size=2, in_channels=4,
                    hidden_size=128, depth=2, num_heads=4, mlp_ratio=4.0,
                    learn_sigma=True)

    root = jax.random.PRNGKey(0)
    k_param, k_x, k_t, k_y = jax.random.split(root, 4)

    params = init_params(k_param, cfg)

    x = jax.random.normal(k_x, (2, cfg.in_channels, cfg.input_size,
                                cfg.input_size), dtype=jnp.float32)
    t = jax.random.uniform(k_t, (2,), minval=0.0, maxval=999.0,
                           dtype=jnp.float32)
    y = jax.random.randint(k_y, (2,), 0, 10)

    fwd = jax.jit(functools.partial(vit_forward, cfg=cfg))
    out = fwd(params, x, t, y)
    out = jax.block_until_ready(out)

    assert out.shape == (2, cfg.out_channels, cfg.input_size, cfg.input_size)
    assert bool(jnp.all(jnp.isfinite(out)))
    print("KERNEL_OK")
</pallas_src>

<mosaic_0001>
module attributes {stable_mosaic.version = 11 : i64} {
  func.func @_cond_kernel(%arg0: memref<2x256xf32, #tpu.memory_space<vmem>>, %arg1: memref<256x128xbf16, #tpu.memory_space<vmem>>, %arg2: memref<1x128xf32, #tpu.memory_space<vmem>>, %arg3: memref<128x128xbf16, #tpu.memory_space<vmem>>, %arg4: memref<1x128xf32, #tpu.memory_space<vmem>>, %arg5: memref<128x1792xbf16, #tpu.memory_space<vmem>>, %arg6: memref<1x1792xf32, #tpu.memory_space<vmem>>, %arg7: memref<2x1792xf32, #tpu.memory_space<vmem>>) attributes {dimension_semantics = [], scalar_prefetch = 0 : i64, scratch_operands = 0 : i64, tpu.core_type = #tpu.core_type<tc>} {
    %c0 = arith.constant 0 : index
    %c0_0 = arith.constant 0 : index
    %0 = vector.load %arg0[%c0, %c0_0] : memref<2x256xf32, #tpu.memory_space<vmem>>, vector<2x256xf32>
    %1 = arith.truncf %0 : vector<2x256xf32> to vector<2x256xbf16>
    %c0_1 = arith.constant 0 : index
    %c0_2 = arith.constant 0 : index
    %2 = vector.load %arg1[%c0_1, %c0_2] : memref<256x128xbf16, #tpu.memory_space<vmem>>, vector<256x128xbf16>
    %cst = arith.constant dense<0.000000e+00> : vector<2x128xf32>
    %3 = tpu.matmul %1, %2, %cst {dimension_numbers = #tpu.dot_dimension_numbers<[1], [0], [0], [1], [0, 0, 1, 1], [], []>} : vector<2x256xbf16>, vector<256x128xbf16>, vector<2x128xf32> -> vector<2x128xf32>
    %c0_3 = arith.constant 0 : index
    %c0_4 = arith.constant 0 : index
    %4 = vector.load %arg2[%c0_3, %c0_4] : memref<1x128xf32, #tpu.memory_space<vmem>>, vector<1x128xf32>
    %5 = vector.broadcast %4 : vector<1x128xf32> to vector<2x128xf32>
    %6 = arith.addf %3, %5 : vector<2x128xf32>
    %7 = arith.negf %6 : vector<2x128xf32>
    %8 = math.exp %7 : vector<2x128xf32>
    %cst_5 = arith.constant 1.000000e+00 : f32
    %9 = vector.broadcast %cst_5 : f32 to vector<2x128xf32>
    %10 = arith.addf %9, %8 : vector<2x128xf32>
    %11 = arith.divf %9, %10 : vector<2x128xf32>
    %12 = arith.mulf %6, %11 : vector<2x128xf32>
    %13 = arith.truncf %12 : vector<2x128xf32> to vector<2x128xbf16>
    %c0_6 = arith.constant 0 : index
    %c0_7 = arith.constant 0 : index
    %14 = vector.load %arg3[%c0_6, %c0_7] : memref<128x128xbf16, #tpu.memory_space<vmem>>, vector<128x128xbf16>
    %cst_8 = arith.constant dense<0.000000e+00> : vector<2x128xf32>
    %15 = tpu.matmul %13, %14, %cst_8 {dimension_numbers = #tpu.dot_dimension_numbers<[1], [0], [0], [1], [0, 0, 1, 1], [], []>} : vector<2x128xbf16>, vector<128x128xbf16>, vector<2x128xf32> -> vector<2x128xf32>
    %c0_9 = arith.constant 0 : index
    %c0_10 = arith.constant 0 : index
    %16 = vector.load %arg4[%c0_9, %c0_10] : memref<1x128xf32, #tpu.memory_space<vmem>>, vector<1x128xf32>
    %17 = vector.broadcast %16 : vector<1x128xf32> to vector<2x128xf32>
    %18 = arith.addf %15, %17 : vector<2x128xf32>
    %19 = arith.negf %18 : vector<2x128xf32>
    %20 = math.exp %19 : vector<2x128xf32>
    %cst_11 = arith.constant 1.000000e+00 : f32
    %21 = vector.broadcast %cst_11 : f32 to vector<2x128xf32>
    %22 = arith.addf %21, %20 : vector<2x128xf32>
    %23 = arith.divf %21, %22 : vector<2x128xf32>
    %24 = arith.mulf %18, %23 : vector<2x128xf32>
    %25 = arith.truncf %24 : vector<2x128xf32> to vector<2x128xbf16>
    %c0_12 = arith.constant 0 : index
    %c0_13 = arith.constant 0 : index
    %26 = vector.load %arg5[%c0_12, %c0_13] : memref<128x1792xbf16, #tpu.memory_space<vmem>>, vector<128x1792xbf16>
    %cst_14 = arith.constant dense<0.000000e+00> : vector<2x1792xf32>
    %27 = tpu.matmul %25, %26, %cst_14 {dimension_numbers = #tpu.dot_dimension_numbers<[1], [0], [0], [1], [0, 0, 1, 1], [], []>} : vector<2x128xbf16>, vector<128x1792xbf16>, vector<2x1792xf32> -> vector<2x1792xf32>
    %c0_15 = arith.constant 0 : index
    %c0_16 = arith.constant 0 : index
    %28 = vector.load %arg6[%c0_15, %c0_16] : memref<1x1792xf32, #tpu.memory_space<vmem>>, vector<1x1792xf32>
    %29 = vector.broadcast %28 : vector<1x1792xf32> to vector<2x1792xf32>
    %30 = arith.addf %27, %29 : vector<2x1792xf32>
    %c0_17 = arith.constant 0 : index
    %c0_18 = arith.constant 0 : index
    %31 = vector.load %arg7[%c0_17, %c0_18] : memref<2x1792xf32, #tpu.memory_space<vmem>>, vector<2x1792xf32>
    tpu.vector_store %arg7[%c0_17, %c0_18], %30 {strides = array<i32>} : memref<2x1792xf32, #tpu.memory_space<vmem>>, vector<2x1792xf32>,
    return
  }
}

module attributes {stable_mosaic.version = 11 : i64} {
  func.func @_embed_kernel(%arg0: memref<128x128xf32, #tpu.memory_space<vmem>>, %arg1: memref<128x128xbf16, #tpu.memory_space<vmem>>, %arg2: memref<1x128xf32, #tpu.memory_space<vmem>>, %arg3: memref<64x128xf32, #tpu.memory_space<vmem>>, %arg4: memref<2x64x128xf32, #tpu.memory_space<vmem>>) attributes {dimension_semantics = [], scalar_prefetch = 0 : i64, scratch_operands = 0 : i64, tpu.core_type = #tpu.core_type<tc>} {
    %c0 = arith.constant 0 : index
    %c0_0 = arith.constant 0 : index
    %0 = vector.load %arg0[%c0, %c0_0] : memref<128x128xf32, #tpu.memory_space<vmem>>, vector<128x128xf32>
    %1 = arith.truncf %0 : vector<128x128xf32> to vector<128x128xbf16>
    %c0_1 = arith.constant 0 : index
    %c0_2 = arith.constant 0 : index
    %2 = vector.load %arg1[%c0_1, %c0_2] : memref<128x128xbf16, #tpu.memory_space<vmem>>, vector<128x128xbf16>
    %cst = arith.constant dense<0.000000e+00> : vector<128x128xf32>
    %3 = tpu.matmul %1, %2, %cst {dimension_numbers = #tpu.dot_dimension_numbers<[1], [0], [0], [1], [0, 0, 1, 1], [], []>} : vector<128x128xbf16>, vector<128x128xbf16>, vector<128x128xf32> -> vector<128x128xf32>
    %4 = vector.shape_cast %3 : vector<128x128xf32> to vector<2x64x128xf32>
    %c0_3 = arith.constant 0 : index
    %c0_4 = arith.constant 0 : index
    %5 = vector.load %arg2[%c0_3, %c0_4] : memref<1x128xf32, #tpu.memory_space<vmem>>, vector<1x128xf32>
    %6 = vector.shape_cast %5 : vector<1x128xf32> to vector<1x1x128xf32>
    %7 = vector.broadcast %6 : vector<1x1x128xf32> to vector<2x64x128xf32>
    %8 = arith.addf %4, %7 : vector<2x64x128xf32>
    %c0_5 = arith.constant 0 : index
    %c0_6 = arith.constant 0 : index
    %9 = vector.load %arg3[%c0_5, %c0_6] : memref<64x128xf32, #tpu.memory_space<vmem>>, vector<64x128xf32>
    %10 = vector.shape_cast %9 : vector<64x128xf32> to vector<1x64x128xf32>
    %11 = vector.broadcast %10 : vector<1x64x128xf32> to vector<2x64x128xf32>
    %12 = arith.addf %8, %11 : vector<2x64x128xf32>
    %c0_7 = arith.constant 0 : index
    %c0_8 = arith.constant 0 : index
    %c0_9 = arith.constant 0 : index
    %13 = vector.load %arg4[%c0_7, %c0_8, %c0_9] : memref<2x64x128xf32, #tpu.memory_space<vmem>>, vector<2x64x128xf32>
    tpu.vector_store %arg4[%c0_7, %c0_8, %c0_9], %12 {strides = array<i32>} : memref<2x64x128xf32, #tpu.memory_space<vmem>>, vector<2x64x128xf32>,
    return
  }
}

module attributes {stable_mosaic.version = 11 : i64} {
  func.func @_stack_kernel(%arg0: i32, %arg1: i32, %arg2: memref<2x64x128xf32, #tpu.memory_space<vmem>>, %arg3: memref<1x2x768xf32, #tpu.memory_space<vmem>>, %arg4: memref<1x128x384xbf16, #tpu.memory_space<vmem>>, %arg5: memref<1x1x384xf32, #tpu.memory_space<vmem>>, %arg6: memref<1x128x128xbf16, #tpu.memory_space<vmem>>, %arg7: memref<1x1x128xf32, #tpu.memory_space<vmem>>, %arg8: memref<1x128x512xbf16, #tpu.memory_space<vmem>>, %arg9: memref<1x1x512xf32, #tpu.memory_space<vmem>>, %arg10: memref<1x512x128xbf16, #tpu.memory_space<vmem>>, %arg11: memref<1x1x128xf32, #tpu.memory_space<vmem>>, %arg12: memref<2x64x128xf32, #tpu.memory_space<vmem>>, %arg13: memref<128x128xbf16, #tpu.memory_space<vmem>>) attributes {dimension_semantics = [#tpu.dimension_semantics<parallel>, #tpu.dimension_semantics<arbitrary>], iteration_bounds = array<i64: 1, 2>, scalar_prefetch = 0 : i64, scratch_operands = 1 : i64, tpu.core_type = #tpu.core_type<tc>, window_params = [{transform_indices = @transform_0, window_bounds = array<i64: 2, 64, 128>}, {transform_indices = @transform_1, window_bounds = array<i64: 1, 2, 768>}, {transform_indices = @transform_2, window_bounds = array<i64: 1, 128, 384>}, {transform_indices = @transform_3, window_bounds = array<i64: 1, 1, 384>}, {transform_indices = @transform_4, window_bounds = array<i64: 1, 128, 128>}, {transform_indices = @transform_5, window_bounds = array<i64: 1, 1, 128>}, {transform_indices = @transform_6, window_bounds = array<i64: 1, 128, 512>}, {transform_indices = @transform_7, window_bounds = array<i64: 1, 1, 512>}, {transform_indices = @transform_8, window_bounds = array<i64: 1, 512, 128>}, {transform_indices = @transform_9, window_bounds = array<i64: 1, 1, 128>}, {transform_indices = @transform_10, window_bounds = array<i64: 2, 64, 128>}]} {
    %c0_i32 = arith.constant 0 : i32
    %0 = arith.cmpi eq, %arg1, %c0_i32 : i32
    %1 = arith.extui %0 : i1 to i32
    %c0_i32_0 = arith.constant 0 : i32
    %2 = arith.cmpi ne, %1, %c0_i32_0 : i32
    scf.if %2 {
      %c0_79 = arith.constant 0 : index
      %c0_80 = arith.constant 0 : index
      %c0_81 = arith.constant 0 : index
      %208 = vector.load %arg2[%c0_79, %c0_80, %c0_81] : memref<2x64x128xf32, #tpu.memory_space<vmem>>, vector<2x64x128xf32>
      %c0_82 = arith.constant 0 : index
      %c0_83 = arith.constant 0 : index
      %c0_84 = arith.constant 0 : index
      %209 = vector.load %arg12[%c0_82, %c0_83, %c0_84] : memref<2x64x128xf32, #tpu.memory_space<vmem>>, vector<2x64x128xf32>
      tpu.vector_store %arg12[%c0_82, %c0_83, %c0_84], %208 {strides = array<i32>} : memref<2x64x128xf32, #tpu.memory_space<vmem>>, vector<2x64x128xf32>,
    } else {
    }
    %c0 = arith.constant 0 : index
    %c0_1 = arith.constant 0 : index
    %c0_2 = arith.constant 0 : index
    %3 = vector.load %arg12[%c0, %c0_1, %c0_2] : memref<2x64x128xf32, #tpu.memory_space<vmem>>, vector<2x64x128xf32>
    %c0_3 = arith.constant 0 : index
    %c0_4 = arith.constant 0 : index
    %c0_5 = arith.constant 0 : index
    %4 = vector.load %arg3[%c0_3, %c0_4, %c0_5] : memref<1x2x768xf32, #tpu.memory_space<vmem>>, vector<1x2x768xf32>
    %5 = vector.shape_cast %4 : vector<1x2x768xf32> to vector<2x768xf32>
    %6 = vector.extract_strided_slice %5 {offsets = [0, 0], sizes = [2, 128], strides = [1, 1]} : vector<2x768xf32> to vector<2x128xf32>
    %7 = vector.shape_cast %6 : vector<2x128xf32> to vector<2x1x128xf32>
    %8 = vector.extract_strided_slice %5 {offsets = [0, 128], sizes = [2, 128], strides = [1, 1]} : vector<2x768xf32> to vector<2x128xf32>
    %9 = vector.shape_cast %8 : vector<2x128xf32> to vector<2x1x128xf32>
    %10 = vector.extract_strided_slice %5 {offsets = [0, 256], sizes = [2, 128], strides = [1, 1]} : vector<2x768xf32> to vector<2x128xf32>
    %11 = vector.shape_cast %10 : vector<2x128xf32> to vector<2x1x128xf32>
    %12 = vector.extract_strided_slice %5 {offsets = [0, 384], sizes = [2, 128], strides = [1, 1]} : vector<2x768xf32> to vector<2x128xf32>
    %13 = vector.shape_cast %12 : vector<2x128xf32> to vector<2x1x128xf32>
    %14 = vector.extract_strided_slice %5 {offsets = [0, 512], sizes = [2, 128], strides = [1, 1]} : vector<2x768xf32> to vector<2x128xf32>
    %15 = vector.shape_cast %14 : vector<2x128xf32> to vector<2x1x128xf32>
    %16 = vector.extract_strided_slice %5 {offsets = [0, 640], sizes = [2, 128], strides = [1, 1]} : vector<2x768xf32> to vector<2x128xf32>
    %17 = vector.shape_cast %16 : vector<2x128xf32> to vector<2x1x128xf32>
    %cst = arith.constant dense<0.000000e+00> : vector<2x64xf32>
    %18 = vector.multi_reduction <add>, %3, %cst [2] : vector<2x64x128xf32> to vector<2x64xf32>
    %19 = vector.shape_cast %18 : vector<2x64xf32> to vector<2x64x1xf32>
    %cst_6 = arith.constant 1.280000e+02 : f32
    %20 = vector.broadcast %cst_6 : f32 to vector<2x64x1xf32>
    %21 = arith.divf %19, %20 : vector<2x64x1xf32>
    %22 = vector.broadcast %21 : vector<2x64x1xf32> to vector<2x64x128xf32>
    %23 = arith.subf %3, %22 : vector<2x64x128xf32>
    %24 = arith.mulf %23, %23 : vector<2x64x128xf32>
    %cst_7 = arith.constant dense<0.000000e+00> : vector<2x64xf32>
    %25 = vector.multi_reduction <add>, %24, %cst_7 [2] : vector<2x64x128xf32> to vector<2x64xf32>
    %26 = vector.shape_cast %25 : vector<2x64xf32> to vector<2x64x1xf32>
    %cst_8 = arith.constant 1.280000e+02 : f32
    %27 = vector.broadcast %cst_8 : f32 to vector<2x64x1xf32>
    %28 = arith.divf %26, %27 : vector<2x64x1xf32>
    %29 = vector.broadcast %21 : vector<2x64x1xf32> to vector<2x64x128xf32>
    %30 = arith.subf %3, %29 : vector<2x64x128xf32>
    %cst_9 = arith.constant 9.99999997E-7 : f32
    %31 = vector.broadcast %cst_9 : f32 to vector<2x64x1xf32>
    %32 = arith.addf %28, %31 : vector<2x64x1xf32>
    %33 = math.rsqrt %32 : vector<2x64x1xf32>
    %34 = vector.broadcast %33 : vector<2x64x1xf32> to vector<2x64x128xf32>
    %35 = arith.mulf %30, %34 : vector<2x64x128xf32>
    %cst_10 = arith.constant 1.000000e+00 : f32
    %36 = vector.broadcast %cst_10 : f32 to vector<2x1x128xf32>
    %37 = arith.addf %36, %9 : vector<2x1x128xf32>
    %38 = vector.broadcast %37 : vector<2x1x128xf32> to vector<2x64x128xf32>
    %39 = arith.mulf %35, %38 : vector<2x64x128xf32>
    %40 = vector.broadcast %7 : vector<2x1x128xf32> to vector<2x64x128xf32>
    %41 = arith.addf %39, %40 : vector<2x64x128xf32>
    %42 = vector.shape_cast %41 : vector<2x64x128xf32> to vector<128x128xf32>
    %43 = arith.truncf %42 : vector<128x128xf32> to vector<128x128xbf16>
    %c0_11 = arith.constant 0 : index
    %c0_12 = arith.constant 0 : index
    %c0_13 = arith.constant 0 : index
    %44 = vector.load %arg4[%c0_11, %c0_12, %c0_13] : memref<1x128x384xbf16, #tpu.memory_space<vmem>>, vector<1x128x384xbf16>
    %45 = vector.shape_cast %44 : vector<1x128x384xbf16> to vector<128x384xbf16>
    %cst_14 = arith.constant dense<0.000000e+00> : vector<128x384xf32>
    %46 = tpu.matmul %43, %45, %cst_14 {dimension_numbers = #tpu.dot_dimension_numbers<[1], [0], [0], [1], [0, 0, 1, 1], [], []>} : vector<128x128xbf16>, vector<128x384xbf16>, vector<128x384xf32> -> vector<128x384xf32>
    %c0_15 = arith.constant 0 : index
    %c0_16 = arith.constant 0 : index
    %c0_17 = arith.constant 0 : index
    %47 = vector.load %arg5[%c0_15, %c0_16, %c0_17] : memref<1x1x384xf32, #tpu.memory_space<vmem>>, vector<1x1x384xf32>
    %48 = vector.shape_cast %47 : vector<1x1x384xf32> to vector<1x384xf32>
    %49 = vector.broadcast %48 : vector<1x384xf32> to vector<128x384xf32>
    %50 = arith.addf %46, %49 : vector<128x384xf32>
    %51 = vector.shape_cast %50 : vector<128x384xf32> to vector<2x64x384xf32>
    %52 = arith.truncf %51 : vector<2x64x384xf32> to vector<2x64x384xbf16>
    %53 = vector.extract_strided_slice %52 {offsets = [0, 0, 0], sizes = [2, 64, 32], strides = [1, 1, 1]} : vector<2x64x384xbf16> to vector<2x64x32xbf16>
    %54 = vector.extract_strided_slice %52 {offsets = [0, 0, 128], sizes = [2, 64, 32], strides = [1, 1, 1]} : vector<2x64x384xbf16> to vector<2x64x32xbf16>
    %55 = vector.extract_strided_slice %52 {offsets = [0, 0, 256], sizes = [2, 64, 32], strides = [1, 1, 1]} : vector<2x64x384xbf16> to vector<2x64x32xbf16>
    "tpu.trace_start"() <{level = 10 : i32, message = "bqd,bkd->bqk"}> : () -> ()
    %cst_18 = arith.constant dense<0.000000e+00> : vector<2x64x64xf32>
    %56 = tpu.matmul %53, %54, %cst_18 {dimension_numbers = #tpu.dot_dimension_numbers<[2], [2], [1], [1], [0, 0, 0, 1, 1, 1], [0], [0]>} : vector<2x64x32xbf16>, vector<2x64x32xbf16>, vector<2x64x64xf32> -> vector<2x64x64xf32>
    "tpu.trace_stop"() : () -> ()
    %cst_19 = arith.constant 0.176776692 : f32
    %57 = vector.broadcast %cst_19 : f32 to vector<2x64x64xf32>
    %58 = arith.mulf %56, %57 : vector<2x64x64xf32>
    %cst_20 = arith.constant dense<0xFF800000> : vector<2x64xf32>
    %59 = vector.multi_reduction <maximumf>, %58, %cst_20 [2] : vector<2x64x64xf32> to vector<2x64xf32>
    %60 = vector.shape_cast %59 : vector<2x64xf32> to vector<2x64x1xf32>
    %61 = vector.broadcast %60 : vector<2x64x1xf32> to vector<2x64x64xf32>
    %62 = arith.subf %58, %61 : vector<2x64x64xf32>
    %63 = math.exp %62 : vector<2x64x64xf32>
    %cst_21 = arith.constant dense<0.000000e+00> : vector<2x64xf32>
    %64 = vector.multi_reduction <add>, %63, %cst_21 [2] : vector<2x64x64xf32> to vector<2x64xf32>
    %65 = vector.shape_cast %64 : vector<2x64xf32> to vector<2x64x1xf32>
    %66 = tpu.reciprocal %65 {approx = true} : vector<2x64x1xf32> -> vector<2x64x1xf32>
    %67 = vector.broadcast %66 : vector<2x64x1xf32> to vector<2x64x64xf32>
    %68 = arith.mulf %63, %67 : vector<2x64x64xf32>
    %69 = arith.truncf %68 : vector<2x64x64xf32> to vector<2x64x64xbf16>
    "tpu.trace_start"() <{level = 10 : i32, message = "bqk,bkd->bqd"}> : () -> ()
    %cst_22 = arith.constant dense<0.000000e+00> : vector<2x64x32xf32>
    %70 = tpu.matmul %69, %55, %cst_22 {dimension_numbers = #tpu.dot_dimension_numbers<[2], [1], [1], [2], [0, 0, 0, 1, 1, 2], [0], [0]>} : vector<2x64x64xbf16>, vector<2x64x32xbf16>, vector<2x64x32xf32> -> vector<2x64x32xf32>
    "tpu.trace_stop"() : () -> ()
    %71 = vector.shape_cast %70 : vector<2x64x32xf32> to vector<128x32xf32>
    %72 = arith.truncf %71 : vector<128x32xf32> to vector<128x32xbf16>
    %c0_23 = arith.constant 0 : index
    %c0_24 = arith.constant 0 : index
    %73 = vector.load %arg13[%c0_23, %c0_24] : memref<128x128xbf16, #tpu.memory_space<vmem>>, vector<128x32xbf16>
    tpu.vector_store %arg13[%c0_23, %c0_24], %72 {strides = array<i32>} : memref<128x128xbf16, #tpu.memory_space<vmem>>, vector<128x32xbf16>,
    %74 = vector.extract_strided_slice %52 {offsets = [0, 0, 32], sizes = [2, 64, 32], strides = [1, 1, 1]} : vector<2x64x384xbf16> to vector<2x64x32xbf16>
    %75 = vector.extract_strided_slice %52 {offsets = [0, 0, 160], sizes = [2, 64, 32], strides = [1, 1, 1]} : vector<2x64x384xbf16> to vector<2x64x32xbf16>
    %76 = vector.extract_strided_slice %52 {offsets = [0, 0, 288], sizes = [2, 64, 32], strides = [1, 1, 1]} : vector<2x64x384xbf16> to vector<2x64x32xbf16>
    "tpu.trace_start"() <{level = 10 : i32, message = "bqd,bkd->bqk"}> : () -> ()
    %cst_25 = arith.constant dense<0.000000e+00> : vector<2x64x64xf32>
    %77 = tpu.matmul %74, %75, %cst_25 {dimension_numbers = #tpu.dot_dimension_numbers<[2], [2], [1], [1], [0, 0, 0, 1, 1, 1], [0], [0]>} : vector<2x64x32xbf16>, vector<2x64x32xbf16>, vector<2x64x64xf32> -> vector<2x64x64xf32>
    "tpu.trace_stop"() : () -> ()
    %cst_26 = arith.constant 0.176776692 : f32
    %78 = vector.broadcast %cst_26 : f32 to vector<2x64x64xf32>
    %79 = arith.mulf %77, %78 : vector<2x64x64xf32>
    %cst_27 = arith.constant dense<0xFF800000> : vector<2x64xf32>
    %80 = vector.multi_reduction <maximumf>, %79, %cst_27 [2] : vector<2x64x64xf32> to vector<2x64xf32>
    %81 = vector.shape_cast %80 : vector<2x64xf32> to vector<2x64x1xf32>
    %82 = vector.broadcast %81 : vector<2x64x1xf32> to vector<2x64x64xf32>
    %83 = arith.subf %79, %82 : vector<2x64x64xf32>
    %84 = math.exp %83 : vector<2x64x64xf32>
    %cst_28 = arith.constant dense<0.000000e+00> : vector<2x64xf32>
    %85 = vector.multi_reduction <add>, %84, %cst_28 [2] : vector<2x64x64xf32> to vector<2x64xf32>
    %86 = vector.shape_cast %85 : vector<2x64xf32> to vector<2x64x1xf32>
    %87 = tpu.reciprocal %86 {approx = true} : vector<2x64x1xf32> -> vector<2x64x1xf32>
    %88 = vector.broadcast %87 : vector<2x64x1xf32> to vector<2x64x64xf32>
    %89 = arith.mulf %84, %88 : vector<2x64x64xf32>
    %90 = arith.truncf %89 : vector<2x64x64xf32> to vector<2x64x64xbf16>
    "tpu.trace_start"() <{level = 10 : i32, message = "bqk,bkd->bqd"}> : () -> ()
    %cst_29 = arith.constant dense<0.000000e+00> : vector<2x64x32xf32>
    %91 = tpu.matmul %90, %76, %cst_29 {dimension_numbers = #tpu.dot_dimension_numbers<[2], [1], [1], [2], [0, 0, 0, 1, 1, 2], [0], [0]>} : vector<2x64x64xbf16>, vector<2x64x32xbf16>, vector<2x64x32xf32> -> vector<2x64x32xf32>
    "tpu.trace_stop"() : () -> ()
    %92 = vector.shape_cast %91 : vector<2x64x32xf32> to vector<128x32xf32>
    %93 = arith.truncf %92 : vector<128x32xf32> to vector<128x32xbf16>
    %c0_30 = arith.constant 0 : index
    %c32 = arith.constant 32 : index
    %94 = vector.load %arg13[%c0_30, %c32] : memref<128x128xbf16, #tpu.memory_space<vmem>>, vector<128x32xbf16>
    tpu.vector_store %arg13[%c0_30, %c32], %93 {strides = array<i32>} : memref<128x128xbf16, #tpu.memory_space<vmem>>, vector<128x32xbf16>,
    %95 = vector.extract_strided_slice %52 {offsets = [0, 0, 64], sizes = [2, 64, 32], strides = [1, 1, 1]} : vector<2x64x384xbf16> to vector<2x64x32xbf16>
    %96 = vector.extract_strided_slice %52 {offsets = [0, 0, 192], sizes = [2, 64, 32], strides = [1, 1, 1]} : vector<2x64x384xbf16> to vector<2x64x32xbf16>
    %97 = vector.extract_strided_slice %52 {offsets = [0, 0, 320], sizes = [2, 64, 32], strides = [1, 1, 1]} : vector<2x64x384xbf16> to vector<2x64x32xbf16>
    "tpu.trace_start"() <{level = 10 : i32, message = "bqd,bkd->bqk"}> : () -> ()
    %cst_31 = arith.constant dense<0.000000e+00> : vector<2x64x64xf32>
    %98 = tpu.matmul %95, %96, %cst_31 {dimension_numbers = #tpu.dot_dimension_numbers<[2], [2], [1], [1], [0, 0, 0, 1, 1, 1], [0], [0]>} : vector<2x64x32xbf16>, vector<2x64x32xbf16>, vector<2x64x64xf32> -> vector<2x64x64xf32>
    "tpu.trace_stop"() : () -> ()
    %cst_32 = arith.constant 0.176776692 : f32
    %99 = vector.broadcast %cst_32 : f32 to vector<2x64x64xf32>
    %100 = arith.mulf %98, %99 : vector<2x64x64xf32>
    %cst_33 = arith.constant dense<0xFF800000> : vector<2x64xf32>
    %101 = vector.multi_reduction <maximumf>, %100, %cst_33 [2] : vector<2x64x64xf32> to vector<2x64xf32>
    %102 = vector.shape_cast %101 : vector<2x64xf32> to vector<2x64x1xf32>
    %103 = vector.broadcast %102 : vector<2x64x1xf32> to vector<2x64x64xf32>
    %104 = arith.subf %100, %103 : vector<2x64x64xf32>
    %105 = math.exp %104 : vector<2x64x64xf32>
    %cst_34 = arith.constant dense<0.000000e+00> : vector<2x64xf32>
    %106 = vector.multi_reduction <add>, %105, %cst_34 [2] : vector<2x64x64xf32> to vector<2x64xf32>
    %107 = vector.shape_cast %106 : vector<2x64xf32> to vector<2x64x1xf32>
    %108 = tpu.reciprocal %107 {approx = true} : vector<2x64x1xf32> -> vector<2x64x1xf32>
    %109 = vector.broadcast %108 : vector<2x64x1xf32> to vector<2x64x64xf32>
    %110 = arith.mulf %105, %109 : vector<2x64x64xf32>
    %111 = arith.truncf %110 : vector<2x64x64xf32> to vector<2x64x64xbf16>
    "tpu.trace_start"() <{level = 10 : i32, message = "bqk,bkd->bqd"}> : () -> ()
    %cst_35 = arith.constant dense<0.000000e+00> : vector<2x64x32xf32>
    %112 = tpu.matmul %111, %97, %cst_35 {dimension_numbers = #tpu.dot_dimension_numbers<[2], [1], [1], [2], [0, 0, 0, 1, 1, 2], [0], [0]>} : vector<2x64x64xbf16>, vector<2x64x32xbf16>, vector<2x64x32xf32> -> vector<2x64x32xf32>
    "tpu.trace_stop"() : () -> ()
    %113 = vector.shape_cast %112 : vector<2x64x32xf32> to vector<128x32xf32>
    %114 = arith.truncf %113 : vector<128x32xf32> to vector<128x32xbf16>
    %c0_36 = arith.constant 0 : index
    %c64 = arith.constant 64 : index
    %115 = vector.load %arg13[%c0_36, %c64] : memref<128x128xbf16, #tpu.memory_space<vmem>>, vector<128x32xbf16>
    tpu.vector_store %arg13[%c0_36, %c64], %114 {strides = array<i32>} : memref<128x128xbf16, #tpu.memory_space<vmem>>, vector<128x32xbf16>,
    %116 = vector.extract_strided_slice %52 {offsets = [0, 0, 96], sizes = [2, 64, 32], strides = [1, 1, 1]} : vector<2x64x384xbf16> to vector<2x64x32xbf16>
    %117 = vector.extract_strided_slice %52 {offsets = [0, 0, 224], sizes = [2, 64, 32], strides = [1, 1, 1]} : vector<2x64x384xbf16> to vector<2x64x32xbf16>
    %118 = vector.extract_strided_slice %52 {offsets = [0, 0, 352], sizes = [2, 64, 32], strides = [1, 1, 1]} : vector<2x64x384xbf16> to vector<2x64x32xbf16>
    "tpu.trace_start"() <{level = 10 : i32, message = "bqd,bkd->bqk"}> : () -> ()
    %cst_37 = arith.constant dense<0.000000e+00> : vector<2x64x64xf32>
    %119 = tpu.matmul %116, %117, %cst_37 {dimension_numbers = #tpu.dot_dimension_numbers<[2], [2], [1], [1], [0, 0, 0, 1, 1, 1], [0], [0]>} : vector<2x64x32xbf16>, vector<2x64x32xbf16>, vector<2x64x64xf32> -> vector<2x64x64xf32>
    "tpu.trace_stop"() : () -> ()
    %cst_38 = arith.constant 0.176776692 : f32
    %120 = vector.broadcast %cst_38 : f32 to vector<2x64x64xf32>
    %121 = arith.mulf %119, %120 : vector<2x64x64xf32>
    %cst_39 = arith.constant dense<0xFF800000> : vector<2x64xf32>
    %122 = vector.multi_reduction <maximumf>, %121, %cst_39 [2] : vector<2x64x64xf32> to vector<2x64xf32>
    %123 = vector.shape_cast %122 : vector<2x64xf32> to vector<2x64x1xf32>
    %124 = vector.broadcast %123 : vector<2x64x1xf32> to vector<2x64x64xf32>
    %125 = arith.subf %121, %124 : vector<2x64x64xf32>
    %126 = math.exp %125 : vector<2x64x64xf32>
    %cst_40 = arith.constant dense<0.000000e+00> : vector<2x64xf32>
    %127 = vector.multi_reduction <add>, %126, %cst_40 [2] : vector<2x64x64xf32> to vector<2x64xf32>
    %128 = vector.shape_cast %127 : vector<2x64xf32> to vector<2x64x1xf32>
    %129 = tpu.reciprocal %128 {approx = true} : vector<2x64x1xf32> -> vector<2x64x1xf32>
    %130 = vector.broadcast %129 : vector<2x64x1xf32> to vector<2x64x64xf32>
    %131 = arith.mulf %126, %130 : vector<2x64x64xf32>
    %132 = arith.truncf %131 : vector<2x64x64xf32> to vector<2x64x64xbf16>
    "tpu.trace_start"() <{level = 10 : i32, message = "bqk,bkd->bqd"}> : () -> ()
    %cst_41 = arith.constant dense<0.000000e+00> : vector<2x64x32xf32>
    %133 = tpu.matmul %132, %118, %cst_41 {dimension_numbers = #tpu.dot_dimension_numbers<[2], [1], [1], [2], [0, 0, 0, 1, 1, 2], [0], [0]>} : vector<2x64x64xbf16>, vector<2x64x32xbf16>, vector<2x64x32xf32> -> vector<2x64x32xf32>
    "tpu.trace_stop"() : () -> ()
    %134 = vector.shape_cast %133 : vector<2x64x32xf32> to vector<128x32xf32>
    %135 = arith.truncf %134 : vector<128x32xf32> to vector<128x32xbf16>
    %c0_42 = arith.constant 0 : index
    %c96 = arith.constant 96 : index
    %136 = vector.load %arg13[%c0_42, %c96] : memref<128x128xbf16, #tpu.memory_space<vmem>>, vector<128x32xbf16>
    tpu.vector_store %arg13[%c0_42, %c96], %135 {strides = array<i32>} : memref<128x128xbf16, #tpu.memory_space<vmem>>, vector<128x32xbf16>,
    %c0_43 = arith.constant 0 : index
    %c0_44 = arith.constant 0 : index
    %137 = vector.load %arg13[%c0_43, %c0_44] : memref<128x128xbf16, #tpu.memory_space<vmem>>, vector<128x128xbf16>
    %c0_45 = arith.constant 0 : index
    %c0_46 = arith.constant 0 : index
    %c0_47 = arith.constant 0 : index
    %138 = vector.load %arg6[%c0_45, %c0_46, %c0_47] : memref<1x128x128xbf16, #tpu.memory_space<vmem>>, vector<1x128x128xbf16>
    %139 = vector.shape_cast %138 : vector<1x128x128xbf16> to vector<128x128xbf16>
    %cst_48 = arith.constant dense<0.000000e+00> : vector<128x128xf32>
    %140 = tpu.matmul %137, %139, %cst_48 {dimension_numbers = #tpu.dot_dimension_numbers<[1], [0], [0], [1], [0, 0, 1, 1], [], []>} : vector<128x128xbf16>, vector<128x128xbf16>, vector<128x128xf32> -> vector<128x128xf32>
    %c0_49 = arith.constant 0 : index
    %c0_50 = arith.constant 0 : index
    %c0_51 = arith.constant 0 : index
    %141 = vector.load %arg7[%c0_49, %c0_50, %c0_51] : memref<1x1x128xf32, #tpu.memory_space<vmem>>, vector<1x1x128xf32>
    %142 = vector.shape_cast %141 : vector<1x1x128xf32> to vector<1x128xf32>
    %143 = vector.broadcast %142 : vector<1x128xf32> to vector<128x128xf32>
    %144 = arith.addf %140, %143 : vector<128x128xf32>
    %145 = vector.shape_cast %144 : vector<128x128xf32> to vector<2x64x128xf32>
    %146 = vector.broadcast %11 : vector<2x1x128xf32> to vector<2x64x128xf32>
    %147 = arith.mulf %146, %145 : vector<2x64x128xf32>
    %148 = arith.addf %3, %147 : vector<2x64x128xf32>
    %cst_52 = arith.constant dense<0.000000e+00> : vector<2x64xf32>
    %149 = vector.multi_reduction <add>, %148, %cst_52 [2] : vector<2x64x128xf32> to vector<2x64xf32>
    %150 = vector.shape_cast %149 : vector<2x64xf32> to vector<2x64x1xf32>
    %cst_53 = arith.constant 1.280000e+02 : f32
    %151 = vector.broadcast %cst_53 : f32 to vector<2x64x1xf32>
    %152 = arith.divf %150, %151 : vector<2x64x1xf32>
    %153 = vector.broadcast %152 : vector<2x64x1xf32> to vector<2x64x128xf32>
    %154 = arith.subf %148, %153 : vector<2x64x128xf32>
    %155 = arith.mulf %154, %154 : vector<2x64x128xf32>
    %cst_54 = arith.constant dense<0.000000e+00> : vector<2x64xf32>
    %156 = vector.multi_reduction <add>, %155, %cst_54 [2] : vector<2x64x128xf32> to vector<2x64xf32>
    %157 = vector.shape_cast %156 : vector<2x64xf32> to vector<2x64x1xf32>
    %cst_55 = arith.constant 1.280000e+02 : f32
    %158 = vector.broadcast %cst_55 : f32 to vector<2x64x1xf32>
    %159 = arith.divf %157, %158 : vector<2x64x1xf32>
    %160 = vector.broadcast %152 : vector<2x64x1xf32> to vector<2x64x128xf32>
    %161 = arith.subf %148, %160 : vector<2x64x128xf32>
    %cst_56 = arith.constant 9.99999997E-7 : f32
    %162 = vector.broadcast %cst_56 : f32 to vector<2x64x1xf32>
    %163 = arith.addf %159, %162 : vector<2x64x1xf32>
    %164 = math.rsqrt %163 : vector<2x64x1xf32>
    %165 = vector.broadcast %164 : vector<2x64x1xf32> to vector<2x64x128xf32>
    %166 = arith.mulf %161, %165 : vector<2x64x128xf32>
    %cst_57 = arith.constant 1.000000e+00 : f32
    %167 = vector.broadcast %cst_57 : f32 to vector<2x1x128xf32>
    %168 = arith.addf %167, %15 : vector<2x1x128xf32>
    %169 = vector.broadcast %168 : vector<2x1x128xf32> to vector<2x64x128xf32>
    %170 = arith.mulf %166, %169 : vector<2x64x128xf32>
    %171 = vector.broadcast %13 : vector<2x1x128xf32> to vector<2x64x128xf32>
    %172 = arith.addf %170, %171 : vector<2x64x128xf32>
    %173 = vector.shape_cast %172 : vector<2x64x128xf32> to vector<128x128xf32>
    %174 = arith.truncf %173 : vector<128x128xf32> to vector<128x128xbf16>
    %c0_58 = arith.constant 0 : index
    %c0_59 = arith.constant 0 : index
    %c0_60 = arith.constant 0 : index
    %175 = vector.load %arg8[%c0_58, %c0_59, %c0_60] : memref<1x128x512xbf16, #tpu.memory_space<vmem>>, vector<1x128x512xbf16>
    %176 = vector.shape_cast %175 : vector<1x128x512xbf16> to vector<128x512xbf16>
    %cst_61 = arith.constant dense<0.000000e+00> : vector<128x512xf32>
    %177 = tpu.matmul %174, %176, %cst_61 {dimension_numbers = #tpu.dot_dimension_numbers<[1], [0], [0], [1], [0, 0, 1, 1], [], []>} : vector<128x128xbf16>, vector<128x512xbf16>, vector<128x512xf32> -> vector<128x512xf32>
    %c0_62 = arith.constant 0 : index
    %c0_63 = arith.constant 0 : index
    %c0_64 = arith.constant 0 : index
    %178 = vector.load %arg9[%c0_62, %c0_63, %c0_64] : memref<1x1x512xf32, #tpu.memory_space<vmem>>, vector<1x1x512xf32>
    %179 = vector.shape_cast %178 : vector<1x1x512xf32> to vector<1x512xf32>
    %180 = vector.broadcast %179 : vector<1x512xf32> to vector<128x512xf32>
    %181 = arith.addf %177, %180 : vector<128x512xf32>
    %cst_65 = arith.constant 5.000000e-01 : f32
    %182 = vector.broadcast %cst_65 : f32 to vector<128x512xf32>
    %183 = arith.mulf %182, %181 : vector<128x512xf32>
    %cst_66 = arith.constant 4.471500e-02 : f32
    %184 = vector.broadcast %cst_66 : f32 to vector<128x512xf32>
    %185 = arith.mulf %184, %181 : vector<128x512xf32>
    %186 = arith.mulf %185, %181 : vector<128x512xf32>
    %187 = arith.mulf %186, %181 : vector<128x512xf32>
    %188 = arith.addf %181, %187 : vector<128x512xf32>
    %cst_67 = arith.constant 0.797884583 : f32
    %189 = vector.broadcast %cst_67 : f32 to vector<128x512xf32>
    %190 = arith.mulf %189, %188 : vector<128x512xf32>
    %191 = math.tanh %190 : vector<128x512xf32>
    %cst_68 = arith.constant 1.000000e+00 : f32
    %192 = vector.broadcast %cst_68 : f32 to vector<128x512xf32>
    %193 = arith.addf %192, %191 : vector<128x512xf32>
    %194 = arith.mulf %183, %193 : vector<128x512xf32>
    %195 = arith.truncf %194 : vector<128x512xf32> to vector<128x512xbf16>
    %c0_69 = arith.constant 0 : index
    %c0_70 = arith.constant 0 : index
    %c0_71 = arith.constant 0 : index
    %196 = vector.load %arg10[%c0_69, %c0_70, %c0_71] : memref<1x512x128xbf16, #tpu.memory_space<vmem>>, vector<1x512x128xbf16>
    %197 = vector.shape_cast %196 : vector<1x512x128xbf16> to vector<512x128xbf16>
    %cst_72 = arith.constant dense<0.000000e+00> : vector<128x128xf32>
    %198 = tpu.matmul %195, %197, %cst_72 {dimension_numbers = #tpu.dot_dimension_numbers<[1], [0], [0], [1], [0, 0, 1, 1], [], []>} : vector<128x512xbf16>, vector<512x128xbf16>, vector<128x128xf32> -> vector<128x128xf32>
    %c0_73 = arith.constant 0 : index
    %c0_74 = arith.constant 0 : index
    %c0_75 = arith.constant 0 : index
    %199 = vector.load %arg11[%c0_73, %c0_74, %c0_75] : memref<1x1x128xf32, #tpu.memory_space<vmem>>, vector<1x1x128xf32>
    %200 = vector.shape_cast %199 : vector<1x1x128xf32> to vector<1x128xf32>
    %201 = vector.broadcast %200 : vector<1x128xf32> to vector<128x128xf32>
    %202 = arith.addf %198, %201 : vector<128x128xf32>
    %203 = vector.shape_cast %202 : vector<128x128xf32> to vector<2x64x128xf32>
    %204 = vector.broadcast %17 : vector<2x1x128xf32> to vector<2x64x128xf32>
    %205 = arith.mulf %204, %203 : vector<2x64x128xf32>
    %206 = arith.addf %148, %205 : vector<2x64x128xf32>
    %c0_76 = arith.constant 0 : index
    %c0_77 = arith.constant 0 : index
    %c0_78 = arith.constant 0 : index
    %207 = vector.load %arg12[%c0_76, %c0_77, %c0_78] : memref<2x64x128xf32, #tpu.memory_space<vmem>>, vector<2x64x128xf32>
    tpu.vector_store %arg12[%c0_76, %c0_77, %c0_78], %206 {strides = array<i32>} : memref<2x64x128xf32, #tpu.memory_space<vmem>>, vector<2x64x128xf32>,
    return
  }
  func.func @transform_0(%arg0: i32, %arg1: i32) -> (i32, i32, i32) {
    %c0_i32 = arith.constant 0 : i32
    %c0_i32_0 = arith.constant 0 : i32
    %c0_i32_1 = arith.constant 0 : i32
    return %arg0, %c0_i32, %c0_i32_0 : i32, i32, i32
  }
  func.func @transform_1(%arg0: i32, %arg1: i32) -> (i32, i32, i32) {
    %c0_i32 = arith.constant 0 : i32
    %c0_i32_0 = arith.constant 0 : i32
    return %arg1, %arg0, %c0_i32 : i32, i32, i32
  }
  func.func @transform_2(%arg0: i32, %arg1: i32) -> (i32, i32, i32) {
    %c0_i32 = arith.constant 0 : i32
    %c0_i32_0 = arith.constant 0 : i32
    %c0_i32_1 = arith.constant 0 : i32
    return %arg1, %c0_i32, %c0_i32_0 : i32, i32, i32
  }
  func.func @transform_3(%arg0: i32, %arg1: i32) -> (i32, i32, i32) {
    %c0_i32 = arith.constant 0 : i32
    %c0_i32_0 = arith.constant 0 : i32
    %c0_i32_1 = arith.constant 0 : i32
    return %arg1, %c0_i32, %c0_i32_0 : i32, i32, i32
  }
  func.func @transform_4(%arg0: i32, %arg1: i32) -> (i32, i32, i32) {
    %c0_i32 = arith.constant 0 : i32
    %c0_i32_0 = arith.constant 0 : i32
    %c0_i32_1 = arith.constant 0 : i32
    return %arg1, %c0_i32, %c0_i32_0 : i32, i32, i32
  }
  func.func @transform_5(%arg0: i32, %arg1: i32) -> (i32, i32, i32) {
    %c0_i32 = arith.constant 0 : i32
    %c0_i32_0 = arith.constant 0 : i32
    %c0_i32_1 = arith.constant 0 : i32
    return %arg1, %c0_i32, %c0_i32_0 : i32, i32, i32
  }
  func.func @transform_6(%arg0: i32, %arg1: i32) -> (i32, i32, i32) {
    %c0_i32 = arith.constant 0 : i32
    %c0_i32_0 = arith.constant 0 : i32
    %c0_i32_1 = arith.constant 0 : i32
    return %arg1, %c0_i32, %c0_i32_0 : i32, i32, i32
  }
  func.func @transform_7(%arg0: i32, %arg1: i32) -> (i32, i32, i32) {
    %c0_i32 = arith.constant 0 : i32
    %c0_i32_0 = arith.constant 0 : i32
    %c0_i32_1 = arith.constant 0 : i32
    return %arg1, %c0_i32, %c0_i32_0 : i32, i32, i32
  }
  func.func @transform_8(%arg0: i32, %arg1: i32) -> (i32, i32, i32) {
    %c0_i32 = arith.constant 0 : i32
    %c0_i32_0 = arith.constant 0 : i32
    %c0_i32_1 = arith.constant 0 : i32
    return %arg1, %c0_i32, %c0_i32_0 : i32, i32, i32
  }
  func.func @transform_9(%arg0: i32, %arg1: i32) -> (i32, i32, i32) {
    %c0_i32 = arith.constant 0 : i32
    %c0_i32_0 = arith.constant 0 : i32
    %c0_i32_1 = arith.constant 0 : i32
    return %arg1, %c0_i32, %c0_i32_0 : i32, i32, i32
  }
  func.func @transform_10(%arg0: i32, %arg1: i32) -> (i32, i32, i32) {
    %c0_i32 = arith.constant 0 : i32
    %c0_i32_0 = arith.constant 0 : i32
    %c0_i32_1 = arith.constant 0 : i32
    return %arg0, %c0_i32, %c0_i32_0 : i32, i32, i32
  }
}

module attributes {stable_mosaic.version = 11 : i64} {
  func.func @_final_kernel(%arg0: memref<2x64x128xf32, #tpu.memory_space<vmem>>, %arg1: memref<2x256xf32, #tpu.memory_space<vmem>>, %arg2: memref<128x128xbf16, #tpu.memory_space<vmem>>, %arg3: memref<1x128xf32, #tpu.memory_space<vmem>>, %arg4: memref<2x64x128xf32, #tpu.memory_space<vmem>>) attributes {dimension_semantics = [], scalar_prefetch = 0 : i64, scratch_operands = 0 : i64, tpu.core_type = #tpu.core_type<tc>} {
    %c0 = arith.constant 0 : index
    %c0_0 = arith.constant 0 : index
    %c0_1 = arith.constant 0 : index
    %0 = vector.load %arg0[%c0, %c0_0, %c0_1] : memref<2x64x128xf32, #tpu.memory_space<vmem>>, vector<2x64x128xf32>
    %c0_2 = arith.constant 0 : index
    %c0_3 = arith.constant 0 : index
    %1 = vector.load %arg1[%c0_2, %c0_3] : memref<2x256xf32, #tpu.memory_space<vmem>>, vector<2x256xf32>
    %2 = vector.extract_strided_slice %1 {offsets = [0, 0], sizes = [2, 128], strides = [1, 1]} : vector<2x256xf32> to vector<2x128xf32>
    %3 = vector.shape_cast %2 : vector<2x128xf32> to vector<2x1x128xf32>
    %4 = vector.extract_strided_slice %1 {offsets = [0, 128], sizes = [2, 128], strides = [1, 1]} : vector<2x256xf32> to vector<2x128xf32>
    %5 = vector.shape_cast %4 : vector<2x128xf32> to vector<2x1x128xf32>
    %cst = arith.constant dense<0.000000e+00> : vector<2x64xf32>
    %6 = vector.multi_reduction <add>, %0, %cst [2] : vector<2x64x128xf32> to vector<2x64xf32>
    %7 = vector.shape_cast %6 : vector<2x64xf32> to vector<2x64x1xf32>
    %cst_4 = arith.constant 1.280000e+02 : f32
    %8 = vector.broadcast %cst_4 : f32 to vector<2x64x1xf32>
    %9 = arith.divf %7, %8 : vector<2x64x1xf32>
    %10 = vector.broadcast %9 : vector<2x64x1xf32> to vector<2x64x128xf32>
    %11 = arith.subf %0, %10 : vector<2x64x128xf32>
    %12 = arith.mulf %11, %11 : vector<2x64x128xf32>
    %cst_5 = arith.constant dense<0.000000e+00> : vector<2x64xf32>
    %13 = vector.multi_reduction <add>, %12, %cst_5 [2] : vector<2x64x128xf32> to vector<2x64xf32>
    %14 = vector.shape_cast %13 : vector<2x64xf32> to vector<2x64x1xf32>
    %cst_6 = arith.constant 1.280000e+02 : f32
    %15 = vector.broadcast %cst_6 : f32 to vector<2x64x1xf32>
    %16 = arith.divf %14, %15 : vector<2x64x1xf32>
    %17 = vector.broadcast %9 : vector<2x64x1xf32> to vector<2x64x128xf32>
    %18 = arith.subf %0, %17 : vector<2x64x128xf32>
    %cst_7 = arith.constant 9.99999997E-7 : f32
    %19 = vector.broadcast %cst_7 : f32 to vector<2x64x1xf32>
    %20 = arith.addf %16, %19 : vector<2x64x1xf32>
    %21 = math.rsqrt %20 : vector<2x64x1xf32>
    %22 = vector.broadcast %21 : vector<2x64x1xf32> to vector<2x64x128xf32>
    %23 = arith.mulf %18, %22 : vector<2x64x128xf32>
    %cst_8 = arith.constant 1.000000e+00 : f32
    %24 = vector.broadcast %cst_8 : f32 to vector<2x1x128xf32>
    %25 = arith.addf %24, %5 : vector<2x1x128xf32>
    %26 = vector.broadcast %25 : vector<2x1x128xf32> to vector<2x64x128xf32>
    %27 = arith.mulf %23, %26 : vector<2x64x128xf32>
    %28 = vector.broadcast %3 : vector<2x1x128xf32> to vector<2x64x128xf32>
    %29 = arith.addf %27, %28 : vector<2x64x128xf32>
    %30 = vector.shape_cast %29 : vector<2x64x128xf32> to vector<128x128xf32>
    %31 = arith.truncf %30 : vector<128x128xf32> to vector<128x128xbf16>
    %c0_9 = arith.constant 0 : index
    %c0_10 = arith.constant 0 : index
    %32 = vector.load %arg2[%c0_9, %c0_10] : memref<128x128xbf16, #tpu.memory_space<vmem>>, vector<128x128xbf16>
    %cst_11 = arith.constant dense<0.000000e+00> : vector<128x128xf32>
    %33 = tpu.matmul %31, %32, %cst_11 {dimension_numbers = #tpu.dot_dimension_numbers<[1], [0], [0], [1], [0, 0, 1, 1], [], []>} : vector<128x128xbf16>, vector<128x128xbf16>, vector<128x128xf32> -> vector<128x128xf32>
    %c0_12 = arith.constant 0 : index
    %c0_13 = arith.constant 0 : index
    %34 = vector.load %arg3[%c0_12, %c0_13] : memref<1x128xf32, #tpu.memory_space<vmem>>, vector<1x128xf32>
    %35 = vector.broadcast %34 : vector<1x128xf32> to vector<128x128xf32>
    %36 = arith.addf %33, %35 : vector<128x128xf32>
    %37 = vector.shape_cast %36 : vector<128x128xf32> to vector<2x64x128xf32>
    %c0_14 = arith.constant 0 : index
    %c0_15 = arith.constant 0 : index
    %c0_16 = arith.constant 0 : index
    %38 = vector.load %arg4[%c0_14, %c0_15, %c0_16] : memref<2x64x128xf32, #tpu.memory_space<vmem>>, vector<2x64x128xf32>
    tpu.vector_store %arg4[%c0_14, %c0_15, %c0_16], %37 {strides = array<i32>} : memref<2x64x128xf32, #tpu.memory_space<vmem>>, vector<2x64x128xf32>,
    return
  }
}

</mosaic_0001>

<bundles_post_ra>
// kernel: vit_forward.4
= control target key start
LH: loop header
LB: loop body
LE: loop exit
PB: predicated region body
PF: predicated region fallthrough
CT: control target
= control target key end

     0   :  { %s523_s1 = inlined_call_operand.vmem [shape: bf16[128,128], index: 1, kind: input, shape index: {}]   ;;  %s524_s0 = inlined_call_operand.vmem [shape: f32[128,128], index: 0, kind: input, shape index: {}]   ;;  %s525_s2 = inlined_call_operand.vmem [shape: f32[1,128], index: 2, kind: input, shape index: {}]   ;;  %s526_s3 = inlined_call_operand.vmem [shape: f32[64,128], index: 3, kind: input, shape index: {}]   ;;  %s527_s4 = inlined_call_operand.vmem [shape: f32[2,64,128], index: 4, kind: output, shape index: {}]  }
   0x1   :  { %v343_v0 = vld [vmem:[%s523_s1] sm:$0xff]   ;;  %v344_v1 = vld [vmem:[%s523_s1 + $0x8] sm:$0xff]   ;;  %v345_v2 = vld [vmem:[%s523_s1 + $0x10] sm:$0xff]  }
   0x2   :  { %295 = vmatprep.subr.bf16.mxu0 %v343_v0  ;;  %327 = vmatprep.subr.bf16.mxu1 %v343_v0  ;;  %v346_v3 = vld [vmem:[%s523_s1 + $0x18] sm:$0xff]   ;;  %v18_v4 = vld [vmem:[%s524_s0] sm:$0xff]  ;;  %v19_v5 = vld [vmem:[%s524_s0 + $0x8] sm:$0xff] }
   0x3   :  { %296 = vmatpush3.bf16.msra.mxu0 %v343_v0  ;;  %335 = vmatpush3.bf16.msra.mxu1 %v343_v0  ;;  %v26_v6 = vld [vmem:[%s524_s0 + $0x40] sm:$0xff]  ;;  %v34_v7 = vpack.c.bf16 %v19_v5, %v18_v4  ;;  %v27_v8 = vld [vmem:[%s524_s0 + $0x48] sm:$0xff]  ;;  %v349_v12 = vld [vmem:[%s523_s1 + $0x30] sm:$0xff]  }
   0x4   :  { %297 = vmatprep.subr.bf16.mxu0 %v344_v1  ;;  %328 = vmatprep.subr.bf16.mxu1 %v344_v1  ;;  %v38_v9 = vpack.c.bf16 %v27_v8, %v26_v6  ;;  %v347_v10 = vld [vmem:[%s523_s1 + $0x20] sm:$0xff]   ;;  %v348_v11 = vld [vmem:[%s523_s1 + $0x28] sm:$0xff]   ;;  %v350_v13 = vld [vmem:[%s523_s1 + $0x38] sm:$0xff]  }
   0x5   :  { %311 = vmatprep.mubr.bf16.mxu0 %v34_v7  ;;  %v20_v14 = vld [vmem:[%s524_s0 + $0x10] sm:$0xff]  ;;  %v21_v15 = vld [vmem:[%s524_s0 + $0x18] sm:$0xff]  ;;  %v22_v18 = vld [vmem:[%s524_s0 + $0x20] sm:$0xff] }
   0x6   :  { %319 = vmatprep.mubr.bf16.mxu1 %v38_v9  ;;  %v28_v16 = vld [vmem:[%s524_s0 + $0x50] sm:$0xff]  ;;  %v29_v17 = vld [vmem:[%s524_s0 + $0x58] sm:$0xff]  ;;  %v23_v19 = vld [vmem:[%s524_s0 + $0x28] sm:$0xff]  ;;  %v35_v22 = vpack.c.bf16 %v21_v15, %v20_v14 }
   0x7   :  { %298 = vmatpush3.bf16.msra.mxu0 %v344_v1  ;;  %336 = vmatpush3.bf16.msra.mxu1 %v344_v1  ;;  %v30_v20 = vld [vmem:[%s524_s0 + $0x60] sm:$0xff]  ;;  %v31_v21 = vld [vmem:[%s524_s0 + $0x68] sm:$0xff]  ;;  %v39_v23 = vpack.c.bf16 %v29_v17, %v28_v16  ;;  %v36_v24 = vpack.c.bf16 %v23_v19, %v22_v18  ;;  %v24_v26 = vld [vmem:[%s524_s0 + $0x30] sm:$0xff] }
   0x8   :  { %299 = vmatprep.subr.bf16.mxu0 %v345_v2  ;;  %329 = vmatprep.subr.bf16.mxu1 %v345_v2  ;;  %v40_v25 = vpack.c.bf16 %v31_v21, %v30_v20  ;;  %v25_v27 = vld [vmem:[%s524_s0 + $0x38] sm:$0xff]  ;;  %v32_v28 = vld [vmem:[%s524_s0 + $0x70] sm:$0xff]  ;;  %v278_v32 = vld [vmem:[%s525_s2] ss:$0 sm:$0xff] }
   0x9   :  { %v33_v29 = vld [vmem:[%s524_s0 + $0x78] sm:$0xff]  ;;  %v37_v30 = vpack.c.bf16 %v25_v27, %v24_v26  ;;  %v228_v34 = vld [vmem:[%s526_s3 + $0x10] sm:$0xff]  ;;  %v226_v39 = vld [vmem:[%s526_s3] sm:$0xff] }
   0xa   :  { %v41_v31 = vpack.c.bf16 %v33_v29, %v32_v28  ;;  %v229_v44 = vld [vmem:[%s526_s3 + $0x18] sm:$0xff]  ;;  %v227_v51 = vld [vmem:[%s526_s3 + $0x8] sm:$0xff]  ;;  %v232_v62 = vld [vmem:[%s526_s3 + $0x30] sm:$0xff] }
   0xb   :  { %300 = vmatpush3.bf16.msra.mxu0 %v345_v2  ;;  %337 = vmatpush3.bf16.msra.mxu1 %v345_v2  ;;  %v233_v8 = vld [vmem:[%s526_s3 + $0x38] sm:$0xff]  ;;  %v231_v15 = vld [vmem:[%s526_s3 + $0x28] sm:$0xff] }
   0xc   :  { %301 = vmatprep.subr.bf16.mxu0 %v346_v3  ;;  %330 = vmatprep.subr.bf16.mxu1 %v346_v3 }
   0xf   :  { %302 = vmatpush3.bf16.msra.mxu0 %v346_v3  ;;  %338 = vmatpush3.bf16.msra.mxu1 %v346_v3  ;;  %v230_v3 = vld [vmem:[%s526_s3 + $0x20] sm:$0xff] }
  0x10   :  { %303 = vmatprep.subr.bf16.mxu0 %v347_v10  ;;  %331 = vmatprep.subr.bf16.mxu1 %v347_v10 }
  0x13   :  { %304 = vmatpush3.bf16.msra.mxu0 %v347_v10  ;;  %339 = vmatpush3.bf16.msra.mxu1 %v347_v10 }
  0x14   :  { %305 = vmatprep.subr.bf16.mxu0 %v348_v11  ;;  %332 = vmatprep.subr.bf16.mxu1 %v348_v11 }
  0x17   :  { %306 = vmatpush3.bf16.msra.mxu0 %v348_v11  ;;  %340 = vmatpush3.bf16.msra.mxu1 %v348_v11 }
  0x18   :  { %307 = vmatprep.subr.bf16.mxu0 %v349_v12  ;;  %333 = vmatprep.subr.bf16.mxu1 %v349_v12 }
  0x1b   :  { %308 = vmatpush3.bf16.msra.mxu0 %v349_v12  ;;  %341 = vmatpush3.bf16.msra.mxu1 %v349_v12 }
  0x1c   :  { %309 = vmatprep.subr.bf16.mxu0 %v350_v13  ;;  %334 = vmatprep.subr.bf16.mxu1 %v350_v13 }
  0x1f   :  { %310 = vmatpush3.bf16.msra.mxu0 %v350_v13  ;;  %342 = vmatpush3.bf16.msra.mxu1 %v350_v13 }
  0x22   :  { %312 = vmatmul.mubr.bf16.vlgmr.msra.gmra.mrb[0].mxu0 %v35_v22  ;;  %320 = vmatmul.mubr.bf16.vlgmr.msra.gmra.mrb[0].mxu1 %v39_v23 }
  0x23   :  { %315 = vmatprep.mubr.bf16.mxu0 %v36_v24  ;;  %323 = vmatprep.mubr.bf16.mxu1 %v40_v25 }
  0x2a   :  { %316 = vmatmul.mubr.bf16.gmra.mrb[4].mxu0 %v37_v30  ;;  %324 = vmatmul.mubr.bf16.gmra.mrb[4].mxu1 %v41_v31 }
  0xf5   :  { %v313_v33 = vpop.f32.mrb[0].mxu0  ;;  %v321_v35 = vpop.f32.mrb[0].mxu1 }
  0xf6   :  { %v212_v36 = vadd.f32 %v313_v33, %v278_v32  ;;  %v220_v37 = vadd.f32 %v321_v35, %v278_v32  ;;  %v140_v38 = vpop.f32.mrb[1].mxu0  ;;  %v172_v40 = vpop.f32.mrb[1].mxu1 }
  0xf7   :  { %v210_v41 = vadd.f32 %v278_v32, %v140_v38  ;;  %v218_v42 = vadd.f32 %v278_v32, %v172_v40  ;;  %v314_v43 = vpop.f32.mrb[2].mxu0  ;;  %v322_v45 = vpop.f32.mrb[2].mxu1 }
  0xf8   :  { %v236_v46 = vadd.f32 %v228_v34, %v212_v36  ;;  %v244_v47 = vadd.f32 %v228_v34, %v220_v37  ;;  %v213_v48 = vadd.f32 %v314_v43, %v278_v32  ;;  %v221_v49 = vadd.f32 %v322_v45, %v278_v32  ;;  %v143_v50 = vpop.f32.mrb[3].mxu0  ;;  %v175_v52 = vpop.f32.mrb[3].mxu1 }
  0xf9   :  { %v234_v53 = vadd.f32 %v226_v39, %v210_v41  ;;  %v242_v54 = vadd.f32 %v226_v39, %v218_v42  ;;  %v211_v55 = vadd.f32 %v278_v32, %v143_v50  ;;  %v219_v56 = vadd.f32 %v278_v32, %v175_v52 }
  0xfa   :  { %252 = vst [vmem:[%s527_s4 + $0x10] sm:$0xff] %v236_v46  ;;  %260 = vst [vmem:[%s527_s4 + $0x50] sm:$0xff] %v244_v47  ;;  %v237_v57 = vadd.f32 %v229_v44, %v213_v48  ;;  %v245_v58 = vadd.f32 %v229_v44, %v221_v49 }
  0xfb   :  { %250 = vst [vmem:[%s527_s4] sm:$0xff] %v234_v53  ;;  %258 = vst [vmem:[%s527_s4 + $0x40] sm:$0xff] %v242_v54  ;;  %v235_v59 = vadd.f32 %v227_v51, %v211_v55  ;;  %v243_v60 = vadd.f32 %v227_v51, %v219_v56 }
  0xfc   :  { %253 = vst [vmem:[%s527_s4 + $0x18] sm:$0xff] %v237_v57  ;;  %261 = vst [vmem:[%s527_s4 + $0x58] sm:$0xff] %v245_v58 }
  0xfd   :  { %251 = vst [vmem:[%s527_s4 + $0x8] sm:$0xff] %v235_v59  ;;  %259 = vst [vmem:[%s527_s4 + $0x48] sm:$0xff] %v243_v60  ;;  %v317_v61 = vpop.f32.mrb[4].mxu0  ;;  %v325_v63 = vpop.f32.mrb[4].mxu1 }
  0xfe   :  { %v216_v0 = vadd.f32 %v317_v61, %v278_v32  ;;  %v224_v1 = vadd.f32 %v325_v63, %v278_v32  ;;  %v156_v2 = vpop.f32.mrb[5].mxu0  ;;  %v188_v4 = vpop.f32.mrb[5].mxu1 }
  0xff   :  { %v214_v5 = vadd.f32 %v278_v32, %v156_v2  ;;  %v222_v6 = vadd.f32 %v278_v32, %v188_v4  ;;  %v318_v7 = vpop.f32.mrb[6].mxu0  ;;  %v326_v9 = vpop.f32.mrb[6].mxu1 }
 0x100   :  { %v240_v10 = vadd.f32 %v232_v62, %v216_v0  ;;  %v248_v11 = vadd.f32 %v232_v62, %v224_v1  ;;  %v217_v12 = vadd.f32 %v318_v7, %v278_v32  ;;  %v225_v13 = vadd.f32 %v326_v9, %v278_v32  ;;  %v159_v14 = vpop.f32.mrb[7].mxu0  ;;  %v191_v16 = vpop.f32.mrb[7].mxu1 }
 0x101   :  { %v238_v17 = vadd.f32 %v230_v3, %v214_v5  ;;  %v246_v18 = vadd.f32 %v230_v3, %v222_v6  ;;  %v215_v19 = vadd.f32 %v278_v32, %v159_v14  ;;  %v223_v20 = vadd.f32 %v278_v32, %v191_v16 }
 0x102   :  { %256 = vst [vmem:[%s527_s4 + $0x30] sm:$0xff] %v240_v10  ;;  %264 = vst [vmem:[%s527_s4 + $0x70] sm:$0xff] %v248_v11  ;;  %v241_v21 = vadd.f32 %v233_v8, %v217_v12  ;;  %v249_v22 = vadd.f32 %v233_v8, %v225_v13 }
 0x103   :  { %254 = vst [vmem:[%s527_s4 + $0x20] sm:$0xff] %v238_v17  ;;  %262 = vst [vmem:[%s527_s4 + $0x60] sm:$0xff] %v246_v18  ;;  %v239_v23 = vadd.f32 %v231_v15, %v215_v19  ;;  %v247_v24 = vadd.f32 %v231_v15, %v223_v20 }
 0x104   :  { %257 = vst [vmem:[%s527_s4 + $0x38] sm:$0xff] %v241_v21  ;;  %265 = vst [vmem:[%s527_s4 + $0x78] sm:$0xff] %v249_v22 }
 0x105   :  { %255 = vst [vmem:[%s527_s4 + $0x28] sm:$0xff] %v239_v23  ;;  %263 = vst [vmem:[%s527_s4 + $0x68] sm:$0xff] %v247_v24 }

// kernel: vit_forward.5
= control target key start
LH: loop header
LB: loop body
LE: loop exit
PB: predicated region body
PF: predicated region fallthrough
CT: control target
= control target key end

     0   :  { %12 = vsyncpa [#allocation3], 0  ;;  %s2094_s0 = inlined_call_operand.vmem [shape: f32[2,256], index: 0, kind: input, shape index: {}]   ;;  %s2095_s1 = inlined_call_operand.hbm [shape: bf16[256,128], index: 1, kind: input, shape index: {}]   ;;  %s2096_s2 = inlined_call_operand.vmem [shape: f32[1,128], index: 2, kind: input, shape index: {}]   ;;  %s2097_s3 = inlined_call_operand.vmem [shape: bf16[128,128], index: 3, kind: input, shape index: {}]   ;;  %s2098_s4 = inlined_call_operand.vmem [shape: f32[1,128], index: 4, kind: input, shape index: {}]   ;;  %s2099_s5 = inlined_call_operand.hbm [shape: bf16[128,1792], index: 5, kind: input, shape index: {}]   ;;  %s2100_s6 = inlined_call_operand.vmem [shape: f32[1,1792], index: 6, kind: input, shape index: {}]   ;;  %s2101_s7 = inlined_call_operand.vmem [shape: f32[2,1792], index: 7, kind: output, shape index: {}]  }
   0x1   :  { %13 = vsyncpa [#allocation5], 0  ;;  %s1942_s24 = smov [#allocation2]   ;;  %s1894_s28 = scalar_lea.hbm %s2095_s1, 2048 }
   0x2   :  { %s21_s25 = sshll.u32 %s1942_s24, 4  ;;  %p1895_p0 = scmp.ne.s32.totalorder %s2095_s1, %s1894_s28  ;;  %s22_s25 = int_to_ptr.vmem [resolvable:$true] %s21_s25 }
   0x3   :  { %p1898_p1 = scmp.lt.u32.totalorder %s1894_s28, %s2095_s1 }
   0x5   :  { %p1900_p2 = pnand %p1898_p1, %p1895_p0 }
   0x7   :  { %1903 = shalt.err (!%p1900_p2)
}
   0x8   :  { %s1904_s10 = scalar_lea.vmem %s22_s25, 2048  ;;  %p1909_p4 = scmp.lt.s32.totalorder %s22_s25, %s22_s25 }
   0x9   :  { %p1905_p3 = scmp.ne.s32.totalorder %s22_s25, %s1904_s10  ;;  %p1910_p5 = scmp.lt.s32.totalorder %s1904_s10, %s1904_s10 }
   0xb   :  { %p1911_p6 = por %p1910_p5, %p1909_p4 }
   0xd   :  { %p1912_p7 = pnand %p1911_p6, %p1905_p3 }
   0xf   :  { %1915 = shalt.err (!%p1912_p7)
}
  0x10   :  { %s1943_s11 = smov 64   ;;  %s1944_s12 = smov 4  }
  0x11   :  { %27 = dma.hbm_to_vmem [thread:$0]  %s2095_s1, 2048, %s22_s25, [#allocation3], %s1943_s11, %s1943_s11, %s1944_s12  }
  0x12   :  { %s1945_s15 = smov [#allocation4]   ;;  %s1916_s19 = scalar_lea.hbm %s2099_s5, 14336 }
  0x13   :  { %s39_s16 = sshll.u32 %s1945_s15, 4  ;;  %p1917_p8 = scmp.ne.s32.totalorder %s2099_s5, %s1916_s19  ;;  %s40_s16 = int_to_ptr.vmem [resolvable:$true] %s39_s16 }
  0x14   :  { %p1920_p9 = scmp.lt.u32.totalorder %s1916_s19, %s2099_s5 }
  0x16   :  { %p1922_p10 = pnand %p1920_p9, %p1917_p8 }
  0x18   :  { %1925 = shalt.err (!%p1922_p10)
}
  0x19   :  { %s1926_s24 = scalar_lea.vmem %s40_s16, 14336  ;;  %p1931_p12 = scmp.lt.s32.totalorder %s40_s16, %s40_s16 }
  0x1a   :  { %p1927_p11 = scmp.ne.s32.totalorder %s40_s16, %s1926_s24  ;;  %p1932_p13 = scmp.lt.s32.totalorder %s1926_s24, %s1926_s24 }
  0x1c   :  { %p1933_p0 = por %p1932_p13, %p1931_p12 }
  0x1e   :  { %p1934_p1 = pnand %p1933_p0, %p1927_p11 }
  0x20   :  { %1937 = shalt.err (!%p1934_p1)
}
  0x21   :  { %s1946_s1 = smov 896   ;;  %s1947_s25 = smov 56  }
  0x22   :  { %45 = dma.hbm_to_vmem [thread:$0]  %s2099_s5, 14336, %s40_s16, [#allocation5], %s1946_s1, %s1946_s1, %s1947_s25  }
  0x23   :  { %1938 = dma.done.wait [#allocation3], 2048  }
  0x24   :  { %1939 = vsyncadd [#allocation3], 4294965248 }
  0x25   :  { %1940 = dma.done.wait [#allocation5], 14336  }
  0x26   :  { %1941 = vsyncadd [#allocation5], 4294952960  ;;  %v1694_v0 = vld [vmem:[#allocation2 + $0x40] sm:$0xff]   ;;  %v1696_v2 = vld [vmem:[#allocation2 + $0x48] sm:$0xff]   ;;  %v1948_v21 = vmov 0.0   ;;  %vm1949_vm0 = vmmov 0  }
  0x27   :  { %v1695_v1 = vld [vmem:[#allocation2] sm:$0xff]   ;;  %1633 = vmatprep.subr.bf16.mxu0 %v1694_v0  ;;  %v1697_v3 = vld [vmem:[#allocation2 + $0x8] sm:$0xff]   ;;  %v1698_v4 = vld [vmem:[#allocation2 + $0x50] sm:$0xff]   ;;  %1664 = vmatprep.subr.bf16.mxu1 %v1948_v21 }
  0x28   :  { %1634 = vmatpush3.bf16.msra.mxu0 %v1695_v1  ;;  %v1699_v5 = vld [vmem:[#allocation2 + $0x10] sm:$0xff]   ;;  %v1700_v6 = vld [vmem:[#allocation2 + $0x58] sm:$0xff]   ;;  %v1702_v8 = vld [vmem:[#allocation2 + $0x60] sm:$0xff]   ;;  %1680 = vmatprep.mubr.msk.bf16.mxu1 %vm1949_vm0, %v1948_v21 }
  0x29   :  { %1635 = vmatprep.subr.bf16.mxu0 %v1696_v2  ;;  %v1701_v7 = vld [vmem:[#allocation2 + $0x18] sm:$0xff]   ;;  %v1703_v9 = vld [vmem:[#allocation2 + $0x20] sm:$0xff]   ;;  %v1704_v10 = vld [vmem:[#allocation2 + $0x68] sm:$0xff]  }
  0x2a   :  { %v1491_v11 = vld.sshfl [vmem:[%s2094_s0] sm:$0x33 pattern:$0x76325410]  ;;  %v1705_v12 = vld [vmem:[#allocation2 + $0x28] sm:$0xff]   ;;  %v1706_v14 = vld [vmem:[#allocation2 + $0x70] sm:$0xff]  }
  0x2b   :  { %v64_v13 = vcombine.high %v1491_v11, %v1491_v11  ;;  %v1707_v16 = vld [vmem:[#allocation2 + $0x30] sm:$0xff]   ;;  %v1708_v17 = vld [vmem:[#allocation2 + $0x78] sm:$0xff]   ;;  %v67_v19 = vpack.c.bf16 %v1491_v11, %v1491_v11  ;;  %v1710_v20 = vld [vmem:[%s2097_s3] sm:$0xff]  }
  0x2c   :  { %1636 = vmatpush3.bf16.msra.mxu0 %v1697_v3  ;;  %v1709_v18 = vld [vmem:[#allocation2 + $0x38] sm:$0xff]   ;;  %1665 = vmatpush3.bf16.msra.mxu1 %v1710_v20  ;;  %v1711_v22 = vld [vmem:[%s2097_s3 + $0x8] sm:$0xff]   ;;  %v1712_v23 = vld [vmem:[%s2097_s3 + $0x10] sm:$0xff]  }
  0x2d   :  { %1637 = vmatprep.subr.bf16.mxu0 %v1698_v4  ;;  %v68_v15 = vpack.c.bf16 %v64_v13, %v64_v13  ;;  %1666 = vmatprep.subr.bf16.mxu1 %v1948_v21  ;;  %v1713_v24 = vld [vmem:[%s2097_s3 + $0x18] sm:$0xff]   ;;  %v1714_v25 = vld [vmem:[%s2097_s3 + $0x20] sm:$0xff]   ;;  %v1715_v26 = vld [vmem:[%s2097_s3 + $0x28] sm:$0xff]  }
  0x2e   :  { %v1716_v27 = vld [vmem:[%s2097_s3 + $0x30] sm:$0xff]   ;;  %v1717_v28 = vld [vmem:[%s2097_s3 + $0x38] sm:$0xff]   ;;  %v1492_v30 = vld [vmem:[%s2096_s2] ss:$0 sm:$0xff] }
  0x2f   :  { %236 = vmatprep.mubr.bf16.mxu0 %v68_v15  ;;  %v1720_v42 = vld [vmem:[#allocation4 + $0x4] ss:$56 sps:$4 sm:$0xff]   ;;  %v1718_v44 = vld [vmem:[#allocation4] ss:$56 sps:$4 sm:$0xff]   ;;  %v1726_v46 = vld [vmem:[#allocation4 + $0x74] ss:$56 sps:$4 sm:$0xff]  }
  0x30   :  { %1638 = vmatpush3.bf16.msra.mxu0 %v1699_v5  ;;  %1667 = vmatpush3.bf16.msra.mxu1 %v1711_v22  ;;  %v1723_v43 = vld [vmem:[#allocation4 + $0xc] ss:$56 sps:$4 sm:$0xff]   ;;  %v1721_v45 = vld [vmem:[#allocation4 + $0x8] ss:$56 sps:$4 sm:$0xff]   ;;  %v1729_v47 = vld [vmem:[#allocation4 + $0x7c] ss:$56 sps:$4 sm:$0xff]  }
  0x31   :  { %1639 = vmatprep.subr.bf16.mxu0 %v1700_v6  ;;  %1668 = vmatprep.subr.bf16.mxu1 %v1948_v21  ;;  %v1724_v48 = vld [vmem:[#allocation4 + $0x70] ss:$56 sps:$4 sm:$0xff]   ;;  %v1732_v50 = vld [vmem:[#allocation4 + $0xe4] ss:$56 sps:$4 sm:$0xff]   ;;  %v1730_v52 = vld [vmem:[#allocation4 + $0xe0] ss:$56 sps:$4 sm:$0xff]  }
  0x32   :  { %v1727_v49 = vld [vmem:[#allocation4 + $0x78] ss:$56 sps:$4 sm:$0xff]   ;;  %v1735_v51 = vld [vmem:[#allocation4 + $0xec] ss:$56 sps:$4 sm:$0xff]   ;;  %v1733_v53 = vld [vmem:[#allocation4 + $0xe8] ss:$56 sps:$4 sm:$0xff]  }
  0x33   :  { %v1738_v54 = vld [vmem:[#allocation4 + $0x154] ss:$56 sps:$4 sm:$0xff]   ;;  %v1736_v56 = vld [vmem:[#allocation4 + $0x150] ss:$56 sps:$4 sm:$0xff]   ;;  %v1744_v58 = vld [vmem:[#allocation4 + $0x1c4] ss:$56 sps:$4 sm:$0xff]  }
  0x34   :  { %1640 = vmatpush3.bf16.msra.mxu0 %v1701_v7  ;;  %1669 = vmatpush3.bf16.msra.mxu1 %v1712_v23  ;;  %v1741_v55 = vld [vmem:[#allocation4 + $0x15c] ss:$56 sps:$4 sm:$0xff]   ;;  %v1739_v57 = vld [vmem:[#allocation4 + $0x158] ss:$56 sps:$4 sm:$0xff]   ;;  %v1747_v59 = vld [vmem:[#allocation4 + $0x1cc] ss:$56 sps:$4 sm:$0xff]  }
  0x35   :  { %1641 = vmatprep.subr.bf16.mxu0 %v1702_v8  ;;  %1670 = vmatprep.subr.bf16.mxu1 %v1948_v21  ;;  %v1742_v60 = vld [vmem:[#allocation4 + $0x1c0] ss:$56 sps:$4 sm:$0xff]   ;;  %v1750_v62 = vld [vmem:[#allocation4 + $0x234] ss:$56 sps:$4 sm:$0xff]   ;;  %v1748_v0 = vld [vmem:[#allocation4 + $0x230] ss:$56 sps:$4 sm:$0xff]  }
  0x36   :  { %v1745_v61 = vld [vmem:[#allocation4 + $0x1c8] ss:$56 sps:$4 sm:$0xff]   ;;  %v1753_v63 = vld [vmem:[#allocation4 + $0x23c] ss:$56 sps:$4 sm:$0xff]   ;;  %v1751_v1 = vld [vmem:[#allocation4 + $0x238] ss:$56 sps:$4 sm:$0xff]  }
  0x37   :  { %v1756_v2 = vld [vmem:[#allocation4 + $0x2a4] ss:$56 sps:$4 sm:$0xff]   ;;  %v1754_v4 = vld [vmem:[#allocation4 + $0x2a0] ss:$56 sps:$4 sm:$0xff]   ;;  %v1762_v6 = vld [vmem:[#allocation4 + $0x314] ss:$56 sps:$4 sm:$0xff]  }
  0x38   :  { %1642 = vmatpush3.bf16.msra.mxu0 %v1703_v9  ;;  %1671 = vmatpush3.bf16.msra.mxu1 %v1713_v24  ;;  %v1759_v3 = vld [vmem:[#allocation4 + $0x2ac] ss:$56 sps:$4 sm:$0xff]   ;;  %v1757_v5 = vld [vmem:[#allocation4 + $0x2a8] ss:$56 sps:$4 sm:$0xff]   ;;  %v1765_v7 = vld [vmem:[#allocation4 + $0x31c] ss:$56 sps:$4 sm:$0xff]  }
  0x39   :  { %1643 = vmatprep.subr.bf16.mxu0 %v1704_v10  ;;  %1672 = vmatprep.subr.bf16.mxu1 %v1948_v21  ;;  %v1760_v8 = vld [vmem:[#allocation4 + $0x310] ss:$56 sps:$4 sm:$0xff]   ;;  %v1768_v10 = vld [vmem:[#allocation4 + $0x14] ss:$56 sps:$4 sm:$0xff]   ;;  %v1510_v13 = vld [vmem:[%s2098_s4] ss:$0 sm:$0xff] }
  0x3a   :  { %v1763_v9 = vld [vmem:[#allocation4 + $0x318] ss:$56 sps:$4 sm:$0xff]   ;;  %v1771_v11 = vld [vmem:[#allocation4 + $0x1c] ss:$56 sps:$4 sm:$0xff]  }
  0x3b   :  { %v1766_v24 = vld [vmem:[#allocation4 + $0x10] ss:$56 sps:$4 sm:$0xff]  }
  0x3c   :  { %1644 = vmatpush3.bf16.msra.mxu0 %v1705_v12  ;;  %1673 = vmatpush3.bf16.msra.mxu1 %v1714_v25  ;;  %v1950_v12 = vmov 0   ;;  %v1769_v25 = vld [vmem:[#allocation4 + $0x18] ss:$56 sps:$4 sm:$0xff]  }
  0x3d   :  { %1645 = vmatprep.subr.bf16.mxu0 %v1706_v14  ;;  %1674 = vmatprep.subr.bf16.mxu1 %v1948_v21 }
  0x40   :  { %1646 = vmatpush3.bf16.msra.mxu0 %v1707_v16  ;;  %1675 = vmatpush3.bf16.msra.mxu1 %v1715_v26 }
  0x41   :  { %1647 = vmatprep.subr.bf16.mxu0 %v1708_v17  ;;  %1676 = vmatprep.subr.bf16.mxu1 %v1948_v21 }
  0x44   :  { %1648 = vmatpush3.bf16.msra.mxu0 %v1709_v18  ;;  %1677 = vmatpush3.bf16.msra.mxu1 %v1716_v27  ;;  %v1774_v27 = vld [vmem:[#allocation4 + $0x84] ss:$56 sps:$4 sm:$0xff]  }
  0x45   :  { %1678 = vmatprep.subr.bf16.mxu1 %v1948_v21  ;;  %1117 = vmatprep.subr.bf16.mxu0 %v1720_v42  ;;  %v1793_v42 = vld [vmem:[#allocation4 + $0x1d8] ss:$56 sps:$4 sm:$0xff]  }
  0x47   :  { %237 = vmatmul.mubr.bf16.vlgmr.msra.gmra.mrb[0].mxu0 %v67_v19 }
  0x48   :  { %1679 = vmatpush3.bf16.msra.mxu1 %v1717_v28  ;;  %1118 = vmatpush1.bf16.msra.mxu0 %v1718_v44  ;;  %v1777_v28 = vld [vmem:[#allocation4 + $0x8c] ss:$56 sps:$4 sm:$0xff]  }
  0x49   :  { %1158 = vmatprep.subr.bf16.mxu1 %v1723_v43  ;;  %1119 = vmatprep.subr.bf16.mxu0 %v1726_v46  ;;  %v1798_v43 = vld [vmem:[#allocation4 + $0x244] ss:$56 sps:$4 sm:$0xff]   ;;  %v1799_v46 = vld [vmem:[#allocation4 + $0x248] ss:$56 sps:$4 sm:$0xff]  }
  0x4a   :  { %1149 = vmatprep.mubr.bf16.mxu0 %v1950_v12  ;;  %v1801_v44 = vld [vmem:[#allocation4 + $0x24c] ss:$56 sps:$4 sm:$0xff]  }
  0x4c   :  { %1120 = vmatpush1.bf16.msra.mxu0 %v1724_v48  ;;  %v1807_v48 = vld [vmem:[#allocation4 + $0x2bc] ss:$56 sps:$4 sm:$0xff]  }
  0x4d   :  { %1121 = vmatprep.subr.bf16.mxu0 %v1732_v50  ;;  %v1805_v50 = vld [vmem:[#allocation4 + $0x2b8] ss:$56 sps:$4 sm:$0xff]  }
  0x50   :  { %1122 = vmatpush1.bf16.msra.mxu0 %v1730_v52  ;;  %v1813_v52 = vld [vmem:[#allocation4 + $0x32c] ss:$56 sps:$4 sm:$0xff]  }
  0x51   :  { %1123 = vmatprep.subr.bf16.mxu0 %v1738_v54  ;;  %v1811_v54 = vld [vmem:[#allocation4 + $0x328] ss:$56 sps:$4 sm:$0xff]  }
  0x54   :  { %1124 = vmatpush1.bf16.msra.mxu0 %v1736_v56  ;;  %v1819_v56 = vld [vmem:[#allocation4 + $0x2c] ss:$56 sps:$4 sm:$0xff]  }
  0x55   :  { %1125 = vmatprep.subr.bf16.mxu0 %v1744_v58  ;;  %v1817_v58 = vld [vmem:[#allocation4 + $0x28] ss:$56 sps:$4 sm:$0xff]  }
  0x58   :  { %1126 = vmatpush1.bf16.msra.mxu0 %v1742_v60  ;;  %v1825_v60 = vld [vmem:[#allocation4 + $0x9c] ss:$56 sps:$4 sm:$0xff]  }
  0x59   :  { %1127 = vmatprep.subr.bf16.mxu0 %v1750_v62  ;;  %v1823_v62 = vld [vmem:[#allocation4 + $0x98] ss:$56 sps:$4 sm:$0xff]  }
  0x5c   :  { %1128 = vmatpush1.bf16.msra.mxu0 %v1748_v0  ;;  %v1831_v0 = vld [vmem:[#allocation4 + $0x10c] ss:$56 sps:$4 sm:$0xff]  }
  0x5d   :  { %1129 = vmatprep.subr.bf16.mxu0 %v1756_v2  ;;  %v1829_v2 = vld [vmem:[#allocation4 + $0x108] ss:$56 sps:$4 sm:$0xff]  }
  0x60   :  { %1130 = vmatpush1.bf16.msra.mxu0 %v1754_v4  ;;  %v1837_v4 = vld [vmem:[#allocation4 + $0x17c] ss:$56 sps:$4 sm:$0xff]  }
  0x61   :  { %1131 = vmatprep.subr.bf16.mxu0 %v1762_v6  ;;  %v1835_v6 = vld [vmem:[#allocation4 + $0x178] ss:$56 sps:$4 sm:$0xff]  }
  0x64   :  { %1132 = vmatpush1.bf16.msra.mxu0 %v1760_v8  ;;  %v1843_v8 = vld [vmem:[#allocation4 + $0x1ec] ss:$56 sps:$4 sm:$0xff]  }
  0x65   :  { %1199 = vmatprep.subr.bf16.mxu0 %v1768_v10  ;;  %v1841_v10 = vld [vmem:[#allocation4 + $0x1e8] ss:$56 sps:$4 sm:$0xff]  }
 0x11a   :  { %v1649_v29 = vpop.f32.mrb[0].mxu0 }
 0x11b   :  { %v1650_v31 = vpop.f32.mrb[1].mxu0 }
 0x11c   :  { %v1651_v32 = vadd.f32 %v1650_v31, %v1649_v29  ;;  %v1652_v33 = vpop.f32.mrb[2].mxu0  ;;  %v1772_v29 = vld [vmem:[#allocation4 + $0x80] ss:$56 sps:$4 sm:$0xff]   ;;  %v1780_v31 = vld [vmem:[#allocation4 + $0xf4] ss:$56 sps:$4 sm:$0xff]  }
 0x11d   :  { %v1653_v34 = vpop.f32.mrb[3].mxu0  ;;  %v1778_v33 = vld [vmem:[#allocation4 + $0xf0] ss:$56 sps:$4 sm:$0xff]  }
 0x11e   :  { %v239_v35 = vadd.f32 %v1651_v32, %v1492_v30  ;;  %v1775_v30 = vld [vmem:[#allocation4 + $0x88] ss:$56 sps:$4 sm:$0xff]   ;;  %v1783_v32 = vld [vmem:[#allocation4 + $0xfc] ss:$56 sps:$4 sm:$0xff]   ;;  %v1781_v34 = vld [vmem:[#allocation4 + $0xf8] ss:$56 sps:$4 sm:$0xff]  }
 0x120   :  { %v1509_v36 = vmul.f32 -1.442695, %v239_v35 }
 0x122   :  { %1886 = vpow2.f32 %v1509_v36  ;;  %v1789_v36 = vld [vmem:[#allocation4 + $0x16c] ss:$56 sps:$4 sm:$0xff]  }
 0x12c   :  { %v1887_v37 = vpop.eup %1886 }
 0x12d   :  { %v247_v38 = vadd.f32 1.0, %v1887_v37  ;;  %v1784_v37 = vld [vmem:[#allocation4 + $0x160] ss:$56 sps:$4 sm:$0xff]  }
 0x12f   :  { %1888 = vrcp.f32 %v247_v38  ;;  %v1787_v38 = vld [vmem:[#allocation4 + $0x168] ss:$56 sps:$4 sm:$0xff]  }
 0x139   :  { %v1889_v39 = vpop.eup %1888 }
 0x13a   :  { %v250_v40 = vmul.f32 %v1889_v39, %v239_v35  ;;  %v1786_v35 = vld [vmem:[#allocation4 + $0x164] ss:$56 sps:$4 sm:$0xff]   ;;  %v1792_v39 = vld [vmem:[#allocation4 + $0x1d4] ss:$56 sps:$4 sm:$0xff]  }
 0x13c   :  { %v251_v41 = vpack.c.bf16 %v250_v40, %v250_v40  ;;  %v1795_v40 = vld [vmem:[#allocation4 + $0x1dc] ss:$56 sps:$4 sm:$0xff]  }
 0x13e   :  { %1681 = vmatmul.mubr.bf16.vlgmr.msra.gmra.mrb[0].mxu1 %v251_v41  ;;  %v1790_v41 = vld [vmem:[#allocation4 + $0x1d0] ss:$56 sps:$4 sm:$0xff]  }
 0x13f   :  { %1159 = vmatpush1.bf16.msra.mxu1 %v1721_v45  ;;  %1190 = vmatprep.mubr.bf16.mxu1 %v1950_v12  ;;  %v1796_v45 = vld [vmem:[#allocation4 + $0x240] ss:$56 sps:$4 sm:$0xff]  }
 0x140   :  { %1160 = vmatprep.subr.bf16.mxu1 %v1729_v47  ;;  %v1804_v47 = vld [vmem:[#allocation4 + $0x2b4] ss:$56 sps:$4 sm:$0xff]  }
 0x143   :  { %1161 = vmatpush1.bf16.msra.mxu1 %v1727_v49  ;;  %v1802_v49 = vld [vmem:[#allocation4 + $0x2b0] ss:$56 sps:$4 sm:$0xff]  }
 0x144   :  { %1162 = vmatprep.subr.bf16.mxu1 %v1735_v51  ;;  %v1810_v51 = vld [vmem:[#allocation4 + $0x324] ss:$56 sps:$4 sm:$0xff]  }
 0x147   :  { %1163 = vmatpush1.bf16.msra.mxu1 %v1733_v53  ;;  %v1808_v53 = vld [vmem:[#allocation4 + $0x320] ss:$56 sps:$4 sm:$0xff]  }
 0x148   :  { %1164 = vmatprep.subr.bf16.mxu1 %v1741_v55  ;;  %v1816_v55 = vld [vmem:[#allocation4 + $0x24] ss:$56 sps:$4 sm:$0xff]  }
 0x14b   :  { %1165 = vmatpush1.bf16.msra.mxu1 %v1739_v57  ;;  %v1814_v57 = vld [vmem:[#allocation4 + $0x20] ss:$56 sps:$4 sm:$0xff]  }
 0x14c   :  { %1166 = vmatprep.subr.bf16.mxu1 %v1747_v59  ;;  %v1822_v59 = vld [vmem:[#allocation4 + $0x94] ss:$56 sps:$4 sm:$0xff]  }
 0x14f   :  { %1167 = vmatpush1.bf16.msra.mxu1 %v1745_v61  ;;  %v1820_v61 = vld [vmem:[#allocation4 + $0x90] ss:$56 sps:$4 sm:$0xff]  }
 0x150   :  { %1168 = vmatprep.subr.bf16.mxu1 %v1753_v63  ;;  %v1828_v63 = vld [vmem:[#allocation4 + $0x104] ss:$56 sps:$4 sm:$0xff]  }
 0x153   :  { %1169 = vmatpush1.bf16.msra.mxu1 %v1751_v1  ;;  %v1826_v1 = vld [vmem:[#allocation4 + $0x100] ss:$56 sps:$4 sm:$0xff]  }
 0x154   :  { %1170 = vmatprep.subr.bf16.mxu1 %v1759_v3  ;;  %v1834_v3 = vld [vmem:[#allocation4 + $0x174] ss:$56 sps:$4 sm:$0xff]  }
 0x157   :  { %1171 = vmatpush1.bf16.msra.mxu1 %v1757_v5  ;;  %v1832_v5 = vld [vmem:[#allocation4 + $0x170] ss:$56 sps:$4 sm:$0xff]  }
 0x158   :  { %1172 = vmatprep.subr.bf16.mxu1 %v1765_v7  ;;  %v1840_v7 = vld [vmem:[#allocation4 + $0x1e4] ss:$56 sps:$4 sm:$0xff]  }
 0x15b   :  { %1173 = vmatpush1.bf16.msra.mxu1 %v1763_v9  ;;  %v1838_v9 = vld [vmem:[#allocation4 + $0x1e0] ss:$56 sps:$4 sm:$0xff]  }
 0x15c   :  { %1240 = vmatprep.subr.bf16.mxu1 %v1771_v11  ;;  %v1846_v11 = vld [vmem:[#allocation4 + $0x254] ss:$56 sps:$4 sm:$0xff]  }
 0x211   :  { %v357_v14 = vpop.f32.mrb[0].mxu1 }
 0x212   :  { %v358_v15 = vadd.f32 %v1510_v13, %v357_v14  ;;  %v1682_v16 = vpop.f32.mrb[1].mxu1  ;;  %v1849_v13 = vld [vmem:[#allocation4 + $0x25c] ss:$56 sps:$4 sm:$0xff]   ;;  %v1844_v14 = vld [vmem:[#allocation4 + $0x250] ss:$56 sps:$4 sm:$0xff]  }
 0x213   :  { %v360_v17 = vpop.f32.mrb[2].mxu1  ;;  %v1852_v16 = vld [vmem:[#allocation4 + $0x2c4] ss:$56 sps:$4 sm:$0xff]  }
 0x214   :  { %v1519_v18 = vmul.f32 -1.442695, %v358_v15  ;;  %v1683_v19 = vpop.f32.mrb[3].mxu1  ;;  %v1855_v17 = vld [vmem:[#allocation4 + $0x2cc] ss:$56 sps:$4 sm:$0xff]  }
 0x215   :  { %v1853_v19 = vld [vmem:[#allocation4 + $0x2c8] ss:$56 sps:$4 sm:$0xff]  }
 0x216   :  { %1890 = vpow2.f32 %v1519_v18  ;;  %v1850_v18 = vld [vmem:[#allocation4 + $0x2c0] ss:$56 sps:$4 sm:$0xff]  }
 0x220   :  { %v1891_v20 = vpop.eup %1890 }
 0x221   :  { %v366_v21 = vadd.f32 1.0, %v1891_v20  ;;  %v1858_v20 = vld [vmem:[#allocation4 + $0x334] ss:$56 sps:$4 sm:$0xff]  }
 0x223   :  { %1892 = vrcp.f32 %v366_v21  ;;  %v1861_v21 = vld [vmem:[#allocation4 + $0x33c] ss:$56 sps:$4 sm:$0xff]  }
 0x22d   :  { %v1893_v22 = vpop.eup %1892 }
 0x22e   :  { %v369_v23 = vmul.f32 %v1893_v22, %v358_v15  ;;  %v1847_v15 = vld [vmem:[#allocation4 + $0x258] ss:$56 sps:$4 sm:$0xff]  }
 0x22f   :  { %v1856_v22 = vld [vmem:[#allocation4 + $0x330] ss:$56 sps:$4 sm:$0xff]  }
 0x230   :  { %v2051_v26 = vpack.c.bf16 %v369_v23, %v369_v23  ;;  %v1859_v23 = vld [vmem:[#allocation4 + $0x338] ss:$56 sps:$4 sm:$0xff]  }
 0x232   :  { %1150 = vmatmul.mubr.bf16.vlgmr.msra.gmra.mrb[4].mxu0 %v2051_v26  ;;  %1191 = vmatmul.mubr.bf16.vlgmr.msra.gmra.mrb[4].mxu1 %v2051_v26 }
 0x233   :  { %1200 = vmatpush1.bf16.msra.mxu0 %v1766_v24  ;;  %1241 = vmatpush1.bf16.msra.mxu1 %v1769_v25  ;;  %v1864_v24 = vld [vmem:[#allocation4 + $0x34] ss:$56 sps:$4 sm:$0xff]   ;;  %v1862_v25 = vld [vmem:[#allocation4 + $0x30] ss:$56 sps:$4 sm:$0xff]  }
 0x234   :  { %1201 = vmatprep.subr.bf16.mxu0 %v1774_v27  ;;  %1242 = vmatprep.subr.bf16.mxu1 %v1777_v28  ;;  %v1867_v27 = vld [vmem:[#allocation4 + $0xa4] ss:$56 sps:$4 sm:$0xff]   ;;  %v1865_v28 = vld [vmem:[#allocation4 + $0xa0] ss:$56 sps:$4 sm:$0xff]  }
 0x235   :  { %1231 = vmatprep.mubr.bf16.mxu0 %v1950_v12  ;;  %1272 = vmatprep.mubr.bf16.mxu1 %v1950_v12 }
 0x237   :  { %1202 = vmatpush1.bf16.msra.mxu0 %v1772_v29  ;;  %1243 = vmatpush1.bf16.msra.mxu1 %v1775_v30  ;;  %v1870_v29 = vld [vmem:[#allocation4 + $0x114] ss:$56 sps:$4 sm:$0xff]   ;;  %v1868_v30 = vld [vmem:[#allocation4 + $0x110] ss:$56 sps:$4 sm:$0xff]  }
 0x238   :  { %1203 = vmatprep.subr.bf16.mxu0 %v1780_v31  ;;  %1244 = vmatprep.subr.bf16.mxu1 %v1783_v32  ;;  %v1873_v31 = vld [vmem:[#allocation4 + $0x184] ss:$56 sps:$4 sm:$0xff]   ;;  %v1871_v32 = vld [vmem:[#allocation4 + $0x180] ss:$56 sps:$4 sm:$0xff]  }
 0x23b   :  { %1204 = vmatpush1.bf16.msra.mxu0 %v1778_v33  ;;  %1245 = vmatpush1.bf16.msra.mxu1 %v1781_v34  ;;  %v1876_v33 = vld [vmem:[#allocation4 + $0x1f4] ss:$56 sps:$4 sm:$0xff]   ;;  %v1874_v34 = vld [vmem:[#allocation4 + $0x1f0] ss:$56 sps:$4 sm:$0xff]  }
 0x23c   :  { %1205 = vmatprep.subr.bf16.mxu0 %v1786_v35  ;;  %1246 = vmatprep.subr.bf16.mxu1 %v1789_v36  ;;  %v1879_v35 = vld [vmem:[#allocation4 + $0x264] ss:$56 sps:$4 sm:$0xff]   ;;  %v1877_v36 = vld [vmem:[#allocation4 + $0x260] ss:$56 sps:$4 sm:$0xff]  }
 0x23f   :  { %1206 = vmatpush1.bf16.msra.mxu0 %v1784_v37  ;;  %1247 = vmatpush1.bf16.msra.mxu1 %v1787_v38  ;;  %v1882_v37 = vld [vmem:[#allocation4 + $0x2d4] ss:$56 sps:$4 sm:$0xff]   ;;  %v1885_v38 = vld [vmem:[#allocation4 + $0x344] ss:$56 sps:$4 sm:$0xff]  }
 0x240   :  { %1207 = vmatprep.subr.bf16.mxu0 %v1792_v39  ;;  %1248 = vmatprep.subr.bf16.mxu1 %v1795_v40  ;;  %v1883_v39 = vld [vmem:[#allocation4 + $0x340] ss:$56 sps:$4 sm:$0xff]   ;;  %v487_v40 = vlaneseq }
 0x243   :  { %1208 = vmatpush1.bf16.msra.mxu0 %v1790_v41  ;;  %1249 = vmatpush1.bf16.msra.mxu1 %v1793_v42  ;;  %v2065_v41 = vshrl.u32 %v487_v40, 7 }
 0x244   :  { %1209 = vmatprep.subr.bf16.mxu0 %v1798_v43  ;;  %1250 = vmatprep.subr.bf16.mxu1 %v1801_v44  ;;  %v483_v44 = vld [vmem:[%s2100_s6] sm:$0xff] }
 0x245   :  { %v489_v42 = vsub.s32 0, %v2065_v41  ;;  %v497_v43 = vsub.s32 2, %v2065_v41 }
 0x247   :  { %1210 = vmatpush1.bf16.msra.mxu0 %v1796_v45  ;;  %1251 = vmatpush1.bf16.msra.mxu1 %v1799_v46  ;;  %v493_v45 = vsub.s32 1, %v2065_v41  ;;  %v1951_v46 = vmov 1983009808  }
 0x248   :  { %1211 = vmatprep.subr.bf16.mxu0 %v1804_v47  ;;  %1252 = vmatprep.subr.bf16.mxu1 %v1807_v48  ;;  %v1421_v47 = vunpack.c.l.s4 %v1951_v46  ;;  %v501_v48 = vsub.s32 3, %v2065_v41 }
 0x24b   :  { %1212 = vmatpush1.bf16.msra.mxu0 %v1802_v49  ;;  %1253 = vmatpush1.bf16.msra.mxu1 %v1805_v50  ;;  %v490_v49 = vrot.slane %v483_v44, %v489_v42  ;;  %v498_v50 = vrot.slane %v483_v44, %v497_v43 }
 0x24c   :  { %1213 = vmatprep.subr.bf16.mxu0 %v1810_v51  ;;  %1254 = vmatprep.subr.bf16.mxu1 %v1813_v52  ;;  %v1422_v51 = vunpack.c.0.s8 %v1421_v47  ;;  %v502_v52 = vrot.slane %v483_v44, %v501_v48 }
 0x24f   :  { %1214 = vmatpush1.bf16.msra.mxu0 %v1808_v53  ;;  %1255 = vmatpush1.bf16.msra.mxu1 %v1811_v54 }
 0x250   :  { %1281 = vmatprep.subr.bf16.mxu0 %v1816_v55  ;;  %1322 = vmatprep.subr.bf16.mxu1 %v1819_v56 }
 0x252   :  { %1232 = vmatmul.mubr.bf16.vlgmr.msra.gmra.mrb[8].mxu0 %v2051_v26  ;;  %1273 = vmatmul.mubr.bf16.vlgmr.msra.gmra.mrb[8].mxu1 %v2051_v26 }
 0x253   :  { %1282 = vmatpush1.bf16.msra.mxu0 %v1814_v57  ;;  %1323 = vmatpush1.bf16.msra.mxu1 %v1817_v58 }
 0x254   :  { %1283 = vmatprep.subr.bf16.mxu0 %v1822_v59  ;;  %1324 = vmatprep.subr.bf16.mxu1 %v1825_v60  ;;  %v1425_v60 = vsub.s32 %v1422_v51, %v2065_v41 }
 0x255   :  { %1313 = vmatprep.mubr.bf16.mxu0 %v1950_v12  ;;  %1354 = vmatprep.mubr.bf16.mxu1 %v1950_v12 }
 0x257   :  { %1284 = vmatpush1.bf16.msra.mxu0 %v1820_v61  ;;  %1325 = vmatpush1.bf16.msra.mxu1 %v1823_v62 }
 0x258   :  { %1285 = vmatprep.subr.bf16.mxu0 %v1828_v63  ;;  %1326 = vmatprep.subr.bf16.mxu1 %v1831_v0 }
 0x25b   :  { %1286 = vmatpush1.bf16.msra.mxu0 %v1826_v1  ;;  %1327 = vmatpush1.bf16.msra.mxu1 %v1829_v2 }
 0x25c   :  { %1287 = vmatprep.subr.bf16.mxu0 %v1834_v3  ;;  %1328 = vmatprep.subr.bf16.mxu1 %v1837_v4 }
 0x25f   :  { %1288 = vmatpush1.bf16.msra.mxu0 %v1832_v5  ;;  %1329 = vmatpush1.bf16.msra.mxu1 %v1835_v6 }
 0x260   :  { %1289 = vmatprep.subr.bf16.mxu0 %v1840_v7  ;;  %1330 = vmatprep.subr.bf16.mxu1 %v1843_v8  ;;  %v505_v7 = vsub.s32 4, %v2065_v41  ;;  %v513_v8 = vsub.s32 6, %v2065_v41 }
 0x263   :  { %1290 = vmatpush1.bf16.msra.mxu0 %v1838_v9  ;;  %1331 = vmatpush1.bf16.msra.mxu1 %v1841_v10  ;;  %v509_v9 = vsub.s32 5, %v2065_v41  ;;  %v517_v10 = vsub.s32 7, %v2065_v41 }
 0x264   :  { %1291 = vmatprep.subr.bf16.mxu0 %v1846_v11  ;;  %1332 = vmatprep.subr.bf16.mxu1 %v1849_v13  ;;  %v506_v11 = vrot.slane %v483_v44, %v505_v7  ;;  %v514_v13 = vrot.slane %v483_v44, %v513_v8 }
 0x267   :  { %1292 = vmatpush1.bf16.msra.mxu0 %v1844_v14  ;;  %1333 = vmatpush1.bf16.msra.mxu1 %v1847_v15  ;;  %v510_v14 = vrot.slane %v483_v44, %v509_v9  ;;  %v518_v15 = vrot.slane %v483_v44, %v517_v10 }
 0x268   :  { %1293 = vmatprep.subr.bf16.mxu0 %v1852_v16  ;;  %1334 = vmatprep.subr.bf16.mxu1 %v1855_v17 }
 0x26b   :  { %1294 = vmatpush1.bf16.msra.mxu0 %v1850_v18  ;;  %1335 = vmatpush1.bf16.msra.mxu1 %v1853_v19 }
 0x26c   :  { %1295 = vmatprep.subr.bf16.mxu0 %v1858_v20  ;;  %1336 = vmatprep.subr.bf16.mxu1 %v1861_v21 }
 0x26f   :  { %1296 = vmatpush1.bf16.msra.mxu0 %v1856_v22  ;;  %1337 = vmatpush1.bf16.msra.mxu1 %v1859_v23 }
 0x270   :  { %1363 = vmatprep.subr.bf16.mxu0 %v1864_v24 }
 0x272   :  { %1314 = vmatmul.mubr.bf16.vlgmr.msra.gmra.mrb[12].mxu0 %v2051_v26  ;;  %1355 = vmatmul.mubr.bf16.vlgmr.msra.gmra.mrb[12].mxu1 %v2051_v26 }
 0x273   :  { %1364 = vmatpush1.bf16.msra.mxu0 %v1862_v25  ;;  %1395 = vmatprep.mubr.bf16.mxu0 %v1950_v12  ;;  %v1880_v12 = vld [vmem:[#allocation4 + $0x2d0] ss:$56 sps:$4 sm:$0xff]  }
 0x274   :  { %1365 = vmatprep.subr.bf16.mxu0 %v1867_v27 }
 0x277   :  { %1366 = vmatpush1.bf16.msra.mxu0 %v1865_v28 }
 0x278   :  { %1367 = vmatprep.subr.bf16.mxu0 %v1870_v29 }
 0x27b   :  { %1368 = vmatpush1.bf16.msra.mxu0 %v1868_v30 }
 0x27c   :  { %1369 = vmatprep.subr.bf16.mxu0 %v1873_v31 }
 0x27f   :  { %1370 = vmatpush1.bf16.msra.mxu0 %v1871_v32 }
 0x280   :  { %1371 = vmatprep.subr.bf16.mxu0 %v1876_v33 }
 0x283   :  { %1372 = vmatpush1.bf16.msra.mxu0 %v1874_v34  ;;  %v484_v34 = vld [vmem:[%s2100_s6 + $0x8] sm:$0x3f] }
 0x284   :  { %1373 = vmatprep.subr.bf16.mxu0 %v1879_v35  ;;  %v522_v35 = vrot.slane %v484_v34, %v489_v42 }
 0x287   :  { %1374 = vmatpush1.bf16.msra.mxu0 %v1877_v36  ;;  %v530_v36 = vrot.slane %v484_v34, %v497_v43  ;;  %v538_v43 = vrot.slane %v484_v34, %v505_v7 }
 0x288   :  { %1375 = vmatprep.subr.bf16.mxu0 %v1882_v37  ;;  %v526_v37 = vrot.slane %v484_v34, %v493_v45 }
 0x28b   :  { %1376 = vmatpush1.bf16.msra.mxu0 %v1880_v12  ;;  %v534_v12 = vrot.slane %v484_v34, %v501_v48 }
 0x28c   :  { %1377 = vmatprep.subr.bf16.mxu0 %v1885_v38 }
 0x28f   :  { %1378 = vmatpush1.bf16.msra.mxu0 %v1883_v39 }
 0x292   :  { %1396 = vmatmul.mubr.bf16.vlgmr.msra.gmra.mrb[16].mxu0 %v2051_v26  ;;  %v494_v26 = vrot.slane %v483_v44, %v493_v45  ;;  %v542_v45 = vrot.slane %v484_v34, %v509_v9 }
 0x305   :  { %v1151_v53 = vpop.f32.mrb[4].mxu0  ;;  %v1192_v54 = vpop.f32.mrb[4].mxu1 }
 0x306   :  { %v1152_v55 = vadd.f32 %v1151_v53, %v490_v49  ;;  %v1193_v56 = vadd.f32 %v1192_v54, %v498_v50  ;;  %v1153_v57 = vpop.f32.mrb[5].mxu0  ;;  %v1194_v58 = vpop.f32.mrb[5].mxu1 }
 0x307   :  { %v1154_v59 = vadd.f32 %v1153_v57, %v494_v26  ;;  %v1195_v61 = vadd.f32 %v1194_v58, %v502_v52  ;;  %v1155_v62 = vpop.f32.mrb[6].mxu0  ;;  %v1196_v63 = vpop.f32.mrb[6].mxu1 }
 0x308   :  { %v1156_v0 = vpop.f32.mrb[7].mxu0  ;;  %v1197_v1 = vpop.f32.mrb[7].mxu1 }
 0x309   :  { %v1418_v2 = vcombine.low %v1152_v55, %v1154_v59  ;;  %v1419_v3 = vcombine.low %v1193_v56, %v1195_v61 }
 0x30b   :  { %v1426_v4 = vrot.slane %v1418_v2, %v1425_v60  ;;  %v1433_v5 = vrot.slane %v1419_v3, %v1425_v60 }
 0x30d   :  { %v1434_v6 = vcombine.low %v1426_v4, %v1433_v5 }
 0x30f   :  { %1481 = vst [vmem:[%s2101_s7] sm:$0xff] %v1434_v6 }
 0x325   :  { %v1233_v16 = vpop.f32.mrb[8].mxu0  ;;  %v1274_v17 = vpop.f32.mrb[8].mxu1 }
 0x326   :  { %v1234_v18 = vadd.f32 %v1233_v16, %v506_v11  ;;  %v1275_v19 = vadd.f32 %v1274_v17, %v514_v13  ;;  %v1235_v20 = vpop.f32.mrb[9].mxu0  ;;  %v1276_v21 = vpop.f32.mrb[9].mxu1 }
 0x327   :  { %v1236_v22 = vadd.f32 %v1235_v20, %v510_v14  ;;  %v1277_v23 = vadd.f32 %v1276_v21, %v518_v15  ;;  %v1237_v24 = vpop.f32.mrb[10].mxu0  ;;  %v1278_v25 = vpop.f32.mrb[10].mxu1 }
 0x328   :  { %v1238_v27 = vpop.f32.mrb[11].mxu0  ;;  %v1279_v28 = vpop.f32.mrb[11].mxu1 }
 0x329   :  { %v1435_v29 = vcombine.low %v1234_v18, %v1236_v22  ;;  %v1436_v30 = vcombine.low %v1275_v19, %v1277_v23 }
 0x32b   :  { %v1443_v31 = vrot.slane %v1435_v29, %v1425_v60  ;;  %v1450_v32 = vrot.slane %v1436_v30, %v1425_v60 }
 0x32d   :  { %v1451_v33 = vcombine.low %v1443_v31, %v1450_v32 }
 0x32f   :  { %1482 = vst [vmem:[%s2101_s7 + $0x8] sm:$0xff] %v1451_v33 }
 0x345   :  { %v1315_v38 = vpop.f32.mrb[12].mxu0  ;;  %v1356_v39 = vpop.f32.mrb[12].mxu1 }
 0x346   :  { %v1316_v40 = vadd.f32 %v1315_v38, %v522_v35  ;;  %v1357_v41 = vadd.f32 %v1356_v39, %v530_v36  ;;  %v1317_v44 = vpop.f32.mrb[13].mxu0  ;;  %v1358_v46 = vpop.f32.mrb[13].mxu1 }
 0x347   :  { %v1318_v47 = vadd.f32 %v1317_v44, %v526_v37  ;;  %v1359_v49 = vadd.f32 %v1358_v46, %v534_v12  ;;  %v1319_v50 = vpop.f32.mrb[14].mxu0  ;;  %v1360_v26 = vpop.f32.mrb[14].mxu1 }
 0x348   :  { %v1320_v51 = vpop.f32.mrb[15].mxu0  ;;  %v1361_v52 = vpop.f32.mrb[15].mxu1 }
 0x349   :  { %v1452_v53 = vcombine.low %v1316_v40, %v1318_v47  ;;  %v1453_v54 = vcombine.low %v1357_v41, %v1359_v49 }
 0x34b   :  { %v1460_v55 = vrot.slane %v1452_v53, %v1425_v60  ;;  %v1467_v56 = vrot.slane %v1453_v54, %v1425_v60 }
 0x34d   :  { %v1468_v42 = vcombine.low %v1460_v55, %v1467_v56 }
 0x34f   :  { %1483 = vst [vmem:[%s2101_s7 + $0x10] sm:$0xff] %v1468_v42 }
 0x365   :  { %v1397_v48 = vpop.f32.mrb[16].mxu0 }
 0x366   :  { %v1398_v57 = vadd.f32 %v1397_v48, %v538_v43  ;;  %v1399_v58 = vpop.f32.mrb[17].mxu0 }
 0x367   :  { %v1400_v59 = vadd.f32 %v1399_v58, %v542_v45  ;;  %v1401_v61 = vpop.f32.mrb[18].mxu0 }
 0x368   :  { %v1402_v62 = vpop.f32.mrb[19].mxu0 }
 0x369   :  { %v1469_v63 = vcombine.low %v1398_v57, %v1400_v59 }
 0x36b   :  { %1632 = vst.sshfl [vmem:[%s2101_s7 + $0x18] sm:$0x33 pattern:$0x76325410] %v1469_v63 }
 0x36c   :  { %1489 = vsyncpa [#allocation3], 1 }
 0x36d   :  { %1490 = vsyncpa [#allocation5], 1 }

// kernel: vit_forward.7
= control target key start
LH: loop header
LB: loop body
LE: loop exit
PB: predicated region body
PF: predicated region fallthrough
CT: control target
= control target key end

     0   :  { %s886_s0 = inlined_call_operand.vmem [shape: f32[2,64,128], index: 0, kind: input, shape index: {}]   ;;  %s887_s2 = inlined_call_operand.vmem [shape: bf16[128,128], index: 2, kind: input, shape index: {}]   ;;  %s888_s1 = inlined_call_operand.vmem [shape: f32[2,256], index: 1, kind: input, shape index: {}]   ;;  %s889_s3 = inlined_call_operand.vmem [shape: f32[1,128], index: 3, kind: input, shape index: {}]   ;;  %s890_s4 = inlined_call_operand.vmem [shape: f32[2,64,128], index: 4, kind: output, shape index: {}]  }
   0x1   :  { %v18_v0 = vld [vmem:[%s886_s0] sm:$0xff]  ;;  %v19_v2 = vld [vmem:[%s886_s0 + $0x8] sm:$0xff]  ;;  %v20_v4 = vld [vmem:[%s886_s0 + $0x10] sm:$0xff] }
   0x2   :  { %v26_v1 = vld [vmem:[%s886_s0 + $0x40] sm:$0xff]  ;;  %48 = vadd.xlane.f32.xlu0 %v18_v0  ;;  %v27_v3 = vld [vmem:[%s886_s0 + $0x48] sm:$0xff]  ;;  %v21_v5 = vld [vmem:[%s886_s0 + $0x18] sm:$0xff] }
   0x3   :  { %64 = vadd.xlane.f32.xlu1 %v26_v1  ;;  %v28_v6 = vld [vmem:[%s886_s0 + $0x50] sm:$0xff]  ;;  %v29_v7 = vld [vmem:[%s886_s0 + $0x58] sm:$0xff]  ;;  %v22_v8 = vld [vmem:[%s886_s0 + $0x20] sm:$0xff] }
   0x4   :  { %v23_v9 = vld [vmem:[%s886_s0 + $0x28] sm:$0xff]  ;;  %v649_v10 = vld [vmem:[%s886_s0 + $0x60] sm:$0xff]  ;;  %v661_v12 = vld [vmem:[%s886_s0 + $0x30] sm:$0xff] }
   0x5   :  { %v654_v11 = vld [vmem:[%s886_s0 + $0x68] sm:$0xff]  ;;  %v666_v13 = vld [vmem:[%s886_s0 + $0x38] sm:$0xff]  ;;  %v673_v14 = vld [vmem:[%s886_s0 + $0x70] sm:$0xff] }
   0x6   :  { %50 = vadd.xlane.f32.xlu0 %v19_v2  ;;  %v678_v15 = vld [vmem:[%s886_s0 + $0x78] sm:$0xff]  ;;  %v551_v59 = vld [vmem:[%s887_s2] sm:$0xff]  }
   0x7   :  { %66 = vadd.xlane.f32.xlu1 %v27_v3  ;;  %503 = vmatprep.subr.bf16.mxu0 %v551_v59 }
   0x8   :  { %535 = vmatprep.subr.bf16.mxu1 %v551_v59  ;;  %504 = vmatpush3.bf16.msra.mxu0 %v551_v59 }
   0x9   :  { %543 = vmatpush3.bf16.msra.mxu1 %v551_v59 }
   0xa   :  { %52 = vadd.xlane.f32.xlu0 %v20_v4 }
   0xb   :  { %54 = vadd.xlane.f32.xlu1 %v21_v5 }
   0xe   :  { %68 = vadd.xlane.f32.xlu0 %v28_v6 }
   0xf   :  { %70 = vadd.xlane.f32.xlu1 %v29_v7 }
  0x12   :  { %56 = vadd.xlane.f32.xlu0 %v22_v8 }
  0x13   :  { %58 = vadd.xlane.f32.xlu1 %v23_v9 }
  0x16   :  { %72 = vadd.xlane.f32.xlu0 %v649_v10 }
  0x17   :  { %74 = vadd.xlane.f32.xlu1 %v654_v11 }
  0x1a   :  { %60 = vadd.xlane.f32.xlu0 %v661_v12 }
  0x1b   :  { %62 = vadd.xlane.f32.xlu1 %v666_v13 }
  0x1e   :  { %76 = vadd.xlane.f32.xlu0 %v673_v14 }
  0x1f   :  { %78 = vadd.xlane.f32.xlu1 %v678_v15 }
  0x8f   :  { %v49_v16 = vpop.xlane.xlu0 %48 }
  0x90   :  { %v65_v17 = vpop.xlane.xlu1 %64  ;;  %v81_v18 = vmul.f32 0.0078125, %v49_v16 }
  0x91   :  { %v89_v19 = vmul.f32 0.0078125, %v65_v17 }
  0x92   :  { %v682_v20 = vsub.f32 %v18_v0, %v81_v18  ;;  %v553_v18 = vld [vmem:[%s887_s2 + $0x10] sm:$0xff]  }
  0x93   :  { %v684_v21 = vsub.f32 %v26_v1, %v89_v19  ;;  %v51_v22 = vpop.xlane.xlu0 %50 }
  0x94   :  { %v67_v23 = vpop.xlane.xlu1 %66  ;;  %v82_v24 = vmul.f32 0.0078125, %v51_v22  ;;  %v113_v25 = vmul.f32 %v682_v20, %v682_v20  ;;  %v555_v22 = vld [vmem:[%s887_s2 + $0x20] sm:$0xff]  }
  0x95   :  { %v90_v26 = vmul.f32 0.0078125, %v67_v23  ;;  %v121_v29 = vmul.f32 %v684_v21, %v684_v21  ;;  %v556_v23 = vld [vmem:[%s887_s2 + $0x28] sm:$0xff]  }
  0x96   :  { %v688_v27 = vsub.f32 %v19_v2, %v82_v24  ;;  %129 = vadd.xlane.f32.xlu0 %v113_v25  ;;  %v557_v24 = vld [vmem:[%s887_s2 + $0x30] sm:$0xff]   ;;  %v558_v25 = vld [vmem:[%s887_s2 + $0x38] sm:$0xff]  }
  0x97   :  { %v690_v28 = vsub.f32 %v27_v3, %v90_v26  ;;  %v53_v30 = vpop.xlane.xlu0 %52 }
  0x98   :  { %v55_v31 = vpop.xlane.xlu1 %54  ;;  %v83_v32 = vmul.f32 0.0078125, %v53_v30  ;;  %v114_v33 = vmul.f32 %v688_v27, %v688_v27 }
  0x99   :  { %v84_v34 = vmul.f32 0.0078125, %v55_v31  ;;  %v122_v37 = vmul.f32 %v690_v28, %v690_v28 }
  0x9a   :  { %v696_v35 = vsub.f32 %v20_v4, %v83_v32  ;;  %145 = vadd.xlane.f32.xlu0 %v121_v29  ;;  %131 = vadd.xlane.f32.xlu1 %v114_v33  ;;  %v229_v33 = vlaneseq }
  0x9b   :  { %v698_v36 = vsub.f32 %v21_v5, %v84_v34  ;;  %v69_v38 = vpop.xlane.xlu0 %68 }
  0x9c   :  { %v71_v39 = vpop.xlane.xlu1 %70  ;;  %v91_v40 = vmul.f32 0.0078125, %v69_v38  ;;  %v115_v41 = vmul.f32 %v696_v35, %v696_v35  ;;  %v477_v38 = vld.sshfl [vmem:[%s888_s1] sm:$0x33 pattern:$0x75316420] }
  0x9d   :  { %v92_v42 = vmul.f32 0.0078125, %v71_v39  ;;  %v116_v45 = vmul.f32 %v698_v36, %v698_v36 }
  0x9e   :  { %v704_v43 = vsub.f32 %v28_v6, %v91_v40  ;;  %147 = vadd.xlane.f32.xlu1 %v122_v37  ;;  %133 = vadd.xlane.f32.xlu0 %v115_v41 }
  0x9f   :  { %v706_v44 = vsub.f32 %v29_v7, %v92_v42  ;;  %v57_v46 = vpop.xlane.xlu0 %56  ;;  %v552_v7 = vld [vmem:[%s887_s2 + $0x8] sm:$0xff]  }
  0xa0   :  { %v59_v47 = vpop.xlane.xlu1 %58  ;;  %v85_v48 = vmul.f32 0.0078125, %v57_v46  ;;  %v123_v49 = vmul.f32 %v704_v43, %v704_v43  ;;  %505 = vmatprep.subr.bf16.mxu0 %v552_v7  ;;  %536 = vmatprep.subr.bf16.mxu1 %v552_v7  ;;  %v230_v46 = vshrl.u32 %v229_v33, 7 }
  0xa1   :  { %v86_v50 = vmul.f32 0.0078125, %v59_v47  ;;  %v124_v53 = vmul.f32 %v706_v44, %v706_v44  ;;  %506 = vmatpush3.bf16.msra.mxu0 %v552_v7  ;;  %544 = vmatpush3.bf16.msra.mxu1 %v552_v7  ;;  %v43_v47 = vcombine.high %v477_v38, %v477_v38 }
  0xa2   :  { %v712_v51 = vsub.f32 %v22_v8, %v85_v48  ;;  %135 = vadd.xlane.f32.xlu1 %v116_v45  ;;  %149 = vadd.xlane.f32.xlu0 %v123_v49  ;;  %v44_v45 = vrot.slane %v477_v38, 1 }
  0xa3   :  { %v714_v52 = vsub.f32 %v23_v9, %v86_v50  ;;  %v73_v54 = vpop.xlane.xlu0 %72  ;;  %507 = vmatprep.subr.bf16.mxu0 %v553_v18  ;;  %537 = vmatprep.subr.bf16.mxu1 %v553_v18 }
  0xa4   :  { %v75_v55 = vpop.xlane.xlu1 %74  ;;  %v93_v56 = vmul.f32 0.0078125, %v73_v54  ;;  %v117_v57 = vmul.f32 %v712_v51, %v712_v51 }
  0xa5   :  { %v94_v58 = vmul.f32 0.0078125, %v75_v55  ;;  %v118_v62 = vmul.f32 %v714_v52, %v714_v52  ;;  %508 = vmatpush3.bf16.msra.mxu0 %v553_v18  ;;  %545 = vmatpush3.bf16.msra.mxu1 %v553_v18 }
  0xa6   :  { %v724_v60 = vsub.f32 %v649_v10, %v93_v56  ;;  %151 = vadd.xlane.f32.xlu1 %v124_v53  ;;  %137 = vadd.xlane.f32.xlu0 %v117_v57  ;;  %v225_v56 = vadd.f32 1.0, %v44_v45  ;;  %v231_v57 = vsub.s32 0, %v230_v46 }
  0xa7   :  { %v727_v61 = vsub.f32 %v654_v11, %v94_v58  ;;  %v61_v63 = vpop.xlane.xlu0 %60  ;;  %v45_v58 = vrot.slane %v43_v47, 1 }
  0xa8   :  { %v63_v0 = vpop.xlane.xlu1 %62  ;;  %v87_v1 = vmul.f32 0.0078125, %v61_v63  ;;  %v125_v2 = vmul.f32 %v724_v60, %v724_v60  ;;  %v780_v7 = vrot.slane %v225_v56, %v231_v57  ;;  %v790_v33 = vrot.slane %v43_v47, %v231_v57 }
  0xa9   :  { %v88_v3 = vmul.f32 0.0078125, %v63_v0  ;;  %v126_v6 = vmul.f32 %v727_v61, %v727_v61 }
  0xaa   :  { %v734_v4 = vsub.f32 %v661_v12, %v87_v1  ;;  %139 = vadd.xlane.f32.xlu1 %v118_v62  ;;  %153 = vadd.xlane.f32.xlu0 %v125_v2 }
  0xab   :  { %v737_v5 = vsub.f32 %v666_v13, %v88_v3  ;;  %v77_v8 = vpop.xlane.xlu0 %76 }
  0xac   :  { %v79_v9 = vpop.xlane.xlu1 %78  ;;  %v95_v10 = vmul.f32 0.0078125, %v77_v8  ;;  %v119_v11 = vmul.f32 %v734_v4, %v734_v4  ;;  %v226_v8 = vadd.f32 1.0, %v45_v58 }
  0xad   :  { %v96_v12 = vmul.f32 0.0078125, %v79_v9  ;;  %v120_v17 = vmul.f32 %v737_v5, %v737_v5 }
  0xae   :  { %v747_v13 = vsub.f32 %v673_v14, %v95_v10  ;;  %155 = vadd.xlane.f32.xlu1 %v126_v6  ;;  %141 = vadd.xlane.f32.xlu0 %v119_v11 }
  0xaf   :  { %v750_v16 = vsub.f32 %v678_v15, %v96_v12  ;;  %v554_v15 = vld [vmem:[%s887_s2 + $0x18] sm:$0xff]  }
  0xb0   :  { %v127_v19 = vmul.f32 %v747_v13, %v747_v13  ;;  %509 = vmatprep.subr.bf16.mxu0 %v554_v15  ;;  %538 = vmatprep.subr.bf16.mxu1 %v554_v15 }
  0xb1   :  { %v128_v14 = vmul.f32 %v750_v16, %v750_v16  ;;  %510 = vmatpush3.bf16.msra.mxu0 %v554_v15  ;;  %546 = vmatpush3.bf16.msra.mxu1 %v554_v15 }
  0xb2   :  { %143 = vadd.xlane.f32.xlu1 %v120_v17  ;;  %157 = vadd.xlane.f32.xlu0 %v127_v19 }
  0xb3   :  { %511 = vmatprep.subr.bf16.mxu0 %v555_v22  ;;  %539 = vmatprep.subr.bf16.mxu1 %v555_v22 }
  0xb5   :  { %512 = vmatpush3.bf16.msra.mxu0 %v555_v22  ;;  %547 = vmatpush3.bf16.msra.mxu1 %v555_v22 }
  0xb6   :  { %159 = vadd.xlane.f32.xlu1 %v128_v14  ;;  %513 = vmatprep.subr.bf16.mxu0 %v556_v23 }
  0xb7   :  { %540 = vmatprep.subr.bf16.mxu1 %v556_v23 }
  0xb9   :  { %514 = vmatpush3.bf16.msra.mxu0 %v556_v23  ;;  %548 = vmatpush3.bf16.msra.mxu1 %v556_v23  ;;  %v784_v23 = vrot.slane %v477_v38, %v231_v57 }
  0xba   :  { %515 = vmatprep.subr.bf16.mxu0 %v557_v24  ;;  %541 = vmatprep.subr.bf16.mxu1 %v557_v24 }
  0xbd   :  { %516 = vmatpush3.bf16.msra.mxu0 %v557_v24  ;;  %549 = vmatpush3.bf16.msra.mxu1 %v557_v24 }
  0xbe   :  { %517 = vmatprep.subr.bf16.mxu0 %v558_v25  ;;  %542 = vmatprep.subr.bf16.mxu1 %v558_v25 }
  0xc1   :  { %518 = vmatpush3.bf16.msra.mxu0 %v558_v25  ;;  %550 = vmatpush3.bf16.msra.mxu1 %v558_v25 }
 0x123   :  { %v130_v26 = vpop.xlane.xlu0 %129 }
 0x124   :  { %v161_v29 = vmul.f32 0.0078125, %v130_v26 }
 0x126   :  { %v177_v30 = vadd.f32 1e-06, %v161_v29 }
 0x127   :  { %v132_v31 = vpop.xlane.xlu1 %131  ;;  %v146_v32 = vpop.xlane.xlu0 %145 }
 0x128   :  { %559 = vrsqrt.f32 %v177_v30  ;;  %v162_v34 = vmul.f32 0.0078125, %v132_v31  ;;  %v169_v37 = vmul.f32 0.0078125, %v146_v32 }
 0x12a   :  { %v178_v39 = vadd.f32 1e-06, %v162_v34  ;;  %v185_v40 = vadd.f32 1e-06, %v169_v37 }
 0x12b   :  { %v148_v41 = vpop.xlane.xlu1 %147  ;;  %v134_v42 = vpop.xlane.xlu0 %133 }
 0x12c   :  { %561 = vrsqrt.f32 %v178_v39  ;;  %v170_v48 = vmul.f32 0.0078125, %v148_v41  ;;  %v163_v49 = vmul.f32 0.0078125, %v134_v42 }
 0x12d   :  { %563 = vrsqrt.f32 %v185_v40 }
 0x12e   :  { %v186_v50 = vadd.f32 1e-06, %v170_v48  ;;  %v179_v53 = vadd.f32 1e-06, %v163_v49 }
 0x12f   :  { %v136_v54 = vpop.xlane.xlu1 %135  ;;  %v150_v55 = vpop.xlane.xlu0 %149 }
 0x130   :  { %565 = vrsqrt.f32 %v186_v50  ;;  %v164_v59 = vmul.f32 0.0078125, %v136_v54  ;;  %v171_v62 = vmul.f32 0.0078125, %v150_v55 }
 0x131   :  { %567 = vrsqrt.f32 %v179_v53 }
 0x132   :  { %v560_v63 = vpop.eup %559  ;;  %v180_v0 = vadd.f32 1e-06, %v164_v59  ;;  %v187_v1 = vadd.f32 1e-06, %v171_v62 }
 0x133   :  { %v152_v2 = vpop.xlane.xlu1 %151  ;;  %v138_v3 = vpop.xlane.xlu0 %137  ;;  %v209_v6 = vmul.f32 %v560_v63, %v682_v20  ;;  %v786_v20 = vrot.slane %v226_v8, %v231_v57 }
 0x134   :  { %569 = vrsqrt.f32 %v180_v0  ;;  %v172_v9 = vmul.f32 0.0078125, %v152_v2  ;;  %v165_v10 = vmul.f32 0.0078125, %v138_v3 }
 0x135   :  { %571 = vrsqrt.f32 %v187_v1  ;;  %v239_v22 = vmul.f32 %v780_v7, %v209_v6 }
 0x136   :  { %v562_v11 = vpop.eup %561  ;;  %v188_v12 = vadd.f32 1e-06, %v172_v9  ;;  %v181_v17 = vadd.f32 1e-06, %v165_v10 }
 0x137   :  { %v564_v18 = vpop.eup %563  ;;  %v140_v19 = vpop.xlane.xlu1 %139  ;;  %v210_v15 = vmul.f32 %v562_v11, %v688_v27  ;;  %v265_v38 = vadd.f32 %v784_v23, %v239_v22 }
 0x138   :  { %v154_v14 = vpop.xlane.xlu0 %153  ;;  %573 = vrsqrt.f32 %v188_v12  ;;  %v166_v24 = vmul.f32 0.0078125, %v140_v19  ;;  %v217_v26 = vmul.f32 %v564_v18, %v684_v21 }
 0x139   :  { %v173_v25 = vmul.f32 0.0078125, %v154_v14  ;;  %575 = vrsqrt.f32 %v181_v17  ;;  %v240_v29 = vmul.f32 %v780_v7, %v210_v15 }
 0x13a   :  { %v566_v30 = vpop.eup %565  ;;  %v182_v31 = vadd.f32 1e-06, %v166_v24  ;;  %v247_v41 = vmul.f32 %v786_v20, %v217_v26 }
 0x13b   :  { %v189_v32 = vadd.f32 1e-06, %v173_v25  ;;  %v568_v27 = vpop.eup %567  ;;  %v156_v34 = vpop.xlane.xlu1 %155  ;;  %v266_v39 = vadd.f32 %v784_v23, %v240_v29  ;;  %v218_v40 = vmul.f32 %v566_v30, %v690_v28 }
 0x13c   :  { %v142_v37 = vpop.xlane.xlu0 %141  ;;  %577 = vrsqrt.f32 %v182_v31  ;;  %v174_v21 = vmul.f32 0.0078125, %v156_v34  ;;  %v211_v47 = vmul.f32 %v568_v27, %v696_v35  ;;  %v273_v28 = vadd.f32 %v790_v33, %v247_v41 }
 0x13d   :  { %v167_v42 = vmul.f32 0.0078125, %v142_v37  ;;  %579 = vrsqrt.f32 %v189_v32  ;;  %v281_v45 = vpack.c.bf16 %v266_v39, %v265_v38  ;;  %v248_v46 = vmul.f32 %v786_v20, %v218_v40 }
 0x13e   :  { %v570_v48 = vpop.eup %569  ;;  %v190_v49 = vadd.f32 1e-06, %v174_v21  ;;  %v241_v58 = vmul.f32 %v780_v7, %v211_v47 }
 0x13f   :  { %v183_v50 = vadd.f32 1e-06, %v167_v42  ;;  %v572_v53 = vpop.eup %571  ;;  %v144_v54 = vpop.xlane.xlu1 %143  ;;  %519 = vmatprep.mubr.bf16.mxu0 %v281_v45  ;;  %v274_v56 = vadd.f32 %v790_v33, %v248_v46  ;;  %v212_v57 = vmul.f32 %v570_v48, %v698_v36 }
 0x140   :  { %v158_v55 = vpop.xlane.xlu0 %157  ;;  %581 = vrsqrt.f32 %v190_v49  ;;  %v168_v59 = vmul.f32 0.0078125, %v144_v54  ;;  %v219_v35 = vmul.f32 %v572_v53, %v704_v43  ;;  %v267_v9 = vadd.f32 %v784_v23, %v241_v58 }
 0x141   :  { %v175_v62 = vmul.f32 0.0078125, %v158_v55  ;;  %583 = vrsqrt.f32 %v183_v50  ;;  %v285_v63 = vpack.c.bf16 %v274_v56, %v273_v28  ;;  %v242_v0 = vmul.f32 %v780_v7, %v212_v57 }
 0x142   :  { %v574_v1 = vpop.eup %573  ;;  %v184_v2 = vadd.f32 1e-06, %v168_v59  ;;  %v249_v11 = vmul.f32 %v786_v20, %v219_v35 }
 0x143   :  { %v191_v3 = vadd.f32 1e-06, %v175_v62  ;;  %v576_v6 = vpop.eup %575  ;;  %v160_v8 = vpop.xlane.xlu1 %159  ;;  %527 = vmatprep.mubr.bf16.mxu1 %v285_v63  ;;  %v268_v36 = vadd.f32 %v784_v23, %v242_v0  ;;  %v220_v10 = vmul.f32 %v574_v1, %v706_v44 }
 0x144   :  { %585 = vrsqrt.f32 %v184_v2  ;;  %v176_v43 = vmul.f32 0.0078125, %v160_v8  ;;  %v213_v12 = vmul.f32 %v576_v6, %v712_v51  ;;  %v275_v22 = vadd.f32 %v790_v33, %v249_v11 }
 0x145   :  { %587 = vrsqrt.f32 %v191_v3  ;;  %v282_v17 = vpack.c.bf16 %v268_v36, %v267_v9  ;;  %v250_v18 = vmul.f32 %v786_v20, %v220_v10 }
 0x146   :  { %v578_v19 = vpop.eup %577  ;;  %v192_v14 = vadd.f32 1e-06, %v176_v43  ;;  %v243_v25 = vmul.f32 %v780_v7, %v213_v12 }
 0x147   :  { %v580_v15 = vpop.eup %579  ;;  %520 = vmatmul.mubr.bf16.vlgmr.msra.gmra.mrb[0].mxu0 %v282_v17  ;;  %v276_v24 = vadd.f32 %v790_v33, %v250_v18  ;;  %v214_v44 = vmul.f32 %v578_v19, %v714_v52 }
 0x148   :  { %589 = vrsqrt.f32 %v192_v14  ;;  %v221_v26 = vmul.f32 %v580_v15, %v724_v60  ;;  %v269_v32 = vadd.f32 %v784_v23, %v243_v25 }
 0x149   :  { %v286_v51 = vpack.c.bf16 %v276_v24, %v275_v22  ;;  %v244_v29 = vmul.f32 %v780_v7, %v214_v44 }
 0x14a   :  { %v582_v30 = vpop.eup %581  ;;  %v251_v37 = vmul.f32 %v786_v20, %v221_v26 }
 0x14b   :  { %v584_v31 = vpop.eup %583  ;;  %528 = vmatmul.mubr.bf16.vlgmr.msra.gmra.mrb[0].mxu1 %v286_v51  ;;  %v270_v27 = vadd.f32 %v784_v23, %v244_v29  ;;  %v222_v34 = vmul.f32 %v582_v30, %v727_v61 }
 0x14c   :  { %v215_v52 = vmul.f32 %v584_v31, %v734_v4  ;;  %v277_v41 = vadd.f32 %v790_v33, %v251_v37 }
 0x14d   :  { %v283_v38 = vpack.c.bf16 %v270_v27, %v269_v32  ;;  %v252_v39 = vmul.f32 %v786_v20, %v222_v34 }
 0x14e   :  { %v586_v60 = vpop.eup %585  ;;  %v245_v45 = vmul.f32 %v780_v7, %v215_v52 }
 0x14f   :  { %v588_v40 = vpop.eup %587  ;;  %523 = vmatprep.mubr.bf16.mxu0 %v283_v38  ;;  %v278_v21 = vadd.f32 %v790_v33, %v252_v39  ;;  %v216_v42 = vmul.f32 %v586_v60, %v737_v5 }
 0x150   :  { %v223_v61 = vmul.f32 %v588_v40, %v747_v13  ;;  %v271_v48 = vadd.f32 %v784_v23, %v245_v45 }
 0x151   :  { %v287_v46 = vpack.c.bf16 %v278_v21, %v277_v41  ;;  %v246_v47 = vmul.f32 %v780_v7, %v216_v42  ;;  %v478_v7 = vld [vmem:[%s889_s3] ss:$0 sm:$0xff] }
 0x152   :  { %v590_v4 = vpop.eup %589  ;;  %v253_v53 = vmul.f32 %v786_v20, %v223_v61 }
 0x153   :  { %531 = vmatprep.mubr.bf16.mxu1 %v287_v46  ;;  %v272_v49 = vadd.f32 %v784_v23, %v246_v47  ;;  %v224_v50 = vmul.f32 %v590_v4, %v750_v16 }
 0x154   :  { %v279_v55 = vadd.f32 %v790_v33, %v253_v53 }
 0x155   :  { %v284_v54 = vpack.c.bf16 %v272_v49, %v271_v48  ;;  %v254_v5 = vmul.f32 %v786_v20, %v224_v50 }
 0x157   :  { %524 = vmatmul.mubr.bf16.gmra.mrb[4].mxu0 %v284_v54  ;;  %v280_v13 = vadd.f32 %v790_v33, %v254_v5 }
 0x159   :  { %v288_v28 = vpack.c.bf16 %v280_v13, %v279_v55 }
 0x15b   :  { %532 = vmatmul.mubr.bf16.gmra.mrb[4].mxu1 %v288_v28 }
 0x21a   :  { %v521_v56 = vpop.f32.mrb[0].mxu0 }
 0x21b   :  { %v403_v23 = vadd.f32 %v521_v56, %v478_v7  ;;  %v394_v57 = vpop.f32.mrb[1].mxu0 }
 0x21c   :  { %v395_v16 = vadd.f32 %v478_v7, %v394_v57  ;;  %v522_v58 = vpop.f32.mrb[2].mxu0 }
 0x21d   :  { %459 = vst [vmem:[%s890_s4 + $0x10] sm:$0xff] %v403_v23  ;;  %v406_v20 = vadd.f32 %v522_v58, %v478_v7  ;;  %v397_v59 = vpop.f32.mrb[3].mxu0 }
 0x21e   :  { %457 = vst [vmem:[%s890_s4] sm:$0xff] %v395_v16  ;;  %v398_v33 = vadd.f32 %v478_v7, %v397_v59  ;;  %v529_v62 = vpop.f32.mrb[0].mxu1 }
 0x21f   :  { %460 = vst [vmem:[%s890_s4 + $0x18] sm:$0xff] %v406_v20  ;;  %v435_v35 = vadd.f32 %v529_v62, %v478_v7  ;;  %v426_v63 = vpop.f32.mrb[1].mxu1 }
 0x220   :  { %458 = vst [vmem:[%s890_s4 + $0x8] sm:$0xff] %v398_v33  ;;  %v427_v0 = vadd.f32 %v478_v7, %v426_v63  ;;  %v530_v1 = vpop.f32.mrb[2].mxu1 }
 0x221   :  { %467 = vst [vmem:[%s890_s4 + $0x50] sm:$0xff] %v435_v35  ;;  %v438_v2 = vadd.f32 %v530_v1, %v478_v7  ;;  %v429_v3 = vpop.f32.mrb[3].mxu1 }
 0x222   :  { %465 = vst [vmem:[%s890_s4 + $0x40] sm:$0xff] %v427_v0  ;;  %v430_v6 = vadd.f32 %v478_v7, %v429_v3 }
 0x223   :  { %468 = vst [vmem:[%s890_s4 + $0x58] sm:$0xff] %v438_v2 }
 0x224   :  { %466 = vst [vmem:[%s890_s4 + $0x48] sm:$0xff] %v430_v6 }
 0x22a   :  { %v525_v8 = vpop.f32.mrb[4].mxu0 }
 0x22b   :  { %v419_v9 = vadd.f32 %v525_v8, %v478_v7  ;;  %v410_v36 = vpop.f32.mrb[5].mxu0 }
 0x22c   :  { %v411_v10 = vadd.f32 %v478_v7, %v410_v36  ;;  %v526_v11 = vpop.f32.mrb[6].mxu0 }
 0x22d   :  { %463 = vst [vmem:[%s890_s4 + $0x30] sm:$0xff] %v419_v9  ;;  %v422_v43 = vadd.f32 %v526_v11, %v478_v7  ;;  %v413_v12 = vpop.f32.mrb[7].mxu0 }
 0x22e   :  { %461 = vst [vmem:[%s890_s4 + $0x20] sm:$0xff] %v411_v10  ;;  %v414_v17 = vadd.f32 %v478_v7, %v413_v12  ;;  %v533_v18 = vpop.f32.mrb[4].mxu1 }
 0x22f   :  { %464 = vst [vmem:[%s890_s4 + $0x38] sm:$0xff] %v422_v43  ;;  %v451_v19 = vadd.f32 %v533_v18, %v478_v7  ;;  %v442_v14 = vpop.f32.mrb[5].mxu1 }
 0x230   :  { %462 = vst [vmem:[%s890_s4 + $0x28] sm:$0xff] %v414_v17  ;;  %v443_v15 = vadd.f32 %v478_v7, %v442_v14  ;;  %v534_v22 = vpop.f32.mrb[6].mxu1 }
 0x231   :  { %471 = vst [vmem:[%s890_s4 + $0x70] sm:$0xff] %v451_v19  ;;  %v454_v24 = vadd.f32 %v534_v22, %v478_v7  ;;  %v445_v44 = vpop.f32.mrb[7].mxu1 }
 0x232   :  { %469 = vst [vmem:[%s890_s4 + $0x60] sm:$0xff] %v443_v15  ;;  %v446_v25 = vadd.f32 %v478_v7, %v445_v44 }
 0x233   :  { %472 = vst [vmem:[%s890_s4 + $0x78] sm:$0xff] %v454_v24 }
 0x234   :  { %470 = vst [vmem:[%s890_s4 + $0x68] sm:$0xff] %v446_v25 }

// kernel: vit_forward.6
= control target key start
LH: loop header
LB: loop body
LE: loop exit
PB: predicated region body
PF: predicated region fallthrough
CT: control target
= control target key end

     0   :  { %s7503_s13 = smov 0   ;;  %s7505_s14 = smov 0   ;;  %s10376_s0 = inlined_call_operand.vmem [shape: f32[2,64,128], index: 0, kind: input, shape index: {}]   ;;  %s10377_s1 = inlined_call_operand.vmem [shape: f32[2,2,768], index: 1, kind: input, shape index: {}]   ;;  %s10378_s2 = inlined_call_operand.vmem [shape: bf16[2,128,384], index: 2, kind: input, shape index: {}]   ;;  %s10379_s3 = inlined_call_operand.vmem [shape: f32[2,1,384], index: 3, kind: input, shape index: {}]   ;;  %s10380_s4 = inlined_call_operand.vmem [shape: bf16[2,128,128], index: 4, kind: input, shape index: {}]   ;;  %s10381_s5 = inlined_call_operand.vmem [shape: f32[2,1,128], index: 5, kind: input, shape index: {}]   ;;  %s10382_s6 = inlined_call_operand.vmem [shape: bf16[2,128,512], index: 6, kind: input, shape index: {}]   ;;  %s10383_s7 = inlined_call_operand.vmem [shape: f32[2,1,512], index: 7, kind: input, shape index: {}]   ;;  %s10384_s8 = inlined_call_operand.vmem [shape: bf16[2,512,128], index: 8, kind: input, shape index: {}]   ;;  %s10385_s9 = inlined_call_operand.vmem [shape: f32[2,1,128], index: 9, kind: input, shape index: {}]   ;;  %s10386_s10 = inlined_call_operand.vmem [shape: f32[2,64,128], index: 10, kind: output, shape index: {}]  }
   0x1   :  { %10450 = sst [smem:[#allocation37_spill]] %s10377_s1  ;;  %s7507_s15 = smov 0  }
   0x2   :  { %10451 = sst [smem:[#allocation38_spill]] %s10378_s2 }
   0x3 LB: > { %10452 = sst [smem:[#allocation3_spill]] %s7438_s14  ;;  %s29_s16 = sadd.s32 1, %s7438_s14  ;;  %s7442_s15 = sphi %s7507_s15, %s20_s15   ;;  %s7438_s14 = sphi %s7505_s14, %s10584_s14   ;;  %s7434_s13 = sphi %s7503_s13, %s10583_s13  }
   0x4   : > { %10453 = sst [smem:[#allocation4_spill]] %s7442_s15  ;;  %p5981_p0 = scmp.ge.s32.totalorder %s7442_s15, 1 }
   0x5   : > { %p30_p1 = scmp.ge.s32.totalorder %s29_s16, 2  ;;  %p416_p2 = scmp.lt.s32.totalorder %s7442_s15, 3 }
   0x7   : > { %s10586_s16 = smov (%p30_p1, %s29_s16), 0  ;;  %p417_p3 = pnand %p5981_p0, %p416_p2 }
   0x8   : > { %10454 = sst [smem:[#allocation5_spill]] %s10586_s16 }
   0x9   : > { %420 = sbr.rel (%p417_p3) target bundleno = 4845 (0x12ed), region = 60 }
  0x10   : > { %p506_p4 = scmp.lt.s32.totalorder %s7434_s13, 1  ;;  %s10455_s1 = sld [smem:[#allocation37_spill]] }
  0x11   : > { %s10456_s2 = sld [smem:[#allocation38_spill]]  ;;  %p5991_p5 = scmp.ne.s32.totalorder %s7434_s13, 0 }
  0x12   : > { %s7521_s17 = scalar_select %p506_p4, %s7434_s13, 1 }
  0x13   : > { %v561_v0 = vld [vmem:[%s10376_s0] sm:$0xff] (!%p5991_p5)  ;;  %v562_v1 = vld [vmem:[%s10376_s0 + $0x8] sm:$0xff] (!%p5991_p5)  ;;  %v563_v2 = vld [vmem:[%s10376_s0 + $0x10] sm:$0xff] (!%p5991_p5) }
  0x14   : > { %s6803_s18 = smul.u32 12, %s7521_s17  ;;  %s6160_s19 = sshll.u32 %s7521_s17, 6  ;;  %577 = vst [vmem:[%s10386_s10] sm:$0xff] (!%p5991_p5), %v561_v0  ;;  %578 = vst [vmem:[%s10386_s10 + $0x8] sm:$0xff] (!%p5991_p5), %v562_v1  ;;  %v564_v3 = vld [vmem:[%s10376_s0 + $0x18] sm:$0xff] (!%p5991_p5)  ;;  %v565_v4 = vld [vmem:[%s10376_s0 + $0x20] sm:$0xff] (!%p5991_p5) }
  0x15   : > { %s6804_s20 = smul.u32 192, %s7521_s17  ;;  %s7529_s23 = scalar_lea.vmem %s10380_s4, %s6160_s19  ;;  %579 = vst [vmem:[%s10386_s10 + $0x10] sm:$0xff] (!%p5991_p5), %v563_v2  ;;  %v566_v5 = vld [vmem:[%s10376_s0 + $0x28] sm:$0xff] (!%p5991_p5)  ;;  %580 = vst [vmem:[%s10386_s10 + $0x18] sm:$0xff] (!%p5991_p5), %v564_v3  ;;  %v567_v6 = vld [vmem:[%s10376_s0 + $0x30] sm:$0xff] (!%p5991_p5) }
  0x16   : > { %s7534_s26 = scalar_lea.vmem %s10455_s1, %s6803_s18  ;;  %s6805_s27 = smul.u32 3, %s7521_s17  ;;  %581 = vst [vmem:[%s10386_s10 + $0x20] sm:$0xff] (!%p5991_p5), %v565_v4  ;;  %582 = vst [vmem:[%s10386_s10 + $0x28] sm:$0xff] (!%p5991_p5), %v566_v5  ;;  %v568_v7 = vld [vmem:[%s10376_s0 + $0x38] sm:$0xff] (!%p5991_p5)  ;;  %v569_v8 = vld [vmem:[%s10376_s0 + $0x40] sm:$0xff] (!%p5991_p5) }
  0x17   : > { %s7540_s30 = scalar_lea.vmem %s10456_s2, %s6804_s20  ;;  %s6161_s21 = sshll.u32 %s7521_s17, 8  ;;  %583 = vst [vmem:[%s10386_s10 + $0x30] sm:$0xff] (!%p5991_p5), %v567_v6  ;;  %584 = vst [vmem:[%s10386_s10 + $0x38] sm:$0xff] (!%p5991_p5), %v568_v7  ;;  %v570_v9 = vld [vmem:[%s10376_s0 + $0x48] sm:$0xff] (!%p5991_p5)  ;;  %v571_v10 = vld [vmem:[%s10376_s0 + $0x50] sm:$0xff] (!%p5991_p5) }
  0x18   : > { %s7549_s19 = scalar_lea.vmem %s10379_s3, %s6805_s27  ;;  %s7555_s18 = scalar_lea.vmem %s10382_s6, %s6161_s21  ;;  %585 = vst [vmem:[%s10386_s10 + $0x40] sm:$0xff] (!%p5991_p5), %v569_v8  ;;  %v572_v11 = vld [vmem:[%s10376_s0 + $0x58] sm:$0xff] (!%p5991_p5)  ;;  %586 = vst [vmem:[%s10386_s10 + $0x48] sm:$0xff] (!%p5991_p5), %v570_v9  ;;  %v573_v12 = vld [vmem:[%s10376_s0 + $0x60] sm:$0xff] (!%p5991_p5) }
  0x19   : > { %s5988_s25 = sshll.u32 %s7521_s17, 2  ;;  %s7566_s12 = scalar_lea.vmem %s10384_s8, %s6161_s21  ;;  %587 = vst [vmem:[%s10386_s10 + $0x50] sm:$0xff] (!%p5991_p5), %v571_v10  ;;  %588 = vst [vmem:[%s10386_s10 + $0x58] sm:$0xff] (!%p5991_p5), %v572_v11  ;;  %v574_v13 = vld [vmem:[%s10376_s0 + $0x68] sm:$0xff] (!%p5991_p5)  ;;  %v575_v14 = vld [vmem:[%s10376_s0 + $0x70] sm:$0xff] (!%p5991_p5) }
  0x1a   : > { %s7561_s20 = scalar_lea.vmem %s10383_s7, %s5988_s25  ;;  %s548_s27 = scalar_lea.vmem %s10385_s9, %s7521_s17  ;;  %589 = vst [vmem:[%s10386_s10 + $0x60] sm:$0xff] (!%p5991_p5), %v573_v12  ;;  %590 = vst [vmem:[%s10386_s10 + $0x68] sm:$0xff] (!%p5991_p5), %v574_v13  ;;  %v576_v15 = vld [vmem:[%s10376_s0 + $0x78] sm:$0xff] (!%p5991_p5) }
  0x1b   : > { %560 = sbr.rel (%p5991_p5) target bundleno = 34 (0x22), region = 64  ;;  %591 = vst [vmem:[%s10386_s10 + $0x70] sm:$0xff] (!%p5991_p5), %v575_v14  ;;  %592 = vst [vmem:[%s10386_s10 + $0x78] sm:$0xff] (!%p5991_p5), %v576_v15 }
  0x22 PF: > { %v593_v16 = vld [vmem:[%s10386_s10] sm:$0xff]  ;;  %v595_v17 = vld [vmem:[%s10386_s10 + $0x10] sm:$0xff]  ;;  %v594_v18 = vld [vmem:[%s10386_s10 + $0x8] sm:$0xff]  ;;  %vm1293_vm0 = vcmask 261120   ;;  %vm1488_vm1 = vcmask 523264   ;;  %s7447_s25 = smov 32   ;;  %s10491_s28 = scalar_lea.vmem %s10381_s5, %s7521_s17 }
  0x23   : > { %641 = vadd.xlane.f32.xlu0 %v593_v16  ;;  %645 = vadd.xlane.f32.xlu1 %v595_v17  ;;  %v596_v19 = vld [vmem:[%s10386_s10 + $0x18] sm:$0xff]  ;;  %v597_v20 = vld [vmem:[%s10386_s10 + $0x20] sm:$0xff]  ;;  %v598_v21 = vld [vmem:[%s10386_s10 + $0x28] sm:$0xff]  ;;  %vm2495_vm2 = vcmask 523520   ;;  %vm3132_vm3 = vcmask 785920   ;;  %vm3769_vm4 = vcmask 1048320  }
  0x24   : > { %v7689_v22 = vld [vmem:[%s10386_s10 + $0x30] sm:$0xff]  ;;  %v7694_v23 = vld [vmem:[%s10386_s10 + $0x38] sm:$0xff]  ;;  %v7699_v24 = vld [vmem:[%s10386_s10 + $0x40] sm:$0xff] }
  0x25   : > { %v7704_v25 = vld [vmem:[%s10386_s10 + $0x48] sm:$0xff]  ;;  %v7711_v26 = vld [vmem:[%s10386_s10 + $0x50] sm:$0xff]  ;;  %v7716_v27 = vld [vmem:[%s10386_s10 + $0x58] sm:$0xff] }
  0x26   : > { %v7723_v28 = vld [vmem:[%s10386_s10 + $0x60] sm:$0xff]  ;;  %v7728_v29 = vld [vmem:[%s10386_s10 + $0x68] sm:$0xff]  ;;  %v7735_v30 = vld [vmem:[%s10386_s10 + $0x70] sm:$0xff] }
  0x27   : > { %643 = vadd.xlane.f32.xlu0 %v594_v18  ;;  %647 = vadd.xlane.f32.xlu1 %v596_v19  ;;  %v7740_v31 = vld [vmem:[%s10386_s10 + $0x78] sm:$0xff]  ;;  %v6834_v32 = vld [vmem:[%s7540_s30 + $0x4] ss:$12 sps:$4 sm:$0xff]   ;;  %v6836_v33 = vld [vmem:[%s7540_s30] ss:$12 sps:$4 sm:$0xff]  }
  0x28   : > { %v6837_v34 = vld [vmem:[%s7540_s30 + $0x1c] ss:$12 sps:$4 sm:$0xff]   ;;  %1059 = vmatprep.subr.bf16.mxu0 %v6834_v32  ;;  %v6840_v10 = vld [vmem:[%s7540_s30 + $0x18] ss:$12 sps:$4 sm:$0xff]  }
  0x29   : > { %v6839_v35 = vld [vmem:[%s7540_s30 + $0x8] ss:$12 sps:$4 sm:$0xff]   ;;  %1060 = vmatpush1.bf16.msra.mxu0 %v6836_v33 }
  0x2a   : > { %6451 = vmatprep.subr.bf16.mxu1 %v6839_v35  ;;  %1061 = vmatprep.subr.bf16.mxu0 %v6837_v34  ;;  %v6845_v34 = vld [vmem:[%s7540_s30 + $0x4c] ss:$12 sps:$4 sm:$0xff]  }
  0x2b   : > { %649 = vadd.xlane.f32.xlu0 %v597_v20  ;;  %651 = vadd.xlane.f32.xlu1 %v598_v21 }
  0x2c   : > { %6452 = vmatpush3.bf16.msra.mxu1 %v6839_v35  ;;  %v6847_v35 = vld [vmem:[%s7540_s30 + $0x38] ss:$12 sps:$4 sm:$0xff]  }
  0x2d   : > { %1062 = vmatpush1.bf16.msra.mxu0 %v6840_v10 }
  0x2f   : > { %653 = vadd.xlane.f32.xlu0 %v7689_v22  ;;  %655 = vadd.xlane.f32.xlu1 %v7694_v23 }
  0x33   : > { %657 = vadd.xlane.f32.xlu0 %v7699_v24  ;;  %659 = vadd.xlane.f32.xlu1 %v7704_v25 }
  0x37   : > { %661 = vadd.xlane.f32.xlu0 %v7711_v26  ;;  %663 = vadd.xlane.f32.xlu1 %v7716_v27 }
  0x3b   : > { %665 = vadd.xlane.f32.xlu0 %v7723_v28  ;;  %667 = vadd.xlane.f32.xlu1 %v7728_v29 }
  0x3f   : > { %669 = vadd.xlane.f32.xlu0 %v7735_v30  ;;  %671 = vadd.xlane.f32.xlu1 %v7740_v31 }
  0xb0   : > { %v642_v36 = vpop.xlane.xlu0 %641  ;;  %v646_v37 = vpop.xlane.xlu1 %645 }
  0xb1   : > { %v674_v38 = vmul.f32 0.0078125, %v642_v36  ;;  %v676_v39 = vmul.f32 0.0078125, %v646_v37 }
  0xb3   : > { %v7750_v40 = vsub.f32 %v593_v16, %v674_v38  ;;  %v7752_v41 = vsub.f32 %v595_v17, %v676_v39  ;;  %v6841_v16 = vld [vmem:[%s7540_s30 + $0x34] ss:$12 sps:$4 sm:$0xff]  }
  0xb4   : > { %v644_v42 = vpop.xlane.xlu0 %643  ;;  %v648_v43 = vpop.xlane.xlu1 %647  ;;  %v6843_v17 = vld [vmem:[%s7540_s30 + $0x20] ss:$12 sps:$4 sm:$0xff]   ;;  %1063 = vmatprep.subr.bf16.mxu0 %v6841_v16  ;;  %v6848_v38 = vld [vmem:[%s7540_s30 + $0x48] ss:$12 sps:$4 sm:$0xff]  }
  0xb5   : > { %v675_v44 = vmul.f32 0.0078125, %v644_v42  ;;  %v706_v45 = vmul.f32 %v7750_v40, %v7750_v40  ;;  %v677_v46 = vmul.f32 0.0078125, %v648_v43  ;;  %v708_v47 = vmul.f32 %v7752_v41, %v7752_v41  ;;  %6453 = vmatprep.subr.bf16.mxu1 %v6843_v17 }
  0xb6   : > { %6454 = vmatpush3.bf16.msra.mxu1 %v6843_v17 }
  0xb7   : > { %722 = vadd.xlane.f32.xlu0 %v706_v45  ;;  %v7758_v48 = vsub.f32 %v594_v18, %v675_v44  ;;  %v7760_v49 = vsub.f32 %v596_v19, %v677_v46  ;;  %6455 = vmatprep.subr.bf16.mxu1 %v6847_v35  ;;  %v6849_v45 = vld [vmem:[%s7540_s30 + $0x64] ss:$12 sps:$4 sm:$0xff]  }
  0xb8   : > { %v650_v50 = vpop.xlane.xlu0 %649  ;;  %v652_v51 = vpop.xlane.xlu1 %651  ;;  %v6851_v46 = vld [vmem:[%s7540_s30 + $0x50] ss:$12 sps:$4 sm:$0xff]  }
  0xb9   : > { %v678_v52 = vmul.f32 0.0078125, %v650_v50  ;;  %v707_v53 = vmul.f32 %v7758_v48, %v7758_v48  ;;  %v679_v54 = vmul.f32 0.0078125, %v652_v51  ;;  %v709_v55 = vmul.f32 %v7760_v49, %v7760_v49  ;;  %v6855_v51 = vld [vmem:[%s7540_s30 + $0x68] ss:$12 sps:$4 sm:$0xff]  }
  0xba   : > { %6456 = vmatpush3.bf16.msra.mxu1 %v6847_v35 }
  0xbb   : > { %726 = vadd.xlane.f32.xlu0 %v708_v47  ;;  %724 = vadd.xlane.f32.xlu1 %v707_v53  ;;  %v7766_v56 = vsub.f32 %v597_v20, %v678_v52  ;;  %v7768_v57 = vsub.f32 %v598_v21, %v679_v54  ;;  %v6852_v47 = vld [vmem:[%s7540_s30 + $0x60] ss:$12 sps:$4 sm:$0xff]   ;;  %v6856_v52 = vld [vmem:[%s7540_s30 + $0x78] ss:$12 sps:$4 sm:$0xff]  }
  0xbc   : > { %v654_v58 = vpop.xlane.xlu0 %653  ;;  %v656_v59 = vpop.xlane.xlu1 %655  ;;  %6457 = vmatprep.subr.bf16.mxu1 %v6851_v46  ;;  %v6857_v53 = vld [vmem:[%s7540_s30 + $0x94] ss:$12 sps:$4 sm:$0xff]  }
  0xbd   : > { %v680_v60 = vmul.f32 0.0078125, %v654_v58  ;;  %v710_v61 = vmul.f32 %v7766_v56, %v7766_v56  ;;  %v681_v62 = vmul.f32 0.0078125, %v656_v59  ;;  %v711_v63 = vmul.f32 %v7768_v57, %v7768_v57  ;;  %v6859_v54 = vld [vmem:[%s7540_s30 + $0x80] ss:$12 sps:$4 sm:$0xff]   ;;  %v6863_v59 = vld [vmem:[%s7540_s30 + $0x98] ss:$12 sps:$4 sm:$0xff]  }
  0xbe   : > { %6458 = vmatpush3.bf16.msra.mxu1 %v6851_v46  ;;  %v6861_v58 = vld [vmem:[%s7540_s30 + $0xac] ss:$12 sps:$4 sm:$0xff]  }
  0xbf   : > { %728 = vadd.xlane.f32.xlu1 %v709_v55  ;;  %730 = vadd.xlane.f32.xlu0 %v710_v61  ;;  %v7775_v0 = vsub.f32 %v7689_v22, %v680_v60  ;;  %v7778_v1 = vsub.f32 %v7694_v23, %v681_v62  ;;  %v6844_v23 = vld [vmem:[%s7540_s30 + $0x30] ss:$12 sps:$4 sm:$0xff]   ;;  %v6864_v60 = vld [vmem:[%s7540_s30 + $0xa8] ss:$12 sps:$4 sm:$0xff]   ;;  %v10391_v62 = vmov 0  }
  0xc0   : > { %v658_v2 = vpop.xlane.xlu0 %657  ;;  %v660_v3 = vpop.xlane.xlu1 %659  ;;  %1064 = vmatpush1.bf16.msra.mxu0 %v6844_v23  ;;  %6459 = vmatprep.subr.bf16.mxu1 %v6855_v51  ;;  %v6860_v55 = vld [vmem:[%s7540_s30 + $0x90] ss:$12 sps:$4 sm:$0xff]  }
  0xc1   : > { %v682_v4 = vmul.f32 0.0078125, %v658_v2  ;;  %v712_v5 = vmul.f32 %v7775_v0, %v7775_v0  ;;  %v683_v6 = vmul.f32 0.0078125, %v660_v3  ;;  %v713_v7 = vmul.f32 %v7778_v1, %v7778_v1  ;;  %1065 = vmatprep.subr.bf16.mxu0 %v6845_v34  ;;  %v6865_v61 = vld [vmem:[%s7540_s30 + $0xb0] ss:$12 sps:$4 sm:$0xff]   ;;  %1091 = vmatprep.mubr.bf16.mxu0 %v10391_v62 }
  0xc2   : > { %6460 = vmatpush3.bf16.msra.mxu1 %v6855_v51 }
  0xc3   : > { %732 = vadd.xlane.f32.xlu1 %v711_v63  ;;  %734 = vadd.xlane.f32.xlu0 %v712_v5  ;;  %v7785_v8 = vsub.f32 %v7699_v24, %v682_v4  ;;  %v7788_v9 = vsub.f32 %v7704_v25, %v683_v6  ;;  %v822_v6 = vlaneseq }
  0xc4   : > { %v662_v11 = vpop.xlane.xlu0 %661  ;;  %v664_v12 = vpop.xlane.xlu1 %663  ;;  %1066 = vmatpush1.bf16.msra.mxu0 %v6848_v38  ;;  %6461 = vmatprep.subr.bf16.mxu1 %v6859_v54 }
  0xc5   : > { %v684_v13 = vmul.f32 0.0078125, %v662_v11  ;;  %v714_v14 = vmul.f32 %v7785_v8, %v7785_v8  ;;  %v685_v15 = vmul.f32 0.0078125, %v664_v12  ;;  %v715_v18 = vmul.f32 %v7788_v9, %v7788_v9  ;;  %1067 = vmatprep.subr.bf16.mxu0 %v6849_v45  ;;  %v5992_v11 = vld.sshfl [vmem:[%s7534_s26] sm:$0xff pattern:$0x75316420] }
  0xc6   : > { %6462 = vmatpush3.bf16.msra.mxu1 %v6859_v54  ;;  %v620_v16 = vrot.slane %v5992_v11, 1  ;;  %v7846_v17 = vshrl.u32 %v822_v6, 7 }
  0xc7   : > { %736 = vadd.xlane.f32.xlu1 %v713_v7  ;;  %738 = vadd.xlane.f32.xlu0 %v714_v14  ;;  %v7798_v19 = vsub.f32 %v7711_v26, %v684_v13  ;;  %v7801_v20 = vsub.f32 %v7716_v27, %v685_v15 }
  0xc8   : > { %v666_v21 = vpop.xlane.xlu0 %665  ;;  %v668_v22 = vpop.xlane.xlu1 %667  ;;  %1068 = vmatpush1.bf16.msra.mxu0 %v6852_v47  ;;  %6463 = vmatprep.subr.bf16.mxu1 %v6863_v59  ;;  %10457 = vst [vmem:[#allocation6_spill] sm:$0xff] %v7846_v17 }
  0xc9   : > { %v686_v24 = vmul.f32 0.0078125, %v666_v21  ;;  %v716_v25 = vmul.f32 %v7798_v19, %v7798_v19  ;;  %v687_v32 = vmul.f32 0.0078125, %v668_v22  ;;  %v717_v26 = vmul.f32 %v7801_v20, %v7801_v20 }
  0xca   : > { %6464 = vmatpush3.bf16.msra.mxu1 %v6863_v59 }
  0xcb   : > { %740 = vadd.xlane.f32.xlu1 %v715_v18  ;;  %742 = vadd.xlane.f32.xlu0 %v716_v25  ;;  %v7809_v27 = vsub.f32 %v7723_v28, %v686_v24  ;;  %v7812_v33 = vsub.f32 %v7728_v29, %v687_v32  ;;  %v818_v32 = vadd.f32 1.0, %v620_v16 }
  0xcc   : > { %v670_v36 = vpop.xlane.xlu0 %669  ;;  %v672_v37 = vpop.xlane.xlu1 %671  ;;  %6465 = vmatprep.subr.bf16.mxu1 %v6865_v61 }
  0xcd   : > { %v688_v39 = vmul.f32 0.0078125, %v670_v36  ;;  %v718_v42 = vmul.f32 %v7809_v27, %v7809_v27  ;;  %v689_v43 = vmul.f32 0.0078125, %v672_v37  ;;  %v719_v28 = vmul.f32 %v7812_v33, %v7812_v33 }
  0xce   : > { %6466 = vmatpush3.bf16.msra.mxu1 %v6865_v61 }
  0xcf   : > { %744 = vadd.xlane.f32.xlu1 %v717_v26  ;;  %746 = vadd.xlane.f32.xlu0 %v718_v42  ;;  %v7822_v29 = vsub.f32 %v7735_v30, %v688_v39  ;;  %v7825_v44 = vsub.f32 %v7740_v31, %v689_v43  ;;  %v6853_v31 = vld [vmem:[%s7540_s30 + $0x7c] ss:$12 sps:$4 sm:$0xff]   ;;  %v7849_v26 = vsub.s32 0, %v7846_v17  ;;  %s7445_s30 = smov 96  }
  0xd0   : > { %1069 = vmatprep.subr.bf16.mxu0 %v6853_v31 }
  0xd1   : > { %v720_v50 = vmul.f32 %v7822_v29, %v7822_v29  ;;  %v721_v30 = vmul.f32 %v7825_v44, %v7825_v44  ;;  %1070 = vmatpush1.bf16.msra.mxu0 %v6856_v52  ;;  %10458 = vst [vmem:[#allocation7_spill] sm:$0xff] %v7849_v26 }
  0xd2   : > { %1071 = vmatprep.subr.bf16.mxu0 %v6857_v53 }
  0xd3   : > { %748 = vadd.xlane.f32.xlu1 %v719_v28  ;;  %750 = vadd.xlane.f32.xlu0 %v720_v50  ;;  %v7853_v28 = vrot.slane %v818_v32, %v7849_v26 }
  0xd5   : > { %1072 = vmatpush1.bf16.msra.mxu0 %v6860_v55  ;;  %v7858_v55 = vrot.slane %v5992_v11, %v7849_v26 }
  0xd6   : > { %1073 = vmatprep.subr.bf16.mxu0 %v6861_v58 }
  0xd7   : > { %752 = vadd.xlane.f32.xlu1 %v721_v30 }
  0xd9   : > { %1074 = vmatpush1.bf16.msra.mxu0 %v6864_v60 }
 0x144   : > { %v723_v63 = vpop.xlane.xlu0 %722 }
 0x145   : > { %v754_v2 = vmul.f32 0.0078125, %v723_v63 }
 0x147   : > { %v770_v3 = vadd.f32 1e-06, %v754_v2 }
 0x148   : > { %v725_v4 = vpop.xlane.xlu1 %724  ;;  %v727_v5 = vpop.xlane.xlu0 %726 }
 0x149   : > { %6954 = vrsqrt.f32 %v770_v3  ;;  %v755_v7 = vmul.f32 0.0078125, %v725_v4  ;;  %v756_v10 = vmul.f32 0.0078125, %v727_v5 }
 0x14b   : > { %v771_v12 = vadd.f32 1e-06, %v755_v7  ;;  %v772_v13 = vadd.f32 1e-06, %v756_v10 }
 0x14c   : > { %v729_v14 = vpop.xlane.xlu1 %728  ;;  %v731_v15 = vpop.xlane.xlu0 %730 }
 0x14d   : > { %6956 = vrsqrt.f32 %v771_v12  ;;  %v757_v18 = vmul.f32 0.0078125, %v729_v14  ;;  %v758_v21 = vmul.f32 0.0078125, %v731_v15 }
 0x14e   : > { %6958 = vrsqrt.f32 %v772_v13 }
 0x14f   : > { %v773_v22 = vadd.f32 1e-06, %v757_v18  ;;  %v774_v23 = vadd.f32 1e-06, %v758_v21 }
 0x150   : > { %v733_v24 = vpop.xlane.xlu1 %732  ;;  %v735_v25 = vpop.xlane.xlu0 %734 }
 0x151   : > { %6960 = vrsqrt.f32 %v773_v22  ;;  %v759_v34 = vmul.f32 0.0078125, %v733_v24  ;;  %v760_v35 = vmul.f32 0.0078125, %v735_v25 }
 0x152   : > { %6962 = vrsqrt.f32 %v774_v23 }
 0x153   : > { %v6955_v36 = vpop.eup %6954  ;;  %v775_v37 = vadd.f32 1e-06, %v759_v34  ;;  %v776_v38 = vadd.f32 1e-06, %v760_v35 }
 0x154   : > { %v737_v39 = vpop.xlane.xlu1 %736  ;;  %v739_v42 = vpop.xlane.xlu0 %738  ;;  %v802_v43 = vmul.f32 %v6955_v36, %v7750_v40  ;;  %v7860_v40 = vcombine.high %v5992_v11, %v5992_v11 }
 0x155   : > { %6964 = vrsqrt.f32 %v775_v37  ;;  %v761_v45 = vmul.f32 0.0078125, %v737_v39  ;;  %v762_v46 = vmul.f32 0.0078125, %v739_v42 }
 0x156   : > { %6966 = vrsqrt.f32 %v776_v38  ;;  %v832_v54 = vmul.f32 %v7853_v28, %v802_v43  ;;  %10459 = vst [vmem:[#allocation8_spill] sm:$0xff] %v7860_v40  ;;  %v621_v12 = vrot.slane %v7860_v40, 1 }
 0x157   : > { %v6957_v47 = vpop.eup %6956  ;;  %v777_v50 = vadd.f32 1e-06, %v761_v45  ;;  %v778_v30 = vadd.f32 1e-06, %v762_v46 }
 0x158   : > { %v6959_v31 = vpop.eup %6958  ;;  %v741_v51 = vpop.xlane.xlu1 %740  ;;  %v803_v53 = vmul.f32 %v6957_v47, %v7758_v48  ;;  %v858_v7 = vadd.f32 %v7858_v55, %v832_v54  ;;  %v819_v36 = vadd.f32 1.0, %v621_v12 }
 0x159   : > { %v743_v52 = vpop.xlane.xlu0 %742  ;;  %6968 = vrsqrt.f32 %v777_v50  ;;  %v763_v58 = vmul.f32 0.0078125, %v741_v51  ;;  %v804_v60 = vmul.f32 %v6959_v31, %v7752_v41 }
 0x15a   : > { %v764_v59 = vmul.f32 0.0078125, %v743_v52  ;;  %6970 = vrsqrt.f32 %v778_v30  ;;  %v833_v61 = vmul.f32 %v7853_v28, %v803_v53 }
 0x15b   : > { %v6961_v63 = vpop.eup %6960  ;;  %v779_v2 = vadd.f32 1e-06, %v763_v58  ;;  %v834_v48 = vmul.f32 %v7853_v28, %v804_v60 }
 0x15c   : > { %v780_v3 = vadd.f32 1e-06, %v764_v59  ;;  %v6963_v4 = vpop.eup %6962  ;;  %v745_v5 = vpop.xlane.xlu1 %744  ;;  %v859_v10 = vadd.f32 %v7858_v55, %v833_v61  ;;  %v805_v11 = vmul.f32 %v6961_v63, %v7760_v49  ;;  %v855_v63 = vrot.slane %v7860_v40, %v7849_v26 }
 0x15d   : > { %v747_v6 = vpop.xlane.xlu0 %746  ;;  %6972 = vrsqrt.f32 %v779_v2  ;;  %v765_v41 = vmul.f32 0.0078125, %v745_v5  ;;  %v806_v16 = vmul.f32 %v6963_v4, %v7766_v56  ;;  %v860_v23 = vadd.f32 %v7858_v55, %v834_v48 }
 0x15e   : > { %v766_v13 = vmul.f32 0.0078125, %v747_v6  ;;  %6974 = vrsqrt.f32 %v780_v3  ;;  %v874_v14 = vpack.c.bf16 %v859_v10, %v858_v7  ;;  %v835_v15 = vmul.f32 %v7853_v28, %v805_v11 }
 0x15f   : > { %v6965_v18 = vpop.eup %6964  ;;  %v781_v21 = vadd.f32 1e-06, %v765_v41  ;;  %v836_v35 = vmul.f32 %v7853_v28, %v806_v16 }
 0x160   : > { %v782_v22 = vadd.f32 1e-06, %v766_v13  ;;  %v6967_v24 = vpop.eup %6966  ;;  %v749_v25 = vpop.xlane.xlu1 %748  ;;  %1092 = vmatmul.mubr.bf16.vlgmr.msra.gmra.mrb[0].mxu0 %v874_v14  ;;  %6467 = vmatprep.mubr.bf16.mxu1 %v874_v14  ;;  %v861_v32 = vadd.f32 %v7858_v55, %v835_v15  ;;  %v807_v34 = vmul.f32 %v6965_v18, %v7768_v57 }
 0x161   : > { %v751_v49 = vpop.xlane.xlu0 %750  ;;  %6976 = vrsqrt.f32 %v781_v21  ;;  %v767_v37 = vmul.f32 0.0078125, %v749_v25  ;;  %1101 = vmatprep.mubr.bf16.mxu0 %v10391_v62  ;;  %v808_v38 = vmul.f32 %v6967_v24, %v7775_v0  ;;  %v862_v30 = vadd.f32 %v7858_v55, %v836_v35 }
 0x162   : > { %v768_v56 = vmul.f32 0.0078125, %v751_v49  ;;  %6978 = vrsqrt.f32 %v782_v22  ;;  %v875_v39 = vpack.c.bf16 %v861_v32, %v860_v23  ;;  %v837_v42 = vmul.f32 %v7853_v28, %v807_v34 }
 0x163   : > { %v6969_v43 = vpop.eup %6968  ;;  %v783_v45 = vadd.f32 1e-06, %v767_v37  ;;  %v838_v47 = vmul.f32 %v7853_v28, %v808_v38  ;;  %v829_v0 = vrot.slane %v819_v36, %v7849_v26 }
 0x164   : > { %v784_v46 = vadd.f32 1e-06, %v768_v56  ;;  %v6971_v57 = vpop.eup %6970  ;;  %v753_v50 = vpop.xlane.xlu1 %752  ;;  %6468 = vmatmul.mubr.bf16.vlgmr.msra.gmra.mrb[0].mxu1 %v875_v39  ;;  %v863_v31 = vadd.f32 %v7858_v55, %v837_v42  ;;  %v809_v51 = vmul.f32 %v6969_v43, %v7778_v1  ;;  %v10390_v56 = vsub.s32 2, %v7846_v17 }
 0x165   : > { %6980 = vrsqrt.f32 %v783_v45  ;;  %v769_v52 = vmul.f32 0.0078125, %v753_v50  ;;  %v810_v53 = vmul.f32 %v6971_v57, %v7785_v8  ;;  %v864_v61 = vadd.f32 %v7858_v55, %v838_v47 }
 0x166   : > { %6982 = vrsqrt.f32 %v784_v46  ;;  %v876_v54 = vpack.c.bf16 %v863_v31, %v862_v30  ;;  %v839_v58 = vmul.f32 %v7853_v28, %v809_v51 }
 0x167   : > { %v6973_v59 = vpop.eup %6972  ;;  %v785_v60 = vadd.f32 1e-06, %v769_v52  ;;  %v840_v48 = vmul.f32 %v829_v0, %v810_v53 }
 0x168   : > { %v6975_v2 = vpop.eup %6974  ;;  %1102 = vmatmul.mubr.bf16.gmra.mrb[4].mxu0 %v875_v39  ;;  %6471 = vmatprep.mubr.bf16.mxu1 %v876_v54  ;;  %v865_v1 = vadd.f32 %v7858_v55, %v839_v58  ;;  %v811_v3 = vmul.f32 %v6973_v59, %v7788_v9 }
 0x169   : > { %6984 = vrsqrt.f32 %v785_v60  ;;  %1111 = vmatprep.mubr.bf16.mxu0 %v10391_v62  ;;  %v812_v8 = vmul.f32 %v6975_v2, %v7798_v19  ;;  %v866_v10 = vadd.f32 %v855_v63, %v840_v48 }
 0x16a   : > { %v877_v28 = vpack.c.bf16 %v865_v1, %v864_v61  ;;  %v841_v4 = vmul.f32 %v829_v0, %v811_v3 }
 0x16b   : > { %v6977_v5 = vpop.eup %6976  ;;  %v842_v6 = vmul.f32 %v829_v0, %v812_v8 }
 0x16c   : > { %v6979_v7 = vpop.eup %6978  ;;  %6472 = vmatmul.mubr.bf16.gmra.mrb[4].mxu1 %v877_v28  ;;  %v867_v11 = vadd.f32 %v855_v63, %v841_v4  ;;  %v813_v12 = vmul.f32 %v6977_v5, %v7801_v20 }
 0x16d   : > { %v814_v55 = vmul.f32 %v6979_v7, %v7809_v27  ;;  %v868_v14 = vadd.f32 %v855_v63, %v842_v6 }
 0x16e   : > { %v878_v41 = vpack.c.bf16 %v867_v11, %v866_v10  ;;  %v843_v9 = vmul.f32 %v829_v0, %v813_v12 }
 0x16f   : > { %v6981_v13 = vpop.eup %6980  ;;  %v844_v18 = vmul.f32 %v829_v0, %v814_v55 }
 0x170   : > { %v6983_v15 = vpop.eup %6982  ;;  %1112 = vmatmul.mubr.bf16.gmra.mrb[8].mxu0 %v876_v54  ;;  %6475 = vmatprep.mubr.bf16.mxu1 %v878_v41  ;;  %v869_v19 = vadd.f32 %v855_v63, %v843_v9  ;;  %v815_v16 = vmul.f32 %v6981_v13, %v7812_v33 }
 0x171   : > { %1121 = vmatprep.mubr.bf16.mxu0 %v10391_v62  ;;  %v816_v21 = vmul.f32 %v6983_v15, %v7822_v29  ;;  %v870_v27 = vadd.f32 %v855_v63, %v844_v18  ;;  %v914_v29 = vld [vmem:[%s7549_s19] sm:$0x7]  ;;  %s7446_s19 = smov 64  }
 0x172   : > { %v879_v22 = vpack.c.bf16 %v869_v19, %v868_v14  ;;  %v845_v23 = vmul.f32 %v829_v0, %v815_v16  ;;  %v7905_v37 = vrot.slane %v914_v29, %v7849_v26  ;;  %v7916_v57 = vrot.slane %v914_v29, %v10390_v56 }
 0x173   : > { %v6985_v20 = vpop.eup %6984  ;;  %v846_v49 = vmul.f32 %v829_v0, %v816_v21 }
 0x174   : > { %6476 = vmatmul.mubr.bf16.gmra.mrb[8].mxu1 %v879_v22  ;;  %v871_v24 = vadd.f32 %v855_v63, %v845_v23  ;;  %v817_v25 = vmul.f32 %v6985_v20, %v7825_v44  ;;  %v10389_v44 = vsub.s32 1, %v7846_v17 }
 0x175   : > { %v872_v33 = vadd.f32 %v855_v63, %v846_v49 }
 0x176   : > { %v880_v32 = vpack.c.bf16 %v871_v24, %v870_v27  ;;  %v847_v34 = vmul.f32 %v829_v0, %v817_v25  ;;  %v7910_v39 = vrot.slane %v914_v29, %v10389_v44 }
 0x178   : > { %1122 = vmatmul.mubr.bf16.gmra.mrb[12].mxu0 %v877_v28  ;;  %6479 = vmatprep.mubr.bf16.mxu1 %v880_v32  ;;  %v873_v35 = vadd.f32 %v855_v63, %v847_v34 }
 0x179   : > { %1131 = vmatprep.mubr.bf16.mxu0 %v10391_v62 }
 0x17a   : > { %v881_v36 = vpack.c.bf16 %v873_v35, %v872_v33 }
 0x17c   : > { %6480 = vmatmul.mubr.bf16.gmra.mrb[12].mxu1 %v881_v36 }
 0x180   : > { %1132 = vmatmul.mubr.bf16.gmra.mrb[16].mxu0 %v878_v41 }
 0x181   : > { %1141 = vmatprep.mubr.bf16.mxu0 %v10391_v62 }
 0x188   : > { %1142 = vmatmul.mubr.bf16.gmra.mrb[20].mxu0 %v879_v22 }
 0x189   : > { %1151 = vmatprep.mubr.bf16.mxu0 %v10391_v62 }
 0x190   : > { %1152 = vmatmul.mubr.bf16.gmra.mrb[24].mxu0 %v880_v32 }
 0x191   : > { %1161 = vmatprep.mubr.bf16.mxu0 %v10391_v62 }
 0x198   : > { %1162 = vmatmul.mubr.bf16.gmra.mrb[28].mxu0 %v881_v36 }
 0x233   : > { %v1093_v38 = vpop.f32.mrb[0].mxu0 }
 0x234   : > { %v1095_v42 = vpop.f32.mrb[1].mxu0  ;;  %v1094_v45 = vadd.f32 %v1093_v38, %v7905_v37 }
 0x235   : > { %v1097_v43 = vpop.f32.mrb[2].mxu0  ;;  %v1096_v50 = vadd.f32 %v1095_v42, %v7910_v39 }
 0x236   : > { %v1098_v46 = vadd.f32 %v1097_v43, %v7905_v37  ;;  %v1099_v47 = vpop.f32.mrb[3].mxu0 }
 0x237   : > { %v1100_v30 = vadd.f32 %v1099_v47, %v7910_v39  ;;  %v6469_v31 = vpop.f32.mrb[0].mxu1 }
 0x238   : > { %v7920_v51 = vpack.c.bf16 %v1098_v46, %v1094_v45  ;;  %v1206_v0 = vpop.f32.mrb[1].mxu1  ;;  %v1215_v54 = vadd.f32 %v6469_v31, %v7916_v57 }
 0x239   : > { %v7922_v52 = vpack.c.bf16 %v1100_v30, %v1096_v50  ;;  %v6470_v53 = vpop.f32.mrb[2].mxu1  ;;  %v1207_v60 = vadd.f32 %v1206_v0, %v7916_v57 }
 0x23a   : > { %v1218_v58 = vadd.f32 %v6470_v53, %v7916_v57  ;;  %v1209_v59 = vpop.f32.mrb[3].mxu1  ;;  %6491 = vmatprep.mubr.msk.bf16.mxu1 %vm1293_vm0, %v7920_v51 }
 0x23b   : > { %v1210_v61 = vadd.f32 %v1209_v59, %v7916_v57  ;;  %1859 = vrot.lane.b32.xlu0 %v7922_v52, %s7445_s30  ;;  %v1103_v63 = vpop.f32.mrb[4].mxu0  ;;  %6771 = vmatprep.subr.msk.bf16.mxu1 %vm1293_vm0, %v7922_v52  ;;  %v1307_v2 = vsel %vm1293_vm0, %v7922_v52, 0 }
 0x23c   : > { %v7936_v1 = vpack.c.bf16 %v1218_v58, %v1215_v54  ;;  %v1105_v3 = vpop.f32.mrb[5].mxu0  ;;  %6484 = vmatpush3.bf16.xpose.msra.mxu1 %v1307_v2  ;;  %v1104_v28 = vadd.f32 %v1103_v63, %v7905_v37 }
 0x23d   : > { %v7938_v48 = vpack.c.bf16 %v1210_v61, %v1207_v60  ;;  %v1107_v8 = vpop.f32.mrb[6].mxu0  ;;  %v1106_v6 = vadd.f32 %v1105_v3, %v7910_v39 }
 0x23e   : > { %v1108_v4 = vadd.f32 %v1107_v8, %v7905_v37  ;;  %v1109_v5 = vpop.f32.mrb[7].mxu0 }
 0x23f   : > { %v1110_v7 = vadd.f32 %v1109_v5, %v7910_v39  ;;  %v6473_v10 = vpop.f32.mrb[4].mxu1 }
 0x240   : > { %v7944_v11 = vpack.c.bf16 %v1108_v4, %v1104_v28  ;;  %v1222_v12 = vpop.f32.mrb[5].mxu1  ;;  %v1231_v9 = vadd.f32 %v6473_v10, %v7916_v57 }
 0x241   : > { %v7946_v55 = vpack.c.bf16 %v1110_v7, %v1106_v6  ;;  %v6474_v41 = vpop.f32.mrb[6].mxu1  ;;  %v1223_v15 = vadd.f32 %v1222_v12, %v7916_v57 }
 0x242   : > { %v1234_v13 = vadd.f32 %v6474_v41, %v7916_v57  ;;  %v1225_v14 = vpop.f32.mrb[7].mxu1 }
 0x243   : > { %v1226_v19 = vadd.f32 %v1225_v14, %v7916_v57  ;;  %1861 = vrot.lane.b32.xlu1 %v7946_v55, %s7445_s30  ;;  %v1113_v16 = vpop.f32.mrb[8].mxu0  ;;  %6772 = vmatprep.subr.msk.bf16.mxu1 %vm1293_vm0, %v7946_v55  ;;  %v1310_v18 = vsel %vm1293_vm0, %v7946_v55, 0 }
 0x244   : > { %v7958_v21 = vpack.c.bf16 %v1234_v13, %v1231_v9  ;;  %v1115_v22 = vpop.f32.mrb[9].mxu0  ;;  %6486 = vmatpush3.bf16.xpose.msra.mxu1 %v1310_v18  ;;  %v1114_v27 = vadd.f32 %v1113_v16, %v7905_v37 }
 0x245   : > { %v7960_v23 = vpack.c.bf16 %v1226_v19, %v1223_v15  ;;  %v1117_v20 = vpop.f32.mrb[10].mxu0  ;;  %v1116_v49 = vadd.f32 %v1115_v22, %v7910_v39 }
 0x246   : > { %v1118_v24 = vadd.f32 %v1117_v20, %v7905_v37  ;;  %v1119_v25 = vpop.f32.mrb[11].mxu0 }
 0x247   : > { %v1120_v32 = vadd.f32 %v1119_v25, %v7910_v39  ;;  %v6477_v34 = vpop.f32.mrb[8].mxu1 }
 0x248   : > { %v7966_v33 = vpack.c.bf16 %v1118_v24, %v1114_v27  ;;  %v1247_v35 = vadd.f32 %v6477_v34, %v7916_v57  ;;  %v1238_v36 = vpop.f32.mrb[9].mxu1 }
 0x249   : > { %v7969_v29 = vpack.c.bf16 %v1120_v32, %v1116_v49  ;;  %v6478_v38 = vpop.f32.mrb[10].mxu1  ;;  %v1239_v45 = vadd.f32 %v1238_v36, %v7916_v57 }
 0x24a   : > { %v1250_v42 = vadd.f32 %v6478_v38, %v7916_v57  ;;  %v1241_v43 = vpop.f32.mrb[11].mxu1 }
 0x24b   : > { %v1242_v46 = vadd.f32 %v1241_v43, %v7916_v57  ;;  %1863 = vrot.lane.b32.xlu0 %v7969_v29, %s7445_s30  ;;  %v1123_v47 = vpop.f32.mrb[12].mxu0  ;;  %6773 = vmatprep.subr.msk.bf16.mxu1 %vm1293_vm0, %v7969_v29  ;;  %v1313_v50 = vsel %vm1293_vm0, %v7969_v29, 0 }
 0x24c   : > { %v7980_v30 = vpack.c.bf16 %v1250_v42, %v1247_v35  ;;  %v1125_v31 = vpop.f32.mrb[13].mxu0  ;;  %6488 = vmatpush3.bf16.xpose.msra.mxu1 %v1313_v50  ;;  %v1124_v54 = vadd.f32 %v1123_v47, %v7905_v37 }
 0x24d   : > { %v7982_v0 = vpack.c.bf16 %v1242_v46, %v1239_v45  ;;  %v1127_v53 = vpop.f32.mrb[14].mxu0  ;;  %v1126_v60 = vadd.f32 %v1125_v31, %v7910_v39 }
 0x24e   : > { %v1128_v58 = vadd.f32 %v1127_v53, %v7905_v37  ;;  %v1129_v59 = vpop.f32.mrb[15].mxu0 }
 0x24f   : > { %v1130_v61 = vadd.f32 %v1129_v59, %v7910_v39  ;;  %v6481_v63 = vpop.f32.mrb[12].mxu1 }
 0x250   : > { %v7988_v2 = vpack.c.bf16 %v1128_v58, %v1124_v54  ;;  %v1263_v3 = vadd.f32 %v6481_v63, %v7916_v57  ;;  %v1254_v8 = vpop.f32.mrb[13].mxu1 }
 0x251   : > { %v7991_v28 = vpack.c.bf16 %v1130_v61, %v1126_v60  ;;  %v1255_v4 = vadd.f32 %v1254_v8, %v7916_v57  ;;  %v6482_v5 = vpop.f32.mrb[14].mxu1 }
 0x252   : > { %v1266_v6 = vadd.f32 %v6482_v5, %v7916_v57  ;;  %v1257_v7 = vpop.f32.mrb[15].mxu1 }
 0x253   : > { %v1258_v10 = vadd.f32 %v1257_v7, %v7916_v57  ;;  %1865 = vrot.lane.b32.xlu1 %v7991_v28, %s7445_s30  ;;  %v1133_v12 = vpop.f32.mrb[16].mxu0  ;;  %6774 = vmatprep.subr.msk.bf16.mxu1 %vm1293_vm0, %v7991_v28  ;;  %v1316_v41 = vsel %vm1293_vm0, %v7991_v28, 0 }
 0x254   : > { %v8002_v9 = vpack.c.bf16 %v1266_v6, %v1263_v3  ;;  %v1135_v13 = vpop.f32.mrb[17].mxu0  ;;  %6490 = vmatpush3.bf16.xpose.msra.mxu1 %v1316_v41  ;;  %v1134_v57 = vadd.f32 %v1133_v12, %v7905_v37 }
 0x255   : > { %v8004_v14 = vpack.c.bf16 %v1258_v10, %v1255_v4  ;;  %v1137_v15 = vpop.f32.mrb[18].mxu0  ;;  %6515 = vmatprep.subr.bf16.mxu1 %v7938_v48  ;;  %v1136_v18 = vadd.f32 %v1135_v13, %v7910_v39 }
 0x256   : > { %v1138_v19 = vadd.f32 %v1137_v15, %v7905_v37  ;;  %v1139_v16 = vpop.f32.mrb[19].mxu0 }
 0x257   : > { %v1140_v22 = vadd.f32 %v1139_v16, %v7910_v39 }
 0x258   : > { %v8011_v20 = vpack.c.bf16 %v1138_v19, %v1134_v57 }
 0x259   : > { %v8013_v27 = vpack.c.bf16 %v1140_v22, %v1136_v18 }
 0x25a   : > { %6507 = vmatprep.mubr.msk.bf16.mxu0 %vm1293_vm0, %v8011_v20 }
 0x25b   : > { %1972 = vrot.lane.b32.xlu1 %v8013_v27, %s7445_s30  ;;  %v1143_v24 = vpop.f32.mrb[20].mxu0  ;;  %6492 = vmatmul.mubr.msk.bf16.vlgmr.msra.gmra.mrb[16].mxu1 %vm1293_vm0, %v7944_v11  ;;  %v1396_v25 = vsel %vm1293_vm0, %v8013_v27, 0 }
 0x25c   : > { %v1144_v49 = vadd.f32 %v1143_v24, %v7905_v37  ;;  %6775 = vmatprep.subr.msk.bf16.mxu0 %vm1293_vm0, %v8013_v27  ;;  %v1145_v32 = vpop.f32.mrb[21].mxu0  ;;  %6495 = vmatprep.mubr.msk.bf16.mxu1 %vm1293_vm0, %v7966_v33 }
 0x25d   : > { %6500 = vmatpush3.bf16.xpose.msra.mxu0 %v1396_v25  ;;  %6516 = vmatpush3.bf16.msra.mxu1 %v7938_v48  ;;  %v1147_v34 = vpop.f32.mrb[22].mxu0  ;;  %v1146_v38 = vadd.f32 %v1145_v32, %v7910_v39 }
 0x25e   : > { %v1148_v35 = vadd.f32 %v1147_v34, %v7905_v37  ;;  %6517 = vmatprep.subr.bf16.mxu1 %v7936_v1  ;;  %v1149_v36 = vpop.f32.mrb[23].mxu0 }
 0x25f   : > { %v1150_v42 = vadd.f32 %v1149_v36, %v7910_v39 }
 0x260   : > { %v8033_v43 = vpack.c.bf16 %v1148_v35, %v1144_v49 }
 0x261   : > { %v8035_v45 = vpack.c.bf16 %v1150_v42, %v1146_v38  ;;  %6518 = vmatpush3.bf16.msra.mxu1 %v7936_v1 }
 0x262   : > { %6519 = vmatprep.subr.bf16.mxu1 %v7960_v23 }
 0x263   : > { %1974 = vrot.lane.b32.xlu1 %v8035_v45, %s7445_s30  ;;  %v1153_v46 = vpop.f32.mrb[24].mxu0  ;;  %6496 = vmatmul.mubr.msk.bf16.gmra.mrb[20].mxu1 %vm1293_vm0, %v7988_v2  ;;  %v1399_v47 = vsel %vm1293_vm0, %v8035_v45, 0 }
 0x264   : > { %v1154_v50 = vadd.f32 %v1153_v46, %v7905_v37  ;;  %6776 = vmatprep.subr.msk.bf16.mxu0 %vm1293_vm0, %v8035_v45  ;;  %v1155_v31 = vpop.f32.mrb[25].mxu0 }
 0x265   : > { %6502 = vmatpush3.bf16.xpose.msra.mxu0 %v1399_v47  ;;  %6520 = vmatpush3.bf16.msra.mxu1 %v7960_v23  ;;  %v1157_v53 = vpop.f32.mrb[26].mxu0  ;;  %v1156_v59 = vadd.f32 %v1155_v31, %v7910_v39 }
 0x266   : > { %v1158_v54 = vadd.f32 %v1157_v53, %v7905_v37  ;;  %6521 = vmatprep.subr.bf16.mxu1 %v7958_v21  ;;  %v1159_v58 = vpop.f32.mrb[27].mxu0 }
 0x267   : > { %v1160_v60 = vadd.f32 %v1159_v58, %v7910_v39 }
 0x268   : > { %v8053_v61 = vpack.c.bf16 %v1158_v54, %v1154_v50 }
 0x269   : > { %v8055_v63 = vpack.c.bf16 %v1160_v60, %v1156_v59  ;;  %6522 = vmatpush3.bf16.msra.mxu1 %v7958_v21 }
 0x26a   : > { %6531 = vmatprep.subr.bf16.mxu1 %v7982_v0 }
 0x26b   : > { %v1163_v3 = vpop.f32.mrb[28].mxu0  ;;  %6777 = vmatprep.subr.msk.bf16.mxu0 %vm1293_vm0, %v8055_v63  ;;  %v1402_v8 = vsel %vm1293_vm0, %v8055_v63, 0 }
 0x26c   : > { %v1164_v4 = vadd.f32 %v1163_v3, %v7905_v37  ;;  %v1165_v5 = vpop.f32.mrb[29].mxu0 }
 0x26d   : > { %6504 = vmatpush3.bf16.xpose.msra.mxu0 %v1402_v8  ;;  %v1167_v6 = vpop.f32.mrb[30].mxu0  ;;  %v1166_v12 = vadd.f32 %v1165_v5, %v7910_v39 }
 0x26e   : > { %v1168_v7 = vadd.f32 %v1167_v6, %v7905_v37  ;;  %v1169_v10 = vpop.f32.mrb[31].mxu0 }
 0x26f   : > { %v1170_v41 = vadd.f32 %v1169_v10, %v7910_v39 }
 0x270   : > { %v8067_v13 = vpack.c.bf16 %v1168_v7, %v1164_v4 }
 0x271   : > { %v8069_v15 = vpack.c.bf16 %v1170_v41, %v1166_v12 }
 0x273   : > { %6778 = vmatprep.subr.msk.bf16.mxu0 %vm1293_vm0, %v8069_v15  ;;  %v1405_v57 = vsel %vm1293_vm0, %v8069_v15, 0 }
 0x275   : > { %6506 = vmatpush3.bf16.xpose.msra.mxu0 %v1405_v57 }
 0x27c   : > { %6508 = vmatmul.mubr.msk.bf16.vlgmr.msra.gmra.mrb[32].mxu0 %vm1293_vm0, %v8033_v43 }
 0x27d   : > { %6511 = vmatprep.mubr.msk.bf16.mxu0 %vm1293_vm0, %v8053_v61 }
 0x284   : > { %6512 = vmatmul.mubr.msk.bf16.gmra.mrb[36].mxu0 %vm1293_vm0, %v8067_v13 }
 0x2ad   : > { %v1860_v37 = vpop.permute.xlu0 %1859 }
 0x2ae   : > { %6779 = vmatprep.subr.msk.bf16.mxu0 %vm1293_vm0, %v1860_v37  ;;  %v1880_v39 = vsel %vm1293_vm0, %v1860_v37, 0 }
 0x2af   : > { %6548 = vmatpush3.bf16.xpose.msra.mxu0 %v1880_v39 }
 0x2b5   : > { %v1862_v19 = vpop.permute.xlu1 %1861 }
 0x2b6   : > { %6780 = vmatprep.subr.msk.bf16.mxu0 %vm1293_vm0, %v1862_v19  ;;  %v1883_v16 = vsel %vm1293_vm0, %v1862_v19, 0 }
 0x2b7   : > { %6550 = vmatpush3.bf16.xpose.msra.mxu0 %v1883_v16 }
 0x2bd   : > { %v1864_v18 = vpop.permute.xlu0 %1863 }
 0x2be   : > { %6781 = vmatprep.subr.msk.bf16.mxu0 %vm1293_vm0, %v1864_v18  ;;  %v1886_v22 = vsel %vm1293_vm0, %v1864_v18, 0 }
 0x2bf   : > { %6552 = vmatpush3.bf16.xpose.msra.mxu0 %v1886_v22 }
 0x2c5   : > { %v1866_v24 = vpop.permute.xlu1 %1865 }
 0x2c6   : > { %6782 = vmatprep.subr.msk.bf16.mxu0 %vm1293_vm0, %v1866_v24  ;;  %v1889_v25 = vsel %vm1293_vm0, %v1866_v24, 0 }
 0x2c7   : > { %6554 = vmatpush3.bf16.xpose.msra.mxu0 %v1889_v25 }
 0x32e   : > { %v6493_v49 = vpop.f32.mrb[16].mxu1 }
 0x32f   : > { %v8089_v32 = vmul.f32 0.17677669, %v6493_v49  ;;  %v1352_v34 = vpop.f32.mrb[17].mxu1 }
 0x330   : > { %v6494_v35 = vpop.f32.mrb[18].mxu1  ;;  %v8091_v36 = vmul.f32 0.17677669, %v1352_v34 }
 0x331   : > { %v8093_v38 = vmul.f32 0.17677669, %v6494_v35  ;;  %v1355_v42 = vpop.f32.mrb[19].mxu1  ;;  %v1495_v46 = vsel %vm1488_vm1, %v8089_v32, -inf }
 0x332   : > { %1496 = vmax.xlane.f32.xlu0 %v1495_v46  ;;  %v8097_v47 = vmul.f32 0.17677669, %v1355_v42  ;;  %v1489_v31 = vsel %vm1488_vm1, %v8091_v36, -inf }
 0x333   : > { %v1498_v50 = vsel %vm1488_vm1, %v8093_v38, -inf }
 0x334   : > { %1499 = vmax.xlane.f32.xlu1 %v1498_v50  ;;  %v1492_v59 = vsel %vm1488_vm1, %v8097_v47, -inf }
 0x336   : > { %1490 = vmax.xlane.f32.xlu0 %v1489_v31  ;;  %v6497_v53 = vpop.f32.mrb[20].mxu1 }
 0x337   : > { %v8103_v54 = vmul.f32 0.17677669, %v6497_v53  ;;  %v1368_v58 = vpop.f32.mrb[21].mxu1 }
 0x338   : > { %1493 = vmax.xlane.f32.xlu1 %v1492_v59  ;;  %v6498_v60 = vpop.f32.mrb[22].mxu1  ;;  %v8107_v3 = vmul.f32 0.17677669, %v1368_v58 }
 0x339   : > { %v8109_v8 = vmul.f32 0.17677669, %v6498_v60  ;;  %v1371_v4 = vpop.f32.mrb[23].mxu1  ;;  %v1507_v5 = vsel %vm1488_vm1, %v8103_v54, -inf }
 0x33a   : > { %1508 = vmax.xlane.f32.xlu0 %v1507_v5  ;;  %v8113_v6 = vmul.f32 0.17677669, %v1371_v4  ;;  %v1501_v10 = vsel %vm1488_vm1, %v8107_v3, -inf }
 0x33b   : > { %v1510_v7 = vsel %vm1488_vm1, %v8109_v8, -inf }
 0x33c   : > { %1511 = vmax.xlane.f32.xlu1 %v1510_v7  ;;  %v1504_v12 = vsel %vm1488_vm1, %v8113_v6, -inf }
 0x33e   : > { %1502 = vmax.xlane.f32.xlu0 %v1501_v10  ;;  %v8157_v10 = vpop.permute.xlu1 %1972 }
 0x340   : > { %1505 = vmax.xlane.f32.xlu1 %v1504_v12 }
 0x342   : > { %v8159_v12 = vpop.permute.xlu1 %1974 }
 0x34f   : > { %v6509_v41 = vpop.f32.mrb[32].mxu0 }
 0x350   : > { %v8121_v57 = vmul.f32 0.17677669, %v6509_v41  ;;  %v1441_v37 = vpop.f32.mrb[33].mxu0 }
 0x351   : > { %v6510_v39 = vpop.f32.mrb[34].mxu0  ;;  %v8123_v19 = vmul.f32 0.17677669, %v1441_v37 }
 0x352   : > { %v8125_v16 = vmul.f32 0.17677669, %v6510_v39  ;;  %v1444_v18 = vpop.f32.mrb[35].mxu0  ;;  %v1519_v22 = vsel %vm1488_vm1, %v8121_v57, -inf }
 0x353   : > { %1520 = vmax.xlane.f32.xlu0 %v1519_v22  ;;  %v8129_v24 = vmul.f32 0.17677669, %v1444_v18  ;;  %v1513_v49 = vsel %vm1488_vm1, %v8123_v19, -inf }
 0x354   : > { %v1522_v25 = vsel %vm1488_vm1, %v8125_v16, -inf }
 0x355   : > { %1523 = vmax.xlane.f32.xlu1 %v1522_v25  ;;  %v1516_v46 = vsel %vm1488_vm1, %v8129_v24, -inf }
 0x357   : > { %1514 = vmax.xlane.f32.xlu0 %v1513_v49  ;;  %v6513_v34 = vpop.f32.mrb[36].mxu0 }
 0x358   : > { %v8135_v35 = vmul.f32 0.17677669, %v6513_v34  ;;  %v1457_v42 = vpop.f32.mrb[37].mxu0 }
 0x359   : > { %1517 = vmax.xlane.f32.xlu1 %v1516_v46  ;;  %v6514_v50 = vpop.f32.mrb[38].mxu0  ;;  %v8139_v31 = vmul.f32 0.17677669, %v1457_v42 }
 0x35a   : > { %v8141_v53 = vmul.f32 0.17677669, %v6514_v50  ;;  %v1460_v58 = vpop.f32.mrb[39].mxu0  ;;  %v1531_v59 = vsel %vm1488_vm1, %v8135_v35, -inf }
 0x35b   : > { %1532 = vmax.xlane.f32.xlu0 %v1531_v59  ;;  %v8145_v60 = vmul.f32 0.17677669, %v1460_v58  ;;  %v1525_v5 = vsel %vm1488_vm1, %v8139_v31, -inf }
 0x35c   : > { %v1534_v4 = vsel %vm1488_vm1, %v8141_v53, -inf }
 0x35d   : > { %1535 = vmax.xlane.f32.xlu1 %v1534_v4  ;;  %v1528_v7 = vsel %vm1488_vm1, %v8145_v60, -inf }
 0x35f   : > { %1526 = vmax.xlane.f32.xlu0 %v1525_v5 }
 0x361   : > { %1529 = vmax.xlane.f32.xlu1 %v1528_v7 }
 0x372   : > { %1849 = vrot.lane.b32.xlu1 %v7944_v11, %s7445_s30 }
 0x375   : > { %1847 = vrot.lane.b32.xlu0 %v7920_v51, %s7445_s30 }
 0x3bf   : > { %v1497_v41 = vpop.xlane.xlu0 %1496 }
 0x3c0   : > { %v1539_v37 = vsub.f32 %v8089_v32, %v1497_v41 }
 0x3c1   : > { %v1500_v39 = vpop.xlane.xlu1 %1499 }
 0x3c2   : > { %v1557_v18 = vmul.f32 1.442695, %v1539_v37  ;;  %v1540_v22 = vsub.f32 %v8093_v38, %v1500_v39 }
 0x3c3   : > { %v1491_v25 = vpop.xlane.xlu0 %1490 }
 0x3c4   : > { %6986 = vpow2.f32 %v1557_v18  ;;  %v1559_v49 = vmul.f32 1.442695, %v1540_v22  ;;  %v1537_v34 = vsub.f32 %v8091_v36, %v1491_v25 }
 0x3c5   : > { %v1494_v42 = vpop.xlane.xlu1 %1493 }
 0x3c6   : > { %6988 = vpow2.f32 %v1559_v49  ;;  %v1553_v46 = vmul.f32 1.442695, %v1537_v34  ;;  %v1538_v50 = vsub.f32 %v8097_v47, %v1494_v42 }
 0x3c7   : > { %v1509_v58 = vpop.xlane.xlu0 %1508 }
 0x3c8   : > { %6990 = vpow2.f32 %v1553_v46  ;;  %v1555_v59 = vmul.f32 1.442695, %v1538_v50  ;;  %v1543_v4 = vsub.f32 %v8103_v54, %v1509_v58 }
 0x3c9   : > { %v1512_v32 = vpop.xlane.xlu1 %1511 }
 0x3ca   : > { %6992 = vpow2.f32 %v1555_v59  ;;  %v1565_v5 = vmul.f32 1.442695, %v1543_v4  ;;  %v1544_v38 = vsub.f32 %v8109_v8, %v1512_v32 }
 0x3cb   : > { %v1503_v7 = vpop.xlane.xlu0 %1502 }
 0x3cc   : > { %6994 = vpow2.f32 %v1565_v5  ;;  %v1567_v41 = vmul.f32 1.442695, %v1544_v38  ;;  %v1541_v36 = vsub.f32 %v8107_v3, %v1503_v7 }
 0x3cd   : > { %v1506_v37 = vpop.xlane.xlu1 %1505 }
 0x3ce   : > { %v8168_v39 = vpop.eup %6986  ;;  %6996 = vpow2.f32 %v1567_v41  ;;  %v1561_v47 = vmul.f32 1.442695, %v1541_v36  ;;  %v1542_v18 = vsub.f32 %v8113_v6, %v1506_v37 }
 0x3cf   : > { %v1591_v54 = vsel %vm1488_vm1, %v8168_v39, 0.0 }
 0x3d0   : > { %v8173_v22 = vpop.eup %6988  ;;  %6998 = vpow2.f32 %v1561_v47  ;;  %v1563_v25 = vmul.f32 1.442695, %v1542_v18  ;;  %1592 = vadd.xlane.f32.xlu0 %v1591_v54 }
 0x3d1   : > { %v1594_v8 = vsel %vm1488_vm1, %v8173_v22, 0.0 }
 0x3d2   : > { %v8177_v49 = vpop.eup %6990  ;;  %7000 = vpow2.f32 %v1563_v25  ;;  %1595 = vadd.xlane.f32.xlu1 %v1594_v8 }
 0x3d3   : > { %v1585_v3 = vsel %vm1488_vm1, %v8177_v49, 0.0 }
 0x3d4   : > { %v8181_v34 = vpop.eup %6992  ;;  %1586 = vadd.xlane.f32.xlu0 %v1585_v3 }
 0x3d5   : > { %v1588_v6 = vsel %vm1488_vm1, %v8181_v34, 0.0 }
 0x3d6   : > { %v8185_v42 = vpop.eup %6994  ;;  %1589 = vadd.xlane.f32.xlu1 %v1588_v6 }
 0x3d7   : > { %v1603_v46 = vsel %vm1488_vm1, %v8185_v42, 0.0 }
 0x3d8   : > { %v8189_v50 = vpop.eup %6996  ;;  %1604 = vadd.xlane.f32.xlu0 %v1603_v46 }
 0x3d9   : > { %v1606_v58 = vsel %vm1488_vm1, %v8189_v50, 0.0 }
 0x3da   : > { %v8193_v59 = vpop.eup %6998  ;;  %1607 = vadd.xlane.f32.xlu1 %v1606_v58 }
 0x3db   : > { %v1597_v4 = vsel %vm1488_vm1, %v8193_v59, 0.0 }
 0x3dc   : > { %v8197_v32 = vpop.eup %7000  ;;  %1598 = vadd.xlane.f32.xlu0 %v1597_v4 }
 0x3dd   : > { %v1600_v5 = vsel %vm1488_vm1, %v8197_v32, 0.0 }
 0x3de   : > { %1601 = vadd.xlane.f32.xlu1 %v1600_v5 }
 0x3e0   : > { %v1521_v38 = vpop.xlane.xlu0 %1520 }
 0x3e1   : > { %v1547_v7 = vsub.f32 %v8121_v57, %v1521_v38 }
 0x3e2   : > { %v1524_v41 = vpop.xlane.xlu1 %1523 }
 0x3e3   : > { %v1573_v36 = vmul.f32 1.442695, %v1547_v7  ;;  %v1548_v37 = vsub.f32 %v8125_v16, %v1524_v41 }
 0x3e4   : > { %v1515_v47 = vpop.xlane.xlu0 %1514 }
 0x3e5   : > { %7002 = vpow2.f32 %v1573_v36  ;;  %v1575_v18 = vmul.f32 1.442695, %v1548_v37  ;;  %v1545_v54 = vsub.f32 %v8123_v19, %v1515_v47 }
 0x3e6   : > { %v1518_v25 = vpop.xlane.xlu1 %1517 }
 0x3e7   : > { %7004 = vpow2.f32 %v1575_v18  ;;  %v1569_v8 = vmul.f32 1.442695, %v1545_v54  ;;  %v1546_v3 = vsub.f32 %v8129_v24, %v1518_v25 }
 0x3e8   : > { %v1533_v6 = vpop.xlane.xlu0 %1532 }
 0x3e9   : > { %7006 = vpow2.f32 %v1569_v8  ;;  %v1571_v46 = vmul.f32 1.442695, %v1546_v3  ;;  %v1551_v18 = vsub.f32 %v8135_v35, %v1533_v6 }
 0x3ea   : > { %v1536_v58 = vpop.xlane.xlu1 %1535 }
 0x3eb   : > { %7008 = vpow2.f32 %v1571_v46  ;;  %v1581_v25 = vmul.f32 1.442695, %v1551_v18  ;;  %v1552_v3 = vsub.f32 %v8141_v53, %v1536_v58 }
 0x3ec   : > { %v1527_v57 = vpop.xlane.xlu0 %1526 }
 0x3ed   : > { %v1549_v54 = vsub.f32 %v8139_v31, %v1527_v57  ;;  %7010 = vpow2.f32 %v1581_v25 }
 0x3ee   : > { %v1530_v4 = vpop.xlane.xlu1 %1529 }
 0x3ef   : > { %v8205_v5 = vpop.eup %7002  ;;  %v1550_v8 = vsub.f32 %v8145_v60, %v1530_v4  ;;  %v1577_v46 = vmul.f32 1.442695, %v1549_v54 }
 0x3f0   : > { %v1848_v16 = vpop.permute.xlu0 %1847  ;;  %v1615_v38 = vsel %vm1488_vm1, %v8205_v5, 0.0 }
 0x3f1   : > { %v8209_v7 = vpop.eup %7004  ;;  %1616 = vadd.xlane.f32.xlu0 %v1615_v38  ;;  %6555 = vmatprep.mubr.msk.bf16.mxu0 %vm1293_vm0, %v1848_v16  ;;  %v1579_v16 = vmul.f32 1.442695, %v1550_v8  ;;  %v1583_v38 = vmul.f32 1.442695, %v1552_v3  ;;  %7012 = vpow2.f32 %v1577_v46 }
 0x3f2   : > { %v1850_v19 = vpop.permute.xlu1 %1849  ;;  %v1618_v24 = vsel %vm1488_vm1, %v8209_v7, 0.0 }
 0x3f3   : > { %v8214_v41 = vpop.eup %7006  ;;  %1619 = vadd.xlane.f32.xlu1 %v1618_v24  ;;  %6556 = vmatmul.mubr.msk.bf16.vlgmr.msra.gmra.mrb[40].mxu0 %vm1293_vm0, %v1850_v19  ;;  %7014 = vpow2.f32 %v1579_v16 }
 0x3f4   : > { %v1609_v36 = vsel %vm1488_vm1, %v8214_v41, 0.0  ;;  %7016 = vpow2.f32 %v1583_v38 }
 0x3f5   : > { %v8219_v37 = vpop.eup %7008  ;;  %1610 = vadd.xlane.f32.xlu0 %v1609_v36 }
 0x3f6   : > { %v1612_v47 = vsel %vm1488_vm1, %v8219_v37, 0.0 }
 0x3f7   : > { %1613 = vadd.xlane.f32.xlu1 %v1612_v47  ;;  %v8231_v19 = vpop.eup %7010 }
 0x3f8   : > { %v1627_v35 = vsel %vm1488_vm1, %v8231_v19, 0.0 }
 0x3fb   : > { %v8233_v24 = vpop.eup %7012 }
 0x3fc   : > { %v1621_v53 = vsel %vm1488_vm1, %v8233_v24, 0.0 }
 0x3fd   : > { %v8237_v31 = vpop.eup %7014 }
 0x3fe   : > { %v8241_v60 = vpop.eup %7016  ;;  %v1624_v6 = vsel %vm1488_vm1, %v8237_v31, 0.0 }
 0x3ff   : > { %v1630_v58 = vsel %vm1488_vm1, %v8241_v60, 0.0 }
 0x408   : > { %1851 = vrot.lane.b32.xlu1 %v7966_v33, %s7445_s30 }
 0x40b   : > { %1976 = vrot.lane.b32.xlu0 %v8055_v63, %s7445_s30 }
 0x42a   : > { %1628 = vadd.xlane.f32.xlu0 %v1627_v35 }
 0x42c   : > { %1622 = vadd.xlane.f32.xlu1 %v1621_v53 }
 0x42e   : > { %1625 = vadd.xlane.f32.xlu0 %v1624_v6 }
 0x430   : > { %1631 = vadd.xlane.f32.xlu1 %v1630_v58 }
 0x441   : > { %1978 = vrot.lane.b32.xlu1 %v8069_v15, %s7445_s30 }
 0x444   : > { %1853 = vrot.lane.b32.xlu0 %v7988_v2, %s7445_s30 }
 0x445   : > { %1962 = vrot.lane.b32.xlu1 %v8033_v43, %s7445_s30 }
 0x448   : > { %1960 = vrot.lane.b32.xlu0 %v8011_v20, %s7445_s30 }
 0x449   : > { %1966 = vrot.lane.b32.xlu1 %v8067_v13, %s7445_s30 }
 0x44c   : > { %1964 = vrot.lane.b32.xlu0 %v8053_v61, %s7445_s30 }
 0x45d   : > { %v1593_v57 = vpop.xlane.xlu0 %1592 }
 0x45f   : > { %v1596_v4 = vpop.xlane.xlu1 %1595 }
 0x460   : > { %7018 = vrcp.f32 %v1596_v4 }
 0x461   : > { %v1587_v36 = vpop.xlane.xlu0 %1586 }
 0x462   : > { %7020 = vrcp.f32 %v1587_v36 }
 0x463   : > { %7022 = vrcp.f32 %v1593_v57  ;;  %v1590_v47 = vpop.xlane.xlu1 %1589 }
 0x464   : > { %7024 = vrcp.f32 %v1590_v47 }
 0x465   : > { %v1605_v18 = vpop.xlane.xlu0 %1604 }
 0x467   : > { %v1608_v54 = vpop.xlane.xlu1 %1607 }
 0x468   : > { %7026 = vrcp.f32 %v1608_v54 }
 0x469   : > { %v1599_v25 = vpop.xlane.xlu0 %1598 }
 0x46a   : > { %7028 = vrcp.f32 %v1599_v25  ;;  %v7019_v8 = vpop.eup %7018 }
 0x46b   : > { %7030 = vrcp.f32 %v1605_v18  ;;  %v1602_v3 = vpop.xlane.xlu1 %1601  ;;  %v1652_v35 = vmul.f32 %v7019_v8, %v8173_v22 }
 0x46c   : > { %v7021_v46 = vpop.eup %7020  ;;  %7032 = vrcp.f32 %v1602_v3 }
 0x46d   : > { %v7023_v16 = vpop.eup %7022  ;;  %v1649_v53 = vmul.f32 %v7021_v46, %v8177_v49 }
 0x46e   : > { %v7025_v38 = vpop.eup %7024  ;;  %v1651_v58 = vmul.f32 %v7023_v16, %v8168_v39 }
 0x46f   : > { %v1650_v6 = vmul.f32 %v7025_v38, %v8181_v34 }
 0x470   : > { %v1666_v4 = vpack.c.bf16 %v1652_v35, %v1651_v58 }
 0x471   : > { %v1665_v57 = vpack.c.bf16 %v1650_v6, %v1649_v53 }
 0x472   : > { %v7027_v36 = vpop.eup %7026 }
 0x473   : > { %6523 = vmatprep.mubr.msk.bf16.mxu1 %vm1488_vm1, %v1665_v57  ;;  %v1656_v22 = vmul.f32 %v7027_v36, %v8189_v50 }
 0x474   : > { %v7029_v47 = vpop.eup %7028  ;;  %6524 = vmatmul.mubr.msk.bf16.vlgmr.msra.gmra.mrb[24].mxu1 %vm1488_vm1, %v1666_v4 }
 0x475   : > { %v7031_v18 = vpop.eup %7030  ;;  %6532 = vmatpush3.bf16.msra.mxu1 %v7982_v0  ;;  %v1653_v49 = vmul.f32 %v7029_v47, %v8193_v59  ;;  %v1993_v47 = vsel %vm1293_vm0, %v8157_v10, 0 }
 0x476   : > { %v7033_v54 = vpop.eup %7032  ;;  %6533 = vmatprep.subr.bf16.mxu1 %v7980_v30  ;;  %v1655_v34 = vmul.f32 %v7031_v18, %v8185_v42 }
 0x477   : > { %v1654_v39 = vmul.f32 %v7033_v54, %v8197_v32 }
 0x478   : > { %v1668_v8 = vpack.c.bf16 %v1656_v22, %v1655_v34 }
 0x479   : > { %6534 = vmatpush3.bf16.msra.mxu1 %v7980_v30  ;;  %v1667_v25 = vpack.c.bf16 %v1654_v39, %v1653_v49 }
 0x47a   : > { %6535 = vmatprep.subr.bf16.mxu1 %v8004_v14 }
 0x47b   : > { %6527 = vmatprep.mubr.msk.bf16.mxu1 %vm1488_vm1, %v1667_v25 }
 0x47c   : > { %6528 = vmatmul.mubr.msk.bf16.gmra.mrb[28].mxu1 %vm1488_vm1, %v1668_v8 }
 0x47d   : > { %6536 = vmatpush3.bf16.msra.mxu1 %v8004_v14 }
 0x47e   : > { %6537 = vmatprep.subr.bf16.mxu1 %v8002_v9  ;;  %v1617_v50 = vpop.xlane.xlu0 %1616 }
 0x480   : > { %v1620_v59 = vpop.xlane.xlu1 %1619 }
 0x481   : > { %6538 = vmatpush3.bf16.msra.mxu1 %v8002_v9  ;;  %7034 = vrcp.f32 %v1620_v59 }
 0x482   : > { %6783 = vmatprep.subr.msk.bf16.mxu1 %vm1293_vm0, %v8157_v10  ;;  %v1611_v42 = vpop.xlane.xlu0 %1610 }
 0x483   : > { %7036 = vrcp.f32 %v1611_v42 }
 0x484   : > { %7038 = vrcp.f32 %v1617_v50  ;;  %v1614_v32 = vpop.xlane.xlu1 %1613 }
 0x485   : > { %7040 = vrcp.f32 %v1614_v32 }
 0x488   : > { %v1852_v3 = vpop.permute.xlu1 %1851 }
 0x489   : > { %6559 = vmatprep.mubr.msk.bf16.mxu0 %vm1293_vm0, %v1852_v3 }
 0x48b   : > { %v7035_v46 = vpop.eup %7034 }
 0x48c   : > { %v1660_v53 = vmul.f32 %v7035_v46, %v8209_v7  ;;  %v1996_v7 = vsel %vm1293_vm0, %v8159_v12, 0 }
 0x48d   : > { %v7037_v16 = vpop.eup %7036 }
 0x48e   : > { %v7039_v38 = vpop.eup %7038  ;;  %v1657_v6 = vmul.f32 %v7037_v16, %v8214_v41  ;;  %v1977_v41 = vpop.permute.xlu0 %1976 }
 0x48f   : > { %v7041_v35 = vpop.eup %7040  ;;  %v1659_v57 = vmul.f32 %v7039_v38, %v8205_v5  ;;  %v1999_v5 = vsel %vm1293_vm0, %v1977_v41, 0 }
 0x490   : > { %v1658_v58 = vmul.f32 %v7041_v35, %v8219_v37 }
 0x491   : > { %v1670_v36 = vpack.c.bf16 %v1660_v53, %v1659_v57 }
 0x492   : > { %v1669_v4 = vpack.c.bf16 %v1658_v58, %v1657_v6 }
 0x494   : > { %6539 = vmatprep.mubr.msk.bf16.mxu1 %vm1488_vm1, %v1669_v4 }
 0x495   : > { %6540 = vmatmul.mubr.msk.bf16.vlgmr.msra.gmra.mrb[32].mxu1 %vm1488_vm1, %v1670_v36 }
 0x496   : > { %6564 = vmatpush3.bf16.xpose.msra.mxu1 %v1993_v47 }
 0x497   : > { %6784 = vmatprep.subr.msk.bf16.mxu1 %vm1293_vm0, %v8159_v12 }
 0x49e   : > { %6566 = vmatpush3.bf16.xpose.msra.mxu1 %v1996_v7 }
 0x49f   : > { %6785 = vmatprep.subr.msk.bf16.mxu1 %vm1293_vm0, %v1977_v41 }
 0x4a6   : > { %6568 = vmatpush3.bf16.xpose.msra.mxu1 %v1999_v5 }
 0x4b7   : > { %v1629_v37 = vpop.xlane.xlu0 %1628 }
 0x4b9   : > { %v1623_v18 = vpop.xlane.xlu1 %1622 }
 0x4ba   : > { %7042 = vrcp.f32 %v1623_v18 }
 0x4bb   : > { %7044 = vrcp.f32 %v1629_v37  ;;  %v1626_v54 = vpop.xlane.xlu0 %1625 }
 0x4bc   : > { %7046 = vrcp.f32 %v1626_v54 }
 0x4bd   : > { %v1632_v10 = vpop.xlane.xlu1 %1631 }
 0x4be   : > { %7048 = vrcp.f32 %v1632_v10 }
 0x4bf   : > { %v1854_v22 = vpop.permute.xlu0 %1853 }
 0x4c0   : > { %6560 = vmatmul.mubr.msk.bf16.gmra.mrb[44].mxu0 %vm1293_vm0, %v1854_v22 }
 0x4c1   : > { %v1979_v49 = vpop.permute.xlu1 %1978 }
 0x4c2   : > { %6786 = vmatprep.subr.msk.bf16.mxu1 %vm1293_vm0, %v1979_v49  ;;  %v2002_v12 = vsel %vm1293_vm0, %v1979_v49, 0 }
 0x4c3   : > { %6570 = vmatpush3.bf16.xpose.msra.mxu1 %v2002_v12  ;;  %v1961_v4 = vpop.permute.xlu0 %1960 }
 0x4c4   : > { %v7043_v39 = vpop.eup %7042 }
 0x4c5   : > { %v7045_v34 = vpop.eup %7044  ;;  %v1661_v59 = vmul.f32 %v7043_v39, %v8233_v24  ;;  %v1963_v47 = vpop.permute.xlu1 %1962 }
 0x4c6   : > { %v7047_v25 = vpop.eup %7046  ;;  %v6557_v8 = vpop.f32.mrb[40].mxu0  ;;  %v1663_v35 = vmul.f32 %v7045_v34, %v8231_v19 }
 0x4c7   : > { %v1925_v50 = vpop.f32.mrb[41].mxu0  ;;  %v1662_v42 = vmul.f32 %v7047_v25, %v8237_v31  ;;  %v8304_v6 = vmul.f32 0.17677669, %v6557_v8  ;;  %v1965_v7 = vpop.permute.xlu0 %1964 }
 0x4c8   : > { %v7049_v32 = vpop.eup %7048  ;;  %v8300_v3 = vmul.f32 0.17677669, %v1925_v50  ;;  %v6558_v46 = vpop.f32.mrb[42].mxu0 }
 0x4c9   : > { %v1928_v16 = vpop.f32.mrb[43].mxu0  ;;  %v1671_v38 = vpack.c.bf16 %v1662_v42, %v1661_v59  ;;  %v1664_v53 = vmul.f32 %v7049_v32, %v8241_v60  ;;  %v8314_v19 = vmul.f32 0.17677669, %v6558_v46  ;;  %v2091_v60 = vsel %vm1488_vm1, %v8304_v6, -inf  ;;  %v1967_v41 = vpop.permute.xlu1 %1966 }
 0x4ca   : > { %v8306_v58 = vmul.f32 0.17677669, %v1928_v16  ;;  %v2085_v57 = vsel %vm1488_vm1, %v8300_v3, -inf }
 0x4cb   : > { %2086 = vmax.xlane.f32.xlu0 %v2085_v57  ;;  %6543 = vmatprep.mubr.msk.bf16.mxu1 %vm1488_vm1, %v1671_v38  ;;  %v1672_v24 = vpack.c.bf16 %v1664_v53, %v1663_v35  ;;  %v2094_v36 = vsel %vm1488_vm1, %v8314_v19, -inf }
 0x4cc   : > { %v2088_v31 = vsel %vm1488_vm1, %v8306_v58, -inf }
 0x4cd   : > { %2089 = vmax.xlane.f32.xlu1 %v2088_v31  ;;  %6544 = vmatmul.mubr.msk.bf16.gmra.mrb[36].mxu1 %vm1488_vm1, %v1672_v24 }
 0x4ce   : > { %6571 = vmatprep.mubr.msk.bf16.mxu1 %vm1293_vm0, %v1961_v4 }
 0x4cf   : > { %2092 = vmax.xlane.f32.xlu0 %v2091_v60 }
 0x4d3   : > { %2095 = vmax.xlane.f32.xlu0 %v2094_v36 }
 0x4d5   : > { %6572 = vmatmul.mubr.msk.bf16.vlgmr.msra.gmra.mrb[40].mxu1 %vm1293_vm0, %v1963_v47 }
 0x4d6   : > { %6575 = vmatprep.mubr.msk.bf16.mxu1 %vm1293_vm0, %v1965_v7 }
 0x4dd   : > { %6576 = vmatmul.mubr.msk.bf16.gmra.mrb[44].mxu1 %vm1293_vm0, %v1967_v41 }
 0x547   : > { %v6525_v5 = vpop.f32.mrb[24].mxu1 }
 0x548   : > { %v1719_v37 = vpop.f32.mrb[25].mxu1 }
 0x549   : > { %v6526_v18 = vpop.f32.mrb[26].mxu1 }
 0x54a   : > { %v1828_v54 = vpack.c.bf16 %v6526_v18, %v6525_v5  ;;  %v1722_v10 = vpop.f32.mrb[27].mxu1 }
 0x54b   : > { %v1827_v22 = vpack.c.bf16 %v1722_v10, %v1719_v37 }
 0x54c   : > { %1836 = vst.msk [vmem:[#allocation2 + $0x8] sm:$0xff] %vm1293_vm0, %v1828_v54 }
 0x54d   : > { %1835 = vst.msk [vmem:[#allocation2] sm:$0xff] %vm1293_vm0, %v1827_v22 }
 0x54f   : > { %v6529_v49 = vpop.f32.mrb[28].mxu1 }
 0x550   : > { %v1735_v12 = vpop.f32.mrb[29].mxu1 }
 0x551   : > { %v6530_v39 = vpop.f32.mrb[30].mxu1 }
 0x552   : > { %v1830_v34 = vpack.c.bf16 %v6530_v39, %v6529_v49  ;;  %v1738_v25 = vpop.f32.mrb[31].mxu1 }
 0x553   : > { %v1829_v8 = vpack.c.bf16 %v1738_v25, %v1735_v12 }
 0x554   : > { %1838 = vst.msk [vmem:[#allocation2 + $0x18] sm:$0xff] %vm1293_vm0, %v1830_v34 }
 0x555   : > { %1837 = vst.msk [vmem:[#allocation2 + $0x10] sm:$0xff] %vm1293_vm0, %v1829_v8 }
 0x568   : > { %v6541_v50 = vpop.f32.mrb[32].mxu1 }
 0x569   : > { %v1796_v59 = vpop.f32.mrb[33].mxu1 }
 0x56a   : > { %v6542_v42 = vpop.f32.mrb[34].mxu1 }
 0x56b   : > { %v1832_v32 = vpack.c.bf16 %v6542_v42, %v6541_v50  ;;  %v1799_v46 = vpop.f32.mrb[35].mxu1  ;;  %v2087_v42 = vpop.xlane.xlu0 %2086 }
 0x56c   : > { %v1831_v16 = vpack.c.bf16 %v1799_v46, %v1796_v59 }
 0x56d   : > { %1840 = vst.msk [vmem:[#allocation2 + $0x28] sm:$0xff] %vm1293_vm0, %v1832_v32 }
 0x56e   : > { %1839 = vst.msk [vmem:[#allocation2 + $0x20] sm:$0xff] %vm1293_vm0, %v1831_v16 }
 0x56f   : > { %v2093_v32 = vpop.xlane.xlu0 %2092 }
 0x573   : > { %v2096_v46 = vpop.xlane.xlu0 %2095 }
 0x574   : > { %v2136_v16 = vsub.f32 %v8314_v19, %v2096_v46 }
 0x593   : > { %v6561_v38 = vpop.f32.mrb[44].mxu0 }
 0x594   : > { %v1941_v35 = vpop.f32.mrb[45].mxu0  ;;  %v8332_v31 = vmul.f32 0.17677669, %v6561_v38  ;;  %v2090_v38 = vpop.xlane.xlu1 %2089 }
 0x595   : > { %v8330_v53 = vmul.f32 0.17677669, %v1941_v35  ;;  %v6562_v57 = vpop.f32.mrb[46].mxu0  ;;  %v2134_v35 = vsub.f32 %v8306_v58, %v2090_v38 }
 0x596   : > { %v1944_v24 = vpop.f32.mrb[47].mxu0  ;;  %v8338_v36 = vmul.f32 0.17677669, %v6562_v57  ;;  %v2103_v7 = vsel %vm1488_vm1, %v8332_v31, -inf  ;;  %v2155_v57 = vmul.f32 1.442695, %v2136_v16 }
 0x597   : > { %v8334_v4 = vmul.f32 0.17677669, %v1944_v24  ;;  %v2097_v60 = vsel %vm1488_vm1, %v8330_v53, -inf  ;;  %v2135_v24 = vsub.f32 %v8304_v6, %v2093_v32 }
 0x598   : > { %2098 = vmax.xlane.f32.xlu0 %v2097_v60  ;;  %v2106_v41 = vsel %vm1488_vm1, %v8338_v36, -inf  ;;  %v2151_v60 = vmul.f32 1.442695, %v2134_v35  ;;  %7050 = vpow2.f32 %v2155_v57 }
 0x599   : > { %v2100_v47 = vsel %vm1488_vm1, %v8334_v4, -inf }
 0x59a   : > { %2101 = vmax.xlane.f32.xlu1 %v2100_v47  ;;  %v2133_v47 = vsub.f32 %v8300_v3, %v2087_v42  ;;  %7052 = vpow2.f32 %v2151_v60 }
 0x59c   : > { %2104 = vmax.xlane.f32.xlu0 %v2103_v7  ;;  %v2153_v7 = vmul.f32 1.442695, %v2135_v24 }
 0x59e   : > { %2107 = vmax.xlane.f32.xlu1 %v2106_v41  ;;  %v2149_v41 = vmul.f32 1.442695, %v2133_v47  ;;  %7054 = vpow2.f32 %v2153_v7 }
 0x5a0   : > { %v6545_v5 = vpop.f32.mrb[36].mxu1  ;;  %7056 = vpow2.f32 %v2149_v41 }
 0x5a1   : > { %v1812_v37 = vpop.f32.mrb[37].mxu1 }
 0x5a2   : > { %v6546_v18 = vpop.f32.mrb[38].mxu1 }
 0x5a3   : > { %v1834_v54 = vpack.c.bf16 %v6546_v18, %v6545_v5  ;;  %v1815_v10 = vpop.f32.mrb[39].mxu1  ;;  %v8392_v5 = vpop.eup %7050 }
 0x5a4   : > { %v1833_v22 = vpack.c.bf16 %v1815_v10, %v1812_v37  ;;  %v2190_v19 = vsel %vm1488_vm1, %v8392_v5, 0.0  ;;  %v8396_v37 = vpop.eup %7052 }
 0x5a5   : > { %1842 = vst.msk [vmem:[#allocation2 + $0x38] sm:$0xff] %vm1293_vm0, %v1834_v54  ;;  %v2184_v6 = vsel %vm1488_vm1, %v8396_v37, 0.0 }
 0x5a6   : > { %1841 = vst.msk [vmem:[#allocation2 + $0x30] sm:$0xff] %vm1293_vm0, %v1833_v22 }
 0x5a8   : > { %v8348_v49 = vpop.f32.mrb[40].mxu1  ;;  %v8398_v58 = vpop.eup %7054 }
 0x5a9   : > { %v8350_v12 = vpop.f32.mrb[41].mxu1  ;;  %v2187_v3 = vsel %vm1488_vm1, %v8398_v58, 0.0 }
 0x5aa   : > { %v8352_v39 = vpop.f32.mrb[42].mxu1  ;;  %v8404_v18 = vpop.eup %7056 }
 0x5ab   : > { %v8354_v34 = vpop.f32.mrb[43].mxu1  ;;  %v2181_v54 = vsel %vm1488_vm1, %v8404_v18, 0.0 }
 0x5af   : > { %2275 = vrot.lane.b32.xlu1 %v7936_v1, %s7445_s30 }
 0x5b0   : > { %v8358_v25 = vpop.f32.mrb[44].mxu1 }
 0x5b1   : > { %v8360_v8 = vpop.f32.mrb[45].mxu1 }
 0x5b2   : > { %2273 = vrot.lane.b32.xlu0 %v7938_v48, %s7445_s30  ;;  %v8364_v50 = vpop.f32.mrb[46].mxu1 }
 0x5b3   : > { %2279 = vrot.lane.b32.xlu1 %v7958_v21, %s7445_s30  ;;  %v8368_v59 = vpop.f32.mrb[47].mxu1 }
 0x5b6   : > { %2512 = vrot.lane.b32.xlu0 %v7922_v52, %s7446_s19 }
 0x5b7   : > { %2368 = vrot.lane.b32.xlu1 %v7980_v30, %s7445_s30 }
 0x5ba   : > { %2277 = vrot.lane.b32.xlu0 %v7960_v23, %s7445_s30 }
 0x5bb   : > { %2370 = vrot.lane.b32.xlu1 %v8004_v14, %s7445_s30 }
 0x5be   : > { %2514 = vrot.lane.b32.xlu0 %v7946_v55, %s7446_s19 }
 0x5bf   : > { %2518 = vrot.lane.b32.xlu1 %v7991_v28, %s7446_s19 }
 0x5c2   : > { %2366 = vrot.lane.b32.xlu0 %v7982_v0, %s7445_s30 }
 0x5c6   : > { %2516 = vrot.lane.b32.xlu0 %v7969_v29, %s7446_s19 }
 0x5ca   : > { %2372 = vrot.lane.b32.xlu0 %v8002_v9, %s7445_s30 }
 0x5e3   : > { %2191 = vadd.xlane.f32.xlu1 %v2190_v19 }
 0x5e7   : > { %2185 = vadd.xlane.f32.xlu1 %v2184_v6 }
 0x5e9   : > { %2188 = vadd.xlane.f32.xlu0 %v2187_v3 }
 0x5ed   : > { %2182 = vadd.xlane.f32.xlu0 %v2181_v54 }
 0x625   : > { %v2099_v10 = vpop.xlane.xlu0 %2098 }
 0x626   : > { %v2137_v22 = vsub.f32 %v8330_v53, %v2099_v10 }
 0x627   : > { %v2102_v42 = vpop.xlane.xlu1 %2101 }
 0x628   : > { %v2157_v32 = vmul.f32 1.442695, %v2137_v22  ;;  %v2138_v35 = vsub.f32 %v8334_v4, %v2102_v42  ;;  %v8426_v22 = vmul.f32 0.17677669, %v8350_v12  ;;  %v8437_v12 = vmul.f32 0.17677669, %v8358_v25 }
 0x629   : > { %v2105_v46 = vpop.xlane.xlu0 %2104 }
 0x62a   : > { %7058 = vpow2.f32 %v2157_v32  ;;  %v2139_v16 = vsub.f32 %v8332_v31, %v2105_v46  ;;  %v2159_v41 = vmul.f32 1.442695, %v2138_v35  ;;  %v2109_v35 = vsel %vm1488_vm1, %v8426_v22, -inf }
 0x62b   : > { %v2108_v38 = vpop.xlane.xlu1 %2107 }
 0x62c   : > { %v2161_v57 = vmul.f32 1.442695, %v2139_v16  ;;  %v2140_v24 = vsub.f32 %v8338_v36, %v2108_v38  ;;  %v8417_v36 = vmul.f32 0.17677669, %v8348_v49 }
 0x62d   : > { %v2274_v60 = vpop.permute.xlu0 %2273 }
 0x62e   : > { %7060 = vpow2.f32 %v2161_v57  ;;  %v2163_v47 = vmul.f32 1.442695, %v2140_v24  ;;  %6579 = vmatprep.subr.bf16.mxu1 %v2274_v60  ;;  %v2115_v49 = vsel %vm1488_vm1, %v8417_v36, -inf }
 0x62f   : > { %v2276_v7 = vpop.permute.xlu1 %2275  ;;  %6580 = vmatpush3.bf16.msra.mxu1 %v2274_v60 }
 0x630   : > { %7062 = vpow2.f32 %v2163_v47  ;;  %6581 = vmatprep.subr.bf16.mxu1 %v2276_v7  ;;  %v8446_v47 = vmul.f32 0.17677669, %v8352_v39  ;;  %v8458_v39 = vmul.f32 0.17677669, %v8354_v34 }
 0x631   : > { %v2513_v53 = vpop.permute.xlu0 %2512  ;;  %7064 = vpow2.f32 %v2159_v41  ;;  %v2127_v41 = vsel %vm1488_vm1, %v8437_v12, -inf }
 0x632   : > { %6787 = vmatprep.subr.msk.bf16.mxu0 %vm1293_vm0, %v2513_v53  ;;  %v2533_v31 = vsel %vm1293_vm0, %v2513_v53, 0 }
 0x633   : > { %v2280_v19 = vpop.permute.xlu1 %2279  ;;  %6582 = vmatpush3.bf16.msra.mxu1 %v2276_v7  ;;  %6612 = vmatpush3.bf16.xpose.msra.mxu0 %v2533_v31  ;;  %v8449_v7 = vmul.f32 0.17677669, %v8360_v8 }
 0x634   : > { %v8414_v4 = vpop.eup %7058 }
 0x635   : > { %v2278_v6 = vpop.permute.xlu0 %2277  ;;  %v2193_v3 = vsel %vm1488_vm1, %v8414_v4, 0.0  ;;  %v2121_v8 = vsel %vm1488_vm1, %v8449_v7, -inf }
 0x636   : > { %2194 = vadd.xlane.f32.xlu0 %v2193_v3  ;;  %6583 = vmatprep.subr.bf16.mxu1 %v2278_v6  ;;  %v2112_v3 = vsel %vm1488_vm1, %v8458_v39, -inf }
 0x637   : > { %6584 = vmatpush3.bf16.msra.mxu1 %v2278_v6  ;;  %v8423_v10 = vpop.permute.xlu1 %2368  ;;  %v2118_v6 = vsel %vm1488_vm1, %v8446_v47, -inf }
 0x638   : > { %v8421_v54 = vpop.eup %7060  ;;  %6585 = vmatprep.subr.bf16.mxu1 %v2280_v19 }
 0x639   : > { %v2515_v42 = vpop.permute.xlu0 %2514  ;;  %v2199_v32 = vsel %vm1488_vm1, %v8421_v54, 0.0 }
 0x63a   : > { %v8432_v46 = vpop.eup %7062  ;;  %2116 = vmax.xlane.f32.xlu0 %v2115_v49  ;;  %2200 = vadd.xlane.f32.xlu1 %v2199_v32  ;;  %v2536_v16 = vsel %vm1293_vm0, %v2515_v42, 0 }
 0x63b   : > { %6788 = vmatprep.subr.msk.bf16.mxu0 %vm1293_vm0, %v2515_v42  ;;  %6586 = vmatpush3.bf16.msra.mxu1 %v2280_v19  ;;  %v2202_v57 = vsel %vm1488_vm1, %v8432_v46, 0.0  ;;  %v8443_v24 = vpop.eup %7064  ;;  %v2371_v60 = vpop.permute.xlu1 %2370 }
 0x63c   : > { %6614 = vmatpush3.bf16.xpose.msra.mxu0 %v2536_v16  ;;  %v2196_v53 = vsel %vm1488_vm1, %v8443_v24, 0.0 }
 0x63d   : > { %v2367_v38 = vpop.permute.xlu0 %2366 }
 0x63e   : > { %2110 = vmax.xlane.f32.xlu0 %v2109_v35  ;;  %2203 = vadd.xlane.f32.xlu1 %v2202_v57  ;;  %v8475_v57 = vmul.f32 0.17677669, %v8364_v50 }
 0x63f   : > { %6595 = vmatprep.subr.bf16.mxu1 %v2367_v38  ;;  %v2519_v19 = vpop.permute.xlu1 %2518 }
 0x640   : > { %v2542_v42 = vsel %vm1293_vm0, %v2519_v19, 0 }
 0x641   : > { %v2517_v25 = vpop.permute.xlu0 %2516 }
 0x642   : > { %2128 = vmax.xlane.f32.xlu0 %v2127_v41  ;;  %2197 = vadd.xlane.f32.xlu1 %v2196_v53  ;;  %v2539_v31 = vsel %vm1293_vm0, %v2517_v25, 0  ;;  %v8478_v41 = vmul.f32 0.17677669, %v8368_v59  ;;  %v2130_v53 = vsel %vm1488_vm1, %v8475_v57, -inf }
 0x643   : > { %6789 = vmatprep.subr.msk.bf16.mxu0 %vm1293_vm0, %v2517_v25 }
 0x644   : > { %6616 = vmatpush3.bf16.xpose.msra.mxu0 %v2539_v31 }
 0x645   : > { %6790 = vmatprep.subr.msk.bf16.mxu0 %vm1293_vm0, %v2519_v19  ;;  %v2373_v49 = vpop.permute.xlu0 %2372 }
 0x646   : > { %2122 = vmax.xlane.f32.xlu0 %v2121_v8  ;;  %2119 = vmax.xlane.f32.xlu1 %v2118_v6 }
 0x64a   : > { %2113 = vmax.xlane.f32.xlu1 %v2112_v3  ;;  %v2124_v3 = vsel %vm1488_vm1, %v8478_v41, -inf }
 0x64c   : > { %6618 = vmatpush3.bf16.xpose.msra.mxu0 %v2542_v42 }
 0x65b   : > { %2506 = vrot.lane.b32.xlu1 %v7944_v11, %s7446_s19 }
 0x65c   : > { %2504 = vrot.lane.b32.xlu0 %v7920_v51, %s7446_s19 }
 0x65f   : > { %2617 = vrot.lane.b32.xlu1 %v8013_v27, %s7446_s19 }
 0x670   : > { %v2192_v34 = vpop.xlane.xlu1 %2191 }
 0x674   : > { %v2186_v32 = vpop.xlane.xlu1 %2185 }
 0x676   : > { %v2189_v16 = vpop.xlane.xlu0 %2188 }
 0x677   : > { %7066 = vrcp.f32 %v2189_v16 }
 0x678   : > { %7068 = vrcp.f32 %v2186_v32 }
 0x679   : > { %7070 = vrcp.f32 %v2192_v34 }
 0x67a   : > { %v2183_v35 = vpop.xlane.xlu0 %2182 }
 0x67b   : > { %7072 = vrcp.f32 %v2183_v35 }
 0x681   : > { %v7067_v25 = vpop.eup %7066 }
 0x682   : > { %v7069_v31 = vpop.eup %7068  ;;  %v2247_v6 = vmul.f32 %v7067_v25, %v8398_v58 }
 0x683   : > { %2131 = vmax.xlane.f32.xlu1 %v2130_v53  ;;  %v7071_v19 = vpop.eup %7070  ;;  %v2246_v50 = vmul.f32 %v7069_v31, %v8396_v37 }
 0x684   : > { %v2248_v34 = vmul.f32 %v7071_v19, %v8392_v5 }
 0x685   : > { %v7073_v8 = vpop.eup %7072 }
 0x686   : > { %v2245_v42 = vmul.f32 %v7073_v8, %v8404_v18  ;;  %v2262_v32 = vpack.c.bf16 %v2248_v34, %v2247_v6 }
 0x687   : > { %2125 = vmax.xlane.f32.xlu1 %v2124_v3 }
 0x688   : > { %v2261_v59 = vpack.c.bf16 %v2246_v50, %v2245_v42 }
 0x68a   : > { %6587 = vmatprep.mubr.msk.bf16.mxu1 %vm1488_vm1, %v2261_v59 }
 0x68b   : > { %6588 = vmatmul.mubr.msk.bf16.vlgmr.msra.gmra.mrb[48].mxu1 %vm1488_vm1, %v2262_v32 }
 0x68c   : > { %6596 = vmatpush3.bf16.msra.mxu1 %v2367_v38 }
 0x68d   : > { %6597 = vmatprep.subr.bf16.mxu1 %v8423_v10 }
 0x690   : > { %6598 = vmatpush3.bf16.msra.mxu1 %v8423_v10 }
 0x691   : > { %6599 = vmatprep.subr.bf16.mxu1 %v2371_v60 }
 0x694   : > { %6600 = vmatpush3.bf16.msra.mxu1 %v2371_v60 }
 0x695   : > { %6601 = vmatprep.subr.bf16.mxu1 %v2373_v49 }
 0x698   : > { %6602 = vmatpush3.bf16.msra.mxu1 %v2373_v49  ;;  %2619 = vrot.lane.b32.xlu1 %v8035_v45, %s7446_s19 }
 0x6c3   : > { %v2195_v5 = vpop.xlane.xlu0 %2194 }
 0x6c7   : > { %v2201_v37 = vpop.xlane.xlu1 %2200  ;;  %v2117_v58 = vpop.xlane.xlu0 %2116 }
 0x6c8   : > { %v2143_v18 = vsub.f32 %v8417_v36, %v2117_v58 }
 0x6ca   : > { %v2169_v16 = vmul.f32 1.442695, %v2143_v18 }
 0x6cb   : > { %v2204_v35 = vpop.xlane.xlu1 %2203  ;;  %v2111_v25 = vpop.xlane.xlu0 %2110 }
 0x6cc   : > { %7074 = vpow2.f32 %v2169_v16  ;;  %v2141_v38 = vsub.f32 %v8426_v22, %v2111_v25 }
 0x6cd   : > { %7076 = vrcp.f32 %v2195_v5 }
 0x6ce   : > { %7078 = vrcp.f32 %v2204_v35  ;;  %v2165_v10 = vmul.f32 1.442695, %v2141_v38 }
 0x6cf   : > { %7080 = vrcp.f32 %v2201_v37  ;;  %v2198_v60 = vpop.xlane.xlu1 %2197  ;;  %v2129_v49 = vpop.xlane.xlu0 %2128 }
 0x6d0   : > { %7082 = vpow2.f32 %v2165_v10 }
 0x6d1   : > { %7084 = vrcp.f32 %v2198_v60 }
 0x6d3   : > { %v2120_v53 = vpop.xlane.xlu1 %2119  ;;  %v2123_v31 = vpop.xlane.xlu0 %2122 }
 0x6d4   : > { %v2144_v19 = vsub.f32 %v8446_v47, %v2120_v53 }
 0x6d6   : > { %v8497_v8 = vpop.eup %7074  ;;  %v2171_v36 = vmul.f32 1.442695, %v2144_v19  ;;  %v2145_v19 = vsub.f32 %v8449_v7, %v2123_v31 }
 0x6d7   : > { %v7077_v6 = vpop.eup %7076  ;;  %v2114_v3 = vpop.xlane.xlu1 %2113  ;;  %v2211_v22 = vsel %vm1488_vm1, %v8497_v8, 0.0 }
 0x6d8   : > { %v2505_v42 = vpop.permute.xlu0 %2504  ;;  %v7079_v50 = vpop.eup %7078  ;;  %7086 = vpow2.f32 %v2171_v36  ;;  %v2142_v34 = vsub.f32 %v8458_v39, %v2114_v3  ;;  %2212 = vadd.xlane.f32.xlu1 %v2211_v22  ;;  %v2249_v39 = vmul.f32 %v7077_v6, %v8414_v4  ;;  %v2173_v36 = vmul.f32 1.442695, %v2145_v19 }
 0x6d9   : > { %6619 = vmatprep.mubr.msk.bf16.mxu0 %vm1293_vm0, %v2505_v42  ;;  %v7081_v59 = vpop.eup %7080  ;;  %v2252_v18 = vmul.f32 %v7079_v50, %v8432_v46 }
 0x6da   : > { %v8503_v32 = vpop.eup %7082  ;;  %v2167_v47 = vmul.f32 1.442695, %v2142_v34  ;;  %v2251_v35 = vmul.f32 %v7081_v59, %v8421_v54  ;;  %v2147_v54 = vsub.f32 %v8437_v12, %v2129_v49 }
 0x6db   : > { %v7085_v5 = vpop.eup %7084  ;;  %v2507_v37 = vpop.permute.xlu1 %2506  ;;  %v2205_v58 = vsel %vm1488_vm1, %v8503_v32, 0.0 }
 0x6dc   : > { %7088 = vpow2.f32 %v2167_v47  ;;  %2206 = vadd.xlane.f32.xlu1 %v2205_v58  ;;  %6620 = vmatmul.mubr.msk.bf16.vlgmr.msra.gmra.mrb[48].mxu0 %vm1293_vm0, %v2507_v37  ;;  %v2250_v16 = vmul.f32 %v7085_v5, %v8443_v24  ;;  %v2264_v10 = vpack.c.bf16 %v2252_v18, %v2251_v35  ;;  %v2177_v53 = vmul.f32 1.442695, %v2147_v54 }
 0x6de   : > { %v2263_v25 = vpack.c.bf16 %v2250_v16, %v2249_v39  ;;  %7090 = vpow2.f32 %v2177_v53 }
 0x6df   : > { %v8512_v38 = vpop.permute.xlu1 %2617  ;;  %7092 = vpow2.f32 %v2173_v36 }
 0x6e0   : > { %6591 = vmatprep.mubr.msk.bf16.mxu1 %vm1488_vm1, %v2263_v25  ;;  %6791 = vmatprep.subr.msk.bf16.mxu1 %vm1293_vm0, %v8512_v38 }
 0x6e1   : > { %6592 = vmatmul.mubr.msk.bf16.gmra.mrb[52].mxu1 %vm1488_vm1, %v2264_v10 }
 0x6e2   : > { %v7087_v46 = vpop.eup %7086 }
 0x6e3   : > { %v2214_v60 = vsel %vm1488_vm1, %v7087_v46, 0.0 }
 0x6e4   : > { %2215 = vadd.xlane.f32.xlu1 %v2214_v60 }
 0x6e6   : > { %v7089_v4 = vpop.eup %7088 }
 0x6e7   : > { %v2208_v24 = vsel %vm1488_vm1, %v7089_v4, 0.0 }
 0x6e8   : > { %2209 = vadd.xlane.f32.xlu0 %v2208_v24  ;;  %v8528_v59 = vpop.eup %7090 }
 0x6e9   : > { %v2223_v12 = vsel %vm1488_vm1, %v8528_v59, 0.0  ;;  %v8532_v49 = vpop.eup %7092 }
 0x6ea   : > { %v2217_v7 = vsel %vm1488_vm1, %v8532_v49, 0.0 }
 0x6f5   : > { %2508 = vrot.lane.b32.xlu1 %v7966_v33, %s7446_s19 }
 0x6fe   : > { %2621 = vrot.lane.b32.xlu0 %v8055_v63, %s7446_s19 }
 0x710   : > { %v2132_v6 = vpop.xlane.xlu1 %2131 }
 0x711   : > { %v2148_v3 = vsub.f32 %v8475_v57, %v2132_v6 }
 0x713   : > { %v2179_v42 = vmul.f32 1.442695, %v2148_v3 }
 0x714   : > { %v2126_v22 = vpop.xlane.xlu1 %2125 }
 0x715   : > { %v2146_v50 = vsub.f32 %v8478_v41, %v2126_v22  ;;  %7094 = vpow2.f32 %v2179_v42 }
 0x717   : > { %v2175_v34 = vmul.f32 1.442695, %v2146_v50 }
 0x718   : > { %v2620_v35 = vpop.permute.xlu1 %2619 }
 0x719   : > { %7096 = vpow2.f32 %v2175_v34 }
 0x71d   : > { %2224 = vadd.xlane.f32.xlu0 %v2223_v12 }
 0x71f   : > { %v8536_v57 = vpop.eup %7094 }
 0x720   : > { %v2226_v47 = vsel %vm1488_vm1, %v8536_v57, 0.0 }
 0x721   : > { %2218 = vadd.xlane.f32.xlu0 %v2217_v7  ;;  %v2638_v7 = vsel %vm1293_vm0, %v8512_v38, 0 }
 0x723   : > { %v8538_v31 = vpop.eup %7096 }
 0x724   : > { %v2220_v41 = vsel %vm1488_vm1, %v8538_v31, 0.0 }
 0x725   : > { %2221 = vadd.xlane.f32.xlu1 %v2220_v41  ;;  %2227 = vadd.xlane.f32.xlu0 %v2226_v47  ;;  %v2641_v41 = vsel %vm1293_vm0, %v2620_v35, 0 }
 0x736   : > { %2623 = vrot.lane.b32.xlu1 %v8069_v15, %s7446_s19 }
 0x73a   : > { %2611 = vrot.lane.b32.xlu1 %v8033_v43, %s7446_s19 }
 0x73b   : > { %2510 = vrot.lane.b32.xlu0 %v7988_v2, %s7446_s19 }
 0x73e   : > { %2615 = vrot.lane.b32.xlu1 %v8067_v13, %s7446_s19 }
 0x73f   : > { %2609 = vrot.lane.b32.xlu0 %v8011_v20, %s7446_s19 }
 0x743   : > { %2613 = vrot.lane.b32.xlu0 %v8053_v61, %s7446_s19 }
 0x75e   : > { %v8556_v5 = vpop.f32.mrb[48].mxu1 }
 0x75f   : > { %v8558_v37 = vpop.f32.mrb[49].mxu1 }
 0x760   : > { %v8560_v58 = vpop.f32.mrb[50].mxu1 }
 0x761   : > { %v8564_v39 = vpop.f32.mrb[51].mxu1 }
 0x765   : > { %v2213_v25 = vpop.xlane.xlu1 %2212 }
 0x769   : > { %v2207_v10 = vpop.xlane.xlu1 %2206 }
 0x771   : > { %v2216_v60 = vpop.xlane.xlu1 %2215 }
 0x772   : > { %7098 = vrcp.f32 %v2216_v60 }
 0x773   : > { %7100 = vrcp.f32 %v2207_v10 }
 0x774   : > { %7102 = vrcp.f32 %v2213_v25 }
 0x775   : > { %v2509_v24 = vpop.permute.xlu1 %2508  ;;  %v2210_v54 = vpop.xlane.xlu0 %2209 }
 0x776   : > { %7104 = vrcp.f32 %v2210_v54  ;;  %6623 = vmatprep.mubr.msk.bf16.mxu0 %vm1293_vm0, %v2509_v24 }
 0x77c   : > { %v7099_v53 = vpop.eup %7098 }
 0x77d   : > { %v7101_v19 = vpop.eup %7100  ;;  %v2256_v3 = vmul.f32 %v7099_v53, %v7087_v46  ;;  %v2622_v46 = vpop.permute.xlu0 %2621 }
 0x77e   : > { %v7103_v36 = vpop.eup %7102  ;;  %v2253_v42 = vmul.f32 %v7101_v19, %v8503_v32 }
 0x77f   : > { %v2255_v50 = vmul.f32 %v7103_v36, %v8497_v8  ;;  %v2644_v8 = vsel %vm1293_vm0, %v2622_v46, 0 }
 0x780   : > { %v7105_v6 = vpop.eup %7104 }
 0x781   : > { %v2254_v22 = vmul.f32 %v7105_v6, %v7089_v4  ;;  %v2266_v12 = vpack.c.bf16 %v2256_v3, %v2255_v50 }
 0x783   : > { %v2265_v34 = vpack.c.bf16 %v2254_v22, %v2253_v42 }
 0x785   : > { %6603 = vmatprep.mubr.msk.bf16.mxu1 %vm1488_vm1, %v2265_v34 }
 0x786   : > { %6604 = vmatmul.mubr.msk.bf16.vlgmr.msra.gmra.mrb[56].mxu1 %vm1488_vm1, %v2266_v12 }
 0x787   : > { %6628 = vmatpush3.bf16.xpose.msra.mxu1 %v2638_v7 }
 0x788   : > { %6792 = vmatprep.subr.msk.bf16.mxu1 %vm1293_vm0, %v2620_v35 }
 0x78f   : > { %6630 = vmatpush3.bf16.xpose.msra.mxu1 %v2641_v41 }
 0x790   : > { %6793 = vmatprep.subr.msk.bf16.mxu1 %vm1293_vm0, %v2622_v46 }
 0x797   : > { %6632 = vmatpush3.bf16.xpose.msra.mxu1 %v2644_v8 }
 0x7aa   : > { %v2225_v32 = vpop.xlane.xlu0 %2224 }
 0x7ae   : > { %v2219_v4 = vpop.xlane.xlu0 %2218 }
 0x7af   : > { %v6621_v47 = vpop.f32.mrb[48].mxu0  ;;  %7106 = vrcp.f32 %v2219_v4 }
 0x7b0   : > { %v2578_v25 = vpop.f32.mrb[49].mxu0  ;;  %7108 = vrcp.f32 %v2225_v32  ;;  %v8581_v54 = vmul.f32 0.17677669, %v6621_v47 }
 0x7b1   : > { %v8579_v10 = vmul.f32 0.17677669, %v2578_v25  ;;  %v6622_v38 = vpop.f32.mrb[50].mxu0 }
 0x7b2   : > { %v2222_v60 = vpop.xlane.xlu1 %2221  ;;  %v2581_v24 = vpop.f32.mrb[51].mxu0  ;;  %v2717_v50 = vmul.f32 0.17677669, %v6622_v38  ;;  %v2736_v41 = vsel %vm1488_vm1, %v8581_v54, -inf }
 0x7b3   : > { %7110 = vrcp.f32 %v2222_v60  ;;  %v2715_v35 = vmul.f32 0.17677669, %v2581_v24  ;;  %v2228_v53 = vpop.xlane.xlu0 %2227  ;;  %v2730_v19 = vsel %vm1488_vm1, %v8579_v10, -inf }
 0x7b4   : > { %7112 = vrcp.f32 %v2228_v53  ;;  %v8585_v36 = vpop.f32.mrb[52].mxu1  ;;  %2731 = vmax.xlane.f32.xlu0 %v2730_v19  ;;  %v2739_v4 = vsel %vm1488_vm1, %v2717_v50, -inf }
 0x7b5   : > { %v8587_v6 = vpop.f32.mrb[53].mxu1  ;;  %v2733_v3 = vsel %vm1488_vm1, %v2715_v35, -inf }
 0x7b6   : > { %v8590_v42 = vpop.f32.mrb[54].mxu1  ;;  %v2624_v22 = vpop.permute.xlu1 %2623  ;;  %2734 = vmax.xlane.f32.xlu1 %v2733_v3 }
 0x7b7   : > { %v8594_v12 = vpop.f32.mrb[55].mxu1  ;;  %v2511_v7 = vpop.permute.xlu0 %2510  ;;  %6794 = vmatprep.subr.msk.bf16.mxu1 %vm1293_vm0, %v2624_v22  ;;  %v2647_v46 = vsel %vm1293_vm0, %v2624_v22, 0 }
 0x7b8   : > { %6624 = vmatmul.mubr.msk.bf16.gmra.mrb[52].mxu0 %vm1293_vm0, %v2511_v7  ;;  %2737 = vmax.xlane.f32.xlu0 %v2736_v41 }
 0x7b9   : > { %6634 = vmatpush3.bf16.xpose.msra.mxu1 %v2647_v46  ;;  %v7107_v32 = vpop.eup %7106 }
 0x7ba   : > { %v7109_v47 = vpop.eup %7108  ;;  %v2257_v60 = vmul.f32 %v7107_v32, %v8532_v49  ;;  %v2612_v41 = vpop.permute.xlu1 %2611 }
 0x7bb   : > { %v2259_v53 = vmul.f32 %v7109_v47, %v8528_v59  ;;  %v2610_v7 = vpop.permute.xlu0 %2609 }
 0x7bc   : > { %2740 = vmax.xlane.f32.xlu0 %v2739_v4 }
 0x7bd   : > { %v7111_v25 = vpop.eup %7110 }
 0x7be   : > { %v7113_v38 = vpop.eup %7112  ;;  %v2258_v24 = vmul.f32 %v7111_v25, %v8538_v31  ;;  %v2616_v49 = vpop.permute.xlu1 %2615 }
 0x7bf   : > { %v2260_v19 = vmul.f32 %v7113_v38, %v8536_v57  ;;  %v2614_v46 = vpop.permute.xlu0 %2613 }
 0x7c0   : > { %v2267_v3 = vpack.c.bf16 %v2258_v24, %v2257_v60 }
 0x7c1   : > { %v2268_v22 = vpack.c.bf16 %v2260_v19, %v2259_v53 }
 0x7c2   : > { %6607 = vmatprep.mubr.msk.bf16.mxu1 %vm1488_vm1, %v2267_v3 }
 0x7c3   : > { %6608 = vmatmul.mubr.msk.bf16.gmra.mrb[60].mxu1 %vm1488_vm1, %v2268_v22 }
 0x7c4   : > { %6635 = vmatprep.mubr.msk.bf16.mxu1 %vm1293_vm0, %v2610_v7 }
 0x7cb   : > { %6636 = vmatmul.mubr.msk.bf16.vlgmr.msra.gmra.mrb[64].mxu1 %vm1293_vm0, %v2612_v41 }
 0x7cc   : > { %6639 = vmatprep.mubr.msk.bf16.mxu1 %vm1293_vm0, %v2614_v46 }
 0x7d3   : > { %6640 = vmatmul.mubr.msk.bf16.gmra.mrb[68].mxu1 %vm1293_vm0, %v2616_v49 }
 0x841   : > { %v2732_v25 = vpop.xlane.xlu0 %2731 }
 0x842   : > { %v2778_v24 = vsub.f32 %v8579_v10, %v2732_v25 }
 0x843   : > { %v2735_v60 = vpop.xlane.xlu1 %2734 }
 0x844   : > { %v2779_v53 = vsub.f32 %v2715_v35, %v2735_v60  ;;  %v2794_v3 = vmul.f32 1.442695, %v2778_v24 }
 0x845   : > { %v2738_v38 = vpop.xlane.xlu0 %2737 }
 0x846   : > { %v2780_v22 = vsub.f32 %v8581_v54, %v2738_v38  ;;  %v2796_v7 = vmul.f32 1.442695, %v2779_v53  ;;  %7114 = vpow2.f32 %v2794_v3 }
 0x848   : > { %v2798_v46 = vmul.f32 1.442695, %v2780_v22  ;;  %7116 = vpow2.f32 %v2796_v7 }
 0x849   : > { %v2741_v19 = vpop.xlane.xlu0 %2740 }
 0x84a   : > { %v2781_v41 = vsub.f32 %v2717_v50, %v2741_v19  ;;  %7118 = vpow2.f32 %v2798_v46 }
 0x84c   : > { %v2800_v44 = vmul.f32 1.442695, %v2781_v41 }
 0x84e   : > { %7120 = vpow2.f32 %v2800_v44 }
 0x850   : > { %v8631_v25 = vpop.eup %7114 }
 0x851   : > { %v2826_v44 = vsel %vm1488_vm1, %v8631_v25, 0.0 }
 0x852   : > { %v8634_v38 = vpop.eup %7116 }
 0x853   : > { %v2829_v3 = vsel %vm1488_vm1, %v8634_v38, 0.0 }
 0x859   : > { %v8614_v59 = vpop.f32.mrb[56].mxu1 }
 0x85a   : > { %10460 = vst [vmem:[#allocation9_spill] sm:$0xff] %v8614_v59  ;;  %v8616_v57 = vpop.f32.mrb[57].mxu1 }
 0x85b   : > { %10461 = vst [vmem:[#allocation10_spill] sm:$0xff] %v8616_v57  ;;  %v8618_v31 = vpop.f32.mrb[58].mxu1 }
 0x85c   : > { %v8622_v4 = vpop.f32.mrb[59].mxu1 }
 0x85d   : > { %10462 = vst [vmem:[#allocation11_spill] sm:$0xff] %v8622_v4 }
 0x88b   : > { %v6625_v49 = vpop.f32.mrb[52].mxu0 }
 0x88c   : > { %v2594_v56 = vpop.f32.mrb[53].mxu0  ;;  %v2720_v34 = vmul.f32 0.17677669, %v6625_v49 }
 0x88d   : > { %v2718_v32 = vmul.f32 0.17677669, %v2594_v56  ;;  %v6626_v47 = vpop.f32.mrb[54].mxu0 }
 0x88e   : > { %v2597_v8 = vpop.f32.mrb[55].mxu0  ;;  %v2721_v35 = vmul.f32 0.17677669, %v6626_v47  ;;  %v2748_v50 = vsel %vm1488_vm1, %v2720_v34, -inf  ;;  %v8642_v47 = vpop.eup %7118 }
 0x88f   : > { %v2719_v62 = vmul.f32 0.17677669, %v2597_v8  ;;  %v2742_v10 = vsel %vm1488_vm1, %v2718_v32, -inf  ;;  %v8652_v22 = vpop.eup %7120  ;;  %v2832_v41 = vsel %vm1488_vm1, %v8642_v47, 0.0 }
 0x890   : > { %2743 = vmax.xlane.f32.xlu0 %v2742_v10  ;;  %v2751_v56 = vsel %vm1488_vm1, %v2721_v35, -inf  ;;  %v2835_v46 = vsel %vm1488_vm1, %v8652_v22, 0.0 }
 0x891   : > { %v2745_v54 = vsel %vm1488_vm1, %v2719_v62, -inf }
 0x892   : > { %2746 = vmax.xlane.f32.xlu1 %v2745_v54 }
 0x894   : > { %2749 = vmax.xlane.f32.xlu0 %v2748_v50 }
 0x896   : > { %2752 = vmax.xlane.f32.xlu1 %v2751_v56  ;;  %v8636_v60 = vpop.f32.mrb[60].mxu1 }
 0x897   : > { %10463 = vst [vmem:[#allocation12_spill] sm:$0xff] %v8636_v60  ;;  %v8638_v8 = vpop.f32.mrb[61].mxu1 }
 0x898   : > { %10464 = vst [vmem:[#allocation13_spill] sm:$0xff] %v8638_v8  ;;  %2827 = vadd.xlane.f32.xlu0 %v2826_v44  ;;  %v8644_v24 = vpop.f32.mrb[62].mxu1 }
 0x899   : > { %10465 = vst [vmem:[#allocation14_spill] sm:$0xff] %v8644_v24  ;;  %v8648_v19 = vpop.f32.mrb[63].mxu1 }
 0x89a   : > { %10466 = vst [vmem:[#allocation15_spill] sm:$0xff] %v8648_v19  ;;  %2830 = vadd.xlane.f32.xlu1 %v2829_v3 }
 0x89c   : > { %2833 = vadd.xlane.f32.xlu0 %v2832_v41 }
 0x89e   : > { %2836 = vadd.xlane.f32.xlu1 %v2835_v46  ;;  %v6637_v49 = vpop.f32.mrb[64].mxu1 }
 0x89f   : > { %v8660_v10 = vpop.f32.mrb[65].mxu1 }
 0x8a0   : > { %v8662_v54 = vpop.f32.mrb[66].mxu1 }
 0x8a1   : > { %v8664_v50 = vpop.f32.mrb[67].mxu1 }
 0x8a6   : > { %v8666_v56 = vpop.f32.mrb[68].mxu1 }
 0x8a7   : > { %v8668_v44 = vpop.f32.mrb[69].mxu1 }
 0x8a8   : > { %v8670_v3 = vpop.f32.mrb[70].mxu1 }
 0x8a9   : > { %v8672_v7 = vpop.f32.mrb[71].mxu1 }
 0x8af   : > { %2916 = vrot.lane.b32.xlu1 %v7936_v1, %s7446_s19 }
 0x8b2   : > { %2914 = vrot.lane.b32.xlu0 %v7938_v48, %s7446_s19 }
 0x8b3   : > { %2918 = vrot.lane.b32.xlu1 %v7960_v23, %s7446_s19 }
 0x8b7   : > { %2920 = vrot.lane.b32.xlu1 %v7958_v21, %s7446_s19 }
 0x91d   : > { %v2744_v41 = vpop.xlane.xlu0 %2743 }
 0x91e   : > { %v2782_v46 = vsub.f32 %v2718_v32, %v2744_v41 }
 0x91f   : > { %v2747_v53 = vpop.xlane.xlu1 %2746 }
 0x920   : > { %v2802_v18 = vmul.f32 1.442695, %v2782_v46  ;;  %v2783_v16 = vsub.f32 %v2719_v62, %v2747_v53 }
 0x921   : > { %v2750_v17 = vpop.xlane.xlu0 %2749 }
 0x922   : > { %7122 = vpow2.f32 %v2802_v18  ;;  %v2804_v40 = vmul.f32 1.442695, %v2783_v16  ;;  %v2784_v26 = vsub.f32 %v2720_v34, %v2750_v17 }
 0x923   : > { %v2753_v8 = vpop.xlane.xlu1 %2752 }
 0x924   : > { %7124 = vpow2.f32 %v2804_v40  ;;  %v2806_v19 = vmul.f32 1.442695, %v2784_v26  ;;  %v2785_v60 = vsub.f32 %v2721_v35, %v2753_v8 }
 0x925   : > { %v2828_v24 = vpop.xlane.xlu0 %2827 }
 0x926   : > { %7126 = vpow2.f32 %v2806_v19  ;;  %v2808_v57 = vmul.f32 1.442695, %v2785_v60 }
 0x927   : > { %7128 = vrcp.f32 %v2828_v24  ;;  %v2831_v4 = vpop.xlane.xlu1 %2830  ;;  %v8698_v24 = vmul.f32 0.17677669, %v6637_v49 }
 0x928   : > { %7130 = vpow2.f32 %v2808_v57 }
 0x929   : > { %7132 = vrcp.f32 %v2831_v4  ;;  %v2834_v59 = vpop.xlane.xlu0 %2833 }
 0x92b   : > { %v2837_v32 = vpop.xlane.xlu1 %2836 }
 0x92c   : > { %v8682_v41 = vpop.eup %7122  ;;  %7134 = vrcp.f32 %v2837_v32 }
 0x92d   : > { %7136 = vrcp.f32 %v2834_v59  ;;  %v2915_v62 = vpop.permute.xlu0 %2914  ;;  %v2838_v17 = vsel %vm1488_vm1, %v8682_v41, 0.0 }
 0x92e   : > { %v8686_v40 = vpop.eup %7124  ;;  %2839 = vadd.xlane.f32.xlu0 %v2838_v17  ;;  %6643 = vmatprep.subr.bf16.mxu0 %v2915_v62 }
 0x92f   : > { %v2917_v26 = vpop.permute.xlu1 %2916  ;;  %6644 = vmatpush3.bf16.msra.mxu0 %v2915_v62  ;;  %v2841_v18 = vsel %vm1488_vm1, %v8686_v40, 0.0 }
 0x930   : > { %v8690_v16 = vpop.eup %7126  ;;  %2842 = vadd.xlane.f32.xlu1 %v2841_v18  ;;  %6645 = vmatprep.subr.bf16.mxu0 %v2917_v26 }
 0x931   : > { %v7129_v34 = vpop.eup %7128  ;;  %v2844_v59 = vsel %vm1488_vm1, %v8690_v16, 0.0 }
 0x932   : > { %v8694_v57 = vpop.eup %7130  ;;  %2845 = vadd.xlane.f32.xlu0 %v2844_v59  ;;  %v2890_v60 = vmul.f32 %v7129_v34, %v8631_v25  ;;  %v8705_v25 = vmul.f32 0.17677669, %v8660_v10  ;;  %v8728_v59 = vmul.f32 0.17677669, %v8666_v56 }
 0x933   : > { %v7133_v4 = vpop.eup %7132  ;;  %v2919_v35 = vpop.permute.xlu1 %2918  ;;  %6646 = vmatpush3.bf16.msra.mxu0 %v2917_v26  ;;  %v2847_v53 = vsel %vm1488_vm1, %v8694_v57, 0.0 }
 0x934   : > { %6647 = vmatprep.subr.bf16.mxu0 %v2919_v35  ;;  %v2891_v8 = vmul.f32 %v7133_v4, %v8634_v38  ;;  %v2760_v38 = vsel %vm1488_vm1, %v8698_v24, -inf  ;;  %v2754_v18 = vsel %vm1488_vm1, %v8705_v25, -inf }
 0x936   : > { %v7135_v19 = vpop.eup %7134  ;;  %2848 = vadd.xlane.f32.xlu0 %v2847_v53  ;;  %v2906_v46 = vpack.c.bf16 %v2891_v8, %v2890_v60 }
 0x937   : > { %v7137_v32 = vpop.eup %7136  ;;  %v2921_v62 = vpop.permute.xlu1 %2920  ;;  %6648 = vmatpush3.bf16.msra.mxu0 %v2919_v35  ;;  %v2893_v17 = vmul.f32 %v7135_v19, %v8652_v22  ;;  %v8718_v22 = vmul.f32 0.17677669, %v8662_v54 }
 0x938   : > { %6651 = vmatprep.mubr.msk.bf16.mxu0 %vm1488_vm1, %v2906_v46  ;;  %6649 = vmatprep.subr.bf16.mxu0 %v2921_v62  ;;  %v2892_v49 = vmul.f32 %v7137_v32, %v8642_v47  ;;  %v8721_v47 = vmul.f32 0.17677669, %v8664_v50 }
 0x939   : > { %v2763_v10 = vsel %vm1488_vm1, %v8718_v22, -inf }
 0x93a   : > { %2761 = vmax.xlane.f32.xlu0 %v2760_v38  ;;  %v2907_v26 = vpack.c.bf16 %v2893_v17, %v2892_v49  ;;  %v2757_v34 = vsel %vm1488_vm1, %v8721_v47, -inf }
 0x93b   : > { %6650 = vmatpush3.bf16.msra.mxu0 %v2921_v62 }
 0x93e   : > { %2755 = vmax.xlane.f32.xlu0 %v2754_v18  ;;  %6652 = vmatmul.mubr.msk.bf16.vlgmr.msra.gmra.mrb[56].mxu0 %vm1488_vm1, %v2907_v26 }
 0x941   : > { %3151 = vrot.lane.b32.xlu1 %v7946_v55, %s7447_s25  ;;  %v8731_v55 = vmul.f32 0.17677669, %v8668_v44 }
 0x943   : > { %v2766_v54 = vsel %vm1488_vm1, %v8731_v55, -inf }
 0x954   : > { %3149 = vrot.lane.b32.xlu0 %v7922_v52, %s7447_s25  ;;  %v2772_v52 = vsel %vm1488_vm1, %v8728_v59, -inf }
 0x965   : > { %2764 = vmax.xlane.f32.xlu1 %v2763_v10 }
 0x969   : > { %2758 = vmax.xlane.f32.xlu1 %v2757_v34 }
 0x973   : > { %2773 = vmax.xlane.f32.xlu0 %v2772_v52 }
 0x977   : > { %2767 = vmax.xlane.f32.xlu0 %v2766_v54 }
 0x97a   : > { %3007 = vrot.lane.b32.xlu1 %v8004_v14, %s7446_s19 }
 0x97e   : > { %3155 = vrot.lane.b32.xlu1 %v7991_v28, %s7447_s25  ;;  %v8761_v28 = vmul.f32 0.17677669, %v8672_v7 }
 0x982   : > { %3143 = vrot.lane.b32.xlu1 %v7944_v11, %s7447_s25  ;;  %v8758_v11 = vmul.f32 0.17677669, %v8670_v3 }
 0x986   : > { %3254 = vrot.lane.b32.xlu1 %v8013_v27, %s7447_s25  ;;  %v2775_v27 = vsel %vm1488_vm1, %v8758_v11, -inf }
 0x98d   : > { %3003 = vrot.lane.b32.xlu0 %v7982_v0, %s7446_s19 }
 0x991   : > { %3005 = vrot.lane.b32.xlu0 %v7980_v30, %s7446_s19 }
 0x995   : > { %3153 = vrot.lane.b32.xlu0 %v7969_v29, %s7447_s25  ;;  %v2769_v29 = vsel %vm1488_vm1, %v8761_v28, -inf }
 0x999   : > { %3009 = vrot.lane.b32.xlu0 %v8002_v9, %s7446_s19 }
 0x99d   : > { %3141 = vrot.lane.b32.xlu0 %v7920_v51, %s7447_s25 }
 0x9a1   : > { %3145 = vrot.lane.b32.xlu0 %v7966_v33, %s7447_s25 }
 0x9aa   : > { %2776 = vmax.xlane.f32.xlu1 %v2775_v27 }
 0x9ae   : > { %2770 = vmax.xlane.f32.xlu1 %v2769_v29 }
 0x9bb   : > { %v2840_v50 = vpop.xlane.xlu0 %2839 }
 0x9bc   : > { %7138 = vrcp.f32 %v2840_v50 }
 0x9bd   : > { %v2843_v51 = vpop.xlane.xlu1 %2842 }
 0x9be   : > { %7140 = vrcp.f32 %v2843_v51 }
 0x9bf   : > { %3256 = vrot.lane.b32.xlu1 %v8035_v45, %s7447_s25  ;;  %v2846_v33 = vpop.xlane.xlu0 %2845 }
 0x9c0   : > { %7142 = vrcp.f32 %v2846_v33 }
 0x9c3   : > { %v2849_v56 = vpop.xlane.xlu0 %2848 }
 0x9c4   : > { %7144 = vrcp.f32 %v2849_v56 }
 0x9c6   : > { %v7139_v7 = vpop.eup %7138 }
 0x9c7   : > { %v2762_v44 = vpop.xlane.xlu0 %2761  ;;  %v2894_v4 = vmul.f32 %v7139_v7, %v8682_v41  ;;  %v3152_v41 = vpop.permute.xlu1 %3151 }
 0x9c8   : > { %v7141_v3 = vpop.eup %7140  ;;  %v2788_v19 = vsub.f32 %v8698_v24, %v2762_v44 }
 0x9c9   : > { %v2895_v35 = vmul.f32 %v7141_v3, %v8686_v40 }
 0x9ca   : > { %v7143_v53 = vpop.eup %7142  ;;  %v2814_v38 = vmul.f32 1.442695, %v2788_v19 }
 0x9cb   : > { %v2756_v60 = vpop.xlane.xlu0 %2755  ;;  %v2908_v8 = vpack.c.bf16 %v2895_v35, %v2894_v4  ;;  %v2896_v32 = vmul.f32 %v7143_v53, %v8690_v16  ;;  %v3173_v16 = vsel %vm1293_vm0, %v3152_v41, 0 }
 0x9cc   : > { %v2786_v40 = vsub.f32 %v8705_v25, %v2756_v60  ;;  %7146 = vpow2.f32 %v2814_v38 }
 0x9cd   : > { %6655 = vmatprep.mubr.msk.bf16.mxu0 %vm1488_vm1, %v2908_v8 }
 0x9ce   : > { %v7145_v46 = vpop.eup %7144  ;;  %v2810_v24 = vmul.f32 1.442695, %v2786_v40 }
 0x9cf   : > { %v3150_v45 = vpop.permute.xlu0 %3149  ;;  %v2897_v62 = vmul.f32 %v7145_v46, %v8694_v57 }
 0x9d0   : > { %6795 = vmatprep.subr.msk.bf16.mxu0 %vm1293_vm0, %v3150_v45  ;;  %v3170_v17 = vsel %vm1293_vm0, %v3150_v45, 0  ;;  %7148 = vpow2.f32 %v2810_v24 }
 0x9d1   : > { %6676 = vmatpush3.bf16.xpose.msra.mxu0 %v3170_v17  ;;  %v2909_v49 = vpack.c.bf16 %v2897_v62, %v2896_v32 }
 0x9d2   : > { %6796 = vmatprep.subr.msk.bf16.mxu0 %vm1293_vm0, %v3152_v41 }
 0x9d3   : > { %6656 = vmatmul.mubr.msk.bf16.gmra.mrb[60].mxu0 %vm1488_vm1, %v2909_v49 }
 0x9d6   : > { %v8781_v57 = vpop.eup %7146 }
 0x9d7   : > { %v2856_v26 = vsel %vm1488_vm1, %v8781_v57, 0.0 }
 0x9d9   : > { %6678 = vmatpush3.bf16.xpose.msra.mxu0 %v3173_v16 }
 0x9da   : > { %v8785_v18 = vpop.eup %7148 }
 0x9db   : > { %v2850_v25 = vsel %vm1488_vm1, %v8785_v18, 0.0 }
 0x9e3   : > { %2857 = vadd.xlane.f32.xlu1 %v2856_v26 }
 0x9e7   : > { %2851 = vadd.xlane.f32.xlu1 %v2850_v25 }
 0x9f2   : > { %v2765_v10 = vpop.xlane.xlu1 %2764 }
 0x9f3   : > { %v2789_v34 = vsub.f32 %v8718_v22, %v2765_v10 }
 0x9f5   : > { %v2816_v52 = vmul.f32 1.442695, %v2789_v34 }
 0x9f6   : > { %v2759_v54 = vpop.xlane.xlu1 %2758 }
 0x9f7   : > { %7150 = vpow2.f32 %v2816_v52  ;;  %v2787_v27 = vsub.f32 %v8721_v47, %v2759_v54 }
 0x9f9   : > { %v2812_v29 = vmul.f32 1.442695, %v2787_v27 }
 0x9fa   : > { %v3008_v44 = vpop.permute.xlu1 %3007 }
 0x9fb   : > { %7152 = vpow2.f32 %v2812_v29 }
 0xa00   : > { %v2774_v50 = vpop.xlane.xlu0 %2773 }
 0xa01   : > { %v8791_v51 = vpop.eup %7150  ;;  %v2792_v33 = vsub.f32 %v8728_v59, %v2774_v50  ;;  %v3156_v59 = vpop.permute.xlu1 %3155 }
 0xa02   : > { %v2859_v56 = vsel %vm1488_vm1, %v8791_v51, 0.0  ;;  %v3179_v10 = vsel %vm1293_vm0, %v3156_v59, 0 }
 0xa03   : > { %v2822_v7 = vmul.f32 1.442695, %v2792_v33  ;;  %2860 = vadd.xlane.f32.xlu1 %v2859_v56 }
 0xa04   : > { %v2768_v3 = vpop.xlane.xlu0 %2767 }
 0xa05   : > { %v8796_v22 = vpop.eup %7152  ;;  %7154 = vpow2.f32 %v2822_v7  ;;  %v2790_v4 = vsub.f32 %v8731_v55, %v2768_v3  ;;  %v3144_v19 = vpop.permute.xlu1 %3143 }
 0xa06   : > { %v2853_v47 = vsel %vm1488_vm1, %v8796_v22, 0.0 }
 0xa07   : > { %v2818_v35 = vmul.f32 1.442695, %v2790_v4  ;;  %2854 = vadd.xlane.f32.xlu1 %v2853_v47 }
 0xa08   : > { %v3004_v60 = vpop.permute.xlu0 %3003 }
 0xa09   : > { %7156 = vpow2.f32 %v2818_v35  ;;  %6659 = vmatprep.subr.bf16.mxu1 %v3004_v60  ;;  %v3255_v26 = vpop.permute.xlu1 %3254 }
 0xa0a   : > { %6660 = vmatpush3.bf16.msra.mxu1 %v3004_v60 }
 0xa0c   : > { %v3006_v8 = vpop.permute.xlu0 %3005 }
 0xa0d   : > { %6661 = vmatprep.subr.bf16.mxu1 %v3006_v8 }
 0xa0e   : > { %6662 = vmatpush3.bf16.msra.mxu1 %v3006_v8 }
 0xa0f   : > { %v8801_v53 = vpop.eup %7154  ;;  %6663 = vmatprep.subr.bf16.mxu1 %v3008_v44 }
 0xa10   : > { %v3154_v46 = vpop.permute.xlu0 %3153  ;;  %v2868_v55 = vsel %vm1488_vm1, %v8801_v53, 0.0 }
 0xa11   : > { %v8805_v45 = vpop.f32.mrb[56].mxu0  ;;  %2869 = vadd.xlane.f32.xlu0 %v2868_v55  ;;  %6797 = vmatprep.subr.msk.bf16.mxu0 %vm1293_vm0, %v3154_v46  ;;  %v3176_v32 = vsel %vm1293_vm0, %v3154_v46, 0  ;;  %v3275_v46 = vsel %vm1293_vm0, %v3255_v26, 0 }
 0xa12   : > { %v8809_v62 = vpop.f32.mrb[57].mxu0  ;;  %6664 = vmatpush3.bf16.msra.mxu1 %v3008_v44  ;;  %6680 = vmatpush3.bf16.xpose.msra.mxu0 %v3176_v32 }
 0xa13   : > { %v8811_v17 = vpop.eup %7156  ;;  %v8813_v41 = vpop.f32.mrb[58].mxu0  ;;  %6798 = vmatprep.subr.msk.bf16.mxu0 %vm1293_vm0, %v3156_v59 }
 0xa14   : > { %v8818_v40 = vpop.f32.mrb[59].mxu0  ;;  %v3010_v49 = vpop.permute.xlu0 %3009  ;;  %v2862_v24 = vsel %vm1488_vm1, %v8811_v17, 0.0 }
 0xa15   : > { %2863 = vadd.xlane.f32.xlu0 %v2862_v24  ;;  %6665 = vmatprep.subr.bf16.mxu1 %v3010_v49 }
 0xa16   : > { %6666 = vmatpush3.bf16.msra.mxu1 %v3010_v49 }
 0xa17   : > { %6799 = vmatprep.subr.msk.bf16.mxu1 %vm1293_vm0, %v3255_v26 }
 0xa18   : > { %3147 = vrot.lane.b32.xlu1 %v7988_v2, %s7447_s25  ;;  %v3142_v25 = vpop.permute.xlu0 %3141 }
 0xa19   : > { %6683 = vmatprep.mubr.msk.bf16.mxu0 %vm1293_vm0, %v3142_v25 }
 0xa1a   : > { %6682 = vmatpush3.bf16.xpose.msra.mxu0 %v3179_v10 }
 0xa1c   : > { %v3146_v34 = vpop.permute.xlu0 %3145 }
 0xa21   : > { %6684 = vmatmul.mubr.msk.bf16.vlgmr.msra.gmra.mrb[64].mxu0 %vm1293_vm0, %v3144_v19 }
 0xa22   : > { %6687 = vmatprep.mubr.msk.bf16.mxu0 %vm1293_vm0, %v3146_v34 }
 0xa37   : > { %v2777_v52 = vpop.xlane.xlu1 %2776 }
 0xa38   : > { %v2793_v54 = vsub.f32 %v8758_v11, %v2777_v52 }
 0xa3a   : > { %v2824_v27 = vmul.f32 1.442695, %v2793_v54 }
 0xa3b   : > { %v2771_v29 = vpop.xlane.xlu1 %2770 }
 0xa3c   : > { %7158 = vpow2.f32 %v2824_v27  ;;  %v2791_v50 = vsub.f32 %v8761_v28, %v2771_v29 }
 0xa3e   : > { %v2820_v2 = vmul.f32 1.442695, %v2791_v50 }
 0xa3f   : > { %v3257_v11 = vpop.permute.xlu1 %3256 }
 0xa40   : > { %7160 = vpow2.f32 %v2820_v2  ;;  %v3278_v49 = vsel %vm1293_vm0, %v3257_v11, 0 }
 0xa46   : > { %v8833_v33 = vpop.eup %7158 }
 0xa47   : > { %v2871_v56 = vsel %vm1488_vm1, %v8833_v33, 0.0 }
 0xa48   : > { %2872 = vadd.xlane.f32.xlu0 %v2871_v56 }
 0xa4a   : > { %v8837_v7 = vpop.eup %7160 }
 0xa4b   : > { %v2865_v44 = vsel %vm1488_vm1, %v8837_v7, 0.0 }
 0xa4c   : > { %2866 = vadd.xlane.f32.xlu1 %v2865_v44 }
 0xa5d   : > { %3260 = vrot.lane.b32.xlu1 %v8069_v15, %s7447_s25 }
 0xa5e   : > { %3258 = vrot.lane.b32.xlu0 %v8055_v63, %s7447_s25 }
 0xa61   : > { %3248 = vrot.lane.b32.xlu1 %v8033_v43, %s7447_s25 }
 0xa62   : > { %3246 = vrot.lane.b32.xlu0 %v8011_v20, %s7447_s25 }
 0xa65   : > { %3252 = vrot.lane.b32.xlu1 %v8067_v13, %s7447_s25 }
 0xa66   : > { %3250 = vrot.lane.b32.xlu0 %v8053_v61, %s7447_s25 }
 0xa70   : > { %v2858_v28 = vpop.xlane.xlu1 %2857 }
 0xa74   : > { %v2852_v3 = vpop.xlane.xlu1 %2851 }
 0xa90   : > { %v2861_v4 = vpop.xlane.xlu1 %2860 }
 0xa91   : > { %7162 = vrcp.f32 %v2861_v4 }
 0xa92   : > { %7164 = vrcp.f32 %v2852_v3 }
 0xa93   : > { %7166 = vrcp.f32 %v2858_v28 }
 0xa94   : > { %v2855_v63 = vpop.xlane.xlu1 %2854 }
 0xa95   : > { %7168 = vrcp.f32 %v2855_v63 }
 0xa98   : > { %v3148_v15 = vpop.permute.xlu1 %3147 }
 0xa99   : > { %6688 = vmatmul.mubr.msk.bf16.gmra.mrb[68].mxu0 %vm1293_vm0, %v3148_v15 }
 0xa9b   : > { %v7163_v43 = vpop.eup %7162 }
 0xa9c   : > { %v7165_v20 = vpop.eup %7164  ;;  %v2901_v13 = vmul.f32 %v7163_v43, %v8791_v51 }
 0xa9d   : > { %v7167_v47 = vpop.eup %7166  ;;  %v2898_v61 = vmul.f32 %v7165_v20, %v8785_v18 }
 0xa9e   : > { %v2900_v59 = vmul.f32 %v7167_v47, %v8781_v57  ;;  %v2870_v24 = vpop.xlane.xlu0 %2869 }
 0xa9f   : > { %v7169_v35 = vpop.eup %7168 }
 0xaa0   : > { %v2899_v60 = vmul.f32 %v7169_v35, %v8796_v22  ;;  %v2911_v19 = vpack.c.bf16 %v2901_v13, %v2900_v59 }
 0xaa2   : > { %v2910_v8 = vpack.c.bf16 %v2899_v60, %v2898_v61  ;;  %v2864_v26 = vpop.xlane.xlu0 %2863 }
 0xaa4   : > { %6667 = vmatprep.mubr.msk.bf16.mxu1 %vm1488_vm1, %v2910_v8 }
 0xaa5   : > { %6668 = vmatmul.mubr.msk.bf16.vlgmr.msra.gmra.mrb[72].mxu1 %vm1488_vm1, %v2911_v19 }
 0xaa6   : > { %6692 = vmatpush3.bf16.xpose.msra.mxu1 %v3275_v46  ;;  %v8861_v55 = vpop.f32.mrb[60].mxu0 }
 0xaa7   : > { %6800 = vmatprep.subr.msk.bf16.mxu1 %vm1293_vm0, %v3257_v11  ;;  %v8864_v51 = vpop.f32.mrb[61].mxu0 }
 0xaa8   : > { %v8866_v18 = vpop.f32.mrb[62].mxu0 }
 0xaa9   : > { %v8870_v22 = vpop.f32.mrb[63].mxu0 }
 0xaae   : > { %6694 = vmatpush3.bf16.xpose.msra.mxu1 %v3278_v49 }
 0xad5   : > { %v2873_v25 = vpop.xlane.xlu0 %2872 }
 0xad6   : > { %7170 = vrcp.f32 %v2873_v25 }
 0xad7   : > { %7172 = vrcp.f32 %v2864_v26 }
 0xad8   : > { %7174 = vrcp.f32 %v2870_v24 }
 0xad9   : > { %v2867_v10 = vpop.xlane.xlu1 %2866  ;;  %v3259_v34 = vpop.permute.xlu0 %3258 }
 0xada   : > { %7176 = vrcp.f32 %v2867_v10  ;;  %6801 = vmatprep.subr.msk.bf16.mxu1 %vm1293_vm0, %v3259_v34  ;;  %v3281_v52 = vsel %vm1293_vm0, %v3259_v34, 0 }
 0xadb   : > { %6696 = vmatpush3.bf16.xpose.msra.mxu1 %v3281_v52 }
 0xadd   : > { %v3261_v54 = vpop.permute.xlu1 %3260  ;;  %v3247_v15 = vpop.permute.xlu0 %3246 }
 0xade   : > { %6802 = vmatprep.subr.msk.bf16.mxu1 %vm1293_vm0, %v3261_v54  ;;  %v3284_v50 = vsel %vm1293_vm0, %v3261_v54, 0 }
 0xae0   : > { %v7171_v27 = vpop.eup %7170 }
 0xae1   : > { %v7173_v29 = vpop.eup %7172  ;;  %v2905_v44 = vmul.f32 %v7171_v27, %v8833_v33  ;;  %v3249_v43 = vpop.permute.xlu1 %3248 }
 0xae2   : > { %v7175_v2 = vpop.eup %7174  ;;  %v2902_v11 = vmul.f32 %v7173_v29, %v8811_v17  ;;  %v3251_v20 = vpop.permute.xlu0 %3250 }
 0xae3   : > { %6698 = vmatpush3.bf16.xpose.msra.mxu1 %v3284_v50  ;;  %v2904_v3 = vmul.f32 %v7175_v2, %v8801_v53 }
 0xae4   : > { %v7177_v56 = vpop.eup %7176 }
 0xae5   : > { %v2903_v28 = vmul.f32 %v7177_v56, %v8837_v7  ;;  %v2913_v63 = vpack.c.bf16 %v2905_v44, %v2904_v3  ;;  %v3253_v60 = vpop.permute.xlu1 %3252 }
 0xae7   : > { %v2912_v4 = vpack.c.bf16 %v2903_v28, %v2902_v11 }
 0xae9   : > { %6671 = vmatprep.mubr.msk.bf16.mxu1 %vm1488_vm1, %v2912_v4 }
 0xaea   : > { %6672 = vmatmul.mubr.msk.bf16.gmra.mrb[76].mxu1 %vm1488_vm1, %v2913_v63 }
 0xaeb   : > { %6699 = vmatprep.mubr.msk.bf16.mxu1 %vm1293_vm0, %v3247_v15 }
 0xaf2   : > { %6700 = vmatmul.mubr.msk.bf16.vlgmr.msra.gmra.mrb[80].mxu1 %vm1293_vm0, %v3249_v43 }
 0xaf3   : > { %6703 = vmatprep.mubr.msk.bf16.mxu1 %vm1293_vm0, %v3251_v20 }
 0xaf4   : > { %v6685_v17 = vpop.f32.mrb[64].mxu0 }
 0xaf5   : > { %v3215_v33 = vpop.f32.mrb[65].mxu0  ;;  %v3353_v35 = vmul.f32 0.17677669, %v6685_v17 }
 0xaf6   : > { %v3351_v7 = vmul.f32 0.17677669, %v3215_v33  ;;  %v6686_v47 = vpop.f32.mrb[66].mxu0 }
 0xaf7   : > { %v3218_v53 = vpop.f32.mrb[67].mxu0  ;;  %v3354_v8 = vmul.f32 0.17677669, %v6686_v47  ;;  %v3373_v19 = vsel %vm1488_vm1, %v3353_v35, -inf }
 0xaf8   : > { %v3352_v13 = vmul.f32 0.17677669, %v3218_v53  ;;  %v3367_v61 = vsel %vm1488_vm1, %v3351_v7, -inf }
 0xaf9   : > { %3368 = vmax.xlane.f32.xlu0 %v3367_v61  ;;  %v3376_v46 = vsel %vm1488_vm1, %v3354_v8, -inf }
 0xafa   : > { %6704 = vmatmul.mubr.msk.bf16.gmra.mrb[84].mxu1 %vm1293_vm0, %v3253_v60  ;;  %v3370_v59 = vsel %vm1488_vm1, %v3352_v13, -inf }
 0xafb   : > { %3371 = vmax.xlane.f32.xlu1 %v3370_v59 }
 0xafd   : > { %3374 = vmax.xlane.f32.xlu0 %v3373_v19 }
 0xb01   : > { %3377 = vmax.xlane.f32.xlu0 %v3376_v46 }
 0xb6c   : > { %v6689_v49 = vpop.f32.mrb[68].mxu0 }
 0xb6d   : > { %v3231_v24 = vpop.f32.mrb[69].mxu0  ;;  %v8895_v34 = vmul.f32 0.17677669, %v6689_v49 }
 0xb6e   : > { %v8893_v26 = vmul.f32 0.17677669, %v3231_v24  ;;  %v6690_v25 = vpop.f32.mrb[70].mxu0 }
 0xb6f   : > { %v3234_v10 = vpop.f32.mrb[71].mxu0  ;;  %v8901_v27 = vmul.f32 0.17677669, %v6690_v25  ;;  %v3385_v50 = vsel %vm1488_vm1, %v8895_v34, -inf }
 0xb70   : > { %v8897_v52 = vmul.f32 0.17677669, %v3234_v10  ;;  %v3379_v54 = vsel %vm1488_vm1, %v8893_v26, -inf }
 0xb71   : > { %3380 = vmax.xlane.f32.xlu0 %v3379_v54  ;;  %v3388_v2 = vsel %vm1488_vm1, %v8901_v27, -inf }
 0xb72   : > { %v3382_v29 = vsel %vm1488_vm1, %v8897_v52, -inf }
 0xb73   : > { %3383 = vmax.xlane.f32.xlu1 %v3382_v29 }
 0xb75   : > { %3386 = vmax.xlane.f32.xlu0 %v3385_v50 }
 0xb77   : > { %3389 = vmax.xlane.f32.xlu1 %v3388_v2 }
 0xb78   : > { %v8909_v56 = vpop.f32.mrb[72].mxu1 }
 0xb79   : > { %v8911_v44 = vpop.f32.mrb[73].mxu1 }
 0xb7a   : > { %v8913_v11 = vpop.f32.mrb[74].mxu1 }
 0xb7b   : > { %v8917_v3 = vpop.f32.mrb[75].mxu1 }
 0xb86   : > { %v3369_v63 = vpop.xlane.xlu0 %3368 }
 0xb87   : > { %v3415_v15 = vsub.f32 %v3351_v7, %v3369_v63 }
 0xb88   : > { %v3372_v43 = vpop.xlane.xlu1 %3371 }
 0xb89   : > { %v3431_v20 = vmul.f32 1.442695, %v3415_v15  ;;  %v3416_v17 = vsub.f32 %v3352_v13, %v3372_v43 }
 0xb8a   : > { %v3375_v33 = vpop.xlane.xlu0 %3374 }
 0xb8b   : > { %7178 = vpow2.f32 %v3431_v20  ;;  %v3433_v47 = vmul.f32 1.442695, %v3416_v17  ;;  %v3417_v53 = vsub.f32 %v3353_v35, %v3375_v33 }
 0xb8d   : > { %7180 = vpow2.f32 %v3433_v47  ;;  %v3435_v61 = vmul.f32 1.442695, %v3417_v53 }
 0xb8e   : > { %v3378_v60 = vpop.xlane.xlu0 %3377 }
 0xb8f   : > { %7182 = vpow2.f32 %v3435_v61  ;;  %v3418_v59 = vsub.f32 %v3354_v8, %v3378_v60 }
 0xb91   : > { %v3437_v19 = vmul.f32 1.442695, %v3418_v59 }
 0xb93   : > { %7184 = vpow2.f32 %v3437_v19 }
 0xb95   : > { %v8921_v46 = vpop.eup %7178 }
 0xb96   : > { %v3463_v49 = vsel %vm1488_vm1, %v8921_v46, 0.0 }
 0xb97   : > { %v8925_v7 = vpop.eup %7180  ;;  %3464 = vadd.xlane.f32.xlu0 %v3463_v49 }
 0xb98   : > { %v3466_v13 = vsel %vm1488_vm1, %v8925_v7, 0.0 }
 0xb99   : > { %v8929_v24 = vpop.eup %7182  ;;  %3467 = vadd.xlane.f32.xlu1 %v3466_v13 }
 0xb9a   : > { %v3469_v35 = vsel %vm1488_vm1, %v8929_v24, 0.0 }
 0xb9b   : > { %3470 = vadd.xlane.f32.xlu0 %v3469_v35 }
 0xb9d   : > { %v8933_v8 = vpop.eup %7184 }
 0xb9e   : > { %v3472_v25 = vsel %vm1488_vm1, %v8933_v8, 0.0 }
 0xb9f   : > { %3473 = vadd.xlane.f32.xlu1 %v3472_v25 }
 0xbbd   : > { %v8937_v10 = vpop.f32.mrb[76].mxu1 }
 0xbbe   : > { %v8939_v54 = vpop.f32.mrb[77].mxu1 }
 0xbbf   : > { %v8941_v29 = vpop.f32.mrb[78].mxu1 }
 0xbc0   : > { %v8945_v2 = vpop.f32.mrb[79].mxu1 }
 0xbc5   : > { %v6701_v15 = vpop.f32.mrb[80].mxu1 }
 0xbc6   : > { %v8949_v43 = vmul.f32 0.17677669, %v6701_v15  ;;  %v3320_v20 = vpop.f32.mrb[81].mxu1 }
 0xbc7   : > { %v6702_v17 = vpop.f32.mrb[82].mxu1  ;;  %v8951_v33 = vmul.f32 0.17677669, %v3320_v20 }
 0xbc8   : > { %v3323_v47 = vpop.f32.mrb[83].mxu1  ;;  %v3397_v53 = vsel %vm1488_vm1, %v8949_v43, -inf }
 0xbc9   : > { %3398 = vmax.xlane.f32.xlu0 %v3397_v53  ;;  %v3391_v61 = vsel %vm1488_vm1, %v8951_v33, -inf }
 0xbcd   : > { %v6705_v60 = vpop.f32.mrb[84].mxu1  ;;  %3392 = vmax.xlane.f32.xlu0 %v3391_v61 }
 0xbce   : > { %v3336_v59 = vpop.f32.mrb[85].mxu1  ;;  %v8959_v13 = vmul.f32 0.17677669, %v6705_v60 }
 0xbcf   : > { %v6706_v19 = vpop.f32.mrb[86].mxu1  ;;  %v8962_v20 = vmul.f32 0.17677669, %v3336_v59 }
 0xbd0   : > { %v3339_v49 = vpop.f32.mrb[87].mxu1  ;;  %v3409_v61 = vsel %vm1488_vm1, %v8959_v13, -inf }
 0xbd1   : > { %v3403_v59 = vsel %vm1488_vm1, %v8962_v20, -inf }
 0xbe3   : > { %3551 = vrot.lane.b32.xlu0 %v7938_v48, %s7447_s25 }
 0xbfe   : > { %v3381_v35 = vpop.xlane.xlu0 %3380 }
 0xbff   : > { %v3419_v25 = vsub.f32 %v8893_v26, %v3381_v35 }
 0xc00   : > { %v3384_v15 = vpop.xlane.xlu1 %3383 }
 0xc01   : > { %v3439_v53 = vmul.f32 1.442695, %v3419_v25  ;;  %v3420_v63 = vsub.f32 %v8897_v52, %v3384_v15 }
 0xc02   : > { %3410 = vmax.xlane.f32.xlu0 %v3409_v61  ;;  %v3387_v50 = vpop.xlane.xlu0 %3386 }
 0xc03   : > { %7186 = vpow2.f32 %v3439_v53  ;;  %v3441_v4 = vmul.f32 1.442695, %v3420_v63  ;;  %v3421_v48 = vsub.f32 %v8895_v34, %v3387_v50  ;;  %v3362_v50 = vmul.f32 0.17677669, %v6702_v17 }
 0xc04   : > { %v3390_v60 = vpop.xlane.xlu1 %3389  ;;  %v8989_v53 = vmul.f32 0.17677669, %v3323_v47 }
 0xc05   : > { %7188 = vpow2.f32 %v3441_v4  ;;  %v3443_v28 = vmul.f32 1.442695, %v3421_v48  ;;  %v3422_v26 = vsub.f32 %v8901_v27, %v3390_v60  ;;  %v3400_v61 = vsel %vm1488_vm1, %v3362_v50, -inf }
 0xc06   : > { %3404 = vmax.xlane.f32.xlu0 %v3403_v59  ;;  %v8994_v48 = vmul.f32 0.17677669, %v6706_v19  ;;  %v3394_v17 = vsel %vm1488_vm1, %v8989_v53, -inf }
 0xc07   : > { %7190 = vpow2.f32 %v3443_v28  ;;  %v3445_v52 = vmul.f32 1.442695, %v3422_v26 }
 0xc08   : > { %v3412_v26 = vsel %vm1488_vm1, %v8994_v48, -inf }
 0xc09   : > { %7192 = vpow2.f32 %v3445_v52 }
 0xc0d   : > { %v8971_v35 = vpop.eup %7186 }
 0xc0e   : > { %v3475_v25 = vsel %vm1488_vm1, %v8971_v35, 0.0 }
 0xc0f   : > { %v8975_v63 = vpop.eup %7188  ;;  %3476 = vadd.xlane.f32.xlu1 %v3475_v25 }
 0xc10   : > { %v3478_v34 = vsel %vm1488_vm1, %v8975_v63, 0.0 }
 0xc11   : > { %v8979_v4 = vpop.eup %7190 }
 0xc12   : > { %v3481_v27 = vsel %vm1488_vm1, %v8979_v4, 0.0 }
 0xc13   : > { %3479 = vadd.xlane.f32.xlu1 %v3478_v34  ;;  %v8983_v28 = vpop.eup %7192 }
 0xc14   : > { %v3484_v15 = vsel %vm1488_vm1, %v8983_v28, 0.0 }
 0xc17   : > { %3482 = vadd.xlane.f32.xlu1 %v3481_v27 }
 0xc1b   : > { %3485 = vadd.xlane.f32.xlu1 %v3484_v15 }
 0xc1c   : > { %3555 = vrot.lane.b32.xlu0 %v7960_v23, %s7447_s25  ;;  %v9000_v23 = vmul.f32 0.17677669, %v3339_v49 }
 0xc1f   : > { %3401 = vmax.xlane.f32.xlu1 %v3400_v61 }
 0xc20   : > { %3557 = vrot.lane.b32.xlu0 %v7958_v21, %s7447_s25  ;;  %v3406_v21 = vsel %vm1488_vm1, %v9000_v23, -inf }
 0xc23   : > { %3395 = vmax.xlane.f32.xlu1 %v3394_v17 }
 0xc24   : > { %3640 = vrot.lane.b32.xlu0 %v7982_v0, %s7447_s25  ;;  %v3465_v60 = vpop.xlane.xlu0 %3464 }
 0xc25   : > { %7194 = vrcp.f32 %v3465_v60 }
 0xc26   : > { %v3468_v47 = vpop.xlane.xlu1 %3467 }
 0xc27   : > { %7196 = vrcp.f32 %v3468_v47  ;;  %3413 = vmax.xlane.f32.xlu1 %v3412_v26 }
 0xc28   : > { %v3471_v49 = vpop.xlane.xlu0 %3470 }
 0xc2b   : > { %3407 = vmax.xlane.f32.xlu1 %v3406_v21 }
 0xc2f   : > { %v7195_v19 = vpop.eup %7194 }
 0xc30   : > { %v3527_v52 = vmul.f32 %v7195_v19, %v8921_v46  ;;  %v3474_v19 = vpop.xlane.xlu1 %3473 }
 0xc31   : > { %v7197_v59 = vpop.eup %7196 }
 0xc32   : > { %v3528_v0 = vmul.f32 %v7197_v59, %v8925_v7 }
 0xc34   : > { %v3543_v25 = vpack.c.bf16 %v3528_v0, %v3527_v52 }
 0xc36   : > { %6715 = vmatprep.mubr.msk.bf16.mxu0 %vm1488_vm1, %v3543_v25 }
 0xc3c   : > { %3553 = vrot.lane.b32.xlu1 %v7936_v1, %s7447_s25 }
 0xc56   : > { %v3399_v34 = vpop.xlane.xlu0 %3398 }
 0xc57   : > { %v3425_v27 = vsub.f32 %v8949_v43, %v3399_v34 }
 0xc59   : > { %v3451_v15 = vmul.f32 1.442695, %v3425_v27 }
 0xc5a   : > { %v3393_v61 = vpop.xlane.xlu0 %3392 }
 0xc5b   : > { %7198 = vpow2.f32 %v3451_v15  ;;  %v3423_v17 = vsub.f32 %v8951_v33, %v3393_v61 }
 0xc5d   : > { %v3447_v60 = vmul.f32 1.442695, %v3423_v17 }
 0xc5e   : > { %v3552_v47 = vpop.permute.xlu0 %3551 }
 0xc5f   : > { %7200 = vpow2.f32 %v3447_v60  ;;  %6707 = vmatprep.subr.bf16.mxu0 %v3552_v47 }
 0xc60   : > { %6708 = vmatpush3.bf16.msra.mxu0 %v3552_v47 }
 0xc65   : > { %v9013_v46 = vpop.eup %7198 }
 0xc66   : > { %v3493_v7 = vsel %vm1488_vm1, %v9013_v46, 0.0 }
 0xc67   : > { %3494 = vadd.xlane.f32.xlu0 %v3493_v7 }
 0xc69   : > { %v9017_v1 = vpop.eup %7200 }
 0xc6a   : > { %v3487_v43 = vsel %vm1488_vm1, %v9017_v1, 0.0 }
 0xc6b   : > { %3488 = vadd.xlane.f32.xlu0 %v3487_v43 }
 0xc8f   : > { %v3411_v26 = vpop.xlane.xlu0 %3410 }
 0xc90   : > { %v3429_v17 = vsub.f32 %v8959_v13, %v3411_v26 }
 0xc92   : > { %v3459_v43 = vmul.f32 1.442695, %v3429_v17 }
 0xc93   : > { %v3405_v21 = vpop.xlane.xlu0 %3404 }
 0xc94   : > { %v3427_v32 = vsub.f32 %v8962_v20, %v3405_v21 }
 0xc97   : > { %v3556_v33 = vpop.permute.xlu0 %3555 }
 0xc9b   : > { %v3558_v59 = vpop.permute.xlu0 %3557 }
 0xc9c   : > { %v3477_v52 = vpop.xlane.xlu1 %3476 }
 0xc9f   : > { %v3641_v0 = vpop.permute.xlu0 %3640 }
 0xca0   : > { %v3480_v25 = vpop.xlane.xlu1 %3479  ;;  %6723 = vmatprep.subr.bf16.mxu1 %v3641_v0 }
 0xca1   : > { %6724 = vmatpush3.bf16.msra.mxu1 %v3641_v0  ;;  %v3455_v0 = vmul.f32 1.442695, %v3427_v32 }
 0xca4   : > { %v3483_v34 = vpop.xlane.xlu1 %3482 }
 0xca8   : > { %v3486_v27 = vpop.xlane.xlu1 %3485 }
 0xcac   : > { %v3402_v15 = vpop.xlane.xlu1 %3401 }
 0xcad   : > { %v3426_v61 = vsub.f32 %v3362_v50, %v3402_v15 }
 0xcaf   : > { %v3453_v60 = vmul.f32 1.442695, %v3426_v61 }
 0xcb0   : > { %v3396_v47 = vpop.xlane.xlu1 %3395 }
 0xcb1   : > { %7202 = vpow2.f32 %v3453_v60  ;;  %v3424_v7 = vsub.f32 %v8989_v53, %v3396_v47 }
 0xcb2   : > { %7204 = vrcp.f32 %v3474_v19 }
 0xcb3   : > { %v3449_v57 = vmul.f32 1.442695, %v3424_v7 }
 0xcb4   : > { %v3414_v38 = vpop.xlane.xlu1 %3413 }
 0xcb5   : > { %7206 = vpow2.f32 %v3449_v57  ;;  %v3430_v16 = vsub.f32 %v8994_v48, %v3414_v38 }
 0xcb6   : > { %7208 = vpow2.f32 %v3459_v43 }
 0xcb7   : > { %7210 = vrcp.f32 %v3480_v25  ;;  %v3461_v26 = vmul.f32 1.442695, %v3430_v16 }
 0xcb8   : > { %7212 = vrcp.f32 %v3471_v49  ;;  %v3408_v50 = vpop.xlane.xlu1 %3407 }
 0xcb9   : > { %7214 = vrcp.f32 %v3477_v52  ;;  %v3428_v53 = vsub.f32 %v9000_v23, %v3408_v50  ;;  %v6871_v50 = vld [vmem:[%s7529_s23 + $0x28] sm:$0xff]  }
 0xcba   : > { %7216 = vpow2.f32 %v3455_v0 }
 0xcbb   : > { %v9025_v13 = vpop.eup %7202  ;;  %7218 = vrcp.f32 %v3486_v27  ;;  %v3457_v38 = vmul.f32 1.442695, %v3428_v53 }
 0xcbc   : > { %v3554_v15 = vpop.permute.xlu1 %3553  ;;  %v3496_v20 = vsel %vm1488_vm1, %v9025_v13, 0.0  ;;  %v7205_v57 = vpop.eup %7204  ;;  %7220 = vpow2.f32 %v3461_v26 }
 0xcbd   : > { %3497 = vadd.xlane.f32.xlu0 %v3496_v20  ;;  %6709 = vmatprep.subr.bf16.mxu0 %v3554_v15  ;;  %7222 = vrcp.f32 %v3483_v34  ;;  %v3530_v19 = vmul.f32 %v7205_v57, %v8933_v8 }
 0xcbe   : > { %6710 = vmatpush3.bf16.msra.mxu0 %v3554_v15  ;;  %7224 = vpow2.f32 %v3457_v38 }
 0xcbf   : > { %v9030_v32 = vpop.eup %7206  ;;  %6711 = vmatprep.subr.bf16.mxu0 %v3556_v33 }
 0xcc0   : > { %v9032_v48 = vpop.eup %7208  ;;  %v3490_v16 = vsel %vm1488_vm1, %v9030_v32, 0.0 }
 0xcc1   : > { %v7211_v23 = vpop.eup %7210  ;;  %3491 = vadd.xlane.f32.xlu1 %v3490_v16  ;;  %v3505_v52 = vsel %vm1488_vm1, %v9032_v48, 0.0 }
 0xcc2   : > { %v7213_v49 = vpop.eup %7212  ;;  %6712 = vmatpush3.bf16.msra.mxu0 %v3556_v33  ;;  %v3532_v25 = vmul.f32 %v7211_v23, %v8975_v63 }
 0xcc3   : > { %v7215_v21 = vpop.eup %7214  ;;  %6713 = vmatprep.subr.bf16.mxu0 %v3558_v59  ;;  %v3529_v34 = vmul.f32 %v7213_v49, %v8929_v24 }
 0xcc4   : > { %v9040_v27 = vpop.eup %7216  ;;  %v3531_v61 = vmul.f32 %v7215_v21, %v8971_v35 }
 0xcc5   : > { %3506 = vadd.xlane.f32.xlu1 %v3505_v52  ;;  %v3544_v17 = vpack.c.bf16 %v3530_v19, %v3529_v34  ;;  %v7219_v33 = vpop.eup %7218  ;;  %v3499_v8 = vsel %vm1488_vm1, %v9040_v27, 0.0 }
 0xcc6   : > { %6714 = vmatpush3.bf16.msra.mxu0 %v3558_v59  ;;  %v3545_v60 = vpack.c.bf16 %v3532_v25, %v3531_v61  ;;  %v9046_v47 = vpop.eup %7220  ;;  %v3534_v24 = vmul.f32 %v7219_v33, %v8983_v28  ;;  %v10467_v28 = vpack.c.bf16 %v8564_v39, %v8558_v37  ;;  %v6866_v37 = vld [vmem:[%s7529_s23] sm:$0xff]   ;;  %v6867_v39 = vld [vmem:[%s7529_s23 + $0x8] sm:$0xff]  }
 0xcc7   : > { %v7223_v63 = vpop.eup %7222  ;;  %v3508_v35 = vsel %vm1488_vm1, %v9046_v47, 0.0  ;;  %6739 = vmatprep.subr.bf16.mxu0 %v6866_v37 }
 0xcc8   : > { %v9053_v59 = vpop.eup %7224  ;;  %v3533_v7 = vmul.f32 %v7223_v63, %v8979_v4  ;;  %v10468_v4 = vpack.c.bf16 %v8818_v40, %v8809_v62  ;;  %v6868_v62 = vld [vmem:[%s7529_s23 + $0x10] sm:$0xff]  }
 0xcc9   : > { %3500 = vadd.xlane.f32.xlu1 %v3499_v8  ;;  %6716 = vmatmul.mubr.msk.bf16.vlgmr.msra.gmra.mrb[72].mxu0 %vm1488_vm1, %v3544_v17  ;;  %v3502_v0 = vsel %vm1488_vm1, %v9053_v59, 0.0 }
 0xcca   : > { %6719 = vmatprep.mubr.msk.bf16.mxu0 %vm1488_vm1, %v3545_v60  ;;  %v3546_v43 = vpack.c.bf16 %v3534_v24, %v3533_v7  ;;  %6740 = vmatpush3.bf16.msra.mxu0 %v6866_v37 }
 0xccb   : > { %6741 = vmatprep.subr.bf16.mxu0 %v6867_v39 }
 0xccd   : > { %3509 = vadd.xlane.f32.xlu1 %v3508_v35 }
 0xcce   : > { %6742 = vmatpush3.bf16.msra.mxu0 %v6867_v39 }
 0xccf   : > { %6743 = vmatprep.subr.bf16.mxu0 %v6868_v62 }
 0xcd1   : > { %3503 = vadd.xlane.f32.xlu1 %v3502_v0  ;;  %6720 = vmatmul.mubr.msk.bf16.gmra.mrb[76].mxu0 %vm1488_vm1, %v3546_v43 }
 0xcd2   : > { %6744 = vmatpush3.bf16.msra.mxu0 %v6868_v62 }
 0xcd3   : > { %3644 = vrot.lane.b32.xlu0 %v8004_v14, %s7447_s25  ;;  %v10469_v14 = vpack.c.bf16 %v8560_v58, %v8556_v5  ;;  %v6870_v5 = vld [vmem:[%s7529_s23 + $0x20] sm:$0xff]  }
 0xcd7   : > { %3646 = vrot.lane.b32.xlu0 %v8002_v9, %s7447_s25  ;;  %v10470_v9 = vpack.c.bf16 %v8813_v41, %v8805_v45 }
 0xcdb   : > { %2471 = vrot.lane.b32.xlu0 %v10467_v28, %s7447_s25 }
 0xcdf   : > { %3108 = vrot.lane.b32.xlu0 %v10468_v4, %s7446_s19 }
 0xce2   : > { %3642 = vrot.lane.b32.xlu1 %v7980_v30, %s7447_s25  ;;  %v6869_v30 = vld [vmem:[%s7529_s23 + $0x18] sm:$0xff]  }
 0xce3   : > { %6745 = vmatprep.subr.bf16.mxu0 %v6869_v30 }
 0xce4   : > { %6746 = vmatpush3.bf16.msra.mxu0 %v6869_v30 }
 0xce5   : > { %6747 = vmatprep.subr.bf16.mxu0 %v6870_v5 }
 0xce6   : > { %2473 = vrot.lane.b32.xlu1 %v10469_v14, %s7447_s25  ;;  %v6872_v14 = vld [vmem:[%s7529_s23 + $0x30] sm:$0xff]  }
 0xce8   : > { %6748 = vmatpush3.bf16.msra.mxu0 %v6870_v5 }
 0xce9   : > { %6749 = vmatprep.subr.bf16.mxu0 %v6871_v50 }
 0xcea   : > { %3110 = vrot.lane.b32.xlu1 %v10470_v9, %s7446_s19 }
 0xcec   : > { %6750 = vmatpush3.bf16.msra.mxu0 %v6871_v50 }
 0xced   : > { %6751 = vmatprep.subr.bf16.mxu0 %v6872_v14 }
 0xcf0   : > { %6752 = vmatpush3.bf16.msra.mxu0 %v6872_v14  ;;  %v10489_v14 = vpack.c.bf16 %v8941_v29, %v8937_v10 }
 0xcf4   : > { %v3495_v40 = vpop.xlane.xlu0 %3494 }
 0xcf8   : > { %v3489_v58 = vpop.xlane.xlu0 %3488 }
 0xcf9   : > { %7226 = vrcp.f32 %v3489_v58  ;;  %v10473_v58 = vpack.c.bf16 %v8594_v12, %v8587_v6  ;;  %v10476_v6 = vld [vmem:[#allocation9_spill] sm:$0xff]  ;;  %v10478_v12 = vld [vmem:[#allocation11_spill] sm:$0xff] }
 0xd03   : > { %v7227_v38 = vpop.eup %7226 }
 0xd04   : > { %v3535_v21 = vmul.f32 %v7227_v38, %v9017_v1 }
 0xd4a   : > { %v3498_v45 = vpop.xlane.xlu0 %3497 }
 0xd4e   : > { %v3492_v41 = vpop.xlane.xlu1 %3491  ;;  %v3645_v26 = vpop.permute.xlu0 %3644 }
 0xd4f   : > { %7228 = vrcp.f32 %v3492_v41 }
 0xd50   : > { %7230 = vrcp.f32 %v3498_v45 }
 0xd51   : > { %7232 = vrcp.f32 %v3495_v40 }
 0xd52   : > { %v3507_v53 = vpop.xlane.xlu1 %3506  ;;  %v3647_v15 = vpop.permute.xlu0 %3646 }
 0xd56   : > { %v3501_v20 = vpop.xlane.xlu1 %3500  ;;  %v2472_v57 = vpop.permute.xlu0 %2471 }
 0xd57   : > { %2496 = vst.msk [vmem:[#allocation2] sm:$0xff] %vm2495_vm2, %v2472_v57  ;;  %7234 = vrcp.f32 %v3501_v20 }
 0xd59   : > { %v7229_v16 = vpop.eup %7228 }
 0xd5a   : > { %v3510_v23 = vpop.xlane.xlu1 %3509  ;;  %v3109_v49 = vpop.permute.xlu0 %3108  ;;  %v3536_v19 = vmul.f32 %v7229_v16, %v9030_v32 }
 0xd5b   : > { %3133 = vst.msk [vmem:[#allocation2] sm:$0xff] %vm3132_vm3, %v3109_v49  ;;  %v7231_v61 = vpop.eup %7230 }
 0xd5c   : > { %v3547_v52 = vpack.c.bf16 %v3536_v19, %v3535_v21  ;;  %v7233_v17 = vpop.eup %7232  ;;  %v3538_v8 = vmul.f32 %v7231_v61, %v9025_v13 }
 0xd5d   : > { %v3537_v24 = vmul.f32 %v7233_v17, %v9013_v46  ;;  %v10471_v46 = vmov 0  }
 0xd5e   : > { %v3504_v25 = vpop.xlane.xlu1 %3503  ;;  %6731 = vmatprep.mubr.msk.bf16.mxu1 %vm1488_vm1, %v3547_v52 }
 0xd5f   : > { %7236 = vrcp.f32 %v3504_v25  ;;  %v3548_v7 = vpack.c.bf16 %v3538_v8, %v3537_v24 }
 0xd60   : > { %7238 = vrcp.f32 %v3510_v23 }
 0xd61   : > { %7240 = vrcp.f32 %v3507_v53  ;;  %v7235_v32 = vpop.eup %7234  ;;  %v10474_v53 = vpack.c.bf16 %v8866_v18, %v8861_v55  ;;  %v10481_v55 = vpack.c.bf16 %v8913_v11, %v8909_v56 }
 0xd62   : > { %v3643_v34 = vpop.permute.xlu1 %3642  ;;  %v3539_v35 = vmul.f32 %v7235_v32, %v9040_v27  ;;  %v6873_v27 = vld [vmem:[%s7529_s23 + $0x38] sm:$0xff]  }
 0xd63   : > { %6725 = vmatprep.subr.bf16.mxu1 %v3643_v34  ;;  %6753 = vmatprep.subr.bf16.mxu0 %v6873_v27 }
 0xd64   : > { %6726 = vmatpush3.bf16.msra.mxu1 %v3643_v34  ;;  %6754 = vmatpush3.bf16.msra.mxu0 %v6873_v27  ;;  %v10490_v27 = vpack.c.bf16 %v8945_v2, %v8939_v54 }
 0xd65   : > { %6727 = vmatprep.subr.bf16.mxu1 %v3645_v26 }
 0xd66   : > { %v2474_v1 = vpop.permute.xlu1 %2473 }
 0xd67   : > { %2497 = vst.msk [vmem:[#allocation2 + $0x8] sm:$0xff] %vm2495_vm2, %v2474_v1 }
 0xd68   : > { %6728 = vmatpush3.bf16.msra.mxu1 %v3645_v26 }
 0xd69   : > { %v7237_v33 = vpop.eup %7236  ;;  %6729 = vmatprep.subr.bf16.mxu1 %v3647_v15 }
 0xd6a   : > { %v3111_v60 = vpop.permute.xlu1 %3110  ;;  %v3540_v63 = vmul.f32 %v7237_v33, %v9053_v59  ;;  %v7239_v43 = vpop.eup %7238 }
 0xd6b   : > { %3134 = vst.msk [vmem:[#allocation2 + $0x8] sm:$0xff] %vm3132_vm3, %v3111_v60  ;;  %v7241_v28 = vpop.eup %7240  ;;  %v3542_v13 = vmul.f32 %v7239_v43, %v9046_v47  ;;  %v10472_v47 = vpack.c.bf16 %v8590_v42, %v8585_v36  ;;  %v10475_v36 = vpack.c.bf16 %v8870_v22, %v8864_v51  ;;  %v10477_v42 = vpack.c.bf16 %v8618_v31, %v10476_v6  ;;  %v10483_v60 = vld [vmem:[#allocation14_spill] sm:$0xff]  ;;  %v10487_v43 = vld [vmem:[#allocation13_spill] sm:$0xff] }
 0xd6c   : > { %6730 = vmatpush3.bf16.msra.mxu1 %v3647_v15  ;;  %v3549_v0 = vpack.c.bf16 %v3540_v63, %v3539_v35  ;;  %v3541_v59 = vmul.f32 %v7241_v28, %v9032_v48  ;;  %v10479_v15 = vld [vmem:[#allocation10_spill] sm:$0xff]  ;;  %v10482_v51 = vpack.c.bf16 %v8917_v3, %v8911_v44  ;;  %v10484_v63 = vld [vmem:[#allocation12_spill] sm:$0xff] }
 0xd6d   : > { %v10480_v20 = vpack.c.bf16 %v10478_v12, %v10479_v15  ;;  %v10485_v24 = vpack.c.bf16 %v10483_v60, %v10484_v63  ;;  %v7408_v63 = vld [vmem:[%s10386_s10 + $0x28] sm:$0xff] }
 0xd6e   : > { %v3550_v4 = vpack.c.bf16 %v3542_v13, %v3541_v59 }
 0xd6f   : > { %6732 = vmatmul.mubr.msk.bf16.vlgmr.msra.gmra.mrb[88].mxu1 %vm1488_vm1, %v3548_v7  ;;  %v10486_v7 = vld [vmem:[#allocation15_spill] sm:$0xff] }
 0xd70   : > { %6735 = vmatprep.mubr.msk.bf16.mxu1 %vm1488_vm1, %v3549_v0  ;;  %v10488_v0 = vpack.c.bf16 %v10486_v7, %v10487_v43  ;;  %v7410_v43 = vld [vmem:[%s10386_s10 + $0x38] sm:$0xff] }
 0xd77   : > { %6736 = vmatmul.mubr.msk.bf16.gmra.mrb[92].mxu1 %vm1488_vm1, %v3550_v4 }
 0xd78   : > { %4482 = vmatprep.mubr.bf16.mxu1 %v10471_v46 }
 0xd9c   : > { %v6717_v9 = vpop.f32.mrb[72].mxu0 }
 0xd9d   : > { %v3609_v37 = vpop.f32.mrb[73].mxu0 }
 0xd9e   : > { %v6718_v39 = vpop.f32.mrb[74].mxu0 }
 0xd9f   : > { %v3730_v62 = vpack.c.bf16 %v6718_v39, %v6717_v9  ;;  %v3612_v30 = vpop.f32.mrb[75].mxu0 }
 0xda0   : > { %v3729_v40 = vpack.c.bf16 %v3612_v30, %v3609_v37 }
 0xda1   : > { %3747 = vrot.lane.b32.xlu1 %v3730_v62, %s7445_s30 }
 0xda2   : > { %3745 = vrot.lane.b32.xlu0 %v3729_v40, %s7445_s30 }
 0xda4   : > { %v6721_v48 = vpop.f32.mrb[76].mxu0 }
 0xda5   : > { %2477 = vrot.lane.b32.xlu1 %v10472_v47, %s7447_s25  ;;  %v3625_v5 = vpop.f32.mrb[77].mxu0 }
 0xda6   : > { %2475 = vrot.lane.b32.xlu0 %v10473_v58, %s7447_s25  ;;  %v6722_v50 = vpop.f32.mrb[78].mxu0 }
 0xda7   : > { %v3732_v45 = vpack.c.bf16 %v6722_v50, %v6721_v48  ;;  %v3628_v41 = vpop.f32.mrb[79].mxu0  ;;  %v9192_v50 = vld [vmem:[%s10491_s28] ss:$0 sm:$0xff] }
 0xda8   : > { %v3731_v26 = vpack.c.bf16 %v3628_v41, %v3625_v5  ;;  %v9184_v5 = vld.sshfl [vmem:[%s7534_s26] sm:$0xff pattern:$0x75316420]  ;;  %v10492_v41 = vld [vmem:[#allocation7_spill] sm:$0xff] }
 0xda9   : > { %3114 = vrot.lane.b32.xlu1 %v10474_v53, %s7446_s19  ;;  %v624_v58 = vrot.slane %v9184_v5, 2 }
 0xdaa   : > { %3112 = vrot.lane.b32.xlu0 %v10475_v36, %s7446_s19 }
 0xdad   : > { %3751 = vrot.lane.b32.xlu1 %v3732_v45, %s7445_s30 }
 0xdae   : > { %3749 = vrot.lane.b32.xlu0 %v3731_v26, %s7445_s30  ;;  %v3957_v26 = vrot.slane %v624_v58, %v10492_v41  ;;  %v7412_v58 = vld [vmem:[%s10386_s10 + $0x48] sm:$0xff] }
 0xdb1   : > { %2481 = vrot.lane.b32.xlu1 %v10477_v42, %s7447_s25 }
 0xdb2   : > { %2479 = vrot.lane.b32.xlu0 %v10480_v20, %s7447_s25 }
 0xdb5   : > { %3118 = vrot.lane.b32.xlu1 %v10481_v55, %s7446_s19 }
 0xdb6   : > { %3116 = vrot.lane.b32.xlu0 %v10482_v51, %s7446_s19 }
 0xe13   : > { %v3748_v18 = vpop.permute.xlu1 %3747 }
 0xe14   : > { %3771 = vst.msk [vmem:[#allocation2 + $0x8] sm:$0xff] %vm3769_vm4, %v3748_v18  ;;  %v3746_v31 = vpop.permute.xlu0 %3745 }
 0xe15   : > { %3770 = vst.msk [vmem:[#allocation2] sm:$0xff] %vm3769_vm4, %v3746_v31  ;;  %v7403_v31 = vld [vmem:[%s10386_s10] sm:$0xff] }
 0xe17   : > { %v2478_v22 = vpop.permute.xlu1 %2477 }
 0xe18   : > { %2499 = vst.msk [vmem:[#allocation2 + $0x18] sm:$0xff] %vm2495_vm2, %v2478_v22  ;;  %v2476_v57 = vpop.permute.xlu0 %2475 }
 0xe19   : > { %2498 = vst.msk [vmem:[#allocation2 + $0x10] sm:$0xff] %vm2495_vm2, %v2476_v57  ;;  %v7404_v57 = vld [vmem:[%s10386_s10 + $0x8] sm:$0xff] }
 0xe1b   : > { %v3115_v56 = vpop.permute.xlu1 %3114  ;;  %v3779_v44 = vld [vmem:[#allocation2 + $0x8] sm:$0xff] }
 0xe1c   : > { %3136 = vst.msk [vmem:[#allocation2 + $0x18] sm:$0xff] %vm3132_vm3, %v3115_v56  ;;  %v3113_v11 = vpop.permute.xlu0 %3112  ;;  %v3778_v38 = vld [vmem:[#allocation2] sm:$0xff] }
 0xe1d   : > { %3135 = vst.msk [vmem:[#allocation2 + $0x10] sm:$0xff] %vm3132_vm3, %v3113_v11  ;;  %6755 = vmatprep.mubr.bf16.mxu0 %v3778_v38  ;;  %v7405_v38 = vld [vmem:[%s10386_s10 + $0x10] sm:$0xff] }
 0xe1e   : > { %6756 = vmatmul.mubr.bf16.vlgmr.msra.gmra.mrb[80].mxu0 %v3779_v44 }
 0xe1f   : > { %v3752_v3 = vpop.permute.xlu1 %3751 }
 0xe20   : > { %3773 = vst.msk [vmem:[#allocation2 + $0x18] sm:$0xff] %vm3769_vm4, %v3752_v3  ;;  %v3750_v16 = vpop.permute.xlu0 %3749 }
 0xe21   : > { %3772 = vst.msk [vmem:[#allocation2 + $0x10] sm:$0xff] %vm3769_vm4, %v3750_v16 }
 0xe23   : > { %v2482_v23 = vpop.permute.xlu1 %2481 }
 0xe24   : > { %2501 = vst.msk [vmem:[#allocation2 + $0x28] sm:$0xff] %vm2495_vm2, %v2482_v23  ;;  %v2480_v49 = vpop.permute.xlu0 %2479 }
 0xe25   : > { %2500 = vst.msk [vmem:[#allocation2 + $0x20] sm:$0xff] %vm2495_vm2, %v2480_v49 }
 0xe27   : > { %v3119_v21 = vpop.permute.xlu1 %3118  ;;  %v3781_v25 = vld [vmem:[#allocation2 + $0x18] sm:$0xff] }
 0xe28   : > { %3138 = vst.msk [vmem:[#allocation2 + $0x28] sm:$0xff] %vm3132_vm3, %v3119_v21  ;;  %v3117_v19 = vpop.permute.xlu0 %3116  ;;  %v3780_v52 = vld [vmem:[#allocation2 + $0x10] sm:$0xff] }
 0xe29   : > { %3137 = vst.msk [vmem:[#allocation2 + $0x20] sm:$0xff] %vm3132_vm3, %v3117_v19  ;;  %6759 = vmatprep.mubr.bf16.mxu0 %v3780_v52  ;;  %v7406_v19 = vld [vmem:[%s10386_s10 + $0x18] sm:$0xff] }
 0xe2a   : > { %6760 = vmatmul.mubr.bf16.gmra.mrb[84].mxu0 %v3781_v25 }
 0xe42   : > { %v6733_v34 = vpop.f32.mrb[88].mxu1 }
 0xe43   : > { %v3698_v61 = vpop.f32.mrb[89].mxu1 }
 0xe44   : > { %v6734_v1 = vpop.f32.mrb[90].mxu1 }
 0xe45   : > { %v3734_v17 = vpack.c.bf16 %v6734_v1, %v6733_v34  ;;  %v3701_v32 = vpop.f32.mrb[91].mxu1 }
 0xe46   : > { %v3733_v33 = vpack.c.bf16 %v3701_v32, %v3698_v61 }
 0xe47   : > { %3755 = vrot.lane.b32.xlu1 %v3734_v17, %s7445_s30 }
 0xe48   : > { %3753 = vrot.lane.b32.xlu0 %v3733_v33, %s7445_s30  ;;  %v7407_v33 = vld [vmem:[%s10386_s10 + $0x20] sm:$0xff] }
 0xe4a   : > { %v6737_v8 = vpop.f32.mrb[92].mxu1 }
 0xe4b   : > { %2485 = vrot.lane.b32.xlu1 %v10485_v24, %s7447_s25  ;;  %v3714_v35 = vpop.f32.mrb[93].mxu1 }
 0xe4c   : > { %2483 = vrot.lane.b32.xlu0 %v10488_v0, %s7447_s25  ;;  %v6738_v28 = vpop.f32.mrb[94].mxu1 }
 0xe4d   : > { %v3736_v13 = vpack.c.bf16 %v6738_v28, %v6737_v8  ;;  %v3717_v59 = vpop.f32.mrb[95].mxu1  ;;  %v10501_v28 = vld [vmem:[#allocation8_spill] sm:$0xff] }
 0xe4e   : > { %v3735_v4 = vpack.c.bf16 %v3717_v59, %v3714_v35  ;;  %v7409_v35 = vld [vmem:[%s10386_s10 + $0x30] sm:$0xff] }
 0xe4f   : > { %3122 = vrot.lane.b32.xlu1 %v10489_v14, %s7446_s19 }
 0xe50   : > { %3120 = vrot.lane.b32.xlu0 %v10490_v27, %s7446_s19 }
 0xe53   : > { %3759 = vrot.lane.b32.xlu1 %v3736_v13, %s7445_s30  ;;  %v625_v13 = vrot.slane %v10501_v28, 2 }
 0xe54   : > { %3757 = vrot.lane.b32.xlu0 %v3735_v4, %s7445_s30 }
 0xe55   : > { %v3961_v4 = vrot.slane %v625_v13, %v10492_v41  ;;  %v7418_v13 = vld [vmem:[%s10386_s10 + $0x78] sm:$0xff] }
 0xeb9   : > { %v3756_v9 = vpop.permute.xlu1 %3755 }
 0xeba   : > { %3775 = vst.msk [vmem:[#allocation2 + $0x28] sm:$0xff] %vm3769_vm4, %v3756_v9  ;;  %v3754_v37 = vpop.permute.xlu0 %3753 }
 0xebb   : > { %3774 = vst.msk [vmem:[#allocation2 + $0x20] sm:$0xff] %vm3769_vm4, %v3754_v37 }
 0xebd   : > { %v2486_v39 = vpop.permute.xlu1 %2485 }
 0xebe   : > { %2503 = vst.msk [vmem:[#allocation2 + $0x38] sm:$0xff] %vm2495_vm2, %v2486_v39  ;;  %v2484_v10 = vpop.permute.xlu0 %2483 }
 0xebf   : > { %2502 = vst.msk [vmem:[#allocation2 + $0x30] sm:$0xff] %vm2495_vm2, %v2484_v10 }
 0xec1   : > { %v3123_v29 = vpop.permute.xlu1 %3122  ;;  %v3783_v62 = vld [vmem:[#allocation2 + $0x28] sm:$0xff] }
 0xec2   : > { %3140 = vst.msk [vmem:[#allocation2 + $0x38] sm:$0xff] %vm3132_vm3, %v3123_v29  ;;  %v3121_v54 = vpop.permute.xlu0 %3120  ;;  %v3782_v2 = vld [vmem:[#allocation2 + $0x20] sm:$0xff] }
 0xec3   : > { %3139 = vst.msk [vmem:[#allocation2 + $0x30] sm:$0xff] %vm3132_vm3, %v3121_v54  ;;  %6763 = vmatprep.mubr.bf16.mxu0 %v3782_v2 }
 0xec4   : > { %6764 = vmatmul.mubr.bf16.gmra.mrb[88].mxu0 %v3783_v62 }
 0xec5   : > { %v3760_v30 = vpop.permute.xlu1 %3759 }
 0xec6   : > { %3777 = vst.msk [vmem:[#allocation2 + $0x38] sm:$0xff] %vm3769_vm4, %v3760_v30  ;;  %v3758_v40 = vpop.permute.xlu0 %3757 }
 0xec7   : > { %3776 = vst.msk [vmem:[#allocation2 + $0x30] sm:$0xff] %vm3769_vm4, %v3758_v40  ;;  %v7411_v40 = vld [vmem:[%s10386_s10 + $0x40] sm:$0xff] }
 0xecd   : > { %v3785_v47 = vld [vmem:[#allocation2 + $0x38] sm:$0xff] }
 0xece   : > { %v3784_v48 = vld [vmem:[#allocation2 + $0x30] sm:$0xff] }
 0xecf   : > { %6767 = vmatprep.mubr.bf16.mxu0 %v3784_v48 }
 0xed0   : > { %6768 = vmatmul.mubr.bf16.gmra.mrb[92].mxu0 %v3785_v47 }
 0xed1   : > { %4595 = vmatprep.mubr.bf16.mxu0 %v10471_v46 }
 0xef1   : > { %v6757_v45 = vpop.f32.mrb[80].mxu0 }
 0xef2   : > { %v3891_v53 = vpop.f32.mrb[81].mxu0  ;;  %v3900_v36 = vadd.f32 %v6757_v45, %v9192_v50 }
 0xef3   : > { %v3892_v6 = vadd.f32 %v9192_v50, %v3891_v53  ;;  %v6758_v42 = vpop.f32.mrb[82].mxu0  ;;  %v7413_v53 = vld [vmem:[%s10386_s10 + $0x50] sm:$0xff] }
 0xef4   : > { %v3894_v12 = vpop.f32.mrb[83].mxu0  ;;  %v3966_v55 = vmul.f32 %v3957_v26, %v3900_v36  ;;  %v3903_v51 = vadd.f32 %v6758_v42, %v9192_v50  ;;  %v7414_v42 = vld [vmem:[%s10386_s10 + $0x58] sm:$0xff] }
 0xef5   : > { %v3964_v15 = vmul.f32 %v3957_v26, %v3892_v6  ;;  %v3895_v20 = vadd.f32 %v9192_v50, %v3894_v12 }
 0xef6   : > { %v3967_v11 = vmul.f32 %v3957_v26, %v3903_v51  ;;  %v9214_v44 = vadd.f32 %v7405_v38, %v3966_v55 }
 0xef7   : > { %v3965_v18 = vmul.f32 %v3957_v26, %v3895_v20  ;;  %v9202_v22 = vadd.f32 %v7403_v31, %v3964_v15 }
 0xef8   : > { %10495 = vst [vmem:[#allocation10_spill] sm:$0xff] %v9214_v44  ;;  %v9222_v52 = vadd.f32 %v7406_v19, %v3967_v11 }
 0xef9   : > { %10493 = vst [vmem:[#allocation9_spill] sm:$0xff] %v9202_v22  ;;  %3996 = vadd.xlane.f32.xlu0 %v9202_v22  ;;  %v9208_v56 = vadd.f32 %v7404_v57, %v3965_v18 }
 0xefa   : > { %10496 = vst [vmem:[#allocation14_spill] sm:$0xff] %v9222_v52 }
 0xefb   : > { %10494 = vst [vmem:[#allocation11_spill] sm:$0xff] %v9208_v56  ;;  %3998 = vadd.xlane.f32.xlu1 %v9208_v56 }
 0xefd   : > { %4000 = vadd.xlane.f32.xlu0 %v9214_v44  ;;  %v6761_v3 = vpop.f32.mrb[84].mxu0 }
 0xefe   : > { %v3907_v16 = vpop.f32.mrb[85].mxu0  ;;  %v3916_v23 = vadd.f32 %v6761_v3, %v9192_v50 }
 0xeff   : > { %v3908_v49 = vadd.f32 %v9192_v50, %v3907_v16  ;;  %v6762_v21 = vpop.f32.mrb[86].mxu0 }
 0xf00   : > { %v3910_v25 = vpop.f32.mrb[87].mxu0  ;;  %v3919_v61 = vadd.f32 %v6762_v21, %v9192_v50  ;;  %v3970_v17 = vmul.f32 %v3957_v26, %v3916_v23  ;;  %v7415_v21 = vld [vmem:[%s10386_s10 + $0x60] sm:$0xff] }
 0xf01   : > { %v3968_v34 = vmul.f32 %v3957_v26, %v3908_v49  ;;  %v3911_v1 = vadd.f32 %v9192_v50, %v3910_v25  ;;  %4002 = vadd.xlane.f32.xlu0 %v9222_v52 }
 0xf02   : > { %v3971_v60 = vmul.f32 %v3957_v26, %v3919_v61  ;;  %v9242_v7 = vadd.f32 %v7409_v35, %v3970_v17  ;;  %v7416_v61 = vld [vmem:[%s10386_s10 + $0x68] sm:$0xff] }
 0xf03   : > { %v3969_v32 = vmul.f32 %v3957_v26, %v3911_v1  ;;  %v9230_v8 = vadd.f32 %v7407_v33, %v3968_v34  ;;  %v7417_v33 = vld [vmem:[%s10386_s10 + $0x70] sm:$0xff] }
 0xf04   : > { %10499 = vst [vmem:[#allocation13_spill] sm:$0xff] %v9242_v7  ;;  %v9248_v0 = vadd.f32 %v7410_v43, %v3971_v60 }
 0xf05   : > { %10497 = vst [vmem:[#allocation12_spill] sm:$0xff] %v9230_v8  ;;  %4004 = vadd.xlane.f32.xlu0 %v9230_v8  ;;  %v9236_v24 = vadd.f32 %v7408_v63, %v3969_v32 }
 0xf06   : > { %10500 = vst [vmem:[#allocation16_spill] sm:$0xff] %v9248_v0 }
 0xf07   : > { %10498 = vst [vmem:[#allocation15_spill] sm:$0xff] %v9236_v24  ;;  %4006 = vadd.xlane.f32.xlu1 %v9236_v24 }
 0xf09   : > { %4008 = vadd.xlane.f32.xlu0 %v9242_v7 }
 0xf0b   : > { %4010 = vadd.xlane.f32.xlu1 %v9248_v0 }
 0xf86   : > { %v3997_v39 = vpop.xlane.xlu0 %3996 }
 0xf87   : > { %v4028_v16 = vmul.f32 0.0078125, %v3997_v39 }
 0xf88   : > { %v3999_v3 = vpop.xlane.xlu1 %3998 }
 0xf89   : > { %v4029_v25 = vmul.f32 0.0078125, %v3999_v3  ;;  %v9297_v17 = vsub.f32 %v9202_v22, %v4028_v16  ;;  %v6888_v3 = vld [vmem:[%s7555_s18 + $0x44] ss:$16 sps:$4 sm:$0xff]   ;;  %v6886_v16 = vld [vmem:[%s7555_s18 + $0x40] ss:$16 sps:$4 sm:$0xff]  }
 0xf8a   : > { %v4001_v26 = vpop.xlane.xlu0 %4000 }
 0xf8b   : > { %v4030_v32 = vmul.f32 0.0078125, %v4001_v26  ;;  %v9306_v35 = vsub.f32 %v9208_v56, %v4029_v25  ;;  %v6897_v25 = vld [vmem:[%s7555_s18 + $0x6c] ss:$16 sps:$4 sm:$0xff]  }
 0xf8e   : > { %v4003_v18 = vpop.xlane.xlu0 %4002 }
 0xf8f   : > { %v4031_v43 = vmul.f32 0.0078125, %v4003_v18  ;;  %v6882_v18 = vld [vmem:[%s7555_s18 + $0x24] ss:$16 sps:$4 sm:$0xff]  }
 0xf94   : > { %v4007_v63 = vpop.xlane.xlu1 %4006 }
 0xf95   : > { %v4033_v39 = vmul.f32 0.0078125, %v4007_v63  ;;  %v6901_v63 = vld [vmem:[%s7555_s18 + $0x88] ss:$16 sps:$4 sm:$0xff]  }
 0xf97   : > { %v6765_v59 = vpop.f32.mrb[88].mxu0 }
 0xf98   : > { %v3923_v14 = vpop.f32.mrb[89].mxu0  ;;  %v3932_v27 = vadd.f32 %v6765_v59, %v9192_v50 }
 0xf99   : > { %v3924_v9 = vadd.f32 %v9192_v50, %v3923_v14  ;;  %v6766_v37 = vpop.f32.mrb[90].mxu0 }
 0xf9a   : > { %v3926_v10 = vpop.f32.mrb[91].mxu0  ;;  %v3935_v54 = vadd.f32 %v6766_v37, %v9192_v50  ;;  %v3974_v62 = vmul.f32 %v3961_v4, %v3932_v27  ;;  %v4060_v27 = vmul.f32 %v9297_v17, %v9297_v17  ;;  %v9321_v37 = vsub.f32 %v9222_v52, %v4031_v43  ;;  %v6906_v43 = vld [vmem:[%s7555_s18 + $0xa4] ss:$16 sps:$4 sm:$0xff]  }
 0xf9b   : > { %v3972_v29 = vmul.f32 %v3961_v4, %v3924_v9  ;;  %v3927_v2 = vadd.f32 %v9192_v50, %v3926_v10  ;;  %v4061_v10 = vmul.f32 %v9306_v35, %v9306_v35 }
 0xf9c   : > { %v3975_v47 = vmul.f32 %v3961_v4, %v3935_v54  ;;  %v9272_v36 = vadd.f32 %v7413_v53, %v3974_v62  ;;  %v6876_v53 = vld [vmem:[%s7555_s18 + $0x4] ss:$16 sps:$4 sm:$0xff]  }
 0xf9d   : > { %v3973_v30 = vmul.f32 %v3961_v4, %v3927_v2  ;;  %v9260_v48 = vadd.f32 %v7411_v40, %v3972_v29  ;;  %v4011_v29 = vpop.xlane.xlu1 %4010  ;;  %4450 = vmatprep.subr.bf16.mxu1 %v6876_v53 }
 0xf9e   : > { %10504 = vst [vmem:[#allocation18_spill] sm:$0xff] %v9272_v36  ;;  %v9278_v12 = vadd.f32 %v7414_v42, %v3975_v47  ;;  %v4035_v40 = vmul.f32 0.0078125, %v4011_v29  ;;  %v4063_v47 = vmul.f32 %v9321_v37, %v9321_v37  ;;  %v6874_v42 = vld [vmem:[%s7555_s18] ss:$16 sps:$4 sm:$0xff]   ;;  %v6913_v29 = vld [vmem:[%s7555_s18 + $0xc8] ss:$16 sps:$4 sm:$0xff]  }
 0xf9f   : > { %10502 = vst [vmem:[#allocation8_spill] sm:$0xff] %v9260_v48  ;;  %4012 = vadd.xlane.f32.xlu0 %v9260_v48  ;;  %v9266_v45 = vadd.f32 %v7412_v58, %v3973_v30  ;;  %v9331_v30 = vsub.f32 %v9236_v24, %v4033_v39  ;;  %4451 = vmatpush1.bf16.msra.mxu1 %v6874_v42  ;;  %v6915_v39 = vld [vmem:[%s7555_s18 + $0xcc] ss:$16 sps:$4 sm:$0xff]  }
 0xfa0   : > { %10505 = vst [vmem:[#allocation19_spill] sm:$0xff] %v9278_v12  ;;  %4452 = vmatprep.subr.bf16.mxu1 %v6882_v18 }
 0xfa1   : > { %10503 = vst [vmem:[#allocation17_spill] sm:$0xff] %v9266_v45  ;;  %4014 = vadd.xlane.f32.xlu1 %v9266_v45 }
 0xfa3   : > { %4016 = vadd.xlane.f32.xlu0 %v9272_v36  ;;  %v6769_v6 = vpop.f32.mrb[92].mxu0 }
 0xfa4   : > { %v3939_v15 = vpop.f32.mrb[93].mxu0  ;;  %v3948_v20 = vadd.f32 %v6769_v6, %v9192_v50  ;;  %v6879_v6 = vld [vmem:[%s7555_s18 + $0xc] ss:$16 sps:$4 sm:$0xff]  }
 0xfa5   : > { %v3940_v55 = vadd.f32 %v9192_v50, %v3939_v15  ;;  %4018 = vadd.xlane.f32.xlu1 %v9278_v12  ;;  %v6770_v51 = vpop.f32.mrb[94].mxu0  ;;  %v6877_v15 = vld [vmem:[%s7555_s18 + $0x8] ss:$16 sps:$4 sm:$0xff]   ;;  %4563 = vmatprep.subr.bf16.mxu0 %v6879_v6 }
 0xfa6   : > { %v3942_v31 = vpop.f32.mrb[95].mxu0  ;;  %v3951_v11 = vadd.f32 %v6770_v51, %v9192_v50  ;;  %v3978_v23 = vmul.f32 %v3961_v4, %v3948_v20  ;;  %v9345_v20 = vsub.f32 %v9248_v0, %v4035_v40  ;;  %4564 = vmatpush1.bf16.msra.mxu0 %v6877_v15  ;;  %v6921_v40 = vld [vmem:[%s7555_s18 + $0xec] ss:$16 sps:$4 sm:$0xff]  }
 0xfa7   : > { %v3976_v57 = vmul.f32 %v3961_v4, %v3940_v55  ;;  %v3943_v38 = vadd.f32 %v9192_v50, %v3942_v31  ;;  %v4005_v50 = vpop.xlane.xlu0 %4004  ;;  %v4065_v55 = vmul.f32 %v9331_v30, %v9331_v30  ;;  %v6885_v31 = vld [vmem:[%s7555_s18 + $0x2c] ss:$16 sps:$4 sm:$0xff]  }
 0xfa8   : > { %v3979_v34 = vmul.f32 %v3961_v4, %v3951_v11  ;;  %v9303_v60 = vadd.f32 %v7417_v33, %v3978_v23  ;;  %v4032_v14 = vmul.f32 0.0078125, %v4005_v50  ;;  %v6883_v11 = vld [vmem:[%s7555_s18 + $0x28] ss:$16 sps:$4 sm:$0xff]   ;;  %4565 = vmatprep.subr.bf16.mxu0 %v6885_v31  ;;  %v6900_v50 = vld [vmem:[%s7555_s18 + $0x84] ss:$16 sps:$4 sm:$0xff]  }
 0xfa9   : > { %v3977_v49 = vmul.f32 %v3961_v4, %v3943_v38  ;;  %v9288_v19 = vadd.f32 %v7415_v21, %v3976_v57  ;;  %v9315_v4 = vsub.f32 %v9214_v44, %v4030_v32  ;;  %v6880_v57 = vld [vmem:[%s7555_s18 + $0x20] ss:$16 sps:$4 sm:$0xff]   ;;  %v4067_v38 = vmul.f32 %v9345_v20, %v9345_v20  ;;  %v6889_v23 = vld [vmem:[%s7555_s18 + $0x48] ss:$16 sps:$4 sm:$0xff]   ;;  %v6894_v21 = vld [vmem:[%s7555_s18 + $0x64] ss:$16 sps:$4 sm:$0xff]  }
 0xfaa   : > { %10508 = vst [vmem:[#allocation22_spill] sm:$0xff] %v9303_v60  ;;  %v9312_v59 = vadd.f32 %v7418_v13, %v3979_v34  ;;  %v9326_v54 = vsub.f32 %v9230_v8, %v4032_v14  ;;  %4453 = vmatpush1.bf16.msra.mxu1 %v6880_v57  ;;  %4566 = vmatpush1.bf16.msra.mxu0 %v6883_v11  ;;  %v6892_v34 = vld [vmem:[%s7555_s18 + $0x60] ss:$16 sps:$4 sm:$0xff]   ;;  %v6903_v32 = vld [vmem:[%s7555_s18 + $0x8c] ss:$16 sps:$4 sm:$0xff]  }
 0xfab   : > { %10506 = vst [vmem:[#allocation20_spill] sm:$0xff] %v9288_v19  ;;  %4020 = vadd.xlane.f32.xlu0 %v9288_v19  ;;  %v9294_v1 = vadd.f32 %v7416_v61, %v3977_v49  ;;  %v4009_v9 = vpop.xlane.xlu0 %4008  ;;  %v4062_v62 = vmul.f32 %v9315_v4, %v9315_v4  ;;  %4454 = vmatprep.subr.bf16.mxu1 %v6888_v3  ;;  %v6891_v49 = vld [vmem:[%s7555_s18 + $0x4c] ss:$16 sps:$4 sm:$0xff]   ;;  %v6895_v61 = vld [vmem:[%s7555_s18 + $0x68] ss:$16 sps:$4 sm:$0xff]  }
 0xfac   : > { %10509 = vst [vmem:[#allocation23_spill] sm:$0xff] %v9312_v59  ;;  %v4034_v2 = vmul.f32 0.0078125, %v4009_v9  ;;  %v4064_v26 = vmul.f32 %v9326_v54, %v9326_v54  ;;  %4567 = vmatprep.subr.bf16.mxu0 %v6891_v49  ;;  %v6898_v33 = vld [vmem:[%s7555_s18 + $0x80] ss:$16 sps:$4 sm:$0xff]   ;;  %v6909_v13 = vld [vmem:[%s7555_s18 + $0xac] ss:$16 sps:$4 sm:$0xff]  }
 0xfad   : > { %10507 = vst [vmem:[#allocation21_spill] sm:$0xff] %v9294_v1  ;;  %4022 = vadd.xlane.f32.xlu1 %v9294_v1  ;;  %v6904_v14 = vld [vmem:[%s7555_s18 + $0xa0] ss:$16 sps:$4 sm:$0xff]   ;;  %v6912_v9 = vld [vmem:[%s7555_s18 + $0xc4] ss:$16 sps:$4 sm:$0xff]  }
 0xfae   : > { %v9336_v58 = vsub.f32 %v9242_v7, %v4034_v2  ;;  %4455 = vmatpush1.bf16.msra.mxu1 %v6886_v16  ;;  %4568 = vmatpush1.bf16.msra.mxu0 %v6889_v23  ;;  %v6916_v2 = vld [vmem:[%s7555_s18 + $0xe0] ss:$16 sps:$4 sm:$0xff]  }
 0xfaf   : > { %4024 = vadd.xlane.f32.xlu0 %v9303_v60  ;;  %4456 = vmatprep.subr.bf16.mxu1 %v6894_v21 }
 0xfb0   : > { %v4066_v51 = vmul.f32 %v9336_v58, %v9336_v58  ;;  %4569 = vmatprep.subr.bf16.mxu0 %v6897_v25 }
 0xfb1   : > { %4026 = vadd.xlane.f32.xlu1 %v9312_v59 }
 0xfb2   : > { %4457 = vmatpush1.bf16.msra.mxu1 %v6892_v34  ;;  %4570 = vmatpush1.bf16.msra.mxu0 %v6895_v61 }
 0xfb3   : > { %4076 = vadd.xlane.f32.xlu0 %v4060_v27  ;;  %4458 = vmatprep.subr.bf16.mxu1 %v6900_v50  ;;  %v6907_v27 = vld [vmem:[%s7555_s18 + $0xa8] ss:$16 sps:$4 sm:$0xff]  }
 0xfb4   : > { %4571 = vmatprep.subr.bf16.mxu0 %v6903_v32 }
 0xfb5   : > { %4078 = vadd.xlane.f32.xlu1 %v4061_v10  ;;  %v6910_v10 = vld [vmem:[%s7555_s18 + $0xc0] ss:$16 sps:$4 sm:$0xff]  }
 0xfb6   : > { %4459 = vmatpush1.bf16.msra.mxu1 %v6898_v33  ;;  %4572 = vmatpush1.bf16.msra.mxu0 %v6901_v63 }
 0xfb7   : > { %4080 = vadd.xlane.f32.xlu0 %v4062_v62  ;;  %4460 = vmatprep.subr.bf16.mxu1 %v6906_v43  ;;  %v6918_v62 = vld [vmem:[%s7555_s18 + $0xe4] ss:$16 sps:$4 sm:$0xff]  }
 0xfb8   : > { %4573 = vmatprep.subr.bf16.mxu0 %v6909_v13 }
 0xfb9   : > { %4082 = vadd.xlane.f32.xlu1 %v4063_v47  ;;  %v6919_v47 = vld [vmem:[%s7555_s18 + $0xe8] ss:$16 sps:$4 sm:$0xff]  }
 0xfba   : > { %4461 = vmatpush1.bf16.msra.mxu1 %v6904_v14  ;;  %4574 = vmatpush1.bf16.msra.mxu0 %v6907_v27 }
 0xfbb   : > { %4084 = vadd.xlane.f32.xlu0 %v4064_v26  ;;  %4462 = vmatprep.subr.bf16.mxu1 %v6912_v9 }
 0xfbc   : > { %4575 = vmatprep.subr.bf16.mxu0 %v6915_v39 }
 0xfbd   : > { %4086 = vadd.xlane.f32.xlu1 %v4065_v55 }
 0xfbe   : > { %4463 = vmatpush1.bf16.msra.mxu1 %v6910_v10  ;;  %4576 = vmatpush1.bf16.msra.mxu0 %v6913_v29 }
 0xfbf   : > { %4088 = vadd.xlane.f32.xlu0 %v4066_v51  ;;  %4464 = vmatprep.subr.bf16.mxu1 %v6918_v62 }
 0xfc0   : > { %4577 = vmatprep.subr.bf16.mxu0 %v6921_v40 }
 0xfc1   : > { %4090 = vadd.xlane.f32.xlu1 %v4067_v38 }
 0xfc2   : > { %4465 = vmatpush1.bf16.msra.mxu1 %v6916_v2  ;;  %4578 = vmatpush1.bf16.msra.mxu0 %v6919_v47 }
0x102c   : > { %v4013_v26 = vpop.xlane.xlu0 %4012 }
0x102d   : > { %v4036_v53 = vmul.f32 0.0078125, %v4013_v26 }
0x102e   : > { %v4015_v6 = vpop.xlane.xlu1 %4014 }
0x102f   : > { %v9382_v42 = vsub.f32 %v9260_v48, %v4036_v53  ;;  %v4037_v15 = vmul.f32 0.0078125, %v4015_v6 }
0x1030   : > { %v4017_v55 = vpop.xlane.xlu0 %4016 }
0x1031   : > { %v9385_v51 = vsub.f32 %v9266_v45, %v4037_v15  ;;  %v4038_v18 = vmul.f32 0.0078125, %v4017_v55  ;;  %v4068_v31 = vmul.f32 %v9382_v42, %v9382_v42  ;;  %v9422_v55 = vld.sshfl [vmem:[%s7534_s26 + $0x8] sm:$0x33 pattern:$0x75316420] }
0x1032   : > { %v4019_v57 = vpop.xlane.xlu1 %4018 }
0x1033   : > { %v9390_v11 = vsub.f32 %v9272_v36, %v4038_v18  ;;  %v4039_v38 = vmul.f32 0.0078125, %v4019_v57  ;;  %4092 = vadd.xlane.f32.xlu0 %v4068_v31  ;;  %v4069_v3 = vmul.f32 %v9385_v51, %v9385_v51 }
0x1035   : > { %v9395_v16 = vsub.f32 %v9278_v12, %v4039_v38  ;;  %4094 = vadd.xlane.f32.xlu1 %v4069_v3  ;;  %v4070_v23 = vmul.f32 %v9390_v11, %v9390_v11 }
0x1037   : > { %4096 = vadd.xlane.f32.xlu0 %v4070_v23  ;;  %v4071_v49 = vmul.f32 %v9395_v16, %v9395_v16 }
0x1038   : > { %v4021_v21 = vpop.xlane.xlu0 %4020 }
0x1039   : > { %v4040_v25 = vmul.f32 0.0078125, %v4021_v21  ;;  %4098 = vadd.xlane.f32.xlu1 %v4071_v49  ;;  %v4172_v49 = vadd.f32 1.0, %v9422_v55 }
0x103a   : > { %v4023_v34 = vpop.xlane.xlu1 %4022 }
0x103b   : > { %v9402_v61 = vsub.f32 %v9288_v19, %v4040_v25  ;;  %v4041_v50 = vmul.f32 0.0078125, %v4023_v34 }
0x103c   : > { %v4025_v32 = vpop.xlane.xlu0 %4024 }
0x103d   : > { %v9405_v33 = vsub.f32 %v9294_v1, %v4041_v50  ;;  %v4042_v63 = vmul.f32 0.0078125, %v4025_v32  ;;  %v4072_v43 = vmul.f32 %v9402_v61, %v9402_v61  ;;  %v4179_v32 = vrot.slane %v4172_v49, %v10492_v41 }
0x103e   : > { %v4027_v13 = vpop.xlane.xlu1 %4026 }
0x103f   : > { %v9410_v14 = vsub.f32 %v9303_v60, %v4042_v63  ;;  %v4043_v27 = vmul.f32 0.0078125, %v4027_v13  ;;  %4100 = vadd.xlane.f32.xlu0 %v4072_v43  ;;  %v4073_v9 = vmul.f32 %v9405_v33, %v9405_v33  ;;  %v626_v13 = vrot.slane %v9184_v5, 3 }
0x1040   : > { %v4077_v39 = vpop.xlane.xlu0 %4076 }
0x1041   : > { %v9415_v10 = vsub.f32 %v9312_v59, %v4043_v27  ;;  %v4108_v29 = vmul.f32 0.0078125, %v4077_v39  ;;  %4102 = vadd.xlane.f32.xlu1 %v4073_v9  ;;  %v4074_v2 = vmul.f32 %v9410_v14, %v9410_v14 }
0x1042   : > { %v4079_v62 = vpop.xlane.xlu1 %4078 }
0x1043   : > { %v4124_v40 = vadd.f32 1e-06, %v4108_v29  ;;  %v4109_v47 = vmul.f32 0.0078125, %v4079_v62  ;;  %4104 = vadd.xlane.f32.xlu0 %v4074_v2  ;;  %v4075_v26 = vmul.f32 %v9415_v10, %v9415_v10 }
0x1044   : > { %v4081_v53 = vpop.xlane.xlu0 %4080 }
0x1045   : > { %7242 = vrsqrt.f32 %v4124_v40  ;;  %v4125_v6 = vadd.f32 1e-06, %v4109_v47  ;;  %v4110_v15 = vmul.f32 0.0078125, %v4081_v53  ;;  %4106 = vadd.xlane.f32.xlu1 %v4075_v26  ;;  %v4205_v47 = vrot.slane %v626_v13, %v10492_v41 }
0x1046   : > { %v4083_v18 = vpop.xlane.xlu1 %4082 }
0x1047   : > { %7244 = vrsqrt.f32 %v4125_v6  ;;  %v4126_v31 = vadd.f32 1e-06, %v4110_v15  ;;  %v4111_v57 = vmul.f32 0.0078125, %v4083_v18 }
0x1048   : > { %v4085_v38 = vpop.xlane.xlu0 %4084 }
0x1049   : > { %7246 = vrsqrt.f32 %v4126_v31  ;;  %v4127_v3 = vadd.f32 1e-06, %v4111_v57  ;;  %v4112_v23 = vmul.f32 0.0078125, %v4085_v38 }
0x104a   : > { %v4087_v21 = vpop.xlane.xlu1 %4086 }
0x104b   : > { %7248 = vrsqrt.f32 %v4127_v3  ;;  %v4113_v25 = vmul.f32 0.0078125, %v4087_v21  ;;  %v4128_v34 = vadd.f32 1e-06, %v4112_v23 }
0x104c   : > { %v4089_v63 = vpop.xlane.xlu0 %4088 }
0x104d   : > { %v4129_v50 = vadd.f32 1e-06, %v4113_v25  ;;  %v4114_v2 = vmul.f32 0.0078125, %v4089_v63 }
0x104e   : > { %v4091_v43 = vpop.xlane.xlu1 %4090 }
0x104f   : > { %v7243_v27 = vpop.eup %7242  ;;  %7250 = vrsqrt.f32 %v4129_v50  ;;  %v4115_v9 = vmul.f32 0.0078125, %v4091_v43  ;;  %v4130_v18 = vadd.f32 1e-06, %v4114_v2 }
0x1050   : > { %v4156_v39 = vmul.f32 %v7243_v27, %v9297_v17  ;;  %7252 = vrsqrt.f32 %v4128_v34 }
0x1051   : > { %v7245_v29 = vpop.eup %7244  ;;  %v4131_v53 = vadd.f32 1e-06, %v4115_v9 }
0x1052   : > { %v4186_v62 = vmul.f32 %v4179_v32, %v4156_v39  ;;  %v4157_v40 = vmul.f32 %v7245_v29, %v9306_v35 }
0x1053   : > { %v7247_v26 = vpop.eup %7246  ;;  %7254 = vrsqrt.f32 %v4131_v53  ;;  %v6925_v53 = vld [vmem:[%s7566_s12 + $0x80] sm:$0xff]  }
0x1054   : > { %v4187_v6 = vmul.f32 %v4179_v32, %v4157_v40  ;;  %v4212_v31 = vadd.f32 %v4205_v47, %v4186_v62  ;;  %v4158_v57 = vmul.f32 %v7247_v26, %v9315_v4  ;;  %7256 = vrsqrt.f32 %v4130_v18  ;;  %v6924_v26 = vld [vmem:[%s7566_s12] sm:$0xff]   ;;  %v6929_v18 = vld [vmem:[%s7566_s12 + $0x88] sm:$0xff]  }
0x1055   : > { %v7249_v15 = vpop.eup %7248 }
0x1056   : > { %v4213_v5 = vadd.f32 %v4205_v47, %v4187_v6  ;;  %v4159_v38 = vmul.f32 %v7249_v15, %v9321_v37  ;;  %v4188_v35 = vmul.f32 %v4179_v32, %v4158_v57  ;;  %v6927_v6 = vld [vmem:[%s7566_s12 + $0xc8] sm:$0xff]   ;;  %v6932_v57 = vld [vmem:[%s7566_s12 + $0x10] sm:$0xff]  }
0x1057   : > { %v6928_v15 = vld [vmem:[%s7566_s12 + $0x8] sm:$0xff]  }
0x1058   : > { %v4228_v17 = vpack.c.bf16 %v4213_v5, %v4212_v31  ;;  %v4189_v3 = vmul.f32 %v4179_v32, %v4159_v38  ;;  %v4214_v34 = vadd.f32 %v4205_v47, %v4188_v35  ;;  %v6930_v31 = vld [vmem:[%s7566_s12 + $0x50] sm:$0xff]   ;;  %v6936_v35 = vld [vmem:[%s7566_s12 + $0x18] sm:$0xff]  }
0x1059   : > { %v7251_v23 = vpop.eup %7250  ;;  %v6931_v5 = vld [vmem:[%s7566_s12 + $0xd0] sm:$0xff]  }
0x105a   : > { %4483 = vmatmul.mubr.bf16.vlgmr.msra.gmra.mrb[96].mxu1 %v4228_v17  ;;  %4596 = vmatmul.mubr.bf16.vlgmr.msra.gmra.mrb[96].mxu0 %v4228_v17  ;;  %v7253_v49 = vpop.eup %7252  ;;  %v4215_v21 = vadd.f32 %v4205_v47, %v4189_v3  ;;  %v4161_v25 = vmul.f32 %v7251_v23, %v9331_v30  ;;  %v6933_v38 = vld [vmem:[%s7566_s12 + $0x90] sm:$0xff]   ;;  %v6934_v17 = vld [vmem:[%s7566_s12 + $0x58] sm:$0xff]  }
0x105b   : > { %4492 = vmatprep.mubr.bf16.mxu1 %v10471_v46  ;;  %4605 = vmatprep.mubr.bf16.mxu0 %v10471_v46  ;;  %v4160_v4 = vmul.f32 %v7253_v49, %v9326_v54  ;;  %v6935_v3 = vld [vmem:[%s7566_s12 + $0xd8] sm:$0xff]  }
0x105c   : > { %v4229_v37 = vpack.c.bf16 %v4215_v21, %v4214_v34  ;;  %v4191_v50 = vmul.f32 %v4179_v32, %v4161_v25  ;;  %v6937_v49 = vld [vmem:[%s7566_s12 + $0x98] sm:$0xff]  }
0x105d   : > { %v7255_v63 = vpop.eup %7254  ;;  %v4190_v43 = vmul.f32 %v4179_v32, %v4160_v4 }
0x105e   : > { %v7257_v13 = vpop.eup %7256  ;;  %v4217_v27 = vadd.f32 %v4205_v47, %v4191_v50  ;;  %v4163_v9 = vmul.f32 %v7255_v63, %v9345_v20  ;;  %v6939_v50 = vld [vmem:[%s7566_s12 + $0xe0] sm:$0xff]  }
0x105f   : > { %v4216_v39 = vadd.f32 %v4205_v47, %v4190_v43  ;;  %v4162_v30 = vmul.f32 %v7257_v13, %v9336_v58  ;;  %v6922_v58 = vld [vmem:[%s7566_s12 + $0x40] sm:$0xff]  }
0x1060   : > { %v4193_v29 = vmul.f32 %v4179_v32, %v4163_v9  ;;  %6323 = vmatprep.subr.bf16.mxu1 %v6922_v58  ;;  %v6940_v43 = vld [vmem:[%s7566_s12 + $0x20] sm:$0xff]  }
0x1061   : > { %v4230_v54 = vpack.c.bf16 %v4217_v27, %v4216_v39  ;;  %v4192_v2 = vmul.f32 %v4179_v32, %v4162_v30  ;;  %v6923_v32 = vld [vmem:[%s7566_s12 + $0xc0] sm:$0xff]   ;;  %6324 = vmatpush3.bf16.msra.mxu1 %v6924_v26  ;;  %v9466_v30 = vcombine.high %v9422_v55, %v9422_v55  ;;  %v6947_v26 = vld [vmem:[%s7566_s12 + $0xf0] sm:$0xff]  }
0x1062   : > { %4493 = vmatmul.mubr.bf16.gmra.mrb[100].mxu1 %v4229_v37  ;;  %4606 = vmatmul.mubr.bf16.gmra.mrb[100].mxu0 %v4229_v37  ;;  %v4219_v62 = vadd.f32 %v4205_v47, %v4193_v29  ;;  %v6938_v37 = vld [vmem:[%s7566_s12 + $0x60] sm:$0xff]  }
0x1063   : > { %4502 = vmatprep.mubr.bf16.mxu1 %v10471_v46  ;;  %4615 = vmatprep.mubr.bf16.mxu0 %v10471_v46  ;;  %v4218_v20 = vadd.f32 %v4205_v47, %v4192_v2  ;;  %v6926_v47 = vld [vmem:[%s7566_s12 + $0x48] sm:$0xff]   ;;  %v6941_v13 = vld [vmem:[%s7566_s12 + $0xa0] sm:$0xff]   ;;  %10510 = vst [vmem:[#allocation24_spill] sm:$0xff] %v9466_v30  ;;  %v4173_v55 = vadd.f32 1.0, %v9466_v30 }
0x1064   : > { %6387 = vmatprep.subr.bf16.mxu0 %v6923_v32  ;;  %6325 = vmatprep.subr.bf16.mxu1 %v6926_v47  ;;  %v6942_v2 = vld [vmem:[%s7566_s12 + $0x68] sm:$0xff]   ;;  %v6946_v32 = vld [vmem:[%s7566_s12 + $0x70] sm:$0xff]  }
0x1065   : > { %v4231_v40 = vpack.c.bf16 %v4219_v62, %v4218_v20  ;;  %6388 = vmatpush3.bf16.msra.mxu0 %v6925_v53  ;;  %6326 = vmatpush3.bf16.msra.mxu1 %v6928_v15  ;;  %v6943_v62 = vld [vmem:[%s7566_s12 + $0xe8] sm:$0xff]   ;;  %v6948_v47 = vld [vmem:[%s7566_s12 + $0x30] sm:$0xff]  }
0x1066   : > { %6389 = vmatprep.subr.bf16.mxu0 %v6927_v6  ;;  %6327 = vmatprep.subr.bf16.mxu1 %v6930_v31  ;;  %v6944_v20 = vld [vmem:[%s7566_s12 + $0x28] sm:$0xff]   ;;  %v6949_v6 = vld [vmem:[%s7566_s12 + $0xb0] sm:$0xff]   ;;  %v627_v31 = vrot.slane %v10501_v28, 3 }
0x1069   : > { %6390 = vmatpush3.bf16.msra.mxu0 %v6929_v18  ;;  %6328 = vmatpush3.bf16.msra.mxu1 %v6932_v57 }
0x106a   : > { %4503 = vmatmul.mubr.bf16.gmra.mrb[104].mxu1 %v4230_v54  ;;  %4616 = vmatmul.mubr.bf16.gmra.mrb[104].mxu0 %v4230_v54 }
0x106b   : > { %4512 = vmatprep.mubr.bf16.mxu1 %v10471_v46  ;;  %4625 = vmatprep.mubr.bf16.mxu0 %v10471_v46 }
0x106c   : > { %6391 = vmatprep.subr.bf16.mxu0 %v6931_v5  ;;  %6329 = vmatprep.subr.bf16.mxu1 %v6934_v17  ;;  %v9479_v5 = vrot.slane %v4173_v55, %v10492_v41 }
0x106d   : > { %6392 = vmatpush3.bf16.msra.mxu0 %v6933_v38  ;;  %6330 = vmatpush3.bf16.msra.mxu1 %v6936_v35 }
0x106e   : > { %6393 = vmatprep.subr.bf16.mxu0 %v6935_v3  ;;  %6331 = vmatprep.subr.bf16.mxu1 %v6938_v37  ;;  %v6950_v3 = vld [vmem:[%s7566_s12 + $0x78] sm:$0xff]  }
0x1071   : > { %6394 = vmatpush3.bf16.msra.mxu0 %v6937_v49  ;;  %6332 = vmatpush3.bf16.msra.mxu1 %v6940_v43  ;;  %v4209_v43 = vrot.slane %v627_v31, %v10492_v41 }
0x1072   : > { %4513 = vmatmul.mubr.bf16.gmra.mrb[108].mxu1 %v4231_v40  ;;  %4626 = vmatmul.mubr.bf16.gmra.mrb[108].mxu0 %v4231_v40  ;;  %v6945_v40 = vld [vmem:[%s7566_s12 + $0xa8] sm:$0xff]  }
0x1073   : > { %4522 = vmatprep.mubr.bf16.mxu1 %v10471_v46  ;;  %4635 = vmatprep.mubr.bf16.mxu0 %v10471_v46 }
0x1074   : > { %6395 = vmatprep.subr.bf16.mxu0 %v6939_v50  ;;  %6333 = vmatprep.subr.bf16.mxu1 %v6942_v2 }
0x1075   : > { %6396 = vmatpush3.bf16.msra.mxu0 %v6941_v13  ;;  %6334 = vmatpush3.bf16.msra.mxu1 %v6944_v20 }
0x1076   : > { %6397 = vmatprep.subr.bf16.mxu0 %v6943_v62  ;;  %6335 = vmatprep.subr.bf16.mxu1 %v6946_v32 }
0x1079   : > { %6398 = vmatpush3.bf16.msra.mxu0 %v6945_v40  ;;  %6336 = vmatpush3.bf16.msra.mxu1 %v6948_v47 }
0x107a   : > { %6399 = vmatprep.subr.bf16.mxu0 %v6947_v26  ;;  %6337 = vmatprep.subr.bf16.mxu1 %v6950_v3 }
0x107d   : > { %6400 = vmatpush3.bf16.msra.mxu0 %v6949_v6 }
0x10c0   : > { %v4093_v23 = vpop.xlane.xlu0 %4092 }
0x10c1   : > { %v4116_v21 = vmul.f32 0.0078125, %v4093_v23  ;;  %v6951_v23 = vld [vmem:[%s7566_s12 + $0xf8] sm:$0xff]  }
0x10c2   : > { %v4095_v25 = vpop.xlane.xlu1 %4094  ;;  %6401 = vmatprep.subr.bf16.mxu0 %v6951_v23 }
0x10c3   : > { %v4132_v34 = vadd.f32 1e-06, %v4116_v21  ;;  %v4117_v4 = vmul.f32 0.0078125, %v4095_v25  ;;  %v6952_v21 = vld [vmem:[%s7566_s12 + $0x38] sm:$0xff]  }
0x10c4   : > { %v4097_v63 = vpop.xlane.xlu0 %4096  ;;  %v6953_v25 = vld [vmem:[%s7566_s12 + $0xb8] sm:$0xff]   ;;  %6338 = vmatpush3.bf16.msra.mxu1 %v6952_v21 }
0x10c5   : > { %7258 = vrsqrt.f32 %v4132_v34  ;;  %v4133_v27 = vadd.f32 1e-06, %v4117_v4  ;;  %v4118_v9 = vmul.f32 0.0078125, %v4097_v63  ;;  %6402 = vmatpush3.bf16.msra.mxu0 %v6953_v25  ;;  %v10511_v25 = vld [vmem:[#allocation6_spill] sm:$0xff] }
0x10c6   : > { %v4099_v39 = vpop.xlane.xlu1 %4098 }
0x10c7   : > { %7260 = vrsqrt.f32 %v4133_v27  ;;  %v4134_v54 = vadd.f32 1e-06, %v4118_v9  ;;  %v4119_v29 = vmul.f32 0.0078125, %v4099_v39 }
0x10c9   : > { %7262 = vrsqrt.f32 %v4134_v54  ;;  %v4135_v58 = vadd.f32 1e-06, %v4119_v29 }
0x10cb   : > { %7264 = vrsqrt.f32 %v4135_v58 }
0x10cc   : > { %v4101_v53 = vpop.xlane.xlu0 %4100 }
0x10cd   : > { %v4120_v15 = vmul.f32 0.0078125, %v4101_v53 }
0x10ce   : > { %v4103_v18 = vpop.xlane.xlu1 %4102 }
0x10cf   : > { %v7259_v57 = vpop.eup %7258  ;;  %v4136_v38 = vadd.f32 1e-06, %v4120_v15  ;;  %v4121_v17 = vmul.f32 0.0078125, %v4103_v18 }
0x10d0   : > { %v4105_v35 = vpop.xlane.xlu0 %4104  ;;  %v4164_v49 = vmul.f32 %v7259_v57, %v9382_v42 }
0x10d1   : > { %v7261_v34 = vpop.eup %7260  ;;  %7266 = vrsqrt.f32 %v4136_v38  ;;  %v4137_v4 = vadd.f32 1e-06, %v4121_v17  ;;  %v4122_v37 = vmul.f32 0.0078125, %v4105_v35 }
0x10d2   : > { %v4107_v28 = vpop.xlane.xlu1 %4106  ;;  %v4165_v50 = vmul.f32 %v7261_v34, %v9385_v51  ;;  %v4194_v63 = vmul.f32 %v9479_v5, %v4164_v49  ;;  %v4284_v34 = vsub.s32 3, %v10511_v25 }
0x10d3   : > { %v7263_v13 = vpop.eup %7262  ;;  %7268 = vrsqrt.f32 %v4137_v4  ;;  %v4123_v42 = vmul.f32 0.0078125, %v4107_v28  ;;  %v4138_v39 = vadd.f32 1e-06, %v4122_v37  ;;  %v10513_v4 = vsub.s32 2, %v10511_v25 }
0x10d4   : > { %v4195_v27 = vmul.f32 %v9479_v5, %v4165_v50  ;;  %v4220_v29 = vadd.f32 %v4209_v43, %v4194_v63  ;;  %v4166_v62 = vmul.f32 %v7263_v13, %v9390_v11 }
0x10d5   : > { %v7265_v9 = vpop.eup %7264  ;;  %v4139_v54 = vadd.f32 1e-06, %v4123_v42 }
0x10d6   : > { %v4221_v2 = vadd.f32 %v4209_v43, %v4195_v27  ;;  %v4167_v51 = vmul.f32 %v7265_v9, %v9395_v16  ;;  %v4196_v58 = vmul.f32 %v9479_v5, %v4166_v62 }
0x10d7   : > { %7270 = vrsqrt.f32 %v4139_v54 }
0x10d8   : > { %v4232_v20 = vpack.c.bf16 %v4221_v2, %v4220_v29  ;;  %v4197_v40 = vmul.f32 %v9479_v5, %v4167_v51  ;;  %7272 = vrsqrt.f32 %v4138_v39  ;;  %v4222_v53 = vadd.f32 %v4209_v43, %v4196_v58 }
0x10da   : > { %4523 = vmatmul.mubr.bf16.gmra.mrb[112].mxu1 %v4232_v20  ;;  %4636 = vmatmul.mubr.bf16.gmra.mrb[112].mxu0 %v4232_v20  ;;  %v4223_v32 = vadd.f32 %v4209_v43, %v4197_v40 }
0x10db   : > { %v7267_v55 = vpop.eup %7266  ;;  %4532 = vmatprep.mubr.bf16.mxu1 %v10471_v46  ;;  %4645 = vmatprep.mubr.bf16.mxu0 %v10471_v46 }
0x10dc   : > { %v4168_v11 = vmul.f32 %v7267_v55, %v9402_v61  ;;  %v4233_v47 = vpack.c.bf16 %v4223_v32, %v4222_v53 }
0x10dd   : > { %v7269_v26 = vpop.eup %7268 }
0x10de   : > { %v4169_v16 = vmul.f32 %v7269_v26, %v9405_v33  ;;  %v4198_v18 = vmul.f32 %v9479_v5, %v4168_v11 }
0x10e0   : > { %v4199_v6 = vmul.f32 %v9479_v5, %v4169_v16  ;;  %v4224_v61 = vadd.f32 %v4209_v43, %v4198_v18 }
0x10e1   : > { %v7271_v15 = vpop.eup %7270 }
0x10e2   : > { %4533 = vmatmul.mubr.bf16.gmra.mrb[116].mxu1 %v4233_v47  ;;  %4646 = vmatmul.mubr.bf16.gmra.mrb[116].mxu0 %v4233_v47  ;;  %v7273_v31 = vpop.eup %7272  ;;  %v4225_v57 = vadd.f32 %v4209_v43, %v4199_v6  ;;  %v4171_v38 = vmul.f32 %v7271_v15, %v9415_v10  ;;  %v4268_v10 = vld [vmem:[%s7561_s20] sm:$0xf] }
0x10e3   : > { %4542 = vmatprep.mubr.bf16.mxu1 %v10471_v46  ;;  %4655 = vmatprep.mubr.bf16.mxu0 %v10471_v46  ;;  %v4170_v33 = vmul.f32 %v7273_v31, %v9410_v14  ;;  %v9511_v14 = vrot.slane %v4268_v10, %v10492_v41  ;;  %v9515_v37 = vrot.slane %v4268_v10, %v10513_v4 }
0x10e4   : > { %v4234_v17 = vpack.c.bf16 %v4225_v57, %v4224_v61  ;;  %v4201_v3 = vmul.f32 %v9479_v5, %v4171_v38 }
0x10e5   : > { %v4200_v23 = vmul.f32 %v9479_v5, %v4170_v33  ;;  %10512 = vst [vmem:[#allocation6_spill] sm:$0xff] %v9511_v14  ;;  %10514 = vst [vmem:[#allocation25_spill] sm:$0xff] %v9515_v37  ;;  %v10515_v5 = vsub.s32 1, %v10511_v25 }
0x10e6   : > { %v4227_v35 = vadd.f32 %v4209_v43, %v4201_v3 }
0x10e7   : > { %v4226_v49 = vadd.f32 %v4209_v43, %v4200_v23  ;;  %v9519_v28 = vrot.slane %v4268_v10, %v10515_v5 }
0x10e9   : > { %v4235_v21 = vpack.c.bf16 %v4227_v35, %v4226_v49  ;;  %10516 = vst [vmem:[#allocation26_spill] sm:$0xff] %v9519_v28 }
0x10ea   : > { %4543 = vmatmul.mubr.bf16.gmra.mrb[120].mxu1 %v4234_v17  ;;  %4656 = vmatmul.mubr.bf16.gmra.mrb[120].mxu0 %v4234_v17 }
0x10eb   : > { %4552 = vmatprep.mubr.bf16.mxu1 %v10471_v46  ;;  %4665 = vmatprep.mubr.bf16.mxu0 %v10471_v46  ;;  %v9521_v46 = vrot.slane %v4268_v10, %v4284_v34 }
0x10ed   : > { %10517 = vst [vmem:[#allocation27_spill] sm:$0xff] %v9521_v46 }
0x10f2   : > { %4553 = vmatmul.mubr.bf16.gmra.mrb[124].mxu1 %v4235_v21  ;;  %4666 = vmatmul.mubr.bf16.gmra.mrb[124].mxu0 %v4235_v21 }
0x112d   : > { %v4484_v50 = vpop.f32.mrb[96].mxu1  ;;  %v4597_v63 = vpop.f32.mrb[96].mxu0 }
0x112e   : > { %v4485_v43 = vadd.f32 %v4484_v50, %v9511_v14  ;;  %v4598_v13 = vadd.f32 %v4597_v63, %v9515_v37  ;;  %v4486_v42 = vpop.f32.mrb[97].mxu1  ;;  %v4599_v27 = vpop.f32.mrb[97].mxu0 }
0x112f   : > { %v9526_v9 = vadd.f32 %v4486_v42, %v9519_v28  ;;  %v9529_v39 = vadd.f32 %v4599_v27, %v9521_v46  ;;  %v4488_v54 = vpop.f32.mrb[98].mxu1  ;;  %v4601_v29 = vpop.f32.mrb[98].mxu0 }
0x1130   : > { %v4740_v2 = vmul.f32 0.044715, %v4485_v43  ;;  %v4742_v62 = vmul.f32 0.044715, %v4598_v13  ;;  %v4489_v20 = vadd.f32 %v4488_v54, %v9511_v14  ;;  %v4602_v40 = vadd.f32 %v4601_v29, %v9515_v37  ;;  %v4490_v58 = vpop.f32.mrb[99].mxu1  ;;  %v4603_v55 = vpop.f32.mrb[99].mxu0 }
0x1131   : > { %v4741_v51 = vmul.f32 0.044715, %v9526_v9  ;;  %v4743_v53 = vmul.f32 0.044715, %v9529_v39  ;;  %v9536_v11 = vadd.f32 %v4490_v58, %v9519_v28  ;;  %v9539_v18 = vadd.f32 %v4603_v55, %v9521_v46 }
0x1132   : > { %v4804_v32 = vmul.f32 %v4740_v2, %v4485_v43  ;;  %v4806_v26 = vmul.f32 %v4742_v62, %v4598_v13  ;;  %v4744_v16 = vmul.f32 0.044715, %v4489_v20  ;;  %v4746_v15 = vmul.f32 0.044715, %v4602_v40 }
0x1133   : > { %v4805_v31 = vmul.f32 %v4741_v51, %v9526_v9  ;;  %v4807_v17 = vmul.f32 %v4743_v53, %v9529_v39  ;;  %v4745_v23 = vmul.f32 0.044715, %v9536_v11  ;;  %v9550_v50 = vmul.f32 0.5, %v4485_v43 }
0x1134   : > { %v4868_v47 = vmul.f32 %v4804_v32, %v4485_v43  ;;  %v4870_v6 = vmul.f32 %v4806_v26, %v4598_v13  ;;  %v4808_v57 = vmul.f32 %v4744_v16, %v4489_v20  ;;  %v4810_v3 = vmul.f32 %v4746_v15, %v4602_v40 }
0x1135   : > { %v4494_v38 = vpop.f32.mrb[100].mxu1  ;;  %v4607_v61 = vpop.f32.mrb[100].mxu0  ;;  %v9552_v63 = vmul.f32 0.5, %v4598_v13  ;;  %v4747_v27 = vmul.f32 0.044715, %v9539_v18  ;;  %v9555_v62 = vmul.f32 0.5, %v4489_v20  ;;  %v9565_v53 = vmul.f32 %v4805_v31, %v9526_v9 }
0x1136   : > { %v4932_v33 = vadd.f32 %v4868_v47, %v4485_v43  ;;  %v4496_v35 = vpop.f32.mrb[101].mxu1  ;;  %v4609_v49 = vpop.f32.mrb[101].mxu0  ;;  %v4934_v21 = vadd.f32 %v4870_v6, %v4598_v13  ;;  %v4872_v10 = vmul.f32 %v4808_v57, %v4489_v20  ;;  %v9545_v25 = vadd.f32 %v4494_v38, %v9511_v14 }
0x1137   : > { %v9548_v34 = vadd.f32 %v4607_v61, %v9515_v37  ;;  %v4498_v4 = vpop.f32.mrb[102].mxu1  ;;  %v4611_v5 = vpop.f32.mrb[102].mxu0  ;;  %v4874_v42 = vmul.f32 %v4810_v3, %v4602_v40  ;;  %v9557_v58 = vmul.f32 0.5, %v4602_v40  ;;  %v9562_v43 = vadd.f32 %v4496_v35, %v9519_v28 }
0x1138   : > { %v4500_v54 = vpop.f32.mrb[103].mxu1  ;;  %v4613_v29 = vpop.f32.mrb[103].mxu0  ;;  %v4996_v2 = vmul.f32 0.7978846, %v4932_v33  ;;  %v4936_v51 = vadd.f32 %v4872_v10, %v4489_v20  ;;  %v4748_v32 = vmul.f32 0.044715, %v9545_v25  ;;  %v9568_v16 = vmul.f32 %v4807_v17, %v9529_v39 }
0x1139   : > { %10518 = vst [vmem:[#allocation28_spill] sm:$0xff] %v9548_v34  ;;  %v4938_v55 = vadd.f32 %v4874_v42, %v4602_v40  ;;  %v4750_v26 = vmul.f32 0.044715, %v9548_v34  ;;  %v4998_v13 = vmul.f32 0.7978846, %v4934_v21  ;;  %v4809_v47 = vmul.f32 %v4745_v23, %v9536_v11 }
0x113a   : > { %v4811_v20 = vmul.f32 %v4747_v27, %v9539_v18  ;;  %v4749_v40 = vmul.f32 0.044715, %v9562_v43  ;;  %v9574_v6 = vadd.f32 %v4609_v49, %v9521_v46  ;;  %v9577_v15 = vadd.f32 %v4498_v4, %v9511_v14 }
0x113b   : > { %7274 = vtanh.f32 %v4996_v2  ;;  %v5000_v57 = vmul.f32 0.7978846, %v4936_v51  ;;  %v5002_v38 = vmul.f32 0.7978846, %v4938_v55  ;;  %v9580_v31 = vadd.f32 %v4611_v5, %v9515_v37 }
0x113c   : > { %10519 = vst [vmem:[#allocation29_spill] sm:$0xff] %v9577_v15  ;;  %v4812_v17 = vmul.f32 %v4748_v32, %v9545_v25  ;;  %v4814_v3 = vmul.f32 %v4750_v26, %v9548_v34  ;;  %v4751_v23 = vmul.f32 0.044715, %v9574_v6  ;;  %v4752_v35 = vmul.f32 0.044715, %v9577_v15 }
0x113d   : > { %10520 = vst [vmem:[#allocation30_spill] sm:$0xff] %v9580_v31  ;;  %v4504_v61 = vpop.f32.mrb[104].mxu1  ;;  %v4617_v33 = vpop.f32.mrb[104].mxu0  ;;  %v4813_v10 = vmul.f32 %v4749_v40, %v9562_v43  ;;  %v4754_v4 = vmul.f32 0.044715, %v9580_v31  ;;  %v9589_v42 = vadd.f32 %v4500_v54, %v9519_v28  ;;  %v9592_v5 = vadd.f32 %v4613_v29, %v9521_v46 }
0x113e   : > { %v4506_v49 = vpop.f32.mrb[105].mxu1  ;;  %v4619_v21 = vpop.f32.mrb[105].mxu0  ;;  %7276 = vtanh.f32 %v4998_v13  ;;  %v9595_v51 = vmul.f32 %v4809_v47, %v9536_v11  ;;  %v9598_v55 = vadd.f32 %v4504_v61, %v9511_v14  ;;  %v9601_v32 = vadd.f32 %v4617_v33, %v9515_v37 }
0x113f   : > { %v4508_v27 = vpop.f32.mrb[106].mxu1  ;;  %v4621_v2 = vpop.f32.mrb[106].mxu0  ;;  %7278 = vtanh.f32 %v5000_v57  ;;  %v9604_v54 = vmul.f32 %v4811_v20, %v9539_v18  ;;  %v4815_v29 = vmul.f32 %v4751_v23, %v9574_v6  ;;  %v4753_v59 = vmul.f32 0.044715, %v9589_v42 }
0x1140   : > { %v4510_v26 = vpop.f32.mrb[107].mxu1  ;;  %v4623_v40 = vpop.f32.mrb[107].mxu0  ;;  %v9609_v13 = vmul.f32 %v4812_v17, %v9545_v25  ;;  %v4816_v47 = vmul.f32 %v4752_v35, %v9577_v15  ;;  %v4755_v61 = vmul.f32 0.044715, %v9592_v5  ;;  %v9614_v33 = vadd.f32 %v4506_v49, %v9519_v28 }
0x1141   : > { %7280 = vtanh.f32 %v5002_v38  ;;  %v9617_v57 = vmul.f32 %v4814_v3, %v9548_v34  ;;  %v9620_v20 = vmul.f32 %v4813_v10, %v9562_v43  ;;  %v4818_v23 = vmul.f32 %v4754_v4, %v9580_v31 }
0x1142   : > { %10521 = vst [vmem:[#allocation31_spill] sm:$0xff] %v9609_v13  ;;  %v4756_v60 = vmul.f32 0.044715, %v9598_v55  ;;  %v4758_v17 = vmul.f32 0.044715, %v9601_v32  ;;  %v9626_v35 = vadd.f32 %v4619_v21, %v9521_v46  ;;  %v9629_v1 = vadd.f32 %v4508_v27, %v9511_v14 }
0x1143   : > { %10522 = vst [vmem:[#allocation32_spill] sm:$0xff] %v9617_v57  ;;  %v9632_v38 = vmul.f32 %v4815_v29, %v9574_v6  ;;  %v4817_v3 = vmul.f32 %v4753_v59, %v9589_v42  ;;  %v4757_v49 = vmul.f32 0.044715, %v9614_v33  ;;  %v9637_v10 = vadd.f32 %v4621_v2, %v9515_v37 }
0x1144   : > { %v9640_v12 = vmul.f32 %v4816_v47, %v9577_v15  ;;  %v4819_v21 = vmul.f32 %v4755_v61, %v9592_v5  ;;  %v4759_v27 = vmul.f32 0.044715, %v9626_v35  ;;  %v4760_v36 = vmul.f32 0.044715, %v9629_v1 }
0x1145   : > { %v4514_v4 = vpop.f32.mrb[108].mxu1  ;;  %v4627_v19 = vpop.f32.mrb[108].mxu0  ;;  %v4762_v59 = vmul.f32 0.044715, %v9637_v10  ;;  %v9649_v2 = vadd.f32 %v4510_v26, %v9519_v28  ;;  %v9652_v30 = vadd.f32 %v4623_v40, %v9521_v46  ;;  %v9658_v7 = vmul.f32 %v4818_v23, %v9580_v31 }
0x1146   : > { %10523 = vst [vmem:[#allocation33_spill] sm:$0xff] %v9640_v12  ;;  %v4516_v29 = vpop.f32.mrb[109].mxu1  ;;  %v4629_v45 = vpop.f32.mrb[109].mxu0  ;;  %v9655_v47 = vadd.f32 %v4514_v4, %v9511_v14  ;;  %v4820_v24 = vmul.f32 %v4756_v60, %v9598_v55  ;;  %v4822_v8 = vmul.f32 %v4758_v17, %v9601_v32  ;;  %v9663_v52 = vadd.f32 %v4627_v19, %v9515_v37 }
0x1147   : > { %v9645_v48 = vpop.eup %7274  ;;  %v4518_v61 = vpop.f32.mrb[110].mxu1  ;;  %10524 = vst [vmem:[#allocation34_spill] sm:$0xff] %v9658_v7  ;;  %v9666_v40 = vmul.f32 %v4817_v3, %v9589_v42  ;;  %v4761_v4 = vmul.f32 0.044715, %v9649_v2  ;;  %v4763_v56 = vmul.f32 0.044715, %v9652_v30  ;;  %v9672_v41 = vmul.f32 %v4819_v21, %v9592_v5 }
0x1148   : > { %v4631_v0 = vpop.f32.mrb[110].mxu0  ;;  %10525 = vst [vmem:[#allocation35_spill] sm:$0xff] %v9663_v52  ;;  %v4520_v26 = vpop.f32.mrb[111].mxu1  ;;  %v4764_v22 = vmul.f32 0.044715, %v9655_v47  ;;  %v4821_v60 = vmul.f32 %v4757_v49, %v9614_v33  ;;  %v9677_v17 = vadd.f32 %v4516_v29, %v9519_v28  ;;  %v4823_v3 = vmul.f32 %v4759_v27, %v9626_v35 }
0x1149   : > { %v4633_v44 = vpop.f32.mrb[111].mxu0  ;;  %v7277_v23 = vpop.eup %7276  ;;  %v4766_v19 = vmul.f32 0.044715, %v9663_v52  ;;  %v4824_v31 = vmul.f32 %v4760_v36, %v9629_v1  ;;  %v4826_v57 = vmul.f32 %v4762_v59, %v9637_v10  ;;  %v4825_v34 = vmul.f32 %v4761_v4, %v9649_v2 }
0x114a   : > { %v7279_v7 = vpop.eup %7278  ;;  %v4827_v12 = vmul.f32 %v4763_v56, %v9652_v30  ;;  %v4765_v21 = vmul.f32 0.044715, %v9677_v17  ;;  %v9686_v49 = vadd.f32 %v4629_v45, %v9521_v46  ;;  %v9689_v15 = vadd.f32 %v4518_v61, %v9511_v14 }
0x114b   : > { %v7281_v29 = vpop.eup %7280  ;;  %v9692_v13 = vmul.f32 %v4820_v24, %v9598_v55  ;;  %v9695_v36 = vmul.f32 %v4822_v8, %v9601_v32  ;;  %v4828_v27 = vmul.f32 %v4764_v22, %v9655_v47  ;;  %v9699_v59 = vadd.f32 %v4631_v0, %v9515_v37 }
0x114c   : > { %v9702_v56 = vmul.f32 %v4821_v60, %v9614_v33  ;;  %v4830_v45 = vmul.f32 %v4766_v19, %v9663_v52  ;;  %v4829_v61 = vmul.f32 %v4765_v21, %v9677_v17  ;;  %v4767_v4 = vmul.f32 0.044715, %v9686_v49 }
0x114d   : > { %v9708_v24 = vmul.f32 %v4823_v3, %v9626_v35  ;;  %v9711_v8 = vmul.f32 %v4824_v31, %v9629_v1  ;;  %v4768_v22 = vmul.f32 0.044715, %v9689_v15  ;;  %v4770_v0 = vmul.f32 0.044715, %v9699_v59 }
0x114e   : > { %v9716_v37 = vmul.f32 %v4826_v57, %v9637_v10  ;;  %v9719_v60 = vmul.f32 %v4825_v34, %v9649_v2  ;;  %v9722_v19 = vmul.f32 %v4827_v12, %v9652_v30  ;;  %v9725_v21 = vadd.f32 %v4520_v26, %v9519_v28 }
0x114f   : > { %v9728_v3 = vmul.f32 %v4828_v27, %v9655_v47  ;;  %v4831_v31 = vmul.f32 %v4767_v4, %v9686_v49  ;;  %v9732_v14 = vadd.f32 %v4633_v44, %v9521_v46  ;;  %v4933_v57 = vadd.f32 %v9565_v53, %v9526_v9 }
0x1150   : > { %v9737_v34 = vmul.f32 %v4830_v45, %v9663_v52  ;;  %v9740_v12 = vmul.f32 %v4829_v61, %v9677_v17  ;;  %v9743_v26 = vmul.f32 0.5, %v9526_v9  ;;  %v4937_v27 = vadd.f32 %v9595_v51, %v9536_v11 }
0x1151   : > { %v4832_v4 = vmul.f32 %v4768_v22, %v9689_v15  ;;  %v4834_v44 = vmul.f32 %v4770_v0, %v9699_v59  ;;  %v9750_v46 = vmul.f32 0.5, %v9536_v11  ;;  %v4997_v53 = vmul.f32 0.7978846, %v4933_v57 }
0x1152   : > { %10526 = vst [vmem:[#allocation36_spill] sm:$0xff] %v9737_v34  ;;  %v4769_v45 = vmul.f32 0.044715, %v9725_v21  ;;  %v5001_v28 = vmul.f32 0.7978846, %v4937_v27  ;;  %v4935_v61 = vadd.f32 %v9568_v16, %v9529_v39  ;;  %v4939_v9 = vadd.f32 %v9604_v54, %v9539_v18 }
0x1153   : > { %v9758_v34 = vmul.f32 %v4831_v31, %v9686_v49  ;;  %v4771_v51 = vmul.f32 0.044715, %v9732_v14  ;;  %7282 = vtanh.f32 %v4997_v53  ;;  %v5124_v22 = vadd.f32 1.0, %v9645_v48 }
0x1154   : > { %7284 = vtanh.f32 %v5001_v28  ;;  %v4999_v11 = vmul.f32 0.7978846, %v4935_v61  ;;  %v5003_v0 = vmul.f32 0.7978846, %v4939_v9  ;;  %v5128_v57 = vadd.f32 1.0, %v7279_v7 }
0x1155   : > { %v9763_v27 = vmul.f32 %v4832_v4, %v9689_v15  ;;  %v9766_v16 = vmul.f32 0.5, %v9529_v39  ;;  %v5126_v52 = vadd.f32 1.0, %v7277_v23  ;;  %v5130_v54 = vadd.f32 1.0, %v7281_v29 }
0x1156   : > { %7286 = vtanh.f32 %v4999_v11  ;;  %v9769_v31 = vmul.f32 %v5124_v22, %v9550_v50  ;;  %v9772_v53 = vmul.f32 %v5128_v57, %v9555_v62  ;;  %v4941_v48 = vadd.f32 %v9620_v20, %v9562_v43  ;;  %v10528_v22 = vld [vmem:[#allocation29_spill] sm:$0xff]  ;;  %v10530_v57 = vld [vmem:[#allocation28_spill] sm:$0xff] }
0x1157   : > { %7288 = vtanh.f32 %v5003_v0  ;;  %v9777_v7 = vmul.f32 %v5126_v52, %v9552_v63  ;;  %v9780_v28 = vmul.f32 %v5130_v54, %v9557_v58  ;;  %v4945_v39 = vadd.f32 %v9666_v40, %v9589_v42  ;;  %v10529_v11 = vld [vmem:[#allocation33_spill] sm:$0xff]  ;;  %v10531_v54 = vld [vmem:[#allocation32_spill] sm:$0xff] }
0x1158   : > { %v4833_v23 = vmul.f32 %v4769_v45, %v9725_v21  ;;  %v4835_v50 = vmul.f32 %v4771_v51, %v9732_v14  ;;  %v5252_v62 = vpack.c.bf16 %v9772_v53, %v9769_v31  ;;  %v5005_v29 = vmul.f32 0.7978846, %v4941_v48  ;;  %v10527_v45 = vld [vmem:[#allocation31_spill] sm:$0xff] }
0x1159   : > { %v5254_v20 = vpack.c.bf16 %v9780_v28, %v9777_v7  ;;  %v5009_v4 = vmul.f32 0.7978846, %v4945_v39  ;;  %v4943_v52 = vadd.f32 %v9632_v38, %v9574_v6  ;;  %v4947_v63 = vadd.f32 %v9672_v41, %v9592_v5  ;;  %v10532_v39 = vld [vmem:[#allocation30_spill] sm:$0xff] }
0x115a   : > { %v9795_v58 = vmul.f32 %v4834_v44, %v9699_v59  ;;  %v4683_v40 = vmul.f32 0.5, %v9539_v18  ;;  %7290 = vtanh.f32 %v5005_v29  ;;  %v4940_v61 = vadd.f32 %v10527_v45, %v9545_v25  ;;  %v10533_v29 = vld [vmem:[#allocation34_spill] sm:$0xff] }
0x115b   : > { %7292 = vtanh.f32 %v5009_v4  ;;  %v5007_v9 = vmul.f32 0.7978846, %v4943_v52  ;;  %v5011_v51 = vmul.f32 0.7978846, %v4947_v63  ;;  %v4944_v0 = vadd.f32 %v10529_v11, %v10528_v22 }
0x115c   : > { %v9803_v38 = vmul.f32 %v4833_v23, %v9725_v21  ;;  %v9806_v41 = vmul.f32 %v4835_v50, %v9732_v14  ;;  %v5004_v44 = vmul.f32 0.7978846, %v4940_v61  ;;  %v4942_v18 = vadd.f32 %v10531_v54, %v10530_v57 }
0x115d   : > { %v7283_v31 = vpop.eup %7282  ;;  %v4685_v53 = vmul.f32 0.5, %v9562_v43  ;;  %7294 = vtanh.f32 %v5007_v9  ;;  %v5008_v48 = vmul.f32 0.7978846, %v4944_v0  ;;  %v4946_v4 = vadd.f32 %v10533_v29, %v10532_v39 }
0x115e   : > { %v7285_v52 = vpop.eup %7284  ;;  %v5125_v63 = vadd.f32 1.0, %v7283_v31  ;;  %v4689_v23 = vmul.f32 0.5, %v9589_v42  ;;  %7296 = vtanh.f32 %v5011_v51  ;;  %v5006_v45 = vmul.f32 0.7978846, %v4942_v18 }
0x115f   : > { %v5129_v50 = vadd.f32 1.0, %v7285_v52  ;;  %7298 = vtanh.f32 %v5004_v44  ;;  %v5010_v61 = vmul.f32 0.7978846, %v4946_v4  ;;  %v4949_v11 = vadd.f32 %v9702_v56, %v9614_v33 }
0x1160   : > { %v7287_v54 = vpop.eup %7286  ;;  %v5189_v43 = vmul.f32 %v5125_v63, %v9743_v26  ;;  %v4687_v9 = vmul.f32 0.5, %v9574_v6  ;;  %7300 = vtanh.f32 %v5008_v48  ;;  %v4953_v0 = vadd.f32 %v9719_v60, %v9649_v2 }
0x1161   : > { %v7289_v31 = vpop.eup %7288  ;;  %v5193_v42 = vmul.f32 %v5129_v50, %v9750_v46  ;;  %v5127_v51 = vadd.f32 1.0, %v7287_v54  ;;  %7302 = vtanh.f32 %v5006_v45  ;;  %v5013_v18 = vmul.f32 0.7978846, %v4949_v11 }
0x1162   : > { %v5131_v44 = vadd.f32 1.0, %v7289_v31  ;;  %v4691_v29 = vmul.f32 0.5, %v9592_v5  ;;  %7304 = vtanh.f32 %v5010_v61  ;;  %v5017_v56 = vmul.f32 0.7978846, %v4953_v0 }
0x1163   : > { %v5253_v4 = vpack.c.bf16 %v5193_v42, %v5189_v43  ;;  %v4684_v26 = vmul.f32 0.5, %v9545_v25  ;;  %7306 = vtanh.f32 %v5013_v18  ;;  %v4951_v6 = vadd.f32 %v9708_v24, %v9626_v35 }
0x1164   : > { %v7291_v48 = vpop.eup %7290  ;;  %v5191_v60 = vmul.f32 %v5127_v51, %v9766_v16  ;;  %v5195_v52 = vmul.f32 %v5131_v44, %v4683_v40  ;;  %7308 = vtanh.f32 %v5017_v56  ;;  %v4955_v46 = vadd.f32 %v9722_v19, %v9652_v30 }
0x1165   : > { %v7293_v63 = vpop.eup %7292  ;;  %5579 = vmatprep.mubr.bf16.mxu1 %v5253_v4  ;;  %v5133_v5 = vadd.f32 1.0, %v7291_v48  ;;  %v4688_v45 = vmul.f32 0.5, %v10528_v22  ;;  %v5015_v50 = vmul.f32 0.7978846, %v4951_v6  ;;  %v4948_v25 = vadd.f32 %v9692_v13, %v9598_v55 }
0x1166   : > { %v5255_v61 = vpack.c.bf16 %v5195_v52, %v5191_v60  ;;  %5580 = vmatmul.mubr.bf16.vlgmr.msra.gmra.mrb[128].mxu1 %v5252_v62  ;;  %v5137_v24 = vadd.f32 1.0, %v7293_v63  ;;  %v5019_v11 = vmul.f32 0.7978846, %v4955_v46  ;;  %v4952_v16 = vadd.f32 %v9711_v8, %v9629_v1 }
0x1167   : > { %v7295_v40 = vpop.eup %7294  ;;  %v5197_v54 = vmul.f32 %v5133_v5, %v4685_v53  ;;  %v4686_v19 = vmul.f32 0.5, %v10530_v57  ;;  %7310 = vtanh.f32 %v5015_v50  ;;  %v5012_v43 = vmul.f32 0.7978846, %v4948_v25 }
0x1168   : > { %v7297_v0 = vpop.eup %7296  ;;  %5676 = vmatprep.mubr.bf16.mxu0 %v5255_v61  ;;  %v5201_v22 = vmul.f32 %v5137_v24, %v4689_v23  ;;  %v5135_v31 = vadd.f32 1.0, %v7295_v40  ;;  %7312 = vtanh.f32 %v5019_v11  ;;  %v5016_v42 = vmul.f32 0.7978846, %v4952_v16 }
0x1169   : > { %v7299_v13 = vpop.eup %7298  ;;  %5677 = vmatmul.mubr.bf16.vlgmr.msra.gmra.mrb[128].mxu0 %v5254_v20  ;;  %v5139_v62 = vadd.f32 1.0, %v7297_v0  ;;  %v4690_v8 = vmul.f32 0.5, %v10532_v39  ;;  %7314 = vtanh.f32 %v5012_v43  ;;  %v4950_v57 = vadd.f32 %v9695_v36, %v9601_v32 }
0x116a   : > { %v7301_v53 = vpop.eup %7300  ;;  %v5257_v51 = vpack.c.bf16 %v5201_v22, %v5197_v54  ;;  %v5199_v18 = vmul.f32 %v5135_v31, %v4687_v9  ;;  %v5132_v44 = vadd.f32 1.0, %v7299_v13  ;;  %7316 = vtanh.f32 %v5016_v42 }
0x116b   : > { %v7303_v23 = vpop.eup %7302  ;;  %v5203_v56 = vmul.f32 %v5139_v62, %v4691_v29  ;;  %v5136_v4 = vadd.f32 1.0, %v7301_v53  ;;  %v4954_v6 = vadd.f32 %v9716_v37, %v9637_v10  ;;  %v5014_v7 = vmul.f32 0.7978846, %v4950_v57 }
0x116c   : > { %v7305_v28 = vpop.eup %7304  ;;  %5587 = vmatprep.mubr.bf16.mxu1 %v5257_v51  ;;  %v5196_v20 = vmul.f32 %v5132_v44, %v4684_v26  ;;  %v5134_v39 = vadd.f32 1.0, %v7303_v23  ;;  %v4693_v48 = vmul.f32 0.5, %v9614_v33  ;;  %v4697_v36 = vmul.f32 0.5, %v9649_v2 }
0x116d   : > { %v7307_v60 = vpop.eup %7306  ;;  %v5259_v52 = vpack.c.bf16 %v5203_v56, %v5199_v18  ;;  %v5200_v9 = vmul.f32 %v5136_v4, %v4688_v45  ;;  %v5138_v46 = vadd.f32 1.0, %v7305_v28  ;;  %v5018_v63 = vmul.f32 0.7978846, %v4954_v6  ;;  %v10534_v6 = vld [vmem:[#allocation35_spill] sm:$0xff] }
0x116e   : > { %v7309_v5 = vpop.eup %7308  ;;  %v5198_v29 = vmul.f32 %v5134_v39, %v4686_v19  ;;  %v5141_v50 = vadd.f32 1.0, %v7307_v60  ;;  %7318 = vtanh.f32 %v5014_v7  ;;  %v4957_v37 = vadd.f32 %v9740_v12, %v9677_v17  ;;  %v10535_v7 = vld [vmem:[#allocation36_spill] sm:$0xff] }
0x116f   : > { %5684 = vmatprep.mubr.bf16.mxu0 %v5259_v52  ;;  %v5256_v25 = vpack.c.bf16 %v5200_v9, %v5196_v20  ;;  %v5202_v26 = vmul.f32 %v5138_v46, %v4690_v8  ;;  %v5145_v61 = vadd.f32 1.0, %v7309_v5  ;;  %7320 = vtanh.f32 %v5018_v63 }
0x1170   : > { %v4695_v33 = vmul.f32 0.5, %v9626_v35  ;;  %v4699_v2 = vmul.f32 0.5, %v9652_v30  ;;  %v4961_v45 = vadd.f32 %v9803_v38, %v9725_v21  ;;  %v5021_v24 = vmul.f32 0.7978846, %v4957_v37 }
0x1171   : > { %v7311_v11 = vpop.eup %7310  ;;  %5588 = vmatmul.mubr.bf16.gmra.mrb[132].mxu1 %v5256_v25  ;;  %v5258_v16 = vpack.c.bf16 %v5202_v26, %v5198_v29  ;;  %v5205_v40 = vmul.f32 %v5141_v50, %v4693_v48  ;;  %v5209_v54 = vmul.f32 %v5145_v61, %v4697_v36  ;;  %v4959_v12 = vadd.f32 %v9758_v34, %v9686_v49 }
0x1172   : > { %v7313_v19 = vpop.eup %7312  ;;  %v5143_v43 = vadd.f32 1.0, %v7311_v11  ;;  %v5025_v0 = vmul.f32 0.7978846, %v4961_v45  ;;  %7322 = vtanh.f32 %v5021_v24  ;;  %v4963_v35 = vadd.f32 %v9806_v41, %v9732_v14 }
0x1173   : > { %v7315_v30 = vpop.eup %7314  ;;  %5685 = vmatmul.mubr.bf16.gmra.mrb[132].mxu0 %v5258_v16  ;;  %v5261_v22 = vpack.c.bf16 %v5209_v54, %v5205_v40  ;;  %v5147_v38 = vadd.f32 1.0, %v7313_v19  ;;  %v4692_v31 = vmul.f32 0.5, %v9598_v55  ;;  %v5023_v42 = vmul.f32 0.7978846, %v4959_v12 }
0x1174   : > { %v7317_v13 = vpop.eup %7316  ;;  %v4696_v62 = vmul.f32 0.5, %v9629_v1  ;;  %v5140_v8 = vadd.f32 1.0, %v7315_v30  ;;  %7324 = vtanh.f32 %v5025_v0  ;;  %v5027_v34 = vmul.f32 0.7978846, %v4963_v35 }
0x1175   : > { %5595 = vmatprep.mubr.bf16.mxu1 %v5261_v22  ;;  %v5207_v57 = vmul.f32 %v5143_v43, %v4695_v33  ;;  %v5211_v53 = vmul.f32 %v5147_v38, %v4699_v2  ;;  %v5144_v51 = vadd.f32 1.0, %v7317_v13  ;;  %7326 = vtanh.f32 %v5023_v42 }
0x1176   : > { %7328 = vtanh.f32 %v5027_v34  ;;  %v4956_v41 = vadd.f32 %v9728_v3, %v9655_v47  ;;  %v4960_v18 = vadd.f32 %v9763_v27, %v9689_v15  ;;  %v5204_v44 = vmul.f32 %v5140_v8, %v4692_v31 }
0x1177   : > { %v5263_v55 = vpack.c.bf16 %v5211_v53, %v5207_v57  ;;  %v5208_v23 = vmul.f32 %v5144_v51, %v4696_v62  ;;  %v4958_v28 = vadd.f32 %v10535_v7, %v10534_v6  ;;  %v4962_v20 = vadd.f32 %v9795_v58, %v9699_v59 }
0x1178   : > { %v7319_v56 = vpop.eup %7318  ;;  %v5020_v1 = vmul.f32 0.7978846, %v4956_v41  ;;  %v5024_v4 = vmul.f32 0.7978846, %v4960_v18  ;;  %v4694_v3 = vmul.f32 0.5, %v9601_v32  ;;  %v4698_v36 = vmul.f32 0.5, %v9637_v10 }
0x1179   : > { %v7321_v39 = vpop.eup %7320  ;;  %5692 = vmatprep.mubr.bf16.mxu0 %v5263_v55  ;;  %v5260_v48 = vpack.c.bf16 %v5208_v23, %v5204_v44  ;;  %v5142_v27 = vadd.f32 1.0, %v7319_v56  ;;  %v5022_v52 = vmul.f32 0.7978846, %v4958_v28  ;;  %v5026_v9 = vmul.f32 0.7978846, %v4962_v20  ;;  %v10537_v41 = vld [vmem:[#allocation25_spill] sm:$0xff] }
0x117a   : > { %v5146_v60 = vadd.f32 1.0, %v7321_v39  ;;  %7330 = vtanh.f32 %v5020_v1  ;;  %v4701_v32 = vmul.f32 0.5, %v9677_v17  ;;  %v4705_v10 = vmul.f32 0.5, %v9725_v21  ;;  %v10538_v23 = vld [vmem:[#allocation26_spill] sm:$0xff] }
0x117b   : > { %5596 = vmatmul.mubr.bf16.gmra.mrb[136].mxu1 %v5260_v48  ;;  %7332 = vtanh.f32 %v5024_v4  ;;  %v5206_v63 = vmul.f32 %v5142_v27, %v4694_v3  ;;  %v4703_v61 = vmul.f32 0.5, %v9686_v49  ;;  %v4707_v24 = vmul.f32 0.5, %v9732_v14 }
0x117c   : > { %v7323_v46 = vpop.eup %7322  ;;  %v5210_v5 = vmul.f32 %v5146_v60, %v4698_v36  ;;  %7334 = vtanh.f32 %v5022_v52  ;;  %v4700_v0 = vmul.f32 0.5, %v9655_v47  ;;  %v4704_v35 = vmul.f32 0.5, %v9689_v15  ;;  %v10536_v15 = vld [vmem:[#allocation6_spill] sm:$0xff] }
0x117d   : > { %v5149_v29 = vadd.f32 1.0, %v7323_v46  ;;  %7336 = vtanh.f32 %v5026_v9  ;;  %v4702_v22 = vmul.f32 0.5, %v10534_v6  ;;  %v4706_v42 = vmul.f32 0.5, %v9699_v59  ;;  %v10539_v59 = vld [vmem:[#allocation27_spill] sm:$0xff] }
0x117e   : > { %v7325_v58 = vpop.eup %7324  ;;  %v5262_v50 = vpack.c.bf16 %v5210_v5, %v5206_v63 }
0x117f   : > { %v7327_v37 = vpop.eup %7326  ;;  %v5153_v25 = vadd.f32 1.0, %v7325_v58  ;;  %v5213_v2 = vmul.f32 %v5149_v29, %v4701_v32 }
0x1180   : > { %v7329_v26 = vpop.eup %7328  ;;  %5693 = vmatmul.mubr.bf16.gmra.mrb[136].mxu0 %v5262_v50  ;;  %v5151_v33 = vadd.f32 1.0, %v7327_v37 }
0x1181   : > { %v5217_v45 = vmul.f32 %v5153_v25, %v4705_v10  ;;  %v5155_v11 = vadd.f32 1.0, %v7329_v26 }
0x1182   : > { %v5215_v40 = vmul.f32 %v5151_v33, %v4703_v61 }
0x1183   : > { %v5265_v16 = vpack.c.bf16 %v5217_v45, %v5213_v2  ;;  %v5219_v54 = vmul.f32 %v5155_v11, %v4707_v24 }
0x1184   : > { %v7331_v12 = vpop.eup %7330 }
0x1185   : > { %v7333_v19 = vpop.eup %7332  ;;  %5603 = vmatprep.mubr.bf16.mxu1 %v5265_v16  ;;  %v5267_v17 = vpack.c.bf16 %v5219_v54, %v5215_v40  ;;  %v5148_v43 = vadd.f32 1.0, %v7331_v12 }
0x1186   : > { %v7335_v21 = vpop.eup %7334  ;;  %v5152_v49 = vadd.f32 1.0, %v7333_v19 }
0x1187   : > { %v7337_v30 = vpop.eup %7336  ;;  %5700 = vmatprep.mubr.bf16.mxu0 %v5267_v17  ;;  %v5150_v14 = vadd.f32 1.0, %v7335_v21  ;;  %v5212_v38 = vmul.f32 %v5148_v43, %v4700_v0 }
0x1188   : > { %v5216_v31 = vmul.f32 %v5152_v49, %v4704_v35  ;;  %v5154_v13 = vadd.f32 1.0, %v7337_v30 }
0x1189   : > { %v5214_v8 = vmul.f32 %v5150_v14, %v4702_v22 }
0x118a   : > { %v5264_v62 = vpack.c.bf16 %v5216_v31, %v5212_v38  ;;  %v5218_v34 = vmul.f32 %v5154_v13, %v4706_v42 }
0x118c   : > { %5604 = vmatmul.mubr.bf16.gmra.mrb[140].mxu1 %v5264_v62  ;;  %v5266_v57 = vpack.c.bf16 %v5218_v34, %v5214_v8 }
0x118e   : > { %5701 = vmatmul.mubr.bf16.gmra.mrb[140].mxu0 %v5266_v57 }
0x11ad   : > { %v4524_v47 = vpop.f32.mrb[112].mxu1  ;;  %v4637_v53 = vpop.f32.mrb[112].mxu0 }
0x11ae   : > { %v9875_v51 = vadd.f32 %v4524_v47, %v10536_v15  ;;  %v9878_v18 = vadd.f32 %v4637_v53, %v10537_v41  ;;  %v4526_v55 = vpop.f32.mrb[113].mxu1  ;;  %v4639_v44 = vpop.f32.mrb[113].mxu0 }
0x11af   : > { %v9881_v56 = vadd.f32 %v4526_v55, %v10538_v23  ;;  %v9884_v1 = vadd.f32 %v4639_v44, %v10539_v59  ;;  %v4528_v4 = vpop.f32.mrb[114].mxu1  ;;  %v4641_v6 = vpop.f32.mrb[114].mxu0 }
0x11b0   : > { %v4772_v7 = vmul.f32 0.044715, %v9875_v51  ;;  %v9888_v28 = vadd.f32 %v4528_v4, %v10536_v15  ;;  %v9891_v20 = vadd.f32 %v4641_v6, %v10537_v41  ;;  %v4530_v39 = vpop.f32.mrb[115].mxu1  ;;  %v4643_v48 = vpop.f32.mrb[115].mxu0  ;;  %v4774_v3 = vmul.f32 0.044715, %v9878_v18 }
0x11b1   : > { %v4773_v36 = vmul.f32 0.044715, %v9881_v56  ;;  %v9896_v27 = vadd.f32 %v4530_v39, %v10538_v23  ;;  %v9899_v60 = vadd.f32 %v4643_v48, %v10539_v59  ;;  %v4775_v52 = vmul.f32 0.044715, %v9884_v1 }
0x11b2   : > { %v4776_v9 = vmul.f32 0.044715, %v9888_v28  ;;  %v4778_v46 = vmul.f32 0.044715, %v9891_v20  ;;  %v4836_v29 = vmul.f32 %v4772_v7, %v9875_v51  ;;  %v4838_v58 = vmul.f32 %v4774_v3, %v9878_v18 }
0x11b3   : > { %v4777_v63 = vmul.f32 0.044715, %v9896_v27  ;;  %v4779_v5 = vmul.f32 0.044715, %v9899_v60  ;;  %v4837_v50 = vmul.f32 %v4773_v36, %v9881_v56  ;;  %v4839_v10 = vmul.f32 %v4775_v52, %v9884_v1 }
0x11b4   : > { %v4840_v25 = vmul.f32 %v4776_v9, %v9888_v28  ;;  %v4842_v45 = vmul.f32 %v4778_v46, %v9891_v20  ;;  %v9942_v14 = vmul.f32 %v4836_v29, %v9875_v51  ;;  %v9945_v38 = vmul.f32 %v4838_v58, %v9878_v18 }
0x11b5   : > { %v4534_v37 = vpop.f32.mrb[116].mxu1  ;;  %v4647_v32 = vpop.f32.mrb[116].mxu0  ;;  %v4841_v24 = vmul.f32 %v4777_v63, %v9896_v27  ;;  %v4843_v12 = vmul.f32 %v4779_v5, %v9899_v60  ;;  %v9950_v13 = vmul.f32 %v4837_v50, %v9881_v56  ;;  %v9953_v62 = vmul.f32 %v4839_v10, %v9884_v1 }
0x11b6   : > { %v9912_v26 = vadd.f32 %v4534_v37, %v10536_v15  ;;  %v9915_v61 = vadd.f32 %v4647_v32, %v10537_v41  ;;  %v4536_v33 = vpop.f32.mrb[117].mxu1  ;;  %v4649_v2 = vpop.f32.mrb[117].mxu0  ;;  %v9958_v57 = vmul.f32 %v4840_v25, %v9888_v28  ;;  %v9961_v47 = vmul.f32 %v4842_v45, %v9891_v20 }
0x11b7   : > { %v9920_v11 = vadd.f32 %v4536_v33, %v10538_v23  ;;  %v9923_v16 = vadd.f32 %v4649_v2, %v10539_v59  ;;  %v4538_v40 = vpop.f32.mrb[118].mxu1  ;;  %v4651_v54 = vpop.f32.mrb[118].mxu0  ;;  %v9964_v53 = vmul.f32 %v4841_v24, %v9896_v27  ;;  %v9968_v44 = vmul.f32 %v4843_v12, %v9899_v60 }
0x11b8   : > { %10540 = vst [vmem:[#allocation31_spill] sm:$0xff] %v9915_v61  ;;  %v4780_v19 = vmul.f32 0.044715, %v9912_v26  ;;  %v9928_v17 = vadd.f32 %v4538_v40, %v10536_v15  ;;  %v9931_v43 = vadd.f32 %v4651_v54, %v10537_v41  ;;  %v4540_v21 = vpop.f32.mrb[119].mxu1  ;;  %v4653_v0 = vpop.f32.mrb[119].mxu0 }
0x11b9   : > { %v4782_v35 = vmul.f32 0.044715, %v9915_v61  ;;  %v4781_v49 = vmul.f32 0.044715, %v9920_v11  ;;  %v9936_v30 = vadd.f32 %v4540_v21, %v10538_v23  ;;  %v9939_v22 = vadd.f32 %v4653_v0, %v10539_v59 }
0x11ba   : > { %10541 = vst [vmem:[#allocation29_spill] sm:$0xff] %v9928_v17  ;;  %10542 = vst [vmem:[#allocation33_spill] sm:$0xff] %v9931_v43  ;;  %v4783_v31 = vmul.f32 0.044715, %v9923_v16  ;;  %v4784_v42 = vmul.f32 0.044715, %v9928_v17  ;;  %v4844_v4 = vmul.f32 %v4780_v19, %v9912_v26 }
0x11bb   : > { %v4786_v8 = vmul.f32 0.044715, %v9931_v43  ;;  %v4785_v34 = vmul.f32 0.044715, %v9936_v30  ;;  %v4787_v55 = vmul.f32 0.044715, %v9939_v22  ;;  %v4846_v6 = vmul.f32 %v4782_v35, %v9915_v61 }
0x11bc   : > { %v4845_v7 = vmul.f32 %v4781_v49, %v9920_v11  ;;  %v4847_v3 = vmul.f32 %v4783_v31, %v9923_v16  ;;  %v4848_v36 = vmul.f32 %v4784_v42, %v9928_v17  ;;  %v10004_v21 = vmul.f32 %v4844_v4, %v9912_v26 }
0x11bd   : > { %v4544_v39 = vpop.f32.mrb[120].mxu1  ;;  %v4657_v48 = vpop.f32.mrb[120].mxu0  ;;  %v4850_v5 = vmul.f32 %v4786_v8, %v9931_v43  ;;  %v4849_v29 = vmul.f32 %v4785_v34, %v9936_v30  ;;  %v4851_v10 = vmul.f32 %v4787_v55, %v9939_v22  ;;  %v10007_v0 = vmul.f32 %v4846_v6, %v9915_v61 }
0x11be   : > { %v9976_v52 = vadd.f32 %v4544_v39, %v10536_v15  ;;  %v9979_v9 = vadd.f32 %v4657_v48, %v10537_v41  ;;  %v4546_v46 = vpop.f32.mrb[121].mxu1  ;;  %v4659_v63 = vpop.f32.mrb[121].mxu0  ;;  %v10014_v31 = vmul.f32 %v4845_v7, %v9920_v11  ;;  %v10017_v42 = vmul.f32 %v4847_v3, %v9923_v16 }
0x11bf   : > { %v9984_v58 = vadd.f32 %v4546_v46, %v10538_v23  ;;  %v9987_v50 = vadd.f32 %v4659_v63, %v10539_v59  ;;  %v4548_v37 = vpop.f32.mrb[122].mxu1  ;;  %v4661_v32 = vpop.f32.mrb[122].mxu0  ;;  %10543 = vst [vmem:[#allocation28_spill] sm:$0xff] %v10007_v0  ;;  %v10022_v55 = vmul.f32 %v4848_v36, %v9928_v17  ;;  %v10025_v4 = vmul.f32 %v4850_v5, %v9931_v43 }
0x11c0   : > { %v4788_v25 = vmul.f32 0.044715, %v9976_v52  ;;  %v9992_v33 = vadd.f32 %v4548_v37, %v10536_v15  ;;  %v9995_v2 = vadd.f32 %v4661_v32, %v10537_v41  ;;  %v4550_v45 = vpop.f32.mrb[123].mxu1  ;;  %v4663_v24 = vpop.f32.mrb[123].mxu0  ;;  %v4790_v40 = vmul.f32 0.044715, %v9979_v9 }
0x11c1   : > { %v4789_v54 = vmul.f32 0.044715, %v9984_v58  ;;  %v4791_v12 = vmul.f32 0.044715, %v9987_v50  ;;  %v10001_v19 = vadd.f32 %v4550_v45, %v10538_v23  ;;  %v10011_v49 = vadd.f32 %v4663_v24, %v10539_v59  ;;  %10544 = vst [vmem:[#allocation32_spill] sm:$0xff] %v10022_v55  ;;  %10545 = vst [vmem:[#allocation30_spill] sm:$0xff] %v10025_v4 }
0x11c2   : > { %v4792_v35 = vmul.f32 0.044715, %v9992_v33  ;;  %v4794_v8 = vmul.f32 0.044715, %v9995_v2  ;;  %v10028_v6 = vmul.f32 %v4849_v29, %v9936_v30  ;;  %v10031_v39 = vmul.f32 %v4851_v10, %v9939_v22 }
0x11c3   : > { %v4793_v34 = vmul.f32 0.044715, %v10001_v19  ;;  %v4852_v7 = vmul.f32 %v4788_v25, %v9976_v52  ;;  %v4854_v48 = vmul.f32 %v4790_v40, %v9979_v9  ;;  %v4853_v3 = vmul.f32 %v4789_v54, %v9984_v58 }
0x11c4   : > { %v4855_v46 = vmul.f32 %v4791_v12, %v9987_v50  ;;  %v4856_v37 = vmul.f32 %v4792_v35, %v9992_v33  ;;  %v4795_v5 = vmul.f32 0.044715, %v10011_v49  ;;  %v4858_v45 = vmul.f32 %v4794_v8, %v9995_v2 }
0x11c5   : > { %v4554_v63 = vpop.f32.mrb[124].mxu1  ;;  %v4667_v36 = vpop.f32.mrb[124].mxu0  ;;  %v4857_v24 = vmul.f32 %v4793_v34, %v10001_v19  ;;  %v10077_v17 = vmul.f32 %v4854_v48, %v9979_v9 }
0x11c6   : > { %v10040_v29 = vadd.f32 %v4554_v63, %v10536_v15  ;;  %v10043_v32 = vadd.f32 %v4667_v36, %v10537_v41  ;;  %v4556_v10 = vpop.f32.mrb[125].mxu1  ;;  %v4669_v25 = vpop.f32.mrb[125].mxu0  ;;  %v4859_v55 = vmul.f32 %v4795_v5, %v10011_v49  ;;  %v10085_v5 = vmul.f32 %v4855_v46, %v9987_v50 }
0x11c7   : > { %v10048_v40 = vadd.f32 %v4556_v10, %v10538_v23  ;;  %v10051_v54 = vadd.f32 %v4669_v25, %v10539_v59  ;;  %v4558_v12 = vpop.f32.mrb[126].mxu1  ;;  %v4671_v35 = vpop.f32.mrb[126].mxu0  ;;  %10548 = vst [vmem:[#allocation36_spill] sm:$0xff] %v10077_v17  ;;  %v10093_v48 = vmul.f32 %v4858_v45, %v9995_v2 }
0x11c8   : > { %10546 = vst [vmem:[#allocation34_spill] sm:$0xff] %v10040_v29  ;;  %10547 = vst [vmem:[#allocation35_spill] sm:$0xff] %v10043_v32  ;;  %v4796_v63 = vmul.f32 0.044715, %v10040_v29  ;;  %v4798_v4 = vmul.f32 0.044715, %v10043_v32  ;;  %v10056_v36 = vadd.f32 %v4558_v12, %v10536_v15  ;;  %v10059_v43 = vadd.f32 %v4671_v35, %v10537_v41 }
0x11c9   : > { %v4560_v8 = vpop.f32.mrb[127].mxu1  ;;  %v4673_v34 = vpop.f32.mrb[127].mxu0  ;;  %v4797_v10 = vmul.f32 0.044715, %v10048_v40  ;;  %v4799_v0 = vmul.f32 0.044715, %v10051_v54  ;;  %v10074_v35 = vmul.f32 %v4852_v7, %v9976_v52  ;;  %v10090_v7 = vmul.f32 %v4856_v37, %v9992_v33 }
0x11ca   : > { %v10064_v25 = vadd.f32 %v4560_v8, %v10538_v23  ;;  %v10067_v61 = vadd.f32 %v4673_v34, %v10539_v59  ;;  %v4860_v15 = vmul.f32 %v4796_v63, %v10040_v29  ;;  %v4862_v12 = vmul.f32 %v4798_v4, %v10043_v32 }
0x11cb   : > { %v4800_v41 = vmul.f32 0.044715, %v10056_v36  ;;  %v4802_v23 = vmul.f32 0.044715, %v10059_v43  ;;  %v10082_v59 = vmul.f32 %v4853_v3, %v9984_v58  ;;  %v4861_v4 = vmul.f32 %v4797_v10, %v10048_v40 }
0x11cc   : > { %v4801_v8 = vmul.f32 0.044715, %v10064_v25  ;;  %v4863_v63 = vmul.f32 %v4799_v0, %v10051_v54  ;;  %v10096_v34 = vmul.f32 %v4857_v24, %v10001_v19  ;;  %v4803_v17 = vmul.f32 0.044715, %v10067_v61 }
0x11cd   : > { %v10100_v3 = vmul.f32 %v4859_v55, %v10011_v49  ;;  %v10103_v46 = vmul.f32 %v4860_v15, %v10040_v29  ;;  %v10106_v10 = vmul.f32 %v4862_v12, %v10043_v32  ;;  %v10109_v0 = vmul.f32 %v4800_v41, %v10056_v36 }
0x11ce   : > { %v10112_v37 = vmul.f32 %v4802_v23, %v10059_v43  ;;  %v4865_v45 = vmul.f32 %v4801_v8, %v10064_v25  ;;  %v4965_v24 = vadd.f32 %v9950_v13, %v9881_v56  ;;  %v4969_v55 = vadd.f32 %v9964_v53, %v9896_v27 }
0x11cf   : > { %10549 = vst [vmem:[#allocation6_spill] sm:$0xff] %v10103_v46  ;;  %10550 = vst [vmem:[#allocation25_spill] sm:$0xff] %v10106_v10  ;;  %v10120_v15 = vmul.f32 %v4861_v4, %v10048_v40  ;;  %v10123_v12 = vmul.f32 %v4863_v63, %v10051_v54  ;;  %v4967_v41 = vadd.f32 %v9953_v62, %v9884_v1  ;;  %v10133_v13 = vmul.f32 0.5, %v9881_v56 }
0x11d0   : > { %10551 = vst [vmem:[#allocation26_spill] sm:$0xff] %v10112_v37  ;;  %v4971_v23 = vadd.f32 %v9968_v44, %v9899_v60  ;;  %v10130_v8 = vmul.f32 %v4803_v17, %v10067_v61  ;;  %v5029_v10 = vmul.f32 0.7978846, %v4965_v24  ;;  %v5033_v53 = vmul.f32 0.7978846, %v4969_v55 }
0x11d1   : > { %v5031_v32 = vmul.f32 0.7978846, %v4967_v41  ;;  %v4964_v63 = vadd.f32 %v9942_v14, %v9875_v51  ;;  %v4968_v46 = vadd.f32 %v9958_v57, %v9888_v28  ;;  %v10140_v62 = vmul.f32 %v4865_v45, %v10064_v25 }
0x11d2   : > { %v5035_v4 = vmul.f32 0.7978846, %v4971_v23  ;;  %v4713_v44 = vmul.f32 0.5, %v9896_v27  ;;  %7338 = vtanh.f32 %v5029_v10  ;;  %v4966_v56 = vadd.f32 %v9945_v38, %v9878_v18 }
0x11d3   : > { %7340 = vtanh.f32 %v5033_v53  ;;  %v5028_v17 = vmul.f32 0.7978846, %v4964_v63  ;;  %v5032_v24 = vmul.f32 0.7978846, %v4968_v46  ;;  %v4970_v55 = vadd.f32 %v9961_v47, %v9891_v20  ;;  %v10553_v53 = vld [vmem:[#allocation32_spill] sm:$0xff] }
0x11d4   : > { %v4711_v14 = vmul.f32 0.5, %v9884_v1  ;;  %v10149_v41 = vmul.f32 0.5, %v9899_v60  ;;  %7342 = vtanh.f32 %v5031_v32  ;;  %v5030_v57 = vmul.f32 0.7978846, %v4966_v56 }
0x11d5   : > { %7344 = vtanh.f32 %v5035_v4  ;;  %v5034_v45 = vmul.f32 0.7978846, %v4970_v55  ;;  %v4973_v27 = vadd.f32 %v10014_v31, %v9920_v11  ;;  %v4977_v38 = vadd.f32 %v10028_v6, %v9936_v30  ;;  %v10556_v55 = vld [vmem:[#allocation33_spill] sm:$0xff] }
0x11d6   : > { %v4708_v46 = vmul.f32 0.5, %v9875_v51  ;;  %v10157_v10 = vmul.f32 0.5, %v9888_v28  ;;  %7346 = vtanh.f32 %v5028_v17  ;;  %v4975_v1 = vadd.f32 %v10017_v42, %v9923_v16  ;;  %v10552_v42 = vld [vmem:[#allocation29_spill] sm:$0xff] }
0x11d7   : > { %7348 = vtanh.f32 %v5032_v24  ;;  %v5037_v60 = vmul.f32 0.7978846, %v4973_v27  ;;  %v5041_v47 = vmul.f32 0.7978846, %v4977_v38  ;;  %v4979_v32 = vadd.f32 %v10031_v39, %v9939_v22 }
0x11d8   : > { %v10164_v31 = vmul.f32 0.5, %v9878_v18  ;;  %v10167_v6 = vmul.f32 0.5, %v9891_v20  ;;  %7350 = vtanh.f32 %v5030_v57  ;;  %v5039_v51 = vmul.f32 0.7978846, %v4975_v1  ;;  %v10554_v18 = vld [vmem:[#allocation31_spill] sm:$0xff]  ;;  %v10555_v20 = vld [vmem:[#allocation28_spill] sm:$0xff] }
0x11d9   : > { %7352 = vtanh.f32 %v5034_v45  ;;  %v5043_v28 = vmul.f32 0.7978846, %v4979_v32  ;;  %v4972_v23 = vadd.f32 %v10004_v21, %v9912_v26  ;;  %v4976_v4 = vadd.f32 %v10553_v53, %v10552_v42  ;;  %v10557_v57 = vld [vmem:[#allocation30_spill] sm:$0xff] }
0x11da   : > { %v10174_v63 = vmul.f32 0.5, %v9920_v11  ;;  %v10177_v39 = vmul.f32 0.5, %v9936_v30  ;;  %7354 = vtanh.f32 %v5037_v60  ;;  %v4974_v56 = vadd.f32 %v10555_v20, %v10554_v18 }
0x11db   : > { %7356 = vtanh.f32 %v5041_v47  ;;  %v5036_v17 = vmul.f32 0.7978846, %v4972_v23  ;;  %v5040_v24 = vmul.f32 0.7978846, %v4976_v4  ;;  %v4978_v45 = vadd.f32 %v10557_v57, %v10556_v55 }
0x11dc   : > { %v7339_v21 = vpop.eup %7338  ;;  %v10184_v27 = vmul.f32 0.5, %v9923_v16  ;;  %v10187_v11 = vmul.f32 0.5, %v9939_v22  ;;  %7358 = vtanh.f32 %v5039_v51  ;;  %v5038_v30 = vmul.f32 0.7978846, %v4974_v56 }
0x11dd   : > { %v7341_v38 = vpop.eup %7340  ;;  %v5157_v1 = vadd.f32 1.0, %v7339_v21  ;;  %7360 = vtanh.f32 %v5043_v28  ;;  %v5042_v60 = vmul.f32 0.7978846, %v4978_v45  ;;  %v4981_v47 = vadd.f32 %v10082_v59, %v9984_v58 }
0x11de   : > { %v7343_v32 = vpop.eup %7342  ;;  %v5161_v23 = vadd.f32 1.0, %v7341_v38  ;;  %v10192_v53 = vmul.f32 0.5, %v9912_v26  ;;  %7362 = vtanh.f32 %v5036_v17  ;;  %v4985_v16 = vadd.f32 %v10096_v34, %v10001_v19 }
0x11df   : > { %v7345_v22 = vpop.eup %7344  ;;  %v5221_v51 = vmul.f32 %v5157_v1, %v10133_v13  ;;  %v5159_v4 = vadd.f32 1.0, %v7343_v32  ;;  %7364 = vtanh.f32 %v5040_v24  ;;  %v5045_v20 = vmul.f32 0.7978846, %v4981_v47 }
0x11e0   : > { %v7347_v28 = vpop.eup %7346  ;;  %v5225_v56 = vmul.f32 %v5161_v23, %v4713_v44  ;;  %v5163_v57 = vadd.f32 1.0, %v7345_v22  ;;  %7366 = vtanh.f32 %v5038_v30  ;;  %v5049_v59 = vmul.f32 0.7978846, %v4985_v16 }
0x11e1   : > { %v7349_v45 = vpop.eup %7348  ;;  %v5223_v21 = vmul.f32 %v5159_v4, %v4711_v14  ;;  %v5156_v38 = vadd.f32 1.0, %v7347_v28  ;;  %v4720_v26 = vmul.f32 0.5, %v10552_v42  ;;  %7368 = vtanh.f32 %v5042_v60 }
0x11e2   : > { %v7351_v17 = vpop.eup %7350  ;;  %v5269_v29 = vpack.c.bf16 %v5225_v56, %v5221_v51  ;;  %v5227_v34 = vmul.f32 %v5163_v57, %v10149_v41  ;;  %v5160_v37 = vadd.f32 1.0, %v7349_v45  ;;  %7370 = vtanh.f32 %v5045_v20 }
0x11e3   : > { %v7353_v13 = vpop.eup %7352  ;;  %v5220_v24 = vmul.f32 %v5156_v38, %v4708_v46  ;;  %v5158_v1 = vadd.f32 1.0, %v7351_v17  ;;  %7372 = vtanh.f32 %v5049_v59  ;;  %v4983_v44 = vadd.f32 %v10085_v5, %v9987_v50 }
0x11e4   : > { %v7355_v30 = vpop.eup %7354  ;;  %5611 = vmatprep.mubr.bf16.mxu1 %v5269_v29  ;;  %v5271_v14 = vpack.c.bf16 %v5227_v34, %v5223_v21  ;;  %v5224_v47 = vmul.f32 %v5160_v37, %v10157_v10  ;;  %v5162_v42 = vadd.f32 1.0, %v7353_v13  ;;  %v4987_v60 = vadd.f32 %v10100_v3, %v10011_v49 }
0x11e5   : > { %v7357_v32 = vpop.eup %7356  ;;  %v5222_v41 = vmul.f32 %v5158_v1, %v10164_v31  ;;  %v5165_v23 = vadd.f32 1.0, %v7355_v30  ;;  %v4718_v46 = vmul.f32 0.5, %v10554_v18  ;;  %v5047_v16 = vmul.f32 0.7978846, %v4983_v44 }
0x11e6   : > { %v7359_v22 = vpop.eup %7358  ;;  %5708 = vmatprep.mubr.bf16.mxu0 %v5271_v14  ;;  %v5268_v51 = vpack.c.bf16 %v5224_v47, %v5220_v24  ;;  %v5226_v5 = vmul.f32 %v5162_v42, %v10167_v6  ;;  %v5169_v29 = vadd.f32 1.0, %v7357_v32  ;;  %v5051_v4 = vmul.f32 0.7978846, %v4987_v60 }
0x11e7   : > { %v7361_v20 = vpop.eup %7360  ;;  %v5229_v37 = vmul.f32 %v5165_v23, %v10174_v63  ;;  %v5167_v10 = vadd.f32 1.0, %v7359_v22  ;;  %v4722_v3 = vmul.f32 0.5, %v10556_v55  ;;  %7374 = vtanh.f32 %v5047_v16 }
0x11e8   : > { %v7363_v28 = vpop.eup %7362  ;;  %5612 = vmatmul.mubr.bf16.gmra.mrb[144].mxu1 %v5268_v51  ;;  %v5270_v31 = vpack.c.bf16 %v5226_v5, %v5222_v41  ;;  %v5233_v18 = vmul.f32 %v5169_v29, %v10177_v39  ;;  %v5171_v56 = vadd.f32 1.0, %v7361_v20  ;;  %7376 = vtanh.f32 %v5051_v4 }
0x11e9   : > { %v7365_v57 = vpop.eup %7364  ;;  %v5164_v59 = vadd.f32 1.0, %v7363_v28  ;;  %v4725_v6 = vmul.f32 0.5, %v9984_v58  ;;  %v4980_v45 = vadd.f32 %v10074_v35, %v9976_v52  ;;  %v4984_v63 = vadd.f32 %v10090_v7, %v9992_v33 }
0x11ea   : > { %v7367_v21 = vpop.eup %7366  ;;  %5709 = vmatmul.mubr.bf16.gmra.mrb[144].mxu0 %v5270_v31  ;;  %v5273_v55 = vpack.c.bf16 %v5233_v18, %v5229_v37  ;;  %v5231_v38 = vmul.f32 %v5167_v10, %v10184_v27  ;;  %v5235_v17 = vmul.f32 %v5171_v56, %v10187_v11  ;;  %v5168_v39 = vadd.f32 1.0, %v7365_v57  ;;  %v10558_v27 = vld [vmem:[#allocation36_spill] sm:$0xff] }
0x11eb   : > { %v7369_v34 = vpop.eup %7368  ;;  %v5166_v13 = vadd.f32 1.0, %v7367_v21  ;;  %v4729_v24 = vmul.f32 0.5, %v10001_v19  ;;  %v5044_v1 = vmul.f32 0.7978846, %v4980_v45  ;;  %v5048_v58 = vmul.f32 0.7978846, %v4984_v63 }
0x11ec   : > { %v7371_v44 = vpop.eup %7370  ;;  %5619 = vmatprep.mubr.bf16.mxu1 %v5273_v55  ;;  %v5275_v35 = vpack.c.bf16 %v5235_v17, %v5231_v38  ;;  %v5228_v30 = vmul.f32 %v5164_v59, %v10192_v53  ;;  %v5232_v7 = vmul.f32 %v5168_v39, %v4720_v26  ;;  %v5170_v14 = vadd.f32 1.0, %v7369_v34  ;;  %v10561_v45 = vld [vmem:[#allocation6_spill] sm:$0xff]  ;;  %v10562_v17 = vld [vmem:[#allocation35_spill] sm:$0xff]  ;;  %v10563_v39 = vld [vmem:[#allocation25_spill] sm:$0xff] }
0x11ed   : > { %v7373_v47 = vpop.eup %7372  ;;  %v5230_v42 = vmul.f32 %v5166_v13, %v4718_v46  ;;  %v5173_v60 = vadd.f32 1.0, %v7371_v44  ;;  %7378 = vtanh.f32 %v5044_v1  ;;  %v4982_v11 = vadd.f32 %v10558_v27, %v9979_v9 }
0x11ee   : > { %5716 = vmatprep.mubr.bf16.mxu0 %v5275_v35  ;;  %v5272_v32 = vpack.c.bf16 %v5232_v7, %v5228_v30  ;;  %v5234_v41 = vmul.f32 %v5170_v14, %v4722_v3  ;;  %v5177_v19 = vadd.f32 1.0, %v7373_v47  ;;  %7380 = vtanh.f32 %v5048_v58 }
0x11ef   : > { %v4928_v23 = vmul.f32 %v10109_v0, %v10056_v36  ;;  %v4931_v53 = vmul.f32 %v10130_v8, %v10067_v61  ;;  %v4986_v26 = vadd.f32 %v10093_v48, %v9995_v2  ;;  %v5046_v46 = vmul.f32 0.7978846, %v4982_v11 }
0x11f0   : > { %5620 = vmatmul.mubr.bf16.gmra.mrb[148].mxu1 %v5272_v32  ;;  %v5274_v16 = vpack.c.bf16 %v5234_v41, %v5230_v42  ;;  %v5237_v22 = vmul.f32 %v5173_v60, %v4725_v6  ;;  %v5241_v51 = vmul.f32 %v5177_v19, %v4729_v24  ;;  %v4989_v5 = vadd.f32 %v10120_v15, %v10048_v40  ;;  %v10560_v6 = vld [vmem:[#allocation34_spill] sm:$0xff] }
0x11f1   : > { %v7375_v29 = vpop.eup %7374  ;;  %v4727_v4 = vmul.f32 0.5, %v9987_v50  ;;  %v5050_v20 = vmul.f32 0.7978846, %v4986_v26  ;;  %7382 = vtanh.f32 %v5046_v46  ;;  %v4993_v0 = vadd.f32 %v10140_v62, %v10064_v25  ;;  %v10559_v50 = vld [vmem:[#allocation26_spill] sm:$0xff] }
0x11f2   : > { %v7377_v8 = vpop.eup %7376  ;;  %5717 = vmatmul.mubr.bf16.gmra.mrb[148].mxu0 %v5274_v16  ;;  %v5277_v37 = vpack.c.bf16 %v5241_v51, %v5237_v22  ;;  %v4731_v48 = vmul.f32 0.5, %v10011_v49  ;;  %v5175_v10 = vadd.f32 1.0, %v7375_v29  ;;  %v5053_v3 = vmul.f32 0.7978846, %v4989_v5 }
0x11f3   : > { %v5179_v28 = vadd.f32 1.0, %v7377_v8  ;;  %7384 = vtanh.f32 %v5050_v20  ;;  %v5057_v31 = vmul.f32 0.7978846, %v4993_v0  ;;  %v4991_v15 = vadd.f32 %v10123_v12, %v10051_v54 }
0x11f4   : > { %v4930_v18 = vmul.f32 %v10559_v50, %v10059_v43  ;;  %5627 = vmatprep.mubr.bf16.mxu1 %v5277_v37  ;;  %7386 = vtanh.f32 %v5053_v3  ;;  %v4995_v62 = vadd.f32 %v4931_v53, %v10067_v61  ;;  %v5239_v56 = vmul.f32 %v5175_v10, %v4727_v4 }
0x11f5   : > { %v5243_v57 = vmul.f32 %v5179_v28, %v4731_v48  ;;  %7388 = vtanh.f32 %v5057_v31  ;;  %v5055_v59 = vmul.f32 0.7978846, %v4991_v15  ;;  %v4988_v63 = vadd.f32 %v10561_v45, %v10560_v6 }
0x11f6   : > { %v5059_v49 = vmul.f32 0.7978846, %v4995_v62  ;;  %v4992_v21 = vadd.f32 %v4928_v23, %v10056_v36  ;;  %v4724_v12 = vmul.f32 0.5, %v9976_v52  ;;  %v4990_v34 = vadd.f32 %v10563_v39, %v10562_v17 }
0x11f7   : > { %v7379_v55 = vpop.eup %7378  ;;  %v5279_v38 = vpack.c.bf16 %v5243_v57, %v5239_v56  ;;  %7390 = vtanh.f32 %v5055_v59  ;;  %v5052_v1 = vmul.f32 0.7978846, %v4988_v63  ;;  %v4728_v44 = vmul.f32 0.5, %v9992_v33 }
0x11f8   : > { %v7381_v13 = vpop.eup %7380  ;;  %v5172_v24 = vadd.f32 1.0, %v7379_v55  ;;  %7392 = vtanh.f32 %v5059_v49  ;;  %v5056_v58 = vmul.f32 0.7978846, %v4992_v21  ;;  %v4994_v30 = vadd.f32 %v4930_v18, %v10059_v43 }
0x11f9   : > { %5724 = vmatprep.mubr.bf16.mxu0 %v5279_v38  ;;  %v5176_v35 = vadd.f32 1.0, %v7381_v13  ;;  %v5054_v7 = vmul.f32 0.7978846, %v4990_v34  ;;  %7394 = vtanh.f32 %v5052_v1  ;;  %v4726_v41 = vmul.f32 0.5, %v9979_v9  ;;  %v10261_v38 = vld [vmem:[%s548_s27] ss:$0 sm:$0xff] }
0x11fa   : > { %v5236_v47 = vmul.f32 %v5172_v24, %v4724_v12  ;;  %7396 = vtanh.f32 %v5056_v58  ;;  %v5058_v42 = vmul.f32 0.7978846, %v4994_v30  ;;  %v4730_v33 = vmul.f32 0.5, %v9995_v2  ;;  %v10564_v30 = vld [vmem:[#allocation7_spill] sm:$0xff] }
0x11fb   : > { %v7383_v14 = vpop.eup %7382  ;;  %v5240_v52 = vmul.f32 %v5176_v35, %v4728_v44  ;;  %7398 = vtanh.f32 %v5054_v7  ;;  %v4733_v53 = vmul.f32 0.5, %v10048_v40  ;;  %v4737_v22 = vmul.f32 0.5, %v10064_v25 }
0x11fc   : > { %v5174_v60 = vadd.f32 1.0, %v7383_v14  ;;  %7400 = vtanh.f32 %v5058_v42  ;;  %v4735_v9 = vmul.f32 0.5, %v10051_v54  ;;  %v4739_v2 = vmul.f32 0.5, %v10067_v61 }
0x11fd   : > { %v7385_v27 = vpop.eup %7384  ;;  %v5276_v11 = vpack.c.bf16 %v5240_v52, %v5236_v47  ;;  %v4732_v15 = vmul.f32 0.5, %v10560_v6  ;;  %v4736_v50 = vmul.f32 0.5, %v10056_v36  ;;  %v4734_v61 = vmul.f32 0.5, %v10562_v17 }
0x11fe   : > { %v7387_v32 = vpop.eup %7386  ;;  %v5178_v19 = vadd.f32 1.0, %v7385_v27  ;;  %v5238_v46 = vmul.f32 %v5174_v60, %v4726_v41  ;;  %v4738_v49 = vmul.f32 0.5, %v10059_v43  ;;  %v7419_v17 = vld.sshfl [vmem:[%s7534_s26 + $0x8] sm:$0x33 pattern:$0x75316420] }
0x11ff   : > { %v7389_v23 = vpop.eup %7388  ;;  %5628 = vmatmul.mubr.bf16.gmra.mrb[152].mxu1 %v5276_v11  ;;  %v5181_v26 = vadd.f32 1.0, %v7387_v32  ;;  %v639_v39 = vrot.slane %v7419_v17, 1  ;;  %v10565_v32 = vld [vmem:[#allocation9_spill] sm:$0xff]  ;;  %v10569_v17 = vld [vmem:[#allocation12_spill] sm:$0xff] }
0x1200   : > { %v5242_v16 = vmul.f32 %v5178_v19, %v4730_v33  ;;  %v5185_v51 = vadd.f32 1.0, %v7389_v23 }
0x1201   : > { %v7391_v5 = vpop.eup %7390  ;;  %v5245_v20 = vmul.f32 %v5181_v26, %v4733_v53  ;;  %v10266_v7 = vrot.slane %v639_v39, %v10564_v30  ;;  %v10566_v53 = vld [vmem:[#allocation11_spill] sm:$0xff] }
0x1202   : > { %v7393_v29 = vpop.eup %7392  ;;  %v5278_v4 = vpack.c.bf16 %v5242_v16, %v5238_v46  ;;  %v5249_v0 = vmul.f32 %v5185_v51, %v4737_v22  ;;  %v5183_v8 = vadd.f32 1.0, %v7391_v5 }
0x1203   : > { %v5187_v37 = vadd.f32 1.0, %v7393_v29  ;;  %v7395_v48 = vpop.eup %7394 }
0x1204   : > { %5725 = vmatmul.mubr.bf16.gmra.mrb[152].mxu0 %v5278_v4  ;;  %v5281_v40 = vpack.c.bf16 %v5249_v0, %v5245_v20  ;;  %v7397_v10 = vpop.eup %7396  ;;  %v5247_v3 = vmul.f32 %v5183_v8, %v4735_v9  ;;  %v5180_v31 = vadd.f32 1.0, %v7395_v48 }
0x1205   : > { %v5251_v28 = vmul.f32 %v5187_v37, %v4739_v2  ;;  %v7399_v25 = vpop.eup %7398  ;;  %v5184_v18 = vadd.f32 1.0, %v7397_v10  ;;  %v10567_v10 = vld [vmem:[#allocation10_spill] sm:$0xff] }
0x1206   : > { %5635 = vmatprep.mubr.bf16.mxu1 %v5281_v40  ;;  %v7401_v62 = vpop.eup %7400  ;;  %v5182_v56 = vadd.f32 1.0, %v7399_v25  ;;  %v5244_v57 = vmul.f32 %v5180_v31, %v4732_v15  ;;  %v10568_v15 = vld [vmem:[#allocation14_spill] sm:$0xff] }
0x1207   : > { %v5283_v54 = vpack.c.bf16 %v5251_v28, %v5247_v3  ;;  %v5248_v59 = vmul.f32 %v5184_v18, %v4736_v50  ;;  %v5186_v45 = vadd.f32 1.0, %v7401_v62 }
0x1208   : > { %v5246_v21 = vmul.f32 %v5182_v56, %v4734_v61 }
0x1209   : > { %5732 = vmatprep.mubr.bf16.mxu0 %v5283_v54  ;;  %v5280_v63 = vpack.c.bf16 %v5248_v59, %v5244_v57  ;;  %v5250_v55 = vmul.f32 %v5186_v45, %v4738_v49 }
0x120b   : > { %5636 = vmatmul.mubr.bf16.gmra.mrb[156].mxu1 %v5280_v63  ;;  %v5282_v6 = vpack.c.bf16 %v5250_v55, %v5246_v21 }
0x120d   : > { %5733 = vmatmul.mubr.bf16.gmra.mrb[156].mxu0 %v5282_v6 }
0x1239   : > { %v6339_v36 = vpop.f32.mrb[128].mxu1 }
0x123a   : > { %v6340_v12 = vpop.f32.mrb[129].mxu1 }
0x123b   : > { %v6341_v34 = vadd.f32 %v6340_v12, %v6339_v36  ;;  %v6342_v43 = vpop.f32.mrb[130].mxu1 }
0x123c   : > { %v6403_v13 = vpop.f32.mrb[128].mxu0  ;;  %v6343_v24 = vpop.f32.mrb[131].mxu1 }
0x123d   : > { %v5582_v1 = vadd.f32 %v6341_v34, %v10261_v38  ;;  %v6404_v58 = vpop.f32.mrb[129].mxu0  ;;  %v6344_v44 = vadd.f32 %v6343_v24, %v6342_v43  ;;  %v10570_v43 = vld [vmem:[#allocation15_spill] sm:$0xff] }
0x123e   : > { %v6405_v35 = vadd.f32 %v6404_v58, %v6403_v13  ;;  %v6406_v14 = vpop.f32.mrb[130].mxu0 }
0x123f   : > { %v5585_v47 = vadd.f32 %v6344_v44, %v10261_v38  ;;  %v6407_v52 = vpop.f32.mrb[131].mxu0 }
0x1240   : > { %v5679_v42 = vadd.f32 %v6405_v35, %v5582_v1  ;;  %v6408_v60 = vadd.f32 %v6407_v52, %v6406_v14 }
0x1242   : > { %v5751_v27 = vmul.f32 %v10266_v7, %v5679_v42  ;;  %v5682_v11 = vadd.f32 %v6408_v60, %v5585_v47 }
0x1244   : > { %v5767_v41 = vadd.f32 %v5751_v27, %v10565_v32  ;;  %v5752_v33 = vmul.f32 %v10266_v7, %v5682_v11  ;;  %v6345_v19 = vpop.f32.mrb[132].mxu1 }
0x1245   : > { %v6346_v23 = vpop.f32.mrb[133].mxu1 }
0x1246   : > { %5783 = vst [vmem:[%s10386_s10] sm:$0xff] %v5767_v41  ;;  %v5768_v26 = vadd.f32 %v5752_v33, %v10566_v53  ;;  %v6409_v46 = vpop.f32.mrb[132].mxu0  ;;  %v6347_v16 = vadd.f32 %v6346_v23, %v6345_v19  ;;  %v6348_v22 = vpop.f32.mrb[134].mxu1  ;;  %v10571_v53 = vld [vmem:[#allocation13_spill] sm:$0xff] }
0x1247   : > { %v6410_v51 = vpop.f32.mrb[133].mxu0  ;;  %v6349_v5 = vpop.f32.mrb[135].mxu1 }
0x1248   : > { %5784 = vst [vmem:[%s10386_s10 + $0x8] sm:$0xff] %v5768_v26  ;;  %v5590_v29 = vadd.f32 %v6347_v16, %v10261_v38  ;;  %v6411_v4 = vadd.f32 %v6410_v51, %v6409_v46  ;;  %v6412_v20 = vpop.f32.mrb[134].mxu0  ;;  %v6350_v0 = vadd.f32 %v6349_v5, %v6348_v22  ;;  %v10572_v16 = vld [vmem:[#allocation16_spill] sm:$0xff] }
0x1249   : > { %v6413_v8 = vpop.f32.mrb[135].mxu0  ;;  %v10573_v5 = vld [vmem:[#allocation24_spill] sm:$0xff] }
0x124a   : > { %v5687_v9 = vadd.f32 %v6411_v4, %v5590_v29  ;;  %v5593_v2 = vadd.f32 %v6350_v0, %v10261_v38  ;;  %v6414_v37 = vadd.f32 %v6413_v8, %v6412_v20  ;;  %v640_v29 = vrot.slane %v10573_v5, 1  ;;  %v10578_v5 = vld [vmem:[#allocation20_spill] sm:$0xff] }
0x124c   : > { %v5753_v48 = vmul.f32 %v10266_v7, %v5687_v9  ;;  %v5690_v40 = vadd.f32 %v6414_v37, %v5593_v2 }
0x124e   : > { %v5769_v3 = vadd.f32 %v5753_v48, %v10567_v10  ;;  %v5754_v28 = vmul.f32 %v10266_v7, %v5690_v40  ;;  %v6351_v31 = vpop.f32.mrb[136].mxu1  ;;  %v10318_v48 = vrot.slane %v640_v29, %v10564_v30 }
0x124f   : > { %v6352_v25 = vpop.f32.mrb[137].mxu1 }
0x1250   : > { %5785 = vst [vmem:[%s10386_s10 + $0x10] sm:$0xff] %v5769_v3  ;;  %v5770_v50 = vadd.f32 %v5754_v28, %v10568_v15  ;;  %v6353_v18 = vadd.f32 %v6352_v25, %v6351_v31  ;;  %v6354_v62 = vpop.f32.mrb[138].mxu1 }
0x1251   : > { %v6355_v54 = vpop.f32.mrb[139].mxu1 }
0x1252   : > { %5786 = vst [vmem:[%s10386_s10 + $0x18] sm:$0xff] %v5770_v50  ;;  %v6356_v61 = vadd.f32 %v6355_v54, %v6354_v62  ;;  %v5598_v57 = vadd.f32 %v6353_v18, %v10261_v38  ;;  %v10574_v54 = vld [vmem:[#allocation8_spill] sm:$0xff] }
0x1253   : > { %v6415_v56 = vpop.f32.mrb[136].mxu0 }
0x1254   : > { %v6416_v59 = vpop.f32.mrb[137].mxu0  ;;  %v5601_v63 = vadd.f32 %v6356_v61, %v10261_v38 }
0x1255   : > { %v6417_v49 = vadd.f32 %v6416_v59, %v6415_v56  ;;  %v6418_v45 = vpop.f32.mrb[138].mxu0 }
0x1256   : > { %v6419_v21 = vpop.f32.mrb[139].mxu0 }
0x1257   : > { %v5695_v55 = vadd.f32 %v6417_v49, %v5598_v57  ;;  %v6420_v6 = vadd.f32 %v6419_v21, %v6418_v45 }
0x1259   : > { %v5755_v36 = vmul.f32 %v10266_v7, %v5695_v55  ;;  %v5698_v12 = vadd.f32 %v6420_v6, %v5601_v63  ;;  %v10575_v63 = vld [vmem:[#allocation17_spill] sm:$0xff] }
0x125b   : > { %v5771_v39 = vadd.f32 %v5755_v36, %v10569_v17  ;;  %v5756_v34 = vmul.f32 %v10266_v7, %v5698_v12 }
0x125d   : > { %5787 = vst [vmem:[%s10386_s10 + $0x20] sm:$0xff] %v5771_v39  ;;  %v5772_v13 = vadd.f32 %v5756_v34, %v10570_v43 }
0x125f   : > { %5788 = vst [vmem:[%s10386_s10 + $0x28] sm:$0xff] %v5772_v13  ;;  %v6357_v24 = vpop.f32.mrb[140].mxu1 }
0x1260   : > { %v6358_v1 = vpop.f32.mrb[141].mxu1 }
0x1261   : > { %v6421_v58 = vpop.f32.mrb[140].mxu0  ;;  %v6359_v44 = vadd.f32 %v6358_v1, %v6357_v24  ;;  %v6360_v35 = vpop.f32.mrb[142].mxu1  ;;  %v10576_v1 = vld [vmem:[#allocation18_spill] sm:$0xff] }
0x1262   : > { %v6422_v14 = vpop.f32.mrb[141].mxu0  ;;  %v6361_v47 = vpop.f32.mrb[143].mxu1 }
0x1263   : > { %v5606_v52 = vadd.f32 %v6359_v44, %v10261_v38  ;;  %v6423_v42 = vadd.f32 %v6422_v14, %v6421_v58  ;;  %v6424_v60 = vpop.f32.mrb[142].mxu0  ;;  %v6362_v27 = vadd.f32 %v6361_v47, %v6360_v35  ;;  %v10577_v35 = vld [vmem:[#allocation19_spill] sm:$0xff] }
0x1264   : > { %v6425_v11 = vpop.f32.mrb[143].mxu0 }
0x1265   : > { %v5703_v32 = vadd.f32 %v6423_v42, %v5606_v52  ;;  %v5609_v41 = vadd.f32 %v6362_v27, %v10261_v38  ;;  %v6426_v33 = vadd.f32 %v6425_v11, %v6424_v60 }
0x1267   : > { %v5757_v19 = vmul.f32 %v10266_v7, %v5703_v32  ;;  %v5706_v23 = vadd.f32 %v6426_v33, %v5609_v41 }
0x1269   : > { %v5773_v26 = vadd.f32 %v5757_v19, %v10571_v53  ;;  %v5758_v46 = vmul.f32 %v10266_v7, %v5706_v23 }
0x126b   : > { %5789 = vst [vmem:[%s10386_s10 + $0x30] sm:$0xff] %v5773_v26  ;;  %v5774_v22 = vadd.f32 %v5758_v46, %v10572_v16 }
0x126d   : > { %5790 = vst [vmem:[%s10386_s10 + $0x38] sm:$0xff] %v5774_v22 }
0x12bb   : > { %v6363_v51 = vpop.f32.mrb[144].mxu1 }
0x12bc   : > { %v6364_v4 = vpop.f32.mrb[145].mxu1 }
0x12bd   : > { %v6427_v20 = vpop.f32.mrb[144].mxu0  ;;  %v6365_v0 = vadd.f32 %v6364_v4, %v6363_v51  ;;  %v6366_v8 = vpop.f32.mrb[146].mxu1 }
0x12be   : > { %v6428_v9 = vpop.f32.mrb[145].mxu0  ;;  %v6367_v2 = vpop.f32.mrb[147].mxu1 }
0x12bf   : > { %v5614_v7 = vadd.f32 %v6365_v0, %v10261_v38  ;;  %v6429_v37 = vadd.f32 %v6428_v9, %v6427_v20  ;;  %v6430_v40 = vpop.f32.mrb[146].mxu0  ;;  %v6368_v10 = vadd.f32 %v6367_v2, %v6366_v8  ;;  %v10579_v8 = vld [vmem:[#allocation21_spill] sm:$0xff] }
0x12c0   : > { %v6431_v3 = vpop.f32.mrb[147].mxu0 }
0x12c1   : > { %v5711_v28 = vadd.f32 %v6429_v37, %v5614_v7  ;;  %v5617_v31 = vadd.f32 %v6368_v10, %v10261_v38  ;;  %v6432_v25 = vadd.f32 %v6431_v3, %v6430_v40 }
0x12c3   : > { %v5759_v15 = vmul.f32 %v10318_v48, %v5711_v28  ;;  %v5714_v50 = vadd.f32 %v6432_v25, %v5617_v31  ;;  %v6369_v18 = vpop.f32.mrb[148].mxu1 }
0x12c4   : > { %v6370_v62 = vpop.f32.mrb[149].mxu1 }
0x12c5   : > { %v5775_v61 = vadd.f32 %v5759_v15, %v10574_v54  ;;  %v5760_v56 = vmul.f32 %v10318_v48, %v5714_v50  ;;  %v6433_v57 = vpop.f32.mrb[148].mxu0  ;;  %v6371_v59 = vadd.f32 %v6370_v62, %v6369_v18  ;;  %v6372_v30 = vpop.f32.mrb[150].mxu1 }
0x12c6   : > { %v6434_v49 = vpop.f32.mrb[149].mxu0  ;;  %v6373_v45 = vpop.f32.mrb[151].mxu1 }
0x12c7   : > { %5791 = vst [vmem:[%s10386_s10 + $0x40] sm:$0xff] %v5775_v61  ;;  %v5776_v21 = vadd.f32 %v5760_v56, %v10575_v63  ;;  %v5622_v55 = vadd.f32 %v6371_v59, %v10261_v38  ;;  %v6435_v6 = vadd.f32 %v6434_v49, %v6433_v57  ;;  %v6436_v36 = vpop.f32.mrb[150].mxu0  ;;  %v6374_v12 = vadd.f32 %v6373_v45, %v6372_v30  ;;  %v10580_v56 = vld [vmem:[#allocation22_spill] sm:$0xff]  ;;  %v10581_v30 = vld [vmem:[#allocation23_spill] sm:$0xff] }
0x12c8   : > { %v6437_v17 = vpop.f32.mrb[151].mxu0 }
0x12c9   : > { %5792 = vst [vmem:[%s10386_s10 + $0x48] sm:$0xff] %v5776_v21  ;;  %v5719_v39 = vadd.f32 %v6435_v6, %v5622_v55  ;;  %v5625_v34 = vadd.f32 %v6374_v12, %v10261_v38  ;;  %v6438_v43 = vadd.f32 %v6437_v17, %v6436_v36 }
0x12cb   : > { %v5761_v13 = vmul.f32 %v10318_v48, %v5719_v39  ;;  %v5722_v24 = vadd.f32 %v6438_v43, %v5625_v34 }
0x12cd   : > { %v5777_v58 = vadd.f32 %v5761_v13, %v10576_v1  ;;  %v5762_v44 = vmul.f32 %v10318_v48, %v5722_v24 }
0x12cf   : > { %5793 = vst [vmem:[%s10386_s10 + $0x50] sm:$0xff] %v5777_v58  ;;  %v5778_v14 = vadd.f32 %v5762_v44, %v10577_v35 }
0x12d1   : > { %5794 = vst [vmem:[%s10386_s10 + $0x58] sm:$0xff] %v5778_v14 }
0x12d2   : > { %v6375_v47 = vpop.f32.mrb[152].mxu1 }
0x12d3   : > { %v6376_v52 = vpop.f32.mrb[153].mxu1 }
0x12d4   : > { %v6377_v42 = vadd.f32 %v6376_v52, %v6375_v47  ;;  %v6378_v60 = vpop.f32.mrb[154].mxu1 }
0x12d5   : > { %v6379_v27 = vpop.f32.mrb[155].mxu1 }
0x12d6   : > { %v6380_v11 = vadd.f32 %v6379_v27, %v6378_v60  ;;  %v5630_v41 = vadd.f32 %v6377_v42, %v10261_v38 }
0x12d7   : > { %v6439_v32 = vpop.f32.mrb[152].mxu0 }
0x12d8   : > { %v6440_v33 = vpop.f32.mrb[153].mxu0  ;;  %v5633_v53 = vadd.f32 %v6380_v11, %v10261_v38 }
0x12d9   : > { %v6441_v19 = vadd.f32 %v6440_v33, %v6439_v32  ;;  %v6442_v23 = vpop.f32.mrb[154].mxu0 }
0x12da   : > { %v6443_v26 = vpop.f32.mrb[155].mxu0 }
0x12db   : > { %v5727_v46 = vadd.f32 %v6441_v19, %v5630_v41  ;;  %v6444_v16 = vadd.f32 %v6443_v26, %v6442_v23 }
0x12dd   : > { %v5763_v22 = vmul.f32 %v10318_v48, %v5727_v46  ;;  %v5730_v51 = vadd.f32 %v6444_v16, %v5633_v53 }
0x12de   : > { %v6381_v20 = vpop.f32.mrb[156].mxu1 }
0x12df   : > { %v5779_v29 = vadd.f32 %v5763_v22, %v10578_v5  ;;  %v5764_v4 = vmul.f32 %v10318_v48, %v5730_v51  ;;  %v6382_v0 = vpop.f32.mrb[157].mxu1 }
0x12e0   : > { %v6445_v2 = vpop.f32.mrb[156].mxu0  ;;  %v6383_v7 = vadd.f32 %v6382_v0, %v6381_v20  ;;  %v6384_v37 = vpop.f32.mrb[158].mxu1 }
0x12e1   : > { %5795 = vst [vmem:[%s10386_s10 + $0x60] sm:$0xff] %v5779_v29  ;;  %v5780_v9 = vadd.f32 %v5764_v4, %v10579_v8  ;;  %v6446_v40 = vpop.f32.mrb[157].mxu0  ;;  %v6385_v10 = vpop.f32.mrb[159].mxu1 }
0x12e2   : > { %v5638_v3 = vadd.f32 %v6383_v7, %v10261_v38  ;;  %v6447_v28 = vadd.f32 %v6446_v40, %v6445_v2  ;;  %v6448_v31 = vpop.f32.mrb[158].mxu0  ;;  %v6386_v25 = vadd.f32 %v6385_v10, %v6384_v37 }
0x12e3   : > { %5796 = vst [vmem:[%s10386_s10 + $0x68] sm:$0xff] %v5780_v9  ;;  %v6449_v15 = vpop.f32.mrb[159].mxu0 }
0x12e4   : > { %v5735_v50 = vadd.f32 %v6447_v28, %v5638_v3  ;;  %v5641_v18 = vadd.f32 %v6386_v25, %v10261_v38  ;;  %v6450_v62 = vadd.f32 %v6449_v15, %v6448_v31 }
0x12e6   : > { %v5765_v54 = vmul.f32 %v10318_v48, %v5735_v50  ;;  %v5738_v61 = vadd.f32 %v6450_v62, %v5641_v18 }
0x12e8   : > { %v5781_v57 = vadd.f32 %v5765_v54, %v10580_v56  ;;  %v5766_v59 = vmul.f32 %v10318_v48, %v5738_v61 }
0x12ea   : > { %5797 = vst [vmem:[%s10386_s10 + $0x70] sm:$0xff] %v5781_v57  ;;  %v5782_v49 = vadd.f32 %v5766_v59, %v10581_v30 }
0x12ec   : > { %5798 = vst [vmem:[%s10386_s10 + $0x78] sm:$0xff] %v5782_v49 }
0x12ed PF: > { %s10582_s2 = sld [smem:[#allocation4_spill]]  ;;  %s10583_s13 = sld [smem:[#allocation3_spill]] }
0x12ee   : > { %s10584_s14 = sld [smem:[#allocation5_spill]] }
0x12f3   : > { %s20_s15 = sadd.s32 1, %s10582_s2  }
0x12f4   : > { %p17_p6 = scmp.ge.s32.totalorder %s20_s15, 4  }
0x12f6   :  { %19 = sbr.rel (!%p17_p6) target bundleno = 3 (0x3), region = 121 }

</bundles_post_ra>
